<compile_context>
chip_gen: v7x
topology: tpu7x:2x2x1
jax: 0.10.0
libtpu: 0.0.40
codegen_flags: <defaults>
</compile_context>

<pallas_src>
import math
import numpy as np
import jax
import jax.numpy as jnp
from jax.experimental import pallas as pl
from jax.experimental.pallas import tpu as pltpu

INPUT_SIZE = 5
DIN_PAD = 8                      # input features padded to one sublane width
HIDDEN = 128
NUM_HEADS = 8
HEAD_DIM = HIDDEN // NUM_HEADS
OUTPUT_SIZE = 1
SUBLANE = 8


# --------------------------------------------------------------------------
# Fused kernel: wavefronted 2-layer LSTM -> MHA (last query) -> FC head.
# Scratch:
#   g_scr : (T*Bp, 4H)  layer-0 non-recurrent gate contributions (x @ W_ih0 + b0)
#   h_scr : (T*Bp, H)   layer-1 hidden sequence (attention keys/values)
# --------------------------------------------------------------------------
def _fused_kernel(x_ref, wih0_ref, whh0_ref, b0_ref,
                  w1cat_ref, bl1_ref,
                  wqkv_ref, bqkv_ref, wo_ref, bo_ref,
                  wf1_ref, bf1_ref, wf2_ref, bf2_ref, hproj_ref,
                  out_ref, g_scr, h_scr):
    TB = x_ref.shape[0]
    Bp = SUBLANE
    T = TB // Bp
    H = HIDDEN

    # ---- bulk non-recurrent projection for LSTM layer 0 (bias folded, hoisted) ----
    g_scr[...] = (jnp.dot(x_ref[...], wih0_ref[...],
                          preferred_element_type=jnp.float32) + b0_ref[...])

    # Hoisted loop-invariant broadcast of the layer-1 bias.
    bl1 = jnp.broadcast_to(bl1_ref[...], (Bp, 4 * H))

    def cell(g, c):
        i_g = jax.nn.sigmoid(g[:, 0 * H:1 * H])
        f_g = jax.nn.sigmoid(g[:, 1 * H:2 * H])
        g_g = jnp.tanh(g[:, 2 * H:3 * H])
        o_g = jax.nn.sigmoid(g[:, 3 * H:4 * H])
        c_new = f_g * c + i_g * g_g
        h_new = o_g * jnp.tanh(c_new)
        return h_new, c_new

    zeros = jnp.zeros((Bp, H), jnp.float32)
    h0, c0 = zeros, zeros
    h1, c1 = zeros, zeros

    # ---- wavefront: step s computes layer-0 time s and layer-1 time s-1 (independent) ----
    for s in range(T + 1):                        # static unroll (T is a compile-time constant)
        if s >= 1:
            # layer-1 time (s-1): reads h0[s-1] (current live value, not yet overwritten) and h1[s-2]
            xcat = jnp.concatenate([h0, h1], axis=-1)                    # (Bp, 2H), lane-aligned
            g1 = jnp.dot(xcat, w1cat_ref[...],
                         preferred_element_type=jnp.float32) + bl1
            h1, c1 = cell(g1, c1)
            h_scr[pl.ds((s - 1) * Bp, Bp), :] = h1
        if s < T:
            # layer-0 time s: reads h0[s-1]
            g0 = g_scr[pl.ds(s * Bp, Bp), :] + jnp.dot(
                h0, whh0_ref[...], preferred_element_type=jnp.float32)
            h0, c0 = cell(g0, c0)

    # ---- multi-head self-attention: only the last query row is needed ----
    h_all = h_scr[...]                                                   # (T*Bp, H)
    qkv = (jnp.dot(h_all, wqkv_ref[...], preferred_element_type=jnp.float32)
           + bqkv_ref[...])                                              # (T*Bp, 3H)

    scale = 1.0 / math.sqrt(HEAD_DIM)
    q_last = qkv[(T - 1) * Bp:T * Bp, 0:H] * scale                       # (Bp, H)
    k3 = qkv[:, H:2 * H].reshape(T, Bp, H)                               # tile-aligned reshape
    v3 = qkv[:, 2 * H:3 * H].reshape(T, Bp, H)

    # Lane-dense head scores: hproj[i,j] = 1 iff lanes i,j belong to the same head, so every
    # lane of a head carries that head's q.k score; full-128-lane softmax over time is then
    # exactly the per-head softmax (replicated per lane).
    prod = k3 * q_last[None, :, :]                                       # (T, Bp, H)
    scores = jnp.dot(prod.reshape(T * Bp, H), hproj_ref[...],
                     preferred_element_type=jnp.float32).reshape(T, Bp, H)

    m = jnp.max(scores, axis=0, keepdims=True)
    e = jnp.exp(scores - m)
    denom = jnp.sum(e, axis=0, keepdims=True)
    w = e * pl.reciprocal(denom, approx=True)                            # (T, Bp, H)
    attn = jnp.sum(w * v3, axis=0)                                       # (Bp, H)
    attn = jnp.dot(attn, wo_ref[...], preferred_element_type=jnp.float32) + bo_ref[...]

    # ---- FC head (dropout == identity in eval mode); padded lane-dense to 128 ----
    fc1 = jnp.maximum(
        jnp.dot(attn, wf1_ref[...], preferred_element_type=jnp.float32) + bf1_ref[...], 0.0)
    out = jnp.dot(fc1, wf2_ref[...], preferred_element_type=jnp.float32) + bf2_ref[...]
    out_ref[...] = out.astype(out_ref.dtype)                             # full (Bp,128) store


def _full_spec(shape):
    return pl.BlockSpec(shape, lambda i: (0,) * len(shape))


def _forward_padded(x2, T, Bp, pk):
    H = HIDDEN
    return pl.pallas_call(
        _fused_kernel,
        out_shape=jax.ShapeDtypeStruct((Bp, H), jnp.float32),
        grid=(1,),
        in_specs=[
            _full_spec((T * Bp, DIN_PAD)),
            _full_spec((DIN_PAD, 4 * H)), _full_spec((H, 4 * H)), _full_spec((1, 4 * H)),
            _full_spec((2 * H, 4 * H)), _full_spec((1, 4 * H)),
            _full_spec((H, 3 * H)), _full_spec((1, 3 * H)),
            _full_spec((H, H)), _full_spec((1, H)),
            _full_spec((H, H)), _full_spec((1, H)),
            _full_spec((H, H)), _full_spec((1, H)),
            _full_spec((H, H)),
        ],
        out_specs=_full_spec((Bp, H)),
        scratch_shapes=[pltpu.VMEM((T * Bp, 4 * H), jnp.float32),
                        pltpu.VMEM((T * Bp, H), jnp.float32)],
        compiler_params=pltpu.CompilerParams(dimension_semantics=("arbitrary",)),
    )(x2, pk["wih0"], pk["whh0"], pk["b0"], pk["w1cat"], pk["bl1"],
      pk["wqkv"], pk["bqkv"], pk["wo"], pk["bo"],
      pk["wf1"], pk["bf1"], pk["wf2"], pk["bf2"], pk["hproj"])


def _pack_params(p):
    """Layout plumbing done in the wrapper (zero-padding, fused layer-1 weight, head mask)."""
    H, H2 = HIDDEN, HIDDEN // 2
    pk = {}
    pk["wih0"] = jnp.pad(p["w_ih_l0_t"], ((0, DIN_PAD - INPUT_SIZE), (0, 0)))
    pk["whh0"] = p["w_hh_l0_t"]
    pk["b0"] = p["b_l0"]
    pk["w1cat"] = jnp.concatenate([p["w_ih_l1_t"], p["w_hh_l1_t"]], axis=0)   # (2H, 4H)
    pk["bl1"] = p["b_l1"]
    pk["wqkv"] = p["wqkv_t"]
    pk["bqkv"] = p["bqkv"]
    pk["wo"] = p["wo_t"]
    pk["bo"] = p["bo"]
    pk["wf1"] = jnp.pad(p["w1_t"], ((0, 0), (0, H - H2)))                     # (H, 128)
    pk["bf1"] = jnp.pad(p["b1"], ((0, 0), (0, H - H2)))
    pk["wf2"] = jnp.pad(p["w2_t"], ((0, H - H2), (0, H - OUTPUT_SIZE)))       # (128, 128)
    pk["bf2"] = jnp.pad(p["b2"], ((0, 0), (0, H - OUTPUT_SIZE)))
    head_of_lane = jnp.arange(H, dtype=jnp.int32) // HEAD_DIM
    pk["hproj"] = (head_of_lane[:, None] == head_of_lane[None, :]).astype(jnp.float32)
    return pk


@jax.jit
def lstm_traffic_predictor(x, p):
    """x: (B, T, input_size) batch-first -> (B, 1)."""
    B, T, _ = x.shape
    Bp = max(SUBLANE, ((B + SUBLANE - 1) // SUBLANE) * SUBLANE)   # pad batch to full sublanes
    x_tm = jnp.transpose(x, (1, 0, 2)).astype(jnp.float32)        # time-major
    x_tm = jnp.pad(x_tm, ((0, 0), (0, Bp - B), (0, DIN_PAD - INPUT_SIZE)))
    x2 = x_tm.reshape(T * Bp, DIN_PAD)                            # lane-contiguous 2-D LHS
    pk = _pack_params(p)
    out = _forward_padded(x2, T, Bp, pk)
    return out[:B, :OUTPUT_SIZE]


# --------------------------------------------------------------------------
# Parameter init (deterministic, PyTorch-like uniform(-1/sqrt(H), 1/sqrt(H)))
# --------------------------------------------------------------------------
def init_params(key):
    H, H2 = HIDDEN, HIDDEN // 2
    k = 1.0 / math.sqrt(H)
    keys = iter(jax.random.split(key, 32))
    u = lambda shape, bound=k: jax.random.uniform(next(keys), shape, jnp.float32, -bound, bound)

    p = {}
    # LSTM layer 0 (input_size -> H), layer 1 (H -> H); weights stored transposed.
    p["w_ih_l0_t"] = u((INPUT_SIZE, 4 * H))
    p["w_hh_l0_t"] = u((H, 4 * H))
    p["b_l0"] = (u((1, 4 * H)) + u((1, 4 * H)))      # b_ih + b_hh
    p["w_ih_l1_t"] = u((H, 4 * H))
    p["w_hh_l1_t"] = u((H, 4 * H))
    p["b_l1"] = (u((1, 4 * H)) + u((1, 4 * H)))
    # MultiheadAttention: fused in-proj (q|k|v) and out-proj.
    p["wqkv_t"] = u((H, 3 * H))
    p["bqkv"] = u((1, 3 * H))
    p["wo_t"] = u((H, H)); p["bo"] = u((1, H))
    # FC head.
    p["w1_t"] = u((H, H2)); p["b1"] = u((1, H2))
    p["w2_t"] = u((H2, OUTPUT_SIZE), 1.0 / math.sqrt(H2))
    p["b2"] = u((1, OUTPUT_SIZE), 1.0 / math.sqrt(H2))
    return p


# --------------------------------------------------------------------------
# Pure-JAX reference (correctness sanity check)
# --------------------------------------------------------------------------
def reference(x, p):
    H = HIDDEN

    def run_layer(seq, wih_t, whh_t, b):
        B = seq.shape[1]

        def step(carry, x_t):
            h, c = carry
            g = x_t @ wih_t + h @ whh_t + b
            i = jax.nn.sigmoid(g[:, :H]); f = jax.nn.sigmoid(g[:, H:2 * H])
            gg = jnp.tanh(g[:, 2 * H:3 * H]); o = jax.nn.sigmoid(g[:, 3 * H:])
            c = f * c + i * gg
            h = o * jnp.tanh(c)
            return (h, c), h

        init = (jnp.zeros((B, H)), jnp.zeros((B, H)))
        _, hs = jax.lax.scan(step, init, seq)
        return hs

    x_tm = jnp.transpose(x, (1, 0, 2))
    h = run_layer(x_tm, p["w_ih_l0_t"], p["w_hh_l0_t"], p["b_l0"])
    h = run_layer(h, p["w_ih_l1_t"], p["w_hh_l1_t"], p["b_l1"])
    T, B, _ = h.shape

    wq = p["wqkv_t"][:, :H]; wk = p["wqkv_t"][:, H:2 * H]; wv = p["wqkv_t"][:, 2 * H:]
    bq = p["bqkv"][:, :H]; bk = p["bqkv"][:, H:2 * H]; bv = p["bqkv"][:, 2 * H:]
    q = h[-1] @ wq + bq
    k = (h.reshape(T * B, H) @ wk + bk).reshape(T, B, H)
    v = (h.reshape(T * B, H) @ wv + bv).reshape(T, B, H)
    outs = []
    for hh in range(NUM_HEADS):
        lo, hi = hh * HEAD_DIM, (hh + 1) * HEAD_DIM
        s = jnp.sum(q[None, :, lo:hi] * k[:, :, lo:hi], axis=-1) / math.sqrt(HEAD_DIM)
        w = jax.nn.softmax(s, axis=0)
        outs.append(jnp.sum(w[:, :, None] * v[:, :, lo:hi], axis=0))
    a = jnp.concatenate(outs, axis=-1) @ p["wo_t"] + p["bo"]
    f1 = jnp.maximum(a @ p["w1_t"] + p["b1"], 0.0)
    return f1 @ p["w2_t"] + p["b2"]


if __name__ == "__main__":
    key = jax.random.PRNGKey(0)
    kx, kp = jax.random.split(key)
    B, T = 2, 8
    x = jax.random.normal(kx, (B, T, INPUT_SIZE), jnp.float32)
    params = init_params(kp)

    out = lstm_traffic_predictor(x, params)
    out = jax.block_until_ready(out)
    assert out.shape == (B, OUTPUT_SIZE)

    ref = reference(x, params)
    np.testing.assert_allclose(np.asarray(out), np.asarray(ref), rtol=2e-3, atol=2e-3)

    print("KERNEL_OK")
</pallas_src>

<mosaic_0001>
module attributes {stable_mosaic.version = 11 : i64} {
  func.func @_fused_kernel(%arg0: i32, %arg1: memref<64x8xf32, #tpu.memory_space<vmem>>, %arg2: memref<8x512xf32, #tpu.memory_space<vmem>>, %arg3: memref<128x512xf32, #tpu.memory_space<vmem>>, %arg4: memref<1x512xf32, #tpu.memory_space<vmem>>, %arg5: memref<256x512xf32, #tpu.memory_space<vmem>>, %arg6: memref<1x512xf32, #tpu.memory_space<vmem>>, %arg7: memref<128x384xf32, #tpu.memory_space<vmem>>, %arg8: memref<1x384xf32, #tpu.memory_space<vmem>>, %arg9: memref<128x128xf32, #tpu.memory_space<vmem>>, %arg10: memref<1x128xf32, #tpu.memory_space<vmem>>, %arg11: memref<128x128xf32, #tpu.memory_space<vmem>>, %arg12: memref<1x128xf32, #tpu.memory_space<vmem>>, %arg13: memref<128x128xf32, #tpu.memory_space<vmem>>, %arg14: memref<1x128xf32, #tpu.memory_space<vmem>>, %arg15: memref<128x128xf32, #tpu.memory_space<vmem>>, %arg16: memref<8x128xf32, #tpu.memory_space<vmem>>, %arg17: memref<64x512xf32, #tpu.memory_space<vmem>>, %arg18: memref<64x128xf32, #tpu.memory_space<vmem>>) attributes {dimension_semantics = [#tpu.dimension_semantics<arbitrary>], iteration_bounds = array<i64: 1>, scalar_prefetch = 0 : i64, scratch_operands = 2 : i64, tpu.core_type = #tpu.core_type<tc>, window_params = [{pipeline_mode = #tpu.pipeline_mode<synchronous>, transform_indices = @transform_0, window_bounds = array<i64: 64, 8>}, {pipeline_mode = #tpu.pipeline_mode<synchronous>, transform_indices = @transform_1, window_bounds = array<i64: 8, 512>}, {pipeline_mode = #tpu.pipeline_mode<synchronous>, transform_indices = @transform_2, window_bounds = array<i64: 128, 512>}, {pipeline_mode = #tpu.pipeline_mode<synchronous>, transform_indices = @transform_3, window_bounds = array<i64: 1, 512>}, {pipeline_mode = #tpu.pipeline_mode<synchronous>, transform_indices = @transform_4, window_bounds = array<i64: 256, 512>}, {pipeline_mode = #tpu.pipeline_mode<synchronous>, transform_indices = @transform_5, window_bounds = array<i64: 1, 512>}, {pipeline_mode = #tpu.pipeline_mode<synchronous>, transform_indices = @transform_6, window_bounds = array<i64: 128, 384>}, {pipeline_mode = #tpu.pipeline_mode<synchronous>, transform_indices = @transform_7, window_bounds = array<i64: 1, 384>}, {pipeline_mode = #tpu.pipeline_mode<synchronous>, transform_indices = @transform_8, window_bounds = array<i64: 128, 128>}, {pipeline_mode = #tpu.pipeline_mode<synchronous>, transform_indices = @transform_9, window_bounds = array<i64: 1, 128>}, {pipeline_mode = #tpu.pipeline_mode<synchronous>, transform_indices = @transform_10, window_bounds = array<i64: 128, 128>}, {pipeline_mode = #tpu.pipeline_mode<synchronous>, transform_indices = @transform_11, window_bounds = array<i64: 1, 128>}, {pipeline_mode = #tpu.pipeline_mode<synchronous>, transform_indices = @transform_12, window_bounds = array<i64: 128, 128>}, {pipeline_mode = #tpu.pipeline_mode<synchronous>, transform_indices = @transform_13, window_bounds = array<i64: 1, 128>}, {pipeline_mode = #tpu.pipeline_mode<synchronous>, transform_indices = @transform_14, window_bounds = array<i64: 128, 128>}, {pipeline_mode = #tpu.pipeline_mode<synchronous>, transform_indices = @transform_15, window_bounds = array<i64: 8, 128>}]} {
    %c0 = arith.constant 0 : index
    %c0_0 = arith.constant 0 : index
    %0 = vector.load %arg1[%c0, %c0_0] : memref<64x8xf32, #tpu.memory_space<vmem>>, vector<64x8xf32>
    %c0_1 = arith.constant 0 : index
    %c0_2 = arith.constant 0 : index
    %1 = vector.load %arg2[%c0_1, %c0_2] : memref<8x512xf32, #tpu.memory_space<vmem>>, vector<8x512xf32>
    %cst = arith.constant dense<0.000000e+00> : vector<64x512xf32>
    %2 = tpu.matmul %0, %1, %cst {dimension_numbers = #tpu.dot_dimension_numbers<[1], [0], [0], [1], [0, 0, 1, 1], [], []>} : vector<64x8xf32>, vector<8x512xf32>, vector<64x512xf32> -> vector<64x512xf32>
    %c0_3 = arith.constant 0 : index
    %c0_4 = arith.constant 0 : index
    %3 = vector.load %arg4[%c0_3, %c0_4] : memref<1x512xf32, #tpu.memory_space<vmem>>, vector<1x512xf32>
    %4 = vector.broadcast %3 : vector<1x512xf32> to vector<64x512xf32>
    %5 = arith.addf %2, %4 : vector<64x512xf32>
    %c0_5 = arith.constant 0 : index
    %c0_6 = arith.constant 0 : index
    %6 = vector.load %arg17[%c0_5, %c0_6] : memref<64x512xf32, #tpu.memory_space<vmem>>, vector<64x512xf32>
    tpu.vector_store %arg17[%c0_5, %c0_6], %5 {strides = array<i32>} : memref<64x512xf32, #tpu.memory_space<vmem>>, vector<64x512xf32>,
    %c0_7 = arith.constant 0 : index
    %c0_8 = arith.constant 0 : index
    %7 = vector.load %arg6[%c0_7, %c0_8] : memref<1x512xf32, #tpu.memory_space<vmem>>, vector<1x512xf32>
    %8 = vector.shape_cast %7 : vector<1x512xf32> to vector<1x512xf32>
    %9 = vector.broadcast %8 : vector<1x512xf32> to vector<8x512xf32>
    %cst_9 = arith.constant 0.000000e+00 : f32
    %10 = vector.broadcast %cst_9 : f32 to vector<8x128xf32>
    %c0_10 = arith.constant 0 : index
    %c0_11 = arith.constant 0 : index
    %11 = vector.load %arg17[%c0_10, %c0_11] : memref<64x512xf32, #tpu.memory_space<vmem>>, vector<8x512xf32>
    %c0_12 = arith.constant 0 : index
    %c0_13 = arith.constant 0 : index
    %12 = vector.load %arg3[%c0_12, %c0_13] : memref<128x512xf32, #tpu.memory_space<vmem>>, vector<128x512xf32>
    %cst_14 = arith.constant dense<0.000000e+00> : vector<8x512xf32>
    %13 = tpu.matmul %10, %12, %cst_14 {dimension_numbers = #tpu.dot_dimension_numbers<[1], [0], [0], [1], [0, 0, 1, 1], [], []>} : vector<8x128xf32>, vector<128x512xf32>, vector<8x512xf32> -> vector<8x512xf32>
    %14 = arith.addf %11, %13 : vector<8x512xf32>
    %15 = vector.extract_strided_slice %14 {offsets = [0, 0], sizes = [8, 128], strides = [1, 1]} : vector<8x512xf32> to vector<8x128xf32>
    %16 = arith.negf %15 : vector<8x128xf32>
    %17 = math.exp %16 : vector<8x128xf32>
    %cst_15 = arith.constant 1.000000e+00 : f32
    %18 = vector.broadcast %cst_15 : f32 to vector<8x128xf32>
    %19 = arith.addf %18, %17 : vector<8x128xf32>
    %20 = arith.divf %18, %19 : vector<8x128xf32>
    %21 = vector.extract_strided_slice %14 {offsets = [0, 128], sizes = [8, 128], strides = [1, 1]} : vector<8x512xf32> to vector<8x128xf32>
    %22 = arith.negf %21 : vector<8x128xf32>
    %23 = math.exp %22 : vector<8x128xf32>
    %cst_16 = arith.constant 1.000000e+00 : f32
    %24 = vector.broadcast %cst_16 : f32 to vector<8x128xf32>
    %25 = arith.addf %24, %23 : vector<8x128xf32>
    %26 = arith.divf %24, %25 : vector<8x128xf32>
    %27 = vector.extract_strided_slice %14 {offsets = [0, 256], sizes = [8, 128], strides = [1, 1]} : vector<8x512xf32> to vector<8x128xf32>
    %28 = math.tanh %27 : vector<8x128xf32>
    %29 = vector.extract_strided_slice %14 {offsets = [0, 384], sizes = [8, 128], strides = [1, 1]} : vector<8x512xf32> to vector<8x128xf32>
    %30 = arith.negf %29 : vector<8x128xf32>
    %31 = math.exp %30 : vector<8x128xf32>
    %cst_17 = arith.constant 1.000000e+00 : f32
    %32 = vector.broadcast %cst_17 : f32 to vector<8x128xf32>
    %33 = arith.addf %32, %31 : vector<8x128xf32>
    %34 = arith.divf %32, %33 : vector<8x128xf32>
    %35 = arith.mulf %26, %10 : vector<8x128xf32>
    %36 = arith.mulf %20, %28 : vector<8x128xf32>
    %37 = arith.addf %35, %36 : vector<8x128xf32>
    %38 = math.tanh %37 : vector<8x128xf32>
    %39 = arith.mulf %34, %38 : vector<8x128xf32>
    %40 = tpu.concatenate %39, %10 in 1 : vector<8x128xf32>, vector<8x128xf32> -> vector<8x256xf32>
    %c0_18 = arith.constant 0 : index
    %c0_19 = arith.constant 0 : index
    %41 = vector.load %arg5[%c0_18, %c0_19] : memref<256x512xf32, #tpu.memory_space<vmem>>, vector<256x512xf32>
    %cst_20 = arith.constant dense<0.000000e+00> : vector<8x512xf32>
    %42 = tpu.matmul %40, %41, %cst_20 {dimension_numbers = #tpu.dot_dimension_numbers<[1], [0], [0], [1], [0, 0, 1, 1], [], []>} : vector<8x256xf32>, vector<256x512xf32>, vector<8x512xf32> -> vector<8x512xf32>
    %43 = arith.addf %42, %9 : vector<8x512xf32>
    %44 = vector.extract_strided_slice %43 {offsets = [0, 0], sizes = [8, 128], strides = [1, 1]} : vector<8x512xf32> to vector<8x128xf32>
    %45 = arith.negf %44 : vector<8x128xf32>
    %46 = math.exp %45 : vector<8x128xf32>
    %cst_21 = arith.constant 1.000000e+00 : f32
    %47 = vector.broadcast %cst_21 : f32 to vector<8x128xf32>
    %48 = arith.addf %47, %46 : vector<8x128xf32>
    %49 = arith.divf %47, %48 : vector<8x128xf32>
    %50 = vector.extract_strided_slice %43 {offsets = [0, 128], sizes = [8, 128], strides = [1, 1]} : vector<8x512xf32> to vector<8x128xf32>
    %51 = arith.negf %50 : vector<8x128xf32>
    %52 = math.exp %51 : vector<8x128xf32>
    %cst_22 = arith.constant 1.000000e+00 : f32
    %53 = vector.broadcast %cst_22 : f32 to vector<8x128xf32>
    %54 = arith.addf %53, %52 : vector<8x128xf32>
    %55 = arith.divf %53, %54 : vector<8x128xf32>
    %56 = vector.extract_strided_slice %43 {offsets = [0, 256], sizes = [8, 128], strides = [1, 1]} : vector<8x512xf32> to vector<8x128xf32>
    %57 = math.tanh %56 : vector<8x128xf32>
    %58 = vector.extract_strided_slice %43 {offsets = [0, 384], sizes = [8, 128], strides = [1, 1]} : vector<8x512xf32> to vector<8x128xf32>
    %59 = arith.negf %58 : vector<8x128xf32>
    %60 = math.exp %59 : vector<8x128xf32>
    %cst_23 = arith.constant 1.000000e+00 : f32
    %61 = vector.broadcast %cst_23 : f32 to vector<8x128xf32>
    %62 = arith.addf %61, %60 : vector<8x128xf32>
    %63 = arith.divf %61, %62 : vector<8x128xf32>
    %64 = arith.mulf %55, %10 : vector<8x128xf32>
    %65 = arith.mulf %49, %57 : vector<8x128xf32>
    %66 = arith.addf %64, %65 : vector<8x128xf32>
    %67 = math.tanh %66 : vector<8x128xf32>
    %68 = arith.mulf %63, %67 : vector<8x128xf32>
    %c0_24 = arith.constant 0 : index
    %c0_25 = arith.constant 0 : index
    %69 = vector.load %arg18[%c0_24, %c0_25] : memref<64x128xf32, #tpu.memory_space<vmem>>, vector<8x128xf32>
    tpu.vector_store %arg18[%c0_24, %c0_25], %68 {strides = array<i32>} : memref<64x128xf32, #tpu.memory_space<vmem>>, vector<8x128xf32>,
    %c8 = arith.constant 8 : index
    %c0_26 = arith.constant 0 : index
    %70 = vector.load %arg17[%c8, %c0_26] : memref<64x512xf32, #tpu.memory_space<vmem>>, vector<8x512xf32>
    %c0_27 = arith.constant 0 : index
    %c0_28 = arith.constant 0 : index
    %71 = vector.load %arg3[%c0_27, %c0_28] : memref<128x512xf32, #tpu.memory_space<vmem>>, vector<128x512xf32>
    %cst_29 = arith.constant dense<0.000000e+00> : vector<8x512xf32>
    %72 = tpu.matmul %39, %71, %cst_29 {dimension_numbers = #tpu.dot_dimension_numbers<[1], [0], [0], [1], [0, 0, 1, 1], [], []>} : vector<8x128xf32>, vector<128x512xf32>, vector<8x512xf32> -> vector<8x512xf32>
    %73 = arith.addf %70, %72 : vector<8x512xf32>
    %74 = vector.extract_strided_slice %73 {offsets = [0, 0], sizes = [8, 128], strides = [1, 1]} : vector<8x512xf32> to vector<8x128xf32>
    %75 = arith.negf %74 : vector<8x128xf32>
    %76 = math.exp %75 : vector<8x128xf32>
    %cst_30 = arith.constant 1.000000e+00 : f32
    %77 = vector.broadcast %cst_30 : f32 to vector<8x128xf32>
    %78 = arith.addf %77, %76 : vector<8x128xf32>
    %79 = arith.divf %77, %78 : vector<8x128xf32>
    %80 = vector.extract_strided_slice %73 {offsets = [0, 128], sizes = [8, 128], strides = [1, 1]} : vector<8x512xf32> to vector<8x128xf32>
    %81 = arith.negf %80 : vector<8x128xf32>
    %82 = math.exp %81 : vector<8x128xf32>
    %cst_31 = arith.constant 1.000000e+00 : f32
    %83 = vector.broadcast %cst_31 : f32 to vector<8x128xf32>
    %84 = arith.addf %83, %82 : vector<8x128xf32>
    %85 = arith.divf %83, %84 : vector<8x128xf32>
    %86 = vector.extract_strided_slice %73 {offsets = [0, 256], sizes = [8, 128], strides = [1, 1]} : vector<8x512xf32> to vector<8x128xf32>
    %87 = math.tanh %86 : vector<8x128xf32>
    %88 = vector.extract_strided_slice %73 {offsets = [0, 384], sizes = [8, 128], strides = [1, 1]} : vector<8x512xf32> to vector<8x128xf32>
    %89 = arith.negf %88 : vector<8x128xf32>
    %90 = math.exp %89 : vector<8x128xf32>
    %cst_32 = arith.constant 1.000000e+00 : f32
    %91 = vector.broadcast %cst_32 : f32 to vector<8x128xf32>
    %92 = arith.addf %91, %90 : vector<8x128xf32>
    %93 = arith.divf %91, %92 : vector<8x128xf32>
    %94 = arith.mulf %85, %37 : vector<8x128xf32>
    %95 = arith.mulf %79, %87 : vector<8x128xf32>
    %96 = arith.addf %94, %95 : vector<8x128xf32>
    %97 = math.tanh %96 : vector<8x128xf32>
    %98 = arith.mulf %93, %97 : vector<8x128xf32>
    %99 = tpu.concatenate %98, %68 in 1 : vector<8x128xf32>, vector<8x128xf32> -> vector<8x256xf32>
    %c0_33 = arith.constant 0 : index
    %c0_34 = arith.constant 0 : index
    %100 = vector.load %arg5[%c0_33, %c0_34] : memref<256x512xf32, #tpu.memory_space<vmem>>, vector<256x512xf32>
    %cst_35 = arith.constant dense<0.000000e+00> : vector<8x512xf32>
    %101 = tpu.matmul %99, %100, %cst_35 {dimension_numbers = #tpu.dot_dimension_numbers<[1], [0], [0], [1], [0, 0, 1, 1], [], []>} : vector<8x256xf32>, vector<256x512xf32>, vector<8x512xf32> -> vector<8x512xf32>
    %102 = arith.addf %101, %9 : vector<8x512xf32>
    %103 = vector.extract_strided_slice %102 {offsets = [0, 0], sizes = [8, 128], strides = [1, 1]} : vector<8x512xf32> to vector<8x128xf32>
    %104 = arith.negf %103 : vector<8x128xf32>
    %105 = math.exp %104 : vector<8x128xf32>
    %cst_36 = arith.constant 1.000000e+00 : f32
    %106 = vector.broadcast %cst_36 : f32 to vector<8x128xf32>
    %107 = arith.addf %106, %105 : vector<8x128xf32>
    %108 = arith.divf %106, %107 : vector<8x128xf32>
    %109 = vector.extract_strided_slice %102 {offsets = [0, 128], sizes = [8, 128], strides = [1, 1]} : vector<8x512xf32> to vector<8x128xf32>
    %110 = arith.negf %109 : vector<8x128xf32>
    %111 = math.exp %110 : vector<8x128xf32>
    %cst_37 = arith.constant 1.000000e+00 : f32
    %112 = vector.broadcast %cst_37 : f32 to vector<8x128xf32>
    %113 = arith.addf %112, %111 : vector<8x128xf32>
    %114 = arith.divf %112, %113 : vector<8x128xf32>
    %115 = vector.extract_strided_slice %102 {offsets = [0, 256], sizes = [8, 128], strides = [1, 1]} : vector<8x512xf32> to vector<8x128xf32>
    %116 = math.tanh %115 : vector<8x128xf32>
    %117 = vector.extract_strided_slice %102 {offsets = [0, 384], sizes = [8, 128], strides = [1, 1]} : vector<8x512xf32> to vector<8x128xf32>
    %118 = arith.negf %117 : vector<8x128xf32>
    %119 = math.exp %118 : vector<8x128xf32>
    %cst_38 = arith.constant 1.000000e+00 : f32
    %120 = vector.broadcast %cst_38 : f32 to vector<8x128xf32>
    %121 = arith.addf %120, %119 : vector<8x128xf32>
    %122 = arith.divf %120, %121 : vector<8x128xf32>
    %123 = arith.mulf %114, %66 : vector<8x128xf32>
    %124 = arith.mulf %108, %116 : vector<8x128xf32>
    %125 = arith.addf %123, %124 : vector<8x128xf32>
    %126 = math.tanh %125 : vector<8x128xf32>
    %127 = arith.mulf %122, %126 : vector<8x128xf32>
    %c8_39 = arith.constant 8 : index
    %c0_40 = arith.constant 0 : index
    %128 = vector.load %arg18[%c8_39, %c0_40] : memref<64x128xf32, #tpu.memory_space<vmem>>, vector<8x128xf32>
    tpu.vector_store %arg18[%c8_39, %c0_40], %127 {strides = array<i32>} : memref<64x128xf32, #tpu.memory_space<vmem>>, vector<8x128xf32>,
    %c16 = arith.constant 16 : index
    %c0_41 = arith.constant 0 : index
    %129 = vector.load %arg17[%c16, %c0_41] : memref<64x512xf32, #tpu.memory_space<vmem>>, vector<8x512xf32>
    %c0_42 = arith.constant 0 : index
    %c0_43 = arith.constant 0 : index
    %130 = vector.load %arg3[%c0_42, %c0_43] : memref<128x512xf32, #tpu.memory_space<vmem>>, vector<128x512xf32>
    %cst_44 = arith.constant dense<0.000000e+00> : vector<8x512xf32>
    %131 = tpu.matmul %98, %130, %cst_44 {dimension_numbers = #tpu.dot_dimension_numbers<[1], [0], [0], [1], [0, 0, 1, 1], [], []>} : vector<8x128xf32>, vector<128x512xf32>, vector<8x512xf32> -> vector<8x512xf32>
    %132 = arith.addf %129, %131 : vector<8x512xf32>
    %133 = vector.extract_strided_slice %132 {offsets = [0, 0], sizes = [8, 128], strides = [1, 1]} : vector<8x512xf32> to vector<8x128xf32>
    %134 = arith.negf %133 : vector<8x128xf32>
    %135 = math.exp %134 : vector<8x128xf32>
    %cst_45 = arith.constant 1.000000e+00 : f32
    %136 = vector.broadcast %cst_45 : f32 to vector<8x128xf32>
    %137 = arith.addf %136, %135 : vector<8x128xf32>
    %138 = arith.divf %136, %137 : vector<8x128xf32>
    %139 = vector.extract_strided_slice %132 {offsets = [0, 128], sizes = [8, 128], strides = [1, 1]} : vector<8x512xf32> to vector<8x128xf32>
    %140 = arith.negf %139 : vector<8x128xf32>
    %141 = math.exp %140 : vector<8x128xf32>
    %cst_46 = arith.constant 1.000000e+00 : f32
    %142 = vector.broadcast %cst_46 : f32 to vector<8x128xf32>
    %143 = arith.addf %142, %141 : vector<8x128xf32>
    %144 = arith.divf %142, %143 : vector<8x128xf32>
    %145 = vector.extract_strided_slice %132 {offsets = [0, 256], sizes = [8, 128], strides = [1, 1]} : vector<8x512xf32> to vector<8x128xf32>
    %146 = math.tanh %145 : vector<8x128xf32>
    %147 = vector.extract_strided_slice %132 {offsets = [0, 384], sizes = [8, 128], strides = [1, 1]} : vector<8x512xf32> to vector<8x128xf32>
    %148 = arith.negf %147 : vector<8x128xf32>
    %149 = math.exp %148 : vector<8x128xf32>
    %cst_47 = arith.constant 1.000000e+00 : f32
    %150 = vector.broadcast %cst_47 : f32 to vector<8x128xf32>
    %151 = arith.addf %150, %149 : vector<8x128xf32>
    %152 = arith.divf %150, %151 : vector<8x128xf32>
    %153 = arith.mulf %144, %96 : vector<8x128xf32>
    %154 = arith.mulf %138, %146 : vector<8x128xf32>
    %155 = arith.addf %153, %154 : vector<8x128xf32>
    %156 = math.tanh %155 : vector<8x128xf32>
    %157 = arith.mulf %152, %156 : vector<8x128xf32>
    %158 = tpu.concatenate %157, %127 in 1 : vector<8x128xf32>, vector<8x128xf32> -> vector<8x256xf32>
    %c0_48 = arith.constant 0 : index
    %c0_49 = arith.constant 0 : index
    %159 = vector.load %arg5[%c0_48, %c0_49] : memref<256x512xf32, #tpu.memory_space<vmem>>, vector<256x512xf32>
    %cst_50 = arith.constant dense<0.000000e+00> : vector<8x512xf32>
    %160 = tpu.matmul %158, %159, %cst_50 {dimension_numbers = #tpu.dot_dimension_numbers<[1], [0], [0], [1], [0, 0, 1, 1], [], []>} : vector<8x256xf32>, vector<256x512xf32>, vector<8x512xf32> -> vector<8x512xf32>
    %161 = arith.addf %160, %9 : vector<8x512xf32>
    %162 = vector.extract_strided_slice %161 {offsets = [0, 0], sizes = [8, 128], strides = [1, 1]} : vector<8x512xf32> to vector<8x128xf32>
    %163 = arith.negf %162 : vector<8x128xf32>
    %164 = math.exp %163 : vector<8x128xf32>
    %cst_51 = arith.constant 1.000000e+00 : f32
    %165 = vector.broadcast %cst_51 : f32 to vector<8x128xf32>
    %166 = arith.addf %165, %164 : vector<8x128xf32>
    %167 = arith.divf %165, %166 : vector<8x128xf32>
    %168 = vector.extract_strided_slice %161 {offsets = [0, 128], sizes = [8, 128], strides = [1, 1]} : vector<8x512xf32> to vector<8x128xf32>
    %169 = arith.negf %168 : vector<8x128xf32>
    %170 = math.exp %169 : vector<8x128xf32>
    %cst_52 = arith.constant 1.000000e+00 : f32
    %171 = vector.broadcast %cst_52 : f32 to vector<8x128xf32>
    %172 = arith.addf %171, %170 : vector<8x128xf32>
    %173 = arith.divf %171, %172 : vector<8x128xf32>
    %174 = vector.extract_strided_slice %161 {offsets = [0, 256], sizes = [8, 128], strides = [1, 1]} : vector<8x512xf32> to vector<8x128xf32>
    %175 = math.tanh %174 : vector<8x128xf32>
    %176 = vector.extract_strided_slice %161 {offsets = [0, 384], sizes = [8, 128], strides = [1, 1]} : vector<8x512xf32> to vector<8x128xf32>
    %177 = arith.negf %176 : vector<8x128xf32>
    %178 = math.exp %177 : vector<8x128xf32>
    %cst_53 = arith.constant 1.000000e+00 : f32
    %179 = vector.broadcast %cst_53 : f32 to vector<8x128xf32>
    %180 = arith.addf %179, %178 : vector<8x128xf32>
    %181 = arith.divf %179, %180 : vector<8x128xf32>
    %182 = arith.mulf %173, %125 : vector<8x128xf32>
    %183 = arith.mulf %167, %175 : vector<8x128xf32>
    %184 = arith.addf %182, %183 : vector<8x128xf32>
    %185 = math.tanh %184 : vector<8x128xf32>
    %186 = arith.mulf %181, %185 : vector<8x128xf32>
    %c16_54 = arith.constant 16 : index
    %c0_55 = arith.constant 0 : index
    %187 = vector.load %arg18[%c16_54, %c0_55] : memref<64x128xf32, #tpu.memory_space<vmem>>, vector<8x128xf32>
    tpu.vector_store %arg18[%c16_54, %c0_55], %186 {strides = array<i32>} : memref<64x128xf32, #tpu.memory_space<vmem>>, vector<8x128xf32>,
    %c24 = arith.constant 24 : index
    %c0_56 = arith.constant 0 : index
    %188 = vector.load %arg17[%c24, %c0_56] : memref<64x512xf32, #tpu.memory_space<vmem>>, vector<8x512xf32>
    %c0_57 = arith.constant 0 : index
    %c0_58 = arith.constant 0 : index
    %189 = vector.load %arg3[%c0_57, %c0_58] : memref<128x512xf32, #tpu.memory_space<vmem>>, vector<128x512xf32>
    %cst_59 = arith.constant dense<0.000000e+00> : vector<8x512xf32>
    %190 = tpu.matmul %157, %189, %cst_59 {dimension_numbers = #tpu.dot_dimension_numbers<[1], [0], [0], [1], [0, 0, 1, 1], [], []>} : vector<8x128xf32>, vector<128x512xf32>, vector<8x512xf32> -> vector<8x512xf32>
    %191 = arith.addf %188, %190 : vector<8x512xf32>
    %192 = vector.extract_strided_slice %191 {offsets = [0, 0], sizes = [8, 128], strides = [1, 1]} : vector<8x512xf32> to vector<8x128xf32>
    %193 = arith.negf %192 : vector<8x128xf32>
    %194 = math.exp %193 : vector<8x128xf32>
    %cst_60 = arith.constant 1.000000e+00 : f32
    %195 = vector.broadcast %cst_60 : f32 to vector<8x128xf32>
    %196 = arith.addf %195, %194 : vector<8x128xf32>
    %197 = arith.divf %195, %196 : vector<8x128xf32>
    %198 = vector.extract_strided_slice %191 {offsets = [0, 128], sizes = [8, 128], strides = [1, 1]} : vector<8x512xf32> to vector<8x128xf32>
    %199 = arith.negf %198 : vector<8x128xf32>
    %200 = math.exp %199 : vector<8x128xf32>
    %cst_61 = arith.constant 1.000000e+00 : f32
    %201 = vector.broadcast %cst_61 : f32 to vector<8x128xf32>
    %202 = arith.addf %201, %200 : vector<8x128xf32>
    %203 = arith.divf %201, %202 : vector<8x128xf32>
    %204 = vector.extract_strided_slice %191 {offsets = [0, 256], sizes = [8, 128], strides = [1, 1]} : vector<8x512xf32> to vector<8x128xf32>
    %205 = math.tanh %204 : vector<8x128xf32>
    %206 = vector.extract_strided_slice %191 {offsets = [0, 384], sizes = [8, 128], strides = [1, 1]} : vector<8x512xf32> to vector<8x128xf32>
    %207 = arith.negf %206 : vector<8x128xf32>
    %208 = math.exp %207 : vector<8x128xf32>
    %cst_62 = arith.constant 1.000000e+00 : f32
    %209 = vector.broadcast %cst_62 : f32 to vector<8x128xf32>
    %210 = arith.addf %209, %208 : vector<8x128xf32>
    %211 = arith.divf %209, %210 : vector<8x128xf32>
    %212 = arith.mulf %203, %155 : vector<8x128xf32>
    %213 = arith.mulf %197, %205 : vector<8x128xf32>
    %214 = arith.addf %212, %213 : vector<8x128xf32>
    %215 = math.tanh %214 : vector<8x128xf32>
    %216 = arith.mulf %211, %215 : vector<8x128xf32>
    %217 = tpu.concatenate %216, %186 in 1 : vector<8x128xf32>, vector<8x128xf32> -> vector<8x256xf32>
    %c0_63 = arith.constant 0 : index
    %c0_64 = arith.constant 0 : index
    %218 = vector.load %arg5[%c0_63, %c0_64] : memref<256x512xf32, #tpu.memory_space<vmem>>, vector<256x512xf32>
    %cst_65 = arith.constant dense<0.000000e+00> : vector<8x512xf32>
    %219 = tpu.matmul %217, %218, %cst_65 {dimension_numbers = #tpu.dot_dimension_numbers<[1], [0], [0], [1], [0, 0, 1, 1], [], []>} : vector<8x256xf32>, vector<256x512xf32>, vector<8x512xf32> -> vector<8x512xf32>
    %220 = arith.addf %219, %9 : vector<8x512xf32>
    %221 = vector.extract_strided_slice %220 {offsets = [0, 0], sizes = [8, 128], strides = [1, 1]} : vector<8x512xf32> to vector<8x128xf32>
    %222 = arith.negf %221 : vector<8x128xf32>
    %223 = math.exp %222 : vector<8x128xf32>
    %cst_66 = arith.constant 1.000000e+00 : f32
    %224 = vector.broadcast %cst_66 : f32 to vector<8x128xf32>
    %225 = arith.addf %224, %223 : vector<8x128xf32>
    %226 = arith.divf %224, %225 : vector<8x128xf32>
    %227 = vector.extract_strided_slice %220 {offsets = [0, 128], sizes = [8, 128], strides = [1, 1]} : vector<8x512xf32> to vector<8x128xf32>
    %228 = arith.negf %227 : vector<8x128xf32>
    %229 = math.exp %228 : vector<8x128xf32>
    %cst_67 = arith.constant 1.000000e+00 : f32
    %230 = vector.broadcast %cst_67 : f32 to vector<8x128xf32>
    %231 = arith.addf %230, %229 : vector<8x128xf32>
    %232 = arith.divf %230, %231 : vector<8x128xf32>
    %233 = vector.extract_strided_slice %220 {offsets = [0, 256], sizes = [8, 128], strides = [1, 1]} : vector<8x512xf32> to vector<8x128xf32>
    %234 = math.tanh %233 : vector<8x128xf32>
    %235 = vector.extract_strided_slice %220 {offsets = [0, 384], sizes = [8, 128], strides = [1, 1]} : vector<8x512xf32> to vector<8x128xf32>
    %236 = arith.negf %235 : vector<8x128xf32>
    %237 = math.exp %236 : vector<8x128xf32>
    %cst_68 = arith.constant 1.000000e+00 : f32
    %238 = vector.broadcast %cst_68 : f32 to vector<8x128xf32>
    %239 = arith.addf %238, %237 : vector<8x128xf32>
    %240 = arith.divf %238, %239 : vector<8x128xf32>
    %241 = arith.mulf %232, %184 : vector<8x128xf32>
    %242 = arith.mulf %226, %234 : vector<8x128xf32>
    %243 = arith.addf %241, %242 : vector<8x128xf32>
    %244 = math.tanh %243 : vector<8x128xf32>
    %245 = arith.mulf %240, %244 : vector<8x128xf32>
    %c24_69 = arith.constant 24 : index
    %c0_70 = arith.constant 0 : index
    %246 = vector.load %arg18[%c24_69, %c0_70] : memref<64x128xf32, #tpu.memory_space<vmem>>, vector<8x128xf32>
    tpu.vector_store %arg18[%c24_69, %c0_70], %245 {strides = array<i32>} : memref<64x128xf32, #tpu.memory_space<vmem>>, vector<8x128xf32>,
    %c32 = arith.constant 32 : index
    %c0_71 = arith.constant 0 : index
    %247 = vector.load %arg17[%c32, %c0_71] : memref<64x512xf32, #tpu.memory_space<vmem>>, vector<8x512xf32>
    %c0_72 = arith.constant 0 : index
    %c0_73 = arith.constant 0 : index
    %248 = vector.load %arg3[%c0_72, %c0_73] : memref<128x512xf32, #tpu.memory_space<vmem>>, vector<128x512xf32>
    %cst_74 = arith.constant dense<0.000000e+00> : vector<8x512xf32>
    %249 = tpu.matmul %216, %248, %cst_74 {dimension_numbers = #tpu.dot_dimension_numbers<[1], [0], [0], [1], [0, 0, 1, 1], [], []>} : vector<8x128xf32>, vector<128x512xf32>, vector<8x512xf32> -> vector<8x512xf32>
    %250 = arith.addf %247, %249 : vector<8x512xf32>
    %251 = vector.extract_strided_slice %250 {offsets = [0, 0], sizes = [8, 128], strides = [1, 1]} : vector<8x512xf32> to vector<8x128xf32>
    %252 = arith.negf %251 : vector<8x128xf32>
    %253 = math.exp %252 : vector<8x128xf32>
    %cst_75 = arith.constant 1.000000e+00 : f32
    %254 = vector.broadcast %cst_75 : f32 to vector<8x128xf32>
    %255 = arith.addf %254, %253 : vector<8x128xf32>
    %256 = arith.divf %254, %255 : vector<8x128xf32>
    %257 = vector.extract_strided_slice %250 {offsets = [0, 128], sizes = [8, 128], strides = [1, 1]} : vector<8x512xf32> to vector<8x128xf32>
    %258 = arith.negf %257 : vector<8x128xf32>
    %259 = math.exp %258 : vector<8x128xf32>
    %cst_76 = arith.constant 1.000000e+00 : f32
    %260 = vector.broadcast %cst_76 : f32 to vector<8x128xf32>
    %261 = arith.addf %260, %259 : vector<8x128xf32>
    %262 = arith.divf %260, %261 : vector<8x128xf32>
    %263 = vector.extract_strided_slice %250 {offsets = [0, 256], sizes = [8, 128], strides = [1, 1]} : vector<8x512xf32> to vector<8x128xf32>
    %264 = math.tanh %263 : vector<8x128xf32>
    %265 = vector.extract_strided_slice %250 {offsets = [0, 384], sizes = [8, 128], strides = [1, 1]} : vector<8x512xf32> to vector<8x128xf32>
    %266 = arith.negf %265 : vector<8x128xf32>
    %267 = math.exp %266 : vector<8x128xf32>
    %cst_77 = arith.constant 1.000000e+00 : f32
    %268 = vector.broadcast %cst_77 : f32 to vector<8x128xf32>
    %269 = arith.addf %268, %267 : vector<8x128xf32>
    %270 = arith.divf %268, %269 : vector<8x128xf32>
    %271 = arith.mulf %262, %214 : vector<8x128xf32>
    %272 = arith.mulf %256, %264 : vector<8x128xf32>
    %273 = arith.addf %271, %272 : vector<8x128xf32>
    %274 = math.tanh %273 : vector<8x128xf32>
    %275 = arith.mulf %270, %274 : vector<8x128xf32>
    %276 = tpu.concatenate %275, %245 in 1 : vector<8x128xf32>, vector<8x128xf32> -> vector<8x256xf32>
    %c0_78 = arith.constant 0 : index
    %c0_79 = arith.constant 0 : index
    %277 = vector.load %arg5[%c0_78, %c0_79] : memref<256x512xf32, #tpu.memory_space<vmem>>, vector<256x512xf32>
    %cst_80 = arith.constant dense<0.000000e+00> : vector<8x512xf32>
    %278 = tpu.matmul %276, %277, %cst_80 {dimension_numbers = #tpu.dot_dimension_numbers<[1], [0], [0], [1], [0, 0, 1, 1], [], []>} : vector<8x256xf32>, vector<256x512xf32>, vector<8x512xf32> -> vector<8x512xf32>
    %279 = arith.addf %278, %9 : vector<8x512xf32>
    %280 = vector.extract_strided_slice %279 {offsets = [0, 0], sizes = [8, 128], strides = [1, 1]} : vector<8x512xf32> to vector<8x128xf32>
    %281 = arith.negf %280 : vector<8x128xf32>
    %282 = math.exp %281 : vector<8x128xf32>
    %cst_81 = arith.constant 1.000000e+00 : f32
    %283 = vector.broadcast %cst_81 : f32 to vector<8x128xf32>
    %284 = arith.addf %283, %282 : vector<8x128xf32>
    %285 = arith.divf %283, %284 : vector<8x128xf32>
    %286 = vector.extract_strided_slice %279 {offsets = [0, 128], sizes = [8, 128], strides = [1, 1]} : vector<8x512xf32> to vector<8x128xf32>
    %287 = arith.negf %286 : vector<8x128xf32>
    %288 = math.exp %287 : vector<8x128xf32>
    %cst_82 = arith.constant 1.000000e+00 : f32
    %289 = vector.broadcast %cst_82 : f32 to vector<8x128xf32>
    %290 = arith.addf %289, %288 : vector<8x128xf32>
    %291 = arith.divf %289, %290 : vector<8x128xf32>
    %292 = vector.extract_strided_slice %279 {offsets = [0, 256], sizes = [8, 128], strides = [1, 1]} : vector<8x512xf32> to vector<8x128xf32>
    %293 = math.tanh %292 : vector<8x128xf32>
    %294 = vector.extract_strided_slice %279 {offsets = [0, 384], sizes = [8, 128], strides = [1, 1]} : vector<8x512xf32> to vector<8x128xf32>
    %295 = arith.negf %294 : vector<8x128xf32>
    %296 = math.exp %295 : vector<8x128xf32>
    %cst_83 = arith.constant 1.000000e+00 : f32
    %297 = vector.broadcast %cst_83 : f32 to vector<8x128xf32>
    %298 = arith.addf %297, %296 : vector<8x128xf32>
    %299 = arith.divf %297, %298 : vector<8x128xf32>
    %300 = arith.mulf %291, %243 : vector<8x128xf32>
    %301 = arith.mulf %285, %293 : vector<8x128xf32>
    %302 = arith.addf %300, %301 : vector<8x128xf32>
    %303 = math.tanh %302 : vector<8x128xf32>
    %304 = arith.mulf %299, %303 : vector<8x128xf32>
    %c32_84 = arith.constant 32 : index
    %c0_85 = arith.constant 0 : index
    %305 = vector.load %arg18[%c32_84, %c0_85] : memref<64x128xf32, #tpu.memory_space<vmem>>, vector<8x128xf32>
    tpu.vector_store %arg18[%c32_84, %c0_85], %304 {strides = array<i32>} : memref<64x128xf32, #tpu.memory_space<vmem>>, vector<8x128xf32>,
    %c40 = arith.constant 40 : index
    %c0_86 = arith.constant 0 : index
    %306 = vector.load %arg17[%c40, %c0_86] : memref<64x512xf32, #tpu.memory_space<vmem>>, vector<8x512xf32>
    %c0_87 = arith.constant 0 : index
    %c0_88 = arith.constant 0 : index
    %307 = vector.load %arg3[%c0_87, %c0_88] : memref<128x512xf32, #tpu.memory_space<vmem>>, vector<128x512xf32>
    %cst_89 = arith.constant dense<0.000000e+00> : vector<8x512xf32>
    %308 = tpu.matmul %275, %307, %cst_89 {dimension_numbers = #tpu.dot_dimension_numbers<[1], [0], [0], [1], [0, 0, 1, 1], [], []>} : vector<8x128xf32>, vector<128x512xf32>, vector<8x512xf32> -> vector<8x512xf32>
    %309 = arith.addf %306, %308 : vector<8x512xf32>
    %310 = vector.extract_strided_slice %309 {offsets = [0, 0], sizes = [8, 128], strides = [1, 1]} : vector<8x512xf32> to vector<8x128xf32>
    %311 = arith.negf %310 : vector<8x128xf32>
    %312 = math.exp %311 : vector<8x128xf32>
    %cst_90 = arith.constant 1.000000e+00 : f32
    %313 = vector.broadcast %cst_90 : f32 to vector<8x128xf32>
    %314 = arith.addf %313, %312 : vector<8x128xf32>
    %315 = arith.divf %313, %314 : vector<8x128xf32>
    %316 = vector.extract_strided_slice %309 {offsets = [0, 128], sizes = [8, 128], strides = [1, 1]} : vector<8x512xf32> to vector<8x128xf32>
    %317 = arith.negf %316 : vector<8x128xf32>
    %318 = math.exp %317 : vector<8x128xf32>
    %cst_91 = arith.constant 1.000000e+00 : f32
    %319 = vector.broadcast %cst_91 : f32 to vector<8x128xf32>
    %320 = arith.addf %319, %318 : vector<8x128xf32>
    %321 = arith.divf %319, %320 : vector<8x128xf32>
    %322 = vector.extract_strided_slice %309 {offsets = [0, 256], sizes = [8, 128], strides = [1, 1]} : vector<8x512xf32> to vector<8x128xf32>
    %323 = math.tanh %322 : vector<8x128xf32>
    %324 = vector.extract_strided_slice %309 {offsets = [0, 384], sizes = [8, 128], strides = [1, 1]} : vector<8x512xf32> to vector<8x128xf32>
    %325 = arith.negf %324 : vector<8x128xf32>
    %326 = math.exp %325 : vector<8x128xf32>
    %cst_92 = arith.constant 1.000000e+00 : f32
    %327 = vector.broadcast %cst_92 : f32 to vector<8x128xf32>
    %328 = arith.addf %327, %326 : vector<8x128xf32>
    %329 = arith.divf %327, %328 : vector<8x128xf32>
    %330 = arith.mulf %321, %273 : vector<8x128xf32>
    %331 = arith.mulf %315, %323 : vector<8x128xf32>
    %332 = arith.addf %330, %331 : vector<8x128xf32>
    %333 = math.tanh %332 : vector<8x128xf32>
    %334 = arith.mulf %329, %333 : vector<8x128xf32>
    %335 = tpu.concatenate %334, %304 in 1 : vector<8x128xf32>, vector<8x128xf32> -> vector<8x256xf32>
    %c0_93 = arith.constant 0 : index
    %c0_94 = arith.constant 0 : index
    %336 = vector.load %arg5[%c0_93, %c0_94] : memref<256x512xf32, #tpu.memory_space<vmem>>, vector<256x512xf32>
    %cst_95 = arith.constant dense<0.000000e+00> : vector<8x512xf32>
    %337 = tpu.matmul %335, %336, %cst_95 {dimension_numbers = #tpu.dot_dimension_numbers<[1], [0], [0], [1], [0, 0, 1, 1], [], []>} : vector<8x256xf32>, vector<256x512xf32>, vector<8x512xf32> -> vector<8x512xf32>
    %338 = arith.addf %337, %9 : vector<8x512xf32>
    %339 = vector.extract_strided_slice %338 {offsets = [0, 0], sizes = [8, 128], strides = [1, 1]} : vector<8x512xf32> to vector<8x128xf32>
    %340 = arith.negf %339 : vector<8x128xf32>
    %341 = math.exp %340 : vector<8x128xf32>
    %cst_96 = arith.constant 1.000000e+00 : f32
    %342 = vector.broadcast %cst_96 : f32 to vector<8x128xf32>
    %343 = arith.addf %342, %341 : vector<8x128xf32>
    %344 = arith.divf %342, %343 : vector<8x128xf32>
    %345 = vector.extract_strided_slice %338 {offsets = [0, 128], sizes = [8, 128], strides = [1, 1]} : vector<8x512xf32> to vector<8x128xf32>
    %346 = arith.negf %345 : vector<8x128xf32>
    %347 = math.exp %346 : vector<8x128xf32>
    %cst_97 = arith.constant 1.000000e+00 : f32
    %348 = vector.broadcast %cst_97 : f32 to vector<8x128xf32>
    %349 = arith.addf %348, %347 : vector<8x128xf32>
    %350 = arith.divf %348, %349 : vector<8x128xf32>
    %351 = vector.extract_strided_slice %338 {offsets = [0, 256], sizes = [8, 128], strides = [1, 1]} : vector<8x512xf32> to vector<8x128xf32>
    %352 = math.tanh %351 : vector<8x128xf32>
    %353 = vector.extract_strided_slice %338 {offsets = [0, 384], sizes = [8, 128], strides = [1, 1]} : vector<8x512xf32> to vector<8x128xf32>
    %354 = arith.negf %353 : vector<8x128xf32>
    %355 = math.exp %354 : vector<8x128xf32>
    %cst_98 = arith.constant 1.000000e+00 : f32
    %356 = vector.broadcast %cst_98 : f32 to vector<8x128xf32>
    %357 = arith.addf %356, %355 : vector<8x128xf32>
    %358 = arith.divf %356, %357 : vector<8x128xf32>
    %359 = arith.mulf %350, %302 : vector<8x128xf32>
    %360 = arith.mulf %344, %352 : vector<8x128xf32>
    %361 = arith.addf %359, %360 : vector<8x128xf32>
    %362 = math.tanh %361 : vector<8x128xf32>
    %363 = arith.mulf %358, %362 : vector<8x128xf32>
    %c40_99 = arith.constant 40 : index
    %c0_100 = arith.constant 0 : index
    %364 = vector.load %arg18[%c40_99, %c0_100] : memref<64x128xf32, #tpu.memory_space<vmem>>, vector<8x128xf32>
    tpu.vector_store %arg18[%c40_99, %c0_100], %363 {strides = array<i32>} : memref<64x128xf32, #tpu.memory_space<vmem>>, vector<8x128xf32>,
    %c48 = arith.constant 48 : index
    %c0_101 = arith.constant 0 : index
    %365 = vector.load %arg17[%c48, %c0_101] : memref<64x512xf32, #tpu.memory_space<vmem>>, vector<8x512xf32>
    %c0_102 = arith.constant 0 : index
    %c0_103 = arith.constant 0 : index
    %366 = vector.load %arg3[%c0_102, %c0_103] : memref<128x512xf32, #tpu.memory_space<vmem>>, vector<128x512xf32>
    %cst_104 = arith.constant dense<0.000000e+00> : vector<8x512xf32>
    %367 = tpu.matmul %334, %366, %cst_104 {dimension_numbers = #tpu.dot_dimension_numbers<[1], [0], [0], [1], [0, 0, 1, 1], [], []>} : vector<8x128xf32>, vector<128x512xf32>, vector<8x512xf32> -> vector<8x512xf32>
    %368 = arith.addf %365, %367 : vector<8x512xf32>
    %369 = vector.extract_strided_slice %368 {offsets = [0, 0], sizes = [8, 128], strides = [1, 1]} : vector<8x512xf32> to vector<8x128xf32>
    %370 = arith.negf %369 : vector<8x128xf32>
    %371 = math.exp %370 : vector<8x128xf32>
    %cst_105 = arith.constant 1.000000e+00 : f32
    %372 = vector.broadcast %cst_105 : f32 to vector<8x128xf32>
    %373 = arith.addf %372, %371 : vector<8x128xf32>
    %374 = arith.divf %372, %373 : vector<8x128xf32>
    %375 = vector.extract_strided_slice %368 {offsets = [0, 128], sizes = [8, 128], strides = [1, 1]} : vector<8x512xf32> to vector<8x128xf32>
    %376 = arith.negf %375 : vector<8x128xf32>
    %377 = math.exp %376 : vector<8x128xf32>
    %cst_106 = arith.constant 1.000000e+00 : f32
    %378 = vector.broadcast %cst_106 : f32 to vector<8x128xf32>
    %379 = arith.addf %378, %377 : vector<8x128xf32>
    %380 = arith.divf %378, %379 : vector<8x128xf32>
    %381 = vector.extract_strided_slice %368 {offsets = [0, 256], sizes = [8, 128], strides = [1, 1]} : vector<8x512xf32> to vector<8x128xf32>
    %382 = math.tanh %381 : vector<8x128xf32>
    %383 = vector.extract_strided_slice %368 {offsets = [0, 384], sizes = [8, 128], strides = [1, 1]} : vector<8x512xf32> to vector<8x128xf32>
    %384 = arith.negf %383 : vector<8x128xf32>
    %385 = math.exp %384 : vector<8x128xf32>
    %cst_107 = arith.constant 1.000000e+00 : f32
    %386 = vector.broadcast %cst_107 : f32 to vector<8x128xf32>
    %387 = arith.addf %386, %385 : vector<8x128xf32>
    %388 = arith.divf %386, %387 : vector<8x128xf32>
    %389 = arith.mulf %380, %332 : vector<8x128xf32>
    %390 = arith.mulf %374, %382 : vector<8x128xf32>
    %391 = arith.addf %389, %390 : vector<8x128xf32>
    %392 = math.tanh %391 : vector<8x128xf32>
    %393 = arith.mulf %388, %392 : vector<8x128xf32>
    %394 = tpu.concatenate %393, %363 in 1 : vector<8x128xf32>, vector<8x128xf32> -> vector<8x256xf32>
    %c0_108 = arith.constant 0 : index
    %c0_109 = arith.constant 0 : index
    %395 = vector.load %arg5[%c0_108, %c0_109] : memref<256x512xf32, #tpu.memory_space<vmem>>, vector<256x512xf32>
    %cst_110 = arith.constant dense<0.000000e+00> : vector<8x512xf32>
    %396 = tpu.matmul %394, %395, %cst_110 {dimension_numbers = #tpu.dot_dimension_numbers<[1], [0], [0], [1], [0, 0, 1, 1], [], []>} : vector<8x256xf32>, vector<256x512xf32>, vector<8x512xf32> -> vector<8x512xf32>
    %397 = arith.addf %396, %9 : vector<8x512xf32>
    %398 = vector.extract_strided_slice %397 {offsets = [0, 0], sizes = [8, 128], strides = [1, 1]} : vector<8x512xf32> to vector<8x128xf32>
    %399 = arith.negf %398 : vector<8x128xf32>
    %400 = math.exp %399 : vector<8x128xf32>
    %cst_111 = arith.constant 1.000000e+00 : f32
    %401 = vector.broadcast %cst_111 : f32 to vector<8x128xf32>
    %402 = arith.addf %401, %400 : vector<8x128xf32>
    %403 = arith.divf %401, %402 : vector<8x128xf32>
    %404 = vector.extract_strided_slice %397 {offsets = [0, 128], sizes = [8, 128], strides = [1, 1]} : vector<8x512xf32> to vector<8x128xf32>
    %405 = arith.negf %404 : vector<8x128xf32>
    %406 = math.exp %405 : vector<8x128xf32>
    %cst_112 = arith.constant 1.000000e+00 : f32
    %407 = vector.broadcast %cst_112 : f32 to vector<8x128xf32>
    %408 = arith.addf %407, %406 : vector<8x128xf32>
    %409 = arith.divf %407, %408 : vector<8x128xf32>
    %410 = vector.extract_strided_slice %397 {offsets = [0, 256], sizes = [8, 128], strides = [1, 1]} : vector<8x512xf32> to vector<8x128xf32>
    %411 = math.tanh %410 : vector<8x128xf32>
    %412 = vector.extract_strided_slice %397 {offsets = [0, 384], sizes = [8, 128], strides = [1, 1]} : vector<8x512xf32> to vector<8x128xf32>
    %413 = arith.negf %412 : vector<8x128xf32>
    %414 = math.exp %413 : vector<8x128xf32>
    %cst_113 = arith.constant 1.000000e+00 : f32
    %415 = vector.broadcast %cst_113 : f32 to vector<8x128xf32>
    %416 = arith.addf %415, %414 : vector<8x128xf32>
    %417 = arith.divf %415, %416 : vector<8x128xf32>
    %418 = arith.mulf %409, %361 : vector<8x128xf32>
    %419 = arith.mulf %403, %411 : vector<8x128xf32>
    %420 = arith.addf %418, %419 : vector<8x128xf32>
    %421 = math.tanh %420 : vector<8x128xf32>
    %422 = arith.mulf %417, %421 : vector<8x128xf32>
    %c48_114 = arith.constant 48 : index
    %c0_115 = arith.constant 0 : index
    %423 = vector.load %arg18[%c48_114, %c0_115] : memref<64x128xf32, #tpu.memory_space<vmem>>, vector<8x128xf32>
    tpu.vector_store %arg18[%c48_114, %c0_115], %422 {strides = array<i32>} : memref<64x128xf32, #tpu.memory_space<vmem>>, vector<8x128xf32>,
    %c56 = arith.constant 56 : index
    %c0_116 = arith.constant 0 : index
    %424 = vector.load %arg17[%c56, %c0_116] : memref<64x512xf32, #tpu.memory_space<vmem>>, vector<8x512xf32>
    %c0_117 = arith.constant 0 : index
    %c0_118 = arith.constant 0 : index
    %425 = vector.load %arg3[%c0_117, %c0_118] : memref<128x512xf32, #tpu.memory_space<vmem>>, vector<128x512xf32>
    %cst_119 = arith.constant dense<0.000000e+00> : vector<8x512xf32>
    %426 = tpu.matmul %393, %425, %cst_119 {dimension_numbers = #tpu.dot_dimension_numbers<[1], [0], [0], [1], [0, 0, 1, 1], [], []>} : vector<8x128xf32>, vector<128x512xf32>, vector<8x512xf32> -> vector<8x512xf32>
    %427 = arith.addf %424, %426 : vector<8x512xf32>
    %428 = vector.extract_strided_slice %427 {offsets = [0, 0], sizes = [8, 128], strides = [1, 1]} : vector<8x512xf32> to vector<8x128xf32>
    %429 = arith.negf %428 : vector<8x128xf32>
    %430 = math.exp %429 : vector<8x128xf32>
    %cst_120 = arith.constant 1.000000e+00 : f32
    %431 = vector.broadcast %cst_120 : f32 to vector<8x128xf32>
    %432 = arith.addf %431, %430 : vector<8x128xf32>
    %433 = arith.divf %431, %432 : vector<8x128xf32>
    %434 = vector.extract_strided_slice %427 {offsets = [0, 128], sizes = [8, 128], strides = [1, 1]} : vector<8x512xf32> to vector<8x128xf32>
    %435 = arith.negf %434 : vector<8x128xf32>
    %436 = math.exp %435 : vector<8x128xf32>
    %cst_121 = arith.constant 1.000000e+00 : f32
    %437 = vector.broadcast %cst_121 : f32 to vector<8x128xf32>
    %438 = arith.addf %437, %436 : vector<8x128xf32>
    %439 = arith.divf %437, %438 : vector<8x128xf32>
    %440 = vector.extract_strided_slice %427 {offsets = [0, 256], sizes = [8, 128], strides = [1, 1]} : vector<8x512xf32> to vector<8x128xf32>
    %441 = math.tanh %440 : vector<8x128xf32>
    %442 = vector.extract_strided_slice %427 {offsets = [0, 384], sizes = [8, 128], strides = [1, 1]} : vector<8x512xf32> to vector<8x128xf32>
    %443 = arith.negf %442 : vector<8x128xf32>
    %444 = math.exp %443 : vector<8x128xf32>
    %cst_122 = arith.constant 1.000000e+00 : f32
    %445 = vector.broadcast %cst_122 : f32 to vector<8x128xf32>
    %446 = arith.addf %445, %444 : vector<8x128xf32>
    %447 = arith.divf %445, %446 : vector<8x128xf32>
    %448 = arith.mulf %439, %391 : vector<8x128xf32>
    %449 = arith.mulf %433, %441 : vector<8x128xf32>
    %450 = arith.addf %448, %449 : vector<8x128xf32>
    %451 = math.tanh %450 : vector<8x128xf32>
    %452 = arith.mulf %447, %451 : vector<8x128xf32>
    %453 = tpu.concatenate %452, %422 in 1 : vector<8x128xf32>, vector<8x128xf32> -> vector<8x256xf32>
    %c0_123 = arith.constant 0 : index
    %c0_124 = arith.constant 0 : index
    %454 = vector.load %arg5[%c0_123, %c0_124] : memref<256x512xf32, #tpu.memory_space<vmem>>, vector<256x512xf32>
    %cst_125 = arith.constant dense<0.000000e+00> : vector<8x512xf32>
    %455 = tpu.matmul %453, %454, %cst_125 {dimension_numbers = #tpu.dot_dimension_numbers<[1], [0], [0], [1], [0, 0, 1, 1], [], []>} : vector<8x256xf32>, vector<256x512xf32>, vector<8x512xf32> -> vector<8x512xf32>
    %456 = arith.addf %455, %9 : vector<8x512xf32>
    %457 = vector.extract_strided_slice %456 {offsets = [0, 0], sizes = [8, 128], strides = [1, 1]} : vector<8x512xf32> to vector<8x128xf32>
    %458 = arith.negf %457 : vector<8x128xf32>
    %459 = math.exp %458 : vector<8x128xf32>
    %cst_126 = arith.constant 1.000000e+00 : f32
    %460 = vector.broadcast %cst_126 : f32 to vector<8x128xf32>
    %461 = arith.addf %460, %459 : vector<8x128xf32>
    %462 = arith.divf %460, %461 : vector<8x128xf32>
    %463 = vector.extract_strided_slice %456 {offsets = [0, 128], sizes = [8, 128], strides = [1, 1]} : vector<8x512xf32> to vector<8x128xf32>
    %464 = arith.negf %463 : vector<8x128xf32>
    %465 = math.exp %464 : vector<8x128xf32>
    %cst_127 = arith.constant 1.000000e+00 : f32
    %466 = vector.broadcast %cst_127 : f32 to vector<8x128xf32>
    %467 = arith.addf %466, %465 : vector<8x128xf32>
    %468 = arith.divf %466, %467 : vector<8x128xf32>
    %469 = vector.extract_strided_slice %456 {offsets = [0, 256], sizes = [8, 128], strides = [1, 1]} : vector<8x512xf32> to vector<8x128xf32>
    %470 = math.tanh %469 : vector<8x128xf32>
    %471 = vector.extract_strided_slice %456 {offsets = [0, 384], sizes = [8, 128], strides = [1, 1]} : vector<8x512xf32> to vector<8x128xf32>
    %472 = arith.negf %471 : vector<8x128xf32>
    %473 = math.exp %472 : vector<8x128xf32>
    %cst_128 = arith.constant 1.000000e+00 : f32
    %474 = vector.broadcast %cst_128 : f32 to vector<8x128xf32>
    %475 = arith.addf %474, %473 : vector<8x128xf32>
    %476 = arith.divf %474, %475 : vector<8x128xf32>
    %477 = arith.mulf %468, %420 : vector<8x128xf32>
    %478 = arith.mulf %462, %470 : vector<8x128xf32>
    %479 = arith.addf %477, %478 : vector<8x128xf32>
    %480 = math.tanh %479 : vector<8x128xf32>
    %481 = arith.mulf %476, %480 : vector<8x128xf32>
    %c56_129 = arith.constant 56 : index
    %c0_130 = arith.constant 0 : index
    %482 = vector.load %arg18[%c56_129, %c0_130] : memref<64x128xf32, #tpu.memory_space<vmem>>, vector<8x128xf32>
    tpu.vector_store %arg18[%c56_129, %c0_130], %481 {strides = array<i32>} : memref<64x128xf32, #tpu.memory_space<vmem>>, vector<8x128xf32>,
    %c0_131 = arith.constant 0 : index
    %c0_132 = arith.constant 0 : index
    %483 = vector.load %arg18[%c0_131, %c0_132] : memref<64x128xf32, #tpu.memory_space<vmem>>, vector<64x128xf32>
    %c0_133 = arith.constant 0 : index
    %c0_134 = arith.constant 0 : index
    %484 = vector.load %arg7[%c0_133, %c0_134] : memref<128x384xf32, #tpu.memory_space<vmem>>, vector<128x384xf32>
    %cst_135 = arith.constant dense<0.000000e+00> : vector<64x384xf32>
    %485 = tpu.matmul %483, %484, %cst_135 {dimension_numbers = #tpu.dot_dimension_numbers<[1], [0], [0], [1], [0, 0, 1, 1], [], []>} : vector<64x128xf32>, vector<128x384xf32>, vector<64x384xf32> -> vector<64x384xf32>
    %c0_136 = arith.constant 0 : index
    %c0_137 = arith.constant 0 : index
    %486 = vector.load %arg8[%c0_136, %c0_137] : memref<1x384xf32, #tpu.memory_space<vmem>>, vector<1x384xf32>
    %487 = vector.broadcast %486 : vector<1x384xf32> to vector<64x384xf32>
    %488 = arith.addf %485, %487 : vector<64x384xf32>
    %489 = vector.extract_strided_slice %488 {offsets = [56, 0], sizes = [8, 128], strides = [1, 1]} : vector<64x384xf32> to vector<8x128xf32>
    %cst_138 = arith.constant 2.500000e-01 : f32
    %490 = vector.broadcast %cst_138 : f32 to vector<8x128xf32>
    %491 = arith.mulf %489, %490 : vector<8x128xf32>
    %492 = vector.extract_strided_slice %488 {offsets = [0, 128], sizes = [64, 128], strides = [1, 1]} : vector<64x384xf32> to vector<64x128xf32>
    %493 = vector.shape_cast %492 : vector<64x128xf32> to vector<8x8x128xf32>
    %494 = vector.extract_strided_slice %488 {offsets = [0, 256], sizes = [64, 128], strides = [1, 1]} : vector<64x384xf32> to vector<64x128xf32>
    %495 = vector.shape_cast %494 : vector<64x128xf32> to vector<8x8x128xf32>
    %496 = vector.shape_cast %491 : vector<8x128xf32> to vector<1x8x128xf32>
    %497 = vector.broadcast %496 : vector<1x8x128xf32> to vector<8x8x128xf32>
    %498 = arith.mulf %493, %497 : vector<8x8x128xf32>
    %499 = vector.shape_cast %498 : vector<8x8x128xf32> to vector<64x128xf32>
    %c0_139 = arith.constant 0 : index
    %c0_140 = arith.constant 0 : index
    %500 = vector.load %arg15[%c0_139, %c0_140] : memref<128x128xf32, #tpu.memory_space<vmem>>, vector<128x128xf32>
    %cst_141 = arith.constant dense<0.000000e+00> : vector<64x128xf32>
    %501 = tpu.matmul %499, %500, %cst_141 {dimension_numbers = #tpu.dot_dimension_numbers<[1], [0], [0], [1], [0, 0, 1, 1], [], []>} : vector<64x128xf32>, vector<128x128xf32>, vector<64x128xf32> -> vector<64x128xf32>
    %502 = vector.shape_cast %501 : vector<64x128xf32> to vector<8x8x128xf32>
    %cst_142 = arith.constant dense<0xFF800000> : vector<8x128xf32>
    %503 = vector.multi_reduction <maximumf>, %502, %cst_142 [0] : vector<8x8x128xf32> to vector<8x128xf32>
    %504 = vector.shape_cast %503 : vector<8x128xf32> to vector<1x8x128xf32>
    %505 = vector.broadcast %504 : vector<1x8x128xf32> to vector<8x8x128xf32>
    %506 = arith.subf %502, %505 : vector<8x8x128xf32>
    %507 = math.exp %506 : vector<8x8x128xf32>
    %cst_143 = arith.constant dense<0.000000e+00> : vector<8x128xf32>
    %508 = vector.multi_reduction <add>, %507, %cst_143 [0] : vector<8x8x128xf32> to vector<8x128xf32>
    %509 = vector.shape_cast %508 : vector<8x128xf32> to vector<1x8x128xf32>
    %510 = tpu.reciprocal %509 {approx = true} : vector<1x8x128xf32> -> vector<1x8x128xf32>
    %511 = vector.broadcast %510 : vector<1x8x128xf32> to vector<8x8x128xf32>
    %512 = arith.mulf %507, %511 : vector<8x8x128xf32>
    %513 = arith.mulf %512, %495 : vector<8x8x128xf32>
    %cst_144 = arith.constant dense<0.000000e+00> : vector<8x128xf32>
    %514 = vector.multi_reduction <add>, %513, %cst_144 [0] : vector<8x8x128xf32> to vector<8x128xf32>
    %c0_145 = arith.constant 0 : index
    %c0_146 = arith.constant 0 : index
    %515 = vector.load %arg9[%c0_145, %c0_146] : memref<128x128xf32, #tpu.memory_space<vmem>>, vector<128x128xf32>
    %cst_147 = arith.constant dense<0.000000e+00> : vector<8x128xf32>
    %516 = tpu.matmul %514, %515, %cst_147 {dimension_numbers = #tpu.dot_dimension_numbers<[1], [0], [0], [1], [0, 0, 1, 1], [], []>} : vector<8x128xf32>, vector<128x128xf32>, vector<8x128xf32> -> vector<8x128xf32>
    %c0_148 = arith.constant 0 : index
    %c0_149 = arith.constant 0 : index
    %517 = vector.load %arg10[%c0_148, %c0_149] : memref<1x128xf32, #tpu.memory_space<vmem>>, vector<1x128xf32>
    %518 = vector.broadcast %517 : vector<1x128xf32> to vector<8x128xf32>
    %519 = arith.addf %516, %518 : vector<8x128xf32>
    %c0_150 = arith.constant 0 : index
    %c0_151 = arith.constant 0 : index
    %520 = vector.load %arg11[%c0_150, %c0_151] : memref<128x128xf32, #tpu.memory_space<vmem>>, vector<128x128xf32>
    %cst_152 = arith.constant dense<0.000000e+00> : vector<8x128xf32>
    %521 = tpu.matmul %519, %520, %cst_152 {dimension_numbers = #tpu.dot_dimension_numbers<[1], [0], [0], [1], [0, 0, 1, 1], [], []>} : vector<8x128xf32>, vector<128x128xf32>, vector<8x128xf32> -> vector<8x128xf32>
    %c0_153 = arith.constant 0 : index
    %c0_154 = arith.constant 0 : index
    %522 = vector.load %arg12[%c0_153, %c0_154] : memref<1x128xf32, #tpu.memory_space<vmem>>, vector<1x128xf32>
    %523 = vector.broadcast %522 : vector<1x128xf32> to vector<8x128xf32>
    %524 = arith.addf %521, %523 : vector<8x128xf32>
    %cst_155 = arith.constant 0.000000e+00 : f32
    %525 = vector.broadcast %cst_155 : f32 to vector<8x128xf32>
    %526 = arith.maximumf %524, %525 : vector<8x128xf32>
    %c0_156 = arith.constant 0 : index
    %c0_157 = arith.constant 0 : index
    %527 = vector.load %arg13[%c0_156, %c0_157] : memref<128x128xf32, #tpu.memory_space<vmem>>, vector<128x128xf32>
    %cst_158 = arith.constant dense<0.000000e+00> : vector<8x128xf32>
    %528 = tpu.matmul %526, %527, %cst_158 {dimension_numbers = #tpu.dot_dimension_numbers<[1], [0], [0], [1], [0, 0, 1, 1], [], []>} : vector<8x128xf32>, vector<128x128xf32>, vector<8x128xf32> -> vector<8x128xf32>
    %c0_159 = arith.constant 0 : index
    %c0_160 = arith.constant 0 : index
    %529 = vector.load %arg14[%c0_159, %c0_160] : memref<1x128xf32, #tpu.memory_space<vmem>>, vector<1x128xf32>
    %530 = vector.broadcast %529 : vector<1x128xf32> to vector<8x128xf32>
    %531 = arith.addf %528, %530 : vector<8x128xf32>
    %c0_161 = arith.constant 0 : index
    %c0_162 = arith.constant 0 : index
    %532 = vector.load %arg16[%c0_161, %c0_162] : memref<8x128xf32, #tpu.memory_space<vmem>>, vector<8x128xf32>
    tpu.vector_store %arg16[%c0_161, %c0_162], %531 {strides = array<i32>} : memref<8x128xf32, #tpu.memory_space<vmem>>, vector<8x128xf32>,
    return
  }
  func.func @transform_0(%arg0: i32) -> (i32, i32) {
    %c0_i32 = arith.constant 0 : i32
    %c0_i32_0 = arith.constant 0 : i32
    %c0_i32_1 = arith.constant 0 : i32
    return %c0_i32, %c0_i32_0 : i32, i32
  }
  func.func @transform_1(%arg0: i32) -> (i32, i32) {
    %c0_i32 = arith.constant 0 : i32
    %c0_i32_0 = arith.constant 0 : i32
    %c0_i32_1 = arith.constant 0 : i32
    return %c0_i32, %c0_i32_0 : i32, i32
  }
  func.func @transform_2(%arg0: i32) -> (i32, i32) {
    %c0_i32 = arith.constant 0 : i32
    %c0_i32_0 = arith.constant 0 : i32
    %c0_i32_1 = arith.constant 0 : i32
    return %c0_i32, %c0_i32_0 : i32, i32
  }
  func.func @transform_3(%arg0: i32) -> (i32, i32) {
    %c0_i32 = arith.constant 0 : i32
    %c0_i32_0 = arith.constant 0 : i32
    %c0_i32_1 = arith.constant 0 : i32
    return %c0_i32, %c0_i32_0 : i32, i32
  }
  func.func @transform_4(%arg0: i32) -> (i32, i32) {
    %c0_i32 = arith.constant 0 : i32
    %c0_i32_0 = arith.constant 0 : i32
    %c0_i32_1 = arith.constant 0 : i32
    return %c0_i32, %c0_i32_0 : i32, i32
  }
  func.func @transform_5(%arg0: i32) -> (i32, i32) {
    %c0_i32 = arith.constant 0 : i32
    %c0_i32_0 = arith.constant 0 : i32
    %c0_i32_1 = arith.constant 0 : i32
    return %c0_i32, %c0_i32_0 : i32, i32
  }
  func.func @transform_6(%arg0: i32) -> (i32, i32) {
    %c0_i32 = arith.constant 0 : i32
    %c0_i32_0 = arith.constant 0 : i32
    %c0_i32_1 = arith.constant 0 : i32
    return %c0_i32, %c0_i32_0 : i32, i32
  }
  func.func @transform_7(%arg0: i32) -> (i32, i32) {
    %c0_i32 = arith.constant 0 : i32
    %c0_i32_0 = arith.constant 0 : i32
    %c0_i32_1 = arith.constant 0 : i32
    return %c0_i32, %c0_i32_0 : i32, i32
  }
  func.func @transform_8(%arg0: i32) -> (i32, i32) {
    %c0_i32 = arith.constant 0 : i32
    %c0_i32_0 = arith.constant 0 : i32
    %c0_i32_1 = arith.constant 0 : i32
    return %c0_i32, %c0_i32_0 : i32, i32
  }
  func.func @transform_9(%arg0: i32) -> (i32, i32) {
    %c0_i32 = arith.constant 0 : i32
    %c0_i32_0 = arith.constant 0 : i32
    %c0_i32_1 = arith.constant 0 : i32
    return %c0_i32, %c0_i32_0 : i32, i32
  }
  func.func @transform_10(%arg0: i32) -> (i32, i32) {
    %c0_i32 = arith.constant 0 : i32
    %c0_i32_0 = arith.constant 0 : i32
    %c0_i32_1 = arith.constant 0 : i32
    return %c0_i32, %c0_i32_0 : i32, i32
  }
  func.func @transform_11(%arg0: i32) -> (i32, i32) {
    %c0_i32 = arith.constant 0 : i32
    %c0_i32_0 = arith.constant 0 : i32
    %c0_i32_1 = arith.constant 0 : i32
    return %c0_i32, %c0_i32_0 : i32, i32
  }
  func.func @transform_12(%arg0: i32) -> (i32, i32) {
    %c0_i32 = arith.constant 0 : i32
    %c0_i32_0 = arith.constant 0 : i32
    %c0_i32_1 = arith.constant 0 : i32
    return %c0_i32, %c0_i32_0 : i32, i32
  }
  func.func @transform_13(%arg0: i32) -> (i32, i32) {
    %c0_i32 = arith.constant 0 : i32
    %c0_i32_0 = arith.constant 0 : i32
    %c0_i32_1 = arith.constant 0 : i32
    return %c0_i32, %c0_i32_0 : i32, i32
  }
  func.func @transform_14(%arg0: i32) -> (i32, i32) {
    %c0_i32 = arith.constant 0 : i32
    %c0_i32_0 = arith.constant 0 : i32
    %c0_i32_1 = arith.constant 0 : i32
    return %c0_i32, %c0_i32_0 : i32, i32
  }
  func.func @transform_15(%arg0: i32) -> (i32, i32) {
    %c0_i32 = arith.constant 0 : i32
    %c0_i32_0 = arith.constant 0 : i32
    %c0_i32_1 = arith.constant 0 : i32
    return %c0_i32, %c0_i32_0 : i32, i32
  }
}

</mosaic_0001>

<bundles_post_ra>
// kernel: lstm_traffic_predictor.1
= control target key start
LH: loop header
LB: loop body
LE: loop exit
PB: predicated region body
PF: predicated region fallthrough
CT: control target
= control target key end

     0   :  { %v12489_v3 = vmov 0.0   ;;  %vm84_vm0 = vcmask 64512   ;;  %vm7820_vm1 = vmmov 0   ;;  %s12473_s1 = inlined_call_operand.vmem [shape: f32[8,512], index: 1, kind: input, shape index: {}]   ;;  %s12474_s0 = inlined_call_operand.vmem [shape: f32[64,8], index: 0, kind: input, shape index: {}]   ;;  %s12475_s2 = inlined_call_operand.vmem [shape: f32[128,512], index: 2, kind: input, shape index: {}]   ;;  %s12476_s4 = inlined_call_operand.vmem [shape: f32[256,512], index: 4, kind: input, shape index: {}]   ;;  %s12477_s3 = inlined_call_operand.vmem [shape: f32[1,512], index: 3, kind: input, shape index: {}]   ;;  %s12478_s5 = inlined_call_operand.vmem [shape: f32[1,512], index: 5, kind: input, shape index: {}]   ;;  %s12479_s6 = inlined_call_operand.vmem [shape: f32[128,384], index: 6, kind: input, shape index: {}]   ;;  %s12480_s14 = inlined_call_operand.vmem [shape: f32[128,128], index: 14, kind: input, shape index: {}]   ;;  %s12481_s7 = inlined_call_operand.vmem [shape: f32[1,384], index: 7, kind: input, shape index: {}]   ;;  %s12482_s8 = inlined_call_operand.vmem [shape: f32[128,128], index: 8, kind: input, shape index: {}]   ;;  %s12483_s10 = inlined_call_operand.vmem [shape: f32[128,128], index: 10, kind: input, shape index: {}]   ;;  %s12484_s12 = inlined_call_operand.vmem [shape: f32[128,128], index: 12, kind: input, shape index: {}]   ;;  %s12485_s9 = inlined_call_operand.vmem [shape: f32[1,128], index: 9, kind: input, shape index: {}]   ;;  %s12486_s11 = inlined_call_operand.vmem [shape: f32[1,128], index: 11, kind: input, shape index: {}]   ;;  %s12487_s13 = inlined_call_operand.vmem [shape: f32[1,128], index: 13, kind: input, shape index: {}]   ;;  %s12488_s15 = inlined_call_operand.vmem [shape: f32[8,128], index: 15, kind: output, shape index: {}]  }
   0x1   :  { %v59_v0 = vld [vmem:[%s12473_s1 + $0x8] sm:$0xff]  ;;  %v61_v1 = vld [vmem:[%s12473_s1 + $0x18] sm:$0xff]  ;;  %v58_v2 = vld [vmem:[%s12473_s1] sm:$0xff]  ;;  %173 = vmatprep.mubr.f32.mxu0 %v12489_v3  ;;  %286 = vmatprep.mubr.f32.mxu1 %v12489_v3 }
   0x2   :  { %109 = vmatprep.subr.mxu0 %v59_v0  ;;  %222 = vmatprep.subr.mxu1 %v61_v1  ;;  %v60_v4 = vld [vmem:[%s12473_s1 + $0x10] sm:$0xff]  ;;  %v50_v5 = vld [vmem:[%s12474_s0] sm:$0xff]  ;;  %v394_v6 = vld [vmem:[%s12475_s2 + $0x8] sm:$0xff] }
   0x3   :  { %110 = vmatpush1.msra.mxu0 %v58_v2  ;;  %223 = vmatpush1.msra.mxu1 %v60_v4  ;;  %v398_v7 = vld [vmem:[%s12475_s2 + $0x28] sm:$0xff]  ;;  %v396_v8 = vld [vmem:[%s12475_s2 + $0x18] sm:$0xff]  ;;  %v393_v12 = vld [vmem:[%s12475_s2] sm:$0xff] }
   0x4   :  { %v400_v9 = vld [vmem:[%s12475_s2 + $0x38] sm:$0xff]  ;;  %5414 = vmatmul.mubr.msk.f32.vlgmr.msra.gmra.mrb[0].mxu0 %vm84_vm0, %v50_v5  ;;  %5422 = vmatmul.mubr.msk.f32.vlgmr.msra.gmra.mrb[0].mxu1 %vm84_vm0, %v50_v5  ;;  %v7932_v10 = vpack.c.bf16 %v398_v7, %v394_v6  ;;  %v397_v13 = vld [vmem:[%s12475_s2 + $0x20] sm:$0xff]  ;;  %v395_v14 = vld [vmem:[%s12475_s2 + $0x10] sm:$0xff] }
   0x5   :  { %v7934_v11 = vpack.c.bf16 %v400_v9, %v396_v8  ;;  %v7945_v15 = vpack.c.bf16 %v397_v13, %v393_v12  ;;  %v399_v16 = vld [vmem:[%s12475_s2 + $0x30] sm:$0xff]  ;;  %179 = vmatprep.mubr.f32.mxu0 %v12489_v3  ;;  %292 = vmatprep.mubr.f32.mxu1 %v12489_v3  ;;  %v51_v17 = vld [vmem:[%s12474_s0 + $0x8] sm:$0xff]  ;;  %v404_v21 = vld [vmem:[%s12475_s2 + $0x58] sm:$0xff] }
   0x6   :  { %v402_v18 = vld [vmem:[%s12475_s2 + $0x48] sm:$0xff]  ;;  %5774 = vmatprep.subr.bf16.mxu0 %v7932_v10  ;;  %v7960_v19 = vpack.c.bf16 %v399_v16, %v395_v14  ;;  %v408_v22 = vld [vmem:[%s12475_s2 + $0x78] sm:$0xff]  ;;  %v401_v25 = vld [vmem:[%s12475_s2 + $0x40] sm:$0xff] }
   0x7   :  { %5806 = vmatprep.subr.bf16.mxu1 %v7934_v11  ;;  %v406_v20 = vld [vmem:[%s12475_s2 + $0x68] sm:$0xff]  ;;  %5776 = vmatpush1.bf16.msra.mxu0 %v7945_v15  ;;  %v7974_v24 = vpack.c.bf16 %v408_v22, %v404_v21  ;;  %v405_v26 = vld [vmem:[%s12475_s2 + $0x60] sm:$0xff]  ;;  %v403_v27 = vld [vmem:[%s12475_s2 + $0x50] sm:$0xff] }
   0x8   :  { %v7972_v23 = vpack.c.bf16 %v406_v20, %v402_v18  ;;  %5808 = vmatpush1.bf16.msra.mxu1 %v7960_v19  ;;  %5415 = vmatmul.mubr.msk.f32.gmra.mrb[2].mxu0 %vm84_vm0, %v51_v17  ;;  %v7987_v28 = vpack.c.bf16 %v405_v26, %v401_v25  ;;  %v407_v29 = vld [vmem:[%s12475_s2 + $0x70] sm:$0xff]  ;;  %v410_v31 = vld [vmem:[%s12475_s2 + $0x88] sm:$0xff]  ;;  %v412_v34 = vld [vmem:[%s12475_s2 + $0x98] sm:$0xff] }
   0x9   :  { %v52_v30 = vld [vmem:[%s12474_s0 + $0x10] sm:$0xff]  ;;  %5423 = vmatmul.mubr.msk.f32.gmra.mrb[2].mxu1 %vm84_vm0, %v51_v17  ;;  %v8000_v32 = vpack.c.bf16 %v407_v29, %v403_v27  ;;  %v414_v33 = vld [vmem:[%s12475_s2 + $0xa8] sm:$0xff]  ;;  %v416_v35 = vld [vmem:[%s12475_s2 + $0xb8] sm:$0xff]  ;;  %5810 = vmatprep.subr.bf16.mxu1 %v7974_v24 }
   0xa   :  { %5778 = vmatprep.subr.bf16.mxu0 %v7972_v23  ;;  %185 = vmatprep.mubr.f32.mxu0 %v12489_v3  ;;  %v8013_v36 = vpack.c.bf16 %v414_v33, %v410_v31  ;;  %v8015_v37 = vpack.c.bf16 %v416_v35, %v412_v34  ;;  %v409_v38 = vld [vmem:[%s12475_s2 + $0x80] sm:$0xff]  ;;  %v411_v40 = vld [vmem:[%s12475_s2 + $0x90] sm:$0xff]  ;;  %v53_v43 = vld [vmem:[%s12474_s0 + $0x18] sm:$0xff] }
   0xb   :  { %v413_v39 = vld [vmem:[%s12475_s2 + $0xa0] sm:$0xff]  ;;  %5780 = vmatpush1.bf16.msra.mxu0 %v7987_v28  ;;  %298 = vmatprep.mubr.f32.mxu1 %v12489_v3  ;;  %v415_v42 = vld [vmem:[%s12475_s2 + $0xb0] sm:$0xff]  ;;  %v418_v44 = vld [vmem:[%s12475_s2 + $0xc8] sm:$0xff] }
   0xc   :  { %v8028_v41 = vpack.c.bf16 %v413_v39, %v409_v38  ;;  %5812 = vmatpush1.bf16.msra.mxu1 %v8000_v32  ;;  %5416 = vmatmul.mubr.msk.f32.gmra.mrb[4].mxu0 %vm84_vm0, %v52_v30  ;;  %v8041_v45 = vpack.c.bf16 %v415_v42, %v411_v40  ;;  %v422_v46 = vld [vmem:[%s12475_s2 + $0xe8] sm:$0xff]  ;;  %v420_v47 = vld [vmem:[%s12475_s2 + $0xd8] sm:$0xff]  ;;  %v417_v50 = vld [vmem:[%s12475_s2 + $0xc0] sm:$0xff] }
   0xd   :  { %v424_v48 = vld [vmem:[%s12475_s2 + $0xf8] sm:$0xff]  ;;  %5424 = vmatmul.mubr.msk.f32.gmra.mrb[4].mxu1 %vm84_vm0, %v52_v30  ;;  %5782 = vmatprep.subr.bf16.mxu0 %v8013_v36  ;;  %v8054_v49 = vpack.c.bf16 %v422_v46, %v418_v44  ;;  %v421_v51 = vld [vmem:[%s12475_s2 + $0xe0] sm:$0xff]  ;;  %v419_v52 = vld [vmem:[%s12475_s2 + $0xd0] sm:$0xff] }
   0xe   :  { %5814 = vmatprep.subr.bf16.mxu1 %v8015_v37  ;;  %191 = vmatprep.mubr.f32.mxu0 %v12489_v3  ;;  %v8067_v53 = vpack.c.bf16 %v424_v48, %v420_v47  ;;  %v423_v54 = vld [vmem:[%s12475_s2 + $0xf0] sm:$0xff]  ;;  %v426_v55 = vld [vmem:[%s12475_s2 + $0x108] sm:$0xff]  ;;  %v8077_v56 = vpack.c.bf16 %v421_v51, %v417_v50  ;;  %v428_v58 = vld [vmem:[%s12475_s2 + $0x118] sm:$0xff] }
   0xf   :  { %5784 = vmatpush1.bf16.msra.mxu0 %v8028_v41  ;;  %304 = vmatprep.mubr.f32.mxu1 %v12489_v3  ;;  %v430_v57 = vld [vmem:[%s12475_s2 + $0x128] sm:$0xff]  ;;  %v432_v59 = vld [vmem:[%s12475_s2 + $0x138] sm:$0xff]  ;;  %v8090_v60 = vpack.c.bf16 %v423_v54, %v419_v52  ;;  %v425_v61 = vld [vmem:[%s12475_s2 + $0x100] sm:$0xff] }
  0x10   :  { %5816 = vmatpush1.bf16.msra.mxu1 %v8041_v45  ;;  %5417 = vmatmul.mubr.msk.f32.gmra.mrb[6].mxu0 %vm84_vm0, %v53_v43  ;;  %v429_v62 = vld [vmem:[%s12475_s2 + $0x120] sm:$0xff]  ;;  %v8103_v0 = vpack.c.bf16 %v430_v57, %v426_v55  ;;  %v427_v1 = vld [vmem:[%s12475_s2 + $0x110] sm:$0xff]  ;;  %v8113_v4 = vpack.c.bf16 %v432_v59, %v428_v58  ;;  %v434_v5 = vld [vmem:[%s12475_s2 + $0x148] sm:$0xff] }
  0x11   :  { %5425 = vmatmul.mubr.msk.f32.gmra.mrb[6].mxu1 %vm84_vm0, %v53_v43  ;;  %5786 = vmatprep.subr.bf16.mxu0 %v8054_v49  ;;  %v54_v63 = vld [vmem:[%s12474_s0 + $0x20] sm:$0xff]  ;;  %v431_v2 = vld [vmem:[%s12475_s2 + $0x130] sm:$0xff]  ;;  %v438_v6 = vld [vmem:[%s12475_s2 + $0x168] sm:$0xff]  ;;  %v8123_v7 = vpack.c.bf16 %v429_v62, %v425_v61 }
  0x12   :  { %5818 = vmatprep.subr.bf16.mxu1 %v8067_v53  ;;  %197 = vmatprep.mubr.f32.mxu0 %v12489_v3  ;;  %v436_v8 = vld [vmem:[%s12475_s2 + $0x158] sm:$0xff]  ;;  %v8133_v12 = vpack.c.bf16 %v431_v2, %v427_v1  ;;  %v433_v13 = vld [vmem:[%s12475_s2 + $0x140] sm:$0xff]  ;;  %v55_v16 = vld [vmem:[%s12474_s0 + $0x28] sm:$0xff]  ;;  %v8146_v17 = vpack.c.bf16 %v438_v6, %v434_v5 }
  0x13   :  { %5788 = vmatpush1.bf16.msra.mxu0 %v8077_v56  ;;  %310 = vmatprep.mubr.f32.mxu1 %v12489_v3  ;;  %v440_v9 = vld [vmem:[%s12475_s2 + $0x178] sm:$0xff]  ;;  %v437_v14 = vld [vmem:[%s12475_s2 + $0x160] sm:$0xff]  ;;  %v435_v18 = vld [vmem:[%s12475_s2 + $0x150] sm:$0xff] }
  0x14   :  { %5820 = vmatpush1.bf16.msra.mxu1 %v8090_v60  ;;  %5418 = vmatmul.mubr.msk.f32.gmra.mrb[8].mxu0 %vm84_vm0, %v54_v63  ;;  %v439_v20 = vld [vmem:[%s12475_s2 + $0x170] sm:$0xff]  ;;  %v8156_v21 = vpack.c.bf16 %v440_v9, %v436_v8  ;;  %v442_v22 = vld [vmem:[%s12475_s2 + $0x188] sm:$0xff]  ;;  %v8166_v26 = vpack.c.bf16 %v437_v14, %v433_v13  ;;  %v444_v27 = vld [vmem:[%s12475_s2 + $0x198] sm:$0xff] }
  0x15   :  { %5426 = vmatmul.mubr.msk.f32.gmra.mrb[8].mxu1 %vm84_vm0, %v54_v63  ;;  %5790 = vmatprep.subr.bf16.mxu0 %v8103_v0  ;;  %v446_v25 = vld [vmem:[%s12475_s2 + $0x1a8] sm:$0xff]  ;;  %v448_v29 = vld [vmem:[%s12475_s2 + $0x1b8] sm:$0xff]  ;;  %v8176_v30 = vpack.c.bf16 %v439_v20, %v435_v18  ;;  %v441_v31 = vld [vmem:[%s12475_s2 + $0x180] sm:$0xff] }
  0x16   :  { %5822 = vmatprep.subr.bf16.mxu1 %v8113_v4  ;;  %203 = vmatprep.mubr.f32.mxu0 %v12489_v3  ;;  %v445_v33 = vld [vmem:[%s12475_s2 + $0x1a0] sm:$0xff]  ;;  %v56_v34 = vld [vmem:[%s12474_s0 + $0x30] sm:$0xff]  ;;  %v8189_v35 = vpack.c.bf16 %v446_v25, %v442_v22  ;;  %v8199_v40 = vpack.c.bf16 %v448_v29, %v444_v27  ;;  %v450_v42 = vld [vmem:[%s12475_s2 + $0x1c8] sm:$0xff] }
  0x17   :  { %5792 = vmatpush1.bf16.msra.mxu0 %v8123_v7  ;;  %316 = vmatprep.mubr.f32.mxu1 %v12489_v3  ;;  %v443_v38 = vld [vmem:[%s12475_s2 + $0x190] sm:$0xff]  ;;  %v454_v43 = vld [vmem:[%s12475_s2 + $0x1e8] sm:$0xff]  ;;  %v8209_v44 = vpack.c.bf16 %v445_v33, %v441_v31  ;;  %v57_v46 = vld [vmem:[%s12474_s0 + $0x38] sm:$0xff] }
  0x18   :  { %5824 = vmatpush1.bf16.msra.mxu1 %v8133_v12  ;;  %5419 = vmatmul.mubr.msk.f32.gmra.mrb[10].mxu0 %vm84_vm0, %v55_v16  ;;  %v447_v39 = vld [vmem:[%s12475_s2 + $0x1b0] sm:$0xff]  ;;  %v452_v47 = vld [vmem:[%s12475_s2 + $0x1d8] sm:$0xff]  ;;  %v449_v51 = vld [vmem:[%s12475_s2 + $0x1c0] sm:$0xff]  ;;  %v8235_v55 = vpack.c.bf16 %v454_v43, %v450_v42 }
  0x19   :  { %5427 = vmatmul.mubr.msk.f32.gmra.mrb[10].mxu1 %vm84_vm0, %v55_v16  ;;  %5794 = vmatprep.subr.bf16.mxu0 %v8146_v17  ;;  %v456_v48 = vld [vmem:[%s12475_s2 + $0x1f8] sm:$0xff]  ;;  %v8222_v50 = vpack.c.bf16 %v447_v39, %v443_v38  ;;  %v453_v52 = vld [vmem:[%s12475_s2 + $0x1e0] sm:$0xff]  ;;  %v451_v54 = vld [vmem:[%s12475_s2 + $0x1d0] sm:$0xff] }
  0x1a   :  { %5826 = vmatprep.subr.bf16.mxu1 %v8156_v21  ;;  %209 = vmatprep.mubr.f32.mxu0 %v12489_v3  ;;  %v455_v57 = vld [vmem:[%s12475_s2 + $0x1f0] sm:$0xff]  ;;  %v628_v58 = vld [vmem:[%s12476_s4 + $0x8] sm:$0xff]  ;;  %v8248_v61 = vpack.c.bf16 %v456_v48, %v452_v47  ;;  %v630_v62 = vld [vmem:[%s12476_s4 + $0x18] sm:$0xff]  ;;  %v8258_v1 = vpack.c.bf16 %v453_v52, %v449_v51 }
  0x1b   :  { %5796 = vmatpush1.bf16.msra.mxu0 %v8166_v26  ;;  %322 = vmatprep.mubr.f32.mxu1 %v12489_v3  ;;  %v632_v59 = vld [vmem:[%s12476_s4 + $0x28] sm:$0xff]  ;;  %v634_v63 = vld [vmem:[%s12476_s4 + $0x38] sm:$0xff]  ;;  %v8262_v2 = vpack.c.bf16 %v455_v57, %v451_v54  ;;  %v627_v6 = vld [vmem:[%s12476_s4] sm:$0xff] }
  0x1c   :  { %5828 = vmatpush1.bf16.msra.mxu1 %v8176_v30  ;;  %5420 = vmatmul.mubr.msk.f32.gmra.mrb[12].mxu0 %vm84_vm0, %v56_v34  ;;  %v8264_v5 = vpack.c.bf16 %v632_v59, %v628_v58  ;;  %v631_v8 = vld [vmem:[%s12476_s4 + $0x20] sm:$0xff]  ;;  %v629_v9 = vld [vmem:[%s12476_s4 + $0x10] sm:$0xff]  ;;  %v8277_v13 = vpack.c.bf16 %v634_v63, %v630_v62  ;;  %v636_v16 = vld [vmem:[%s12476_s4 + $0x48] sm:$0xff] }
  0x1d   :  { %5428 = vmatmul.mubr.msk.f32.gmra.mrb[12].mxu1 %vm84_vm0, %v56_v34  ;;  %5798 = vmatprep.subr.bf16.mxu0 %v8189_v35  ;;  %v633_v14 = vld [vmem:[%s12476_s4 + $0x30] sm:$0xff]  ;;  %v640_v18 = vld [vmem:[%s12476_s4 + $0x68] sm:$0xff]  ;;  %v638_v20 = vld [vmem:[%s12476_s4 + $0x58] sm:$0xff]  ;;  %v8298_v25 = vpack.c.bf16 %v631_v8, %v627_v6 }
  0x1e   :  { %5830 = vmatprep.subr.bf16.mxu1 %v8199_v40  ;;  %215 = vmatprep.mubr.f32.mxu0 %v12489_v3  ;;  %v642_v22 = vld [vmem:[%s12476_s4 + $0x78] sm:$0xff]  ;;  %v8302_v27 = vpack.c.bf16 %v633_v14, %v629_v9  ;;  %v8304_v29 = vpack.c.bf16 %v640_v18, %v636_v16  ;;  %v635_v31 = vld [vmem:[%s12476_s4 + $0x40] sm:$0xff]  ;;  %v637_v34 = vld [vmem:[%s12476_s4 + $0x50] sm:$0xff] }
  0x1f   :  { %5800 = vmatpush1.bf16.msra.mxu0 %v8209_v44  ;;  %328 = vmatprep.mubr.f32.mxu1 %v12489_v3  ;;  %v639_v33 = vld [vmem:[%s12476_s4 + $0x60] sm:$0xff]  ;;  %v8316_v38 = vpack.c.bf16 %v642_v22, %v638_v20  ;;  %v641_v39 = vld [vmem:[%s12476_s4 + $0x70] sm:$0xff]  ;;  %v644_v42 = vld [vmem:[%s12476_s4 + $0x88] sm:$0xff] }
  0x20   :  { %5832 = vmatpush1.bf16.msra.mxu1 %v8222_v50  ;;  %5421 = vmatmul.mubr.msk.f32.gmra.mrb[14].mxu0 %vm84_vm0, %v57_v46  ;;  %v648_v43 = vld [vmem:[%s12476_s4 + $0xa8] sm:$0xff]  ;;  %v650_v47 = vld [vmem:[%s12476_s4 + $0xb8] sm:$0xff]  ;;  %v8336_v48 = vpack.c.bf16 %v639_v33, %v635_v31  ;;  %v8340_v51 = vpack.c.bf16 %v641_v39, %v637_v34  ;;  %v643_v54 = vld [vmem:[%s12476_s4 + $0x80] sm:$0xff] }
  0x21   :  { %5429 = vmatmul.mubr.msk.f32.gmra.mrb[14].mxu1 %vm84_vm0, %v57_v46  ;;  %5802 = vmatprep.subr.bf16.mxu0 %v8235_v55  ;;  %v646_v46 = vld [vmem:[%s12476_s4 + $0x98] sm:$0xff]  ;;  %v8342_v52 = vpack.c.bf16 %v648_v43, %v644_v42  ;;  %v647_v57 = vld [vmem:[%s12476_s4 + $0xa0] sm:$0xff]  ;;  %v645_v58 = vld [vmem:[%s12476_s4 + $0x90] sm:$0xff] }
  0x22   :  { %5834 = vmatprep.subr.bf16.mxu1 %v8248_v61  ;;  %521 = vmatprep.mubr.f32.mxu0 %v12489_v3  ;;  %v8354_v59 = vpack.c.bf16 %v650_v47, %v646_v46  ;;  %v649_v62 = vld [vmem:[%s12476_s4 + $0xb0] sm:$0xff]  ;;  %v652_v63 = vld [vmem:[%s12476_s4 + $0xc8] sm:$0xff]  ;;  %v654_v8 = vld [vmem:[%s12476_s4 + $0xd8] sm:$0xff]  ;;  %v8374_v14 = vpack.c.bf16 %v647_v57, %v643_v54 }
  0x23   :  { %5804 = vmatpush1.bf16.msra.mxu0 %v8258_v1  ;;  %592 = vmatprep.mubr.f32.mxu1 %v12489_v3  ;;  %v656_v6 = vld [vmem:[%s12476_s4 + $0xe8] sm:$0xff]  ;;  %v658_v9 = vld [vmem:[%s12476_s4 + $0xf8] sm:$0xff]  ;;  %v8378_v16 = vpack.c.bf16 %v649_v62, %v645_v58  ;;  %v651_v20 = vld [vmem:[%s12476_s4 + $0xc0] sm:$0xff] }
  0x24   :  { %5836 = vmatpush1.bf16.msra.mxu1 %v8262_v2  ;;  %5838 = vmatprep.subr.bf16.mxu0 %v8264_v5  ;;  %v8380_v18 = vpack.c.bf16 %v656_v6, %v652_v63  ;;  %v655_v22 = vld [vmem:[%s12476_s4 + $0xe0] sm:$0xff]  ;;  %v653_v31 = vld [vmem:[%s12476_s4 + $0xd0] sm:$0xff]  ;;  %v8392_v33 = vpack.c.bf16 %v658_v9, %v654_v8  ;;  %v660_v39 = vld [vmem:[%s12476_s4 + $0x108] sm:$0xff] }
  0x25   :  { %5902 = vmatprep.subr.bf16.mxu1 %v8277_v13  ;;  %v657_v34 = vld [vmem:[%s12476_s4 + $0xf0] sm:$0xff]  ;;  %v664_v42 = vld [vmem:[%s12476_s4 + $0x128] sm:$0xff]  ;;  %v662_v43 = vld [vmem:[%s12476_s4 + $0x118] sm:$0xff]  ;;  %v8410_v47 = vpack.c.bf16 %v655_v22, %v651_v20 }
  0x26   :  { %522 = vmatmul.mubr.f32.vlgmr.msra.gmra.mrb[0].mxu0 %v12489_v3  ;;  %v666_v46 = vld [vmem:[%s12476_s4 + $0x138] sm:$0xff]  ;;  %v8414_v54 = vpack.c.bf16 %v657_v34, %v653_v31  ;;  %v8416_v57 = vpack.c.bf16 %v664_v42, %v660_v39  ;;  %v659_v58 = vld [vmem:[%s12476_s4 + $0x100] sm:$0xff]  ;;  %v661_v6 = vld [vmem:[%s12476_s4 + $0x110] sm:$0xff] }
  0x27   :  { %593 = vmatmul.mubr.f32.vlgmr.msra.gmra.mrb[0].mxu1 %v12489_v3  ;;  %5840 = vmatpush1.bf16.msra.mxu0 %v8298_v25  ;;  %v663_v62 = vld [vmem:[%s12476_s4 + $0x120] sm:$0xff]  ;;  %v8425_v63 = vpack.c.bf16 %v666_v46, %v662_v43  ;;  %v665_v8 = vld [vmem:[%s12476_s4 + $0x130] sm:$0xff]  ;;  %v668_v22 = vld [vmem:[%s12476_s4 + $0x148] sm:$0xff] }
  0x28   :  { %5904 = vmatpush1.bf16.msra.mxu1 %v8302_v27  ;;  %5842 = vmatprep.subr.bf16.mxu0 %v8304_v29  ;;  %12734 = vst [vmem:[#allocation4_spill] sm:$0xff] %v8416_v57  ;;  %v8434_v9 = vpack.c.bf16 %v663_v62, %v659_v58  ;;  %v8438_v20 = vpack.c.bf16 %v665_v8, %v661_v6  ;;  %v672_v31 = vld [vmem:[%s12476_s4 + $0x168] sm:$0xff]  ;;  %v670_v34 = vld [vmem:[%s12476_s4 + $0x158] sm:$0xff]  ;;  %v667_v43 = vld [vmem:[%s12476_s4 + $0x140] sm:$0xff] }
  0x29   :  { %5906 = vmatprep.subr.bf16.mxu1 %v8316_v38  ;;  %819 = vmatprep.mubr.f32.mxu0 %v12489_v3  ;;  %12735 = vst [vmem:[#allocation5_spill] sm:$0xff] %v8425_v63  ;;  %v8452_v39 = vpack.c.bf16 %v672_v31, %v668_v22  ;;  %v674_v42 = vld [vmem:[%s12476_s4 + $0x178] sm:$0xff]  ;;  %v671_v46 = vld [vmem:[%s12476_s4 + $0x160] sm:$0xff]  ;;  %v669_v6 = vld [vmem:[%s12476_s4 + $0x150] sm:$0xff] }
  0x2a   :  { %890 = vmatprep.mubr.f32.mxu1 %v12489_v3  ;;  %12736 = vst [vmem:[#allocation6_spill] sm:$0xff] %v8434_v9  ;;  %12737 = vst [vmem:[#allocation7_spill] sm:$0xff] %v8438_v20  ;;  %v8463_v58 = vpack.c.bf16 %v674_v42, %v670_v34  ;;  %v8465_v62 = vpack.c.bf16 %v671_v46, %v667_v43  ;;  %v673_v8 = vld [vmem:[%s12476_s4 + $0x170] sm:$0xff]  ;;  %v676_v31 = vld [vmem:[%s12476_s4 + $0x188] sm:$0xff] }
  0x2b   :  { %5844 = vmatpush1.bf16.msra.mxu0 %v8336_v48  ;;  %12738 = vst [vmem:[#allocation8_spill] sm:$0xff] %v8452_v39  ;;  %v8474_v22 = vpack.c.bf16 %v673_v8, %v669_v6  ;;  %v680_v34 = vld [vmem:[%s12476_s4 + $0x1a8] sm:$0xff]  ;;  %v678_v42 = vld [vmem:[%s12476_s4 + $0x198] sm:$0xff]  ;;  %v675_v6 = vld [vmem:[%s12476_s4 + $0x180] sm:$0xff] }
  0x2c   :  { %5908 = vmatpush1.bf16.msra.mxu1 %v8340_v51  ;;  %5846 = vmatprep.subr.bf16.mxu0 %v8342_v52  ;;  %12739 = vst [vmem:[#allocation9_spill] sm:$0xff] %v8463_v58  ;;  %12740 = vst [vmem:[#allocation10_spill] sm:$0xff] %v8465_v62  ;;  %v8488_v43 = vpack.c.bf16 %v680_v34, %v676_v31  ;;  %v682_v46 = vld [vmem:[%s12476_s4 + $0x1b8] sm:$0xff]  ;;  %v679_v8 = vld [vmem:[%s12476_s4 + $0x1a0] sm:$0xff] }
  0x2d   :  { %5910 = vmatprep.subr.bf16.mxu1 %v8354_v59  ;;  %12741 = vst [vmem:[#allocation11_spill] sm:$0xff] %v8474_v22  ;;  %v8499_v3 = vpack.c.bf16 %v682_v46, %v678_v42  ;;  %v677_v31 = vld [vmem:[%s12476_s4 + $0x190] sm:$0xff]  ;;  %v684_v42 = vld [vmem:[%s12476_s4 + $0x1c8] sm:$0xff] }
  0x2e   :  { %12742 = vst [vmem:[#allocation12_spill] sm:$0xff] %v8488_v43  ;;  %v681_v34 = vld [vmem:[%s12476_s4 + $0x1b0] sm:$0xff]  ;;  %v688_v46 = vld [vmem:[%s12476_s4 + $0x1e8] sm:$0xff] }
  0x2f   :  { %5848 = vmatpush1.bf16.msra.mxu0 %v8374_v14  ;;  %12743 = vst [vmem:[#allocation13_spill] sm:$0xff] %v8499_v3 }
  0x30   :  { %5912 = vmatpush1.bf16.msra.mxu1 %v8378_v16  ;;  %5850 = vmatprep.subr.bf16.mxu0 %v8380_v18 }
  0x31   :  { %5914 = vmatprep.subr.bf16.mxu1 %v8392_v33 }
  0x33   :  { %5852 = vmatpush1.bf16.msra.mxu0 %v8410_v47 }
  0x34   :  { %5916 = vmatpush1.bf16.msra.mxu1 %v8414_v54  ;;  %5854 = vmatprep.subr.bf16.mxu0 %v8416_v57 }
  0x35   :  { %5918 = vmatprep.subr.bf16.mxu1 %v8425_v63 }
  0x37   :  { %5856 = vmatpush1.bf16.msra.mxu0 %v8434_v9 }
  0x38   :  { %5920 = vmatpush1.bf16.msra.mxu1 %v8438_v20  ;;  %5858 = vmatprep.subr.bf16.mxu0 %v8452_v39  ;;  %v741_v39 = vld [vmem:[%s12476_s4 + $0x390] sm:$0xff] }
  0x39   :  { %5922 = vmatprep.subr.bf16.mxu1 %v8463_v58 }
  0x3b   :  { %5860 = vmatpush1.bf16.msra.mxu0 %v8465_v62  ;;  %v8501_v62 = vpack.c.bf16 %v679_v8, %v675_v6  ;;  %v686_v6 = vld [vmem:[%s12476_s4 + $0x1d8] sm:$0xff]  ;;  %v8524_v8 = vpack.c.bf16 %v688_v46, %v684_v42  ;;  %v685_v42 = vld [vmem:[%s12476_s4 + $0x1d0] sm:$0xff] }
  0x3c   :  { %5924 = vmatpush1.bf16.msra.mxu1 %v8474_v22  ;;  %5862 = vmatprep.subr.bf16.mxu0 %v8488_v43  ;;  %v8510_v22 = vpack.c.bf16 %v681_v34, %v677_v31  ;;  %v690_v31 = vld [vmem:[%s12476_s4 + $0x1f8] sm:$0xff]  ;;  %v683_v34 = vld [vmem:[%s12476_s4 + $0x1c0] sm:$0xff]  ;;  %v689_v46 = vld [vmem:[%s12476_s4 + $0x1f0] sm:$0xff] }
  0x3d   :  { %12744 = vst [vmem:[#allocation14_spill] sm:$0xff] %v8501_v62  ;;  %5926 = vmatprep.subr.bf16.mxu1 %v8499_v3  ;;  %12746 = vst [vmem:[#allocation16_spill] sm:$0xff] %v8524_v8  ;;  %v8535_v3 = vpack.c.bf16 %v690_v31, %v686_v6  ;;  %v696_v6 = vld [vmem:[%s12476_s4 + $0x228] sm:$0xff]  ;;  %v694_v31 = vld [vmem:[%s12476_s4 + $0x218] sm:$0xff] }
  0x3e   :  { %12745 = vst [vmem:[#allocation15_spill] sm:$0xff] %v8510_v22 }
  0x3f   :  { %5864 = vmatpush1.bf16.msra.mxu0 %v8501_v62  ;;  %v687_v62 = vld [vmem:[%s12476_s4 + $0x1e0] sm:$0xff]  ;;  %12747 = vst [vmem:[#allocation17_spill] sm:$0xff] %v8535_v3 }
  0x40   :  { %5928 = vmatpush1.bf16.msra.mxu1 %v8510_v22  ;;  %v8537_v43 = vpack.c.bf16 %v687_v62, %v683_v34  ;;  %5866 = vmatprep.subr.bf16.mxu0 %v8524_v8  ;;  %v8546_v22 = vpack.c.bf16 %v689_v46, %v685_v42  ;;  %v692_v62 = vld [vmem:[%s12476_s4 + $0x208] sm:$0xff]  ;;  %v698_v42 = vld [vmem:[%s12476_s4 + $0x238] sm:$0xff]  ;;  %v691_v46 = vld [vmem:[%s12476_s4 + $0x200] sm:$0xff] }
  0x41   :  { %5930 = vmatprep.subr.bf16.mxu1 %v8535_v3  ;;  %v8560_v34 = vpack.c.bf16 %v696_v6, %v692_v62  ;;  %v8571_v3 = vpack.c.bf16 %v698_v42, %v694_v31  ;;  %v693_v62 = vld [vmem:[%s12476_s4 + $0x210] sm:$0xff]  ;;  %v704_v31 = vld [vmem:[%s12476_s4 + $0x268] sm:$0xff]  ;;  %v702_v42 = vld [vmem:[%s12476_s4 + $0x258] sm:$0xff] }
  0x42   :  { %12748 = vst [vmem:[#allocation18_spill] sm:$0xff] %v8537_v43  ;;  %12749 = vst [vmem:[#allocation19_spill] sm:$0xff] %v8546_v22  ;;  %v697_v6 = vld [vmem:[%s12476_s4 + $0x230] sm:$0xff] }
  0x43   :  { %5868 = vmatpush1.bf16.msra.mxu0 %v8537_v43  ;;  %12750 = vst [vmem:[#allocation20_spill] sm:$0xff] %v8560_v34  ;;  %v695_v43 = vld [vmem:[%s12476_s4 + $0x220] sm:$0xff]  ;;  %12751 = vst [vmem:[#allocation21_spill] sm:$0xff] %v8571_v3 }
  0x44   :  { %5932 = vmatpush1.bf16.msra.mxu1 %v8546_v22  ;;  %v8573_v8 = vpack.c.bf16 %v695_v43, %v691_v46  ;;  %5870 = vmatprep.subr.bf16.mxu0 %v8560_v34  ;;  %v8582_v22 = vpack.c.bf16 %v697_v6, %v693_v62  ;;  %v700_v43 = vld [vmem:[%s12476_s4 + $0x248] sm:$0xff]  ;;  %v706_v62 = vld [vmem:[%s12476_s4 + $0x278] sm:$0xff]  ;;  %v699_v6 = vld [vmem:[%s12476_s4 + $0x240] sm:$0xff] }
  0x45   :  { %5934 = vmatprep.subr.bf16.mxu1 %v8571_v3  ;;  %v8596_v46 = vpack.c.bf16 %v704_v31, %v700_v43  ;;  %v8607_v3 = vpack.c.bf16 %v706_v62, %v702_v42  ;;  %v701_v43 = vld [vmem:[%s12476_s4 + $0x250] sm:$0xff]  ;;  %v712_v42 = vld [vmem:[%s12476_s4 + $0x2a8] sm:$0xff]  ;;  %v710_v62 = vld [vmem:[%s12476_s4 + $0x298] sm:$0xff] }
  0x46   :  { %12752 = vst [vmem:[#allocation22_spill] sm:$0xff] %v8573_v8  ;;  %12753 = vst [vmem:[#allocation23_spill] sm:$0xff] %v8582_v22  ;;  %v705_v31 = vld [vmem:[%s12476_s4 + $0x270] sm:$0xff] }
  0x47   :  { %5872 = vmatpush1.bf16.msra.mxu0 %v8573_v8  ;;  %12754 = vst [vmem:[#allocation24_spill] sm:$0xff] %v8596_v46  ;;  %v703_v8 = vld [vmem:[%s12476_s4 + $0x260] sm:$0xff]  ;;  %12755 = vst [vmem:[#allocation25_spill] sm:$0xff] %v8607_v3 }
  0x48   :  { %5936 = vmatpush1.bf16.msra.mxu1 %v8582_v22  ;;  %v8609_v34 = vpack.c.bf16 %v703_v8, %v699_v6  ;;  %5874 = vmatprep.subr.bf16.mxu0 %v8596_v46  ;;  %v8618_v22 = vpack.c.bf16 %v705_v31, %v701_v43  ;;  %v708_v8 = vld [vmem:[%s12476_s4 + $0x288] sm:$0xff]  ;;  %v714_v43 = vld [vmem:[%s12476_s4 + $0x2b8] sm:$0xff]  ;;  %v707_v31 = vld [vmem:[%s12476_s4 + $0x280] sm:$0xff] }
  0x49   :  { %5938 = vmatprep.subr.bf16.mxu1 %v8607_v3  ;;  %v8632_v6 = vpack.c.bf16 %v712_v42, %v708_v8  ;;  %v8643_v3 = vpack.c.bf16 %v714_v43, %v710_v62  ;;  %v709_v8 = vld [vmem:[%s12476_s4 + $0x290] sm:$0xff]  ;;  %v720_v62 = vld [vmem:[%s12476_s4 + $0x2e8] sm:$0xff]  ;;  %v718_v43 = vld [vmem:[%s12476_s4 + $0x2d8] sm:$0xff] }
  0x4a   :  { %12756 = vst [vmem:[#allocation26_spill] sm:$0xff] %v8609_v34  ;;  %12757 = vst [vmem:[#allocation27_spill] sm:$0xff] %v8618_v22  ;;  %v713_v42 = vld [vmem:[%s12476_s4 + $0x2b0] sm:$0xff] }
  0x4b   :  { %5876 = vmatpush1.bf16.msra.mxu0 %v8609_v34  ;;  %12758 = vst [vmem:[#allocation28_spill] sm:$0xff] %v8632_v6  ;;  %v711_v34 = vld [vmem:[%s12476_s4 + $0x2a0] sm:$0xff]  ;;  %12759 = vst [vmem:[#allocation29_spill] sm:$0xff] %v8643_v3 }
  0x4c   :  { %5940 = vmatpush1.bf16.msra.mxu1 %v8618_v22  ;;  %v8645_v46 = vpack.c.bf16 %v711_v34, %v707_v31  ;;  %5878 = vmatprep.subr.bf16.mxu0 %v8632_v6  ;;  %v8654_v22 = vpack.c.bf16 %v713_v42, %v709_v8  ;;  %v716_v34 = vld [vmem:[%s12476_s4 + $0x2c8] sm:$0xff]  ;;  %v722_v8 = vld [vmem:[%s12476_s4 + $0x2f8] sm:$0xff]  ;;  %v715_v42 = vld [vmem:[%s12476_s4 + $0x2c0] sm:$0xff] }
  0x4d   :  { %5942 = vmatprep.subr.bf16.mxu1 %v8643_v3  ;;  %v8668_v31 = vpack.c.bf16 %v720_v62, %v716_v34  ;;  %v8679_v3 = vpack.c.bf16 %v722_v8, %v718_v43  ;;  %v717_v34 = vld [vmem:[%s12476_s4 + $0x2d0] sm:$0xff]  ;;  %v728_v43 = vld [vmem:[%s12476_s4 + $0x328] sm:$0xff]  ;;  %v726_v8 = vld [vmem:[%s12476_s4 + $0x318] sm:$0xff] }
  0x4e   :  { %12760 = vst [vmem:[#allocation30_spill] sm:$0xff] %v8645_v46  ;;  %12761 = vst [vmem:[#allocation31_spill] sm:$0xff] %v8654_v22  ;;  %v721_v62 = vld [vmem:[%s12476_s4 + $0x2f0] sm:$0xff] }
  0x4f   :  { %5880 = vmatpush1.bf16.msra.mxu0 %v8645_v46  ;;  %12762 = vst [vmem:[#allocation32_spill] sm:$0xff] %v8668_v31  ;;  %v719_v46 = vld [vmem:[%s12476_s4 + $0x2e0] sm:$0xff]  ;;  %12763 = vst [vmem:[#allocation33_spill] sm:$0xff] %v8679_v3 }
  0x50   :  { %5944 = vmatpush1.bf16.msra.mxu1 %v8654_v22  ;;  %v8681_v6 = vpack.c.bf16 %v719_v46, %v715_v42  ;;  %5882 = vmatprep.subr.bf16.mxu0 %v8668_v31  ;;  %v8690_v22 = vpack.c.bf16 %v721_v62, %v717_v34  ;;  %v724_v46 = vld [vmem:[%s12476_s4 + $0x308] sm:$0xff]  ;;  %v730_v34 = vld [vmem:[%s12476_s4 + $0x338] sm:$0xff]  ;;  %v723_v62 = vld [vmem:[%s12476_s4 + $0x300] sm:$0xff] }
  0x51   :  { %5946 = vmatprep.subr.bf16.mxu1 %v8679_v3  ;;  %v8704_v42 = vpack.c.bf16 %v728_v43, %v724_v46  ;;  %v8715_v3 = vpack.c.bf16 %v730_v34, %v726_v8  ;;  %v725_v46 = vld [vmem:[%s12476_s4 + $0x310] sm:$0xff]  ;;  %v736_v8 = vld [vmem:[%s12476_s4 + $0x368] sm:$0xff]  ;;  %v734_v34 = vld [vmem:[%s12476_s4 + $0x358] sm:$0xff] }
  0x52   :  { %12764 = vst [vmem:[#allocation34_spill] sm:$0xff] %v8681_v6  ;;  %12765 = vst [vmem:[#allocation35_spill] sm:$0xff] %v8690_v22  ;;  %v729_v43 = vld [vmem:[%s12476_s4 + $0x330] sm:$0xff] }
  0x53   :  { %5884 = vmatpush1.bf16.msra.mxu0 %v8681_v6  ;;  %12766 = vst [vmem:[#allocation36_spill] sm:$0xff] %v8704_v42  ;;  %v727_v6 = vld [vmem:[%s12476_s4 + $0x320] sm:$0xff]  ;;  %12767 = vst [vmem:[#allocation37_spill] sm:$0xff] %v8715_v3 }
  0x54   :  { %5948 = vmatpush1.bf16.msra.mxu1 %v8690_v22  ;;  %v8717_v31 = vpack.c.bf16 %v727_v6, %v723_v62  ;;  %5886 = vmatprep.subr.bf16.mxu0 %v8704_v42  ;;  %v8726_v22 = vpack.c.bf16 %v729_v43, %v725_v46  ;;  %v732_v6 = vld [vmem:[%s12476_s4 + $0x348] sm:$0xff]  ;;  %v738_v46 = vld [vmem:[%s12476_s4 + $0x378] sm:$0xff]  ;;  %v731_v43 = vld [vmem:[%s12476_s4 + $0x340] sm:$0xff] }
  0x55   :  { %5950 = vmatprep.subr.bf16.mxu1 %v8715_v3  ;;  %v8740_v62 = vpack.c.bf16 %v736_v8, %v732_v6  ;;  %v8751_v3 = vpack.c.bf16 %v738_v46, %v734_v34  ;;  %v733_v6 = vld [vmem:[%s12476_s4 + $0x350] sm:$0xff]  ;;  %v742_v34 = vld [vmem:[%s12476_s4 + $0x398] sm:$0xff] }
  0x56   :  { %12768 = vst [vmem:[#allocation38_spill] sm:$0xff] %v8717_v31  ;;  %12769 = vst [vmem:[#allocation39_spill] sm:$0xff] %v8726_v22  ;;  %v737_v8 = vld [vmem:[%s12476_s4 + $0x370] sm:$0xff]  ;;  %v746_v46 = vld [vmem:[%s12476_s4 + $0x3b8] sm:$0xff] }
  0x57   :  { %5888 = vmatpush1.bf16.msra.mxu0 %v8717_v31  ;;  %12770 = vst [vmem:[#allocation40_spill] sm:$0xff] %v8740_v62  ;;  %v735_v31 = vld [vmem:[%s12476_s4 + $0x360] sm:$0xff]  ;;  %12771 = vst [vmem:[#allocation41_spill] sm:$0xff] %v8751_v3  ;;  %v8765_v58 = vpack.c.bf16 %v737_v8, %v733_v6  ;;  %v8780_v6 = vpack.c.bf16 %v746_v46, %v742_v34  ;;  %v752_v34 = vld [vmem:[%s12476_s4 + $0x3e8] sm:$0xff] }
  0x58   :  { %5952 = vmatpush1.bf16.msra.mxu1 %v8726_v22  ;;  %v8753_v42 = vpack.c.bf16 %v735_v31, %v731_v43  ;;  %v740_v22 = vld [vmem:[%s12476_s4 + $0x388] sm:$0xff]  ;;  %5890 = vmatprep.subr.bf16.mxu0 %v8740_v62  ;;  %v739_v8 = vld [vmem:[%s12476_s4 + $0x380] sm:$0xff] }
  0x59   :  { %12773 = vst [vmem:[#allocation43_spill] sm:$0xff] %v8765_v58  ;;  %v744_v31 = vld [vmem:[%s12476_s4 + $0x3a8] sm:$0xff]  ;;  %5954 = vmatprep.subr.bf16.mxu1 %v8751_v3  ;;  %12775 = vst [vmem:[#allocation45_spill] sm:$0xff] %v8780_v6  ;;  %v743_v62 = vld [vmem:[%s12476_s4 + $0x3a0] sm:$0xff] }
  0x5a   :  { %12772 = vst [vmem:[#allocation42_spill] sm:$0xff] %v8753_v42  ;;  %v8778_v43 = vpack.c.bf16 %v744_v31, %v740_v22  ;;  %v8792_v3 = vpack.c.bf16 %v743_v62, %v739_v8  ;;  %v745_v22 = vld [vmem:[%s12476_s4 + $0x3b0] sm:$0xff]  ;;  %v748_v31 = vld [vmem:[%s12476_s4 + $0x3c8] sm:$0xff]  ;;  %v750_v8 = vld [vmem:[%s12476_s4 + $0x3d8] sm:$0xff] }
  0x5b   :  { %5892 = vmatpush1.bf16.msra.mxu0 %v8753_v42  ;;  %v8805_v46 = vpack.c.bf16 %v745_v22, %v741_v39  ;;  %v8807_v62 = vpack.c.bf16 %v752_v34, %v748_v31  ;;  %v747_v42 = vld [vmem:[%s12476_s4 + $0x3c0] sm:$0xff]  ;;  %v749_v22 = vld [vmem:[%s12476_s4 + $0x3d0] sm:$0xff] }
  0x5c   :  { %12774 = vst [vmem:[#allocation44_spill] sm:$0xff] %v8778_v43  ;;  %5956 = vmatpush1.bf16.msra.mxu1 %v8765_v58  ;;  %12776 = vst [vmem:[#allocation46_spill] sm:$0xff] %v8792_v3  ;;  %5894 = vmatprep.subr.bf16.mxu0 %v8778_v43  ;;  %v754_v58 = vld [vmem:[%s12476_s4 + $0x3f8] sm:$0xff]  ;;  %v751_v39 = vld [vmem:[%s12476_s4 + $0x3e0] sm:$0xff] }
  0x5d   :  { %5958 = vmatprep.subr.bf16.mxu1 %v8780_v6  ;;  %12777 = vst [vmem:[#allocation47_spill] sm:$0xff] %v8805_v46  ;;  %12778 = vst [vmem:[#allocation48_spill] sm:$0xff] %v8807_v62  ;;  %v8818_v20 = vpack.c.bf16 %v754_v58, %v750_v8  ;;  %v753_v31 = vld [vmem:[%s12476_s4 + $0x3f0] sm:$0xff]  ;;  %v8830_v34 = vpack.c.bf16 %v751_v39, %v747_v42  ;;  %v64_v8 = vlaneseq  ;;  %v62_v39 = vld [vmem:[%s12477_s3] sm:$0xf] }
  0x5e   :  { %v8834_v58 = vpack.c.bf16 %v753_v31, %v749_v22 }
  0x5f   :  { %12779 = vst [vmem:[#allocation49_spill] sm:$0xff] %v8818_v20  ;;  %5896 = vmatpush1.bf16.msra.mxu0 %v8792_v3  ;;  %12780 = vst [vmem:[#allocation50_spill] sm:$0xff] %v8830_v34  ;;  %v8841_v3 = vshrl.u32 %v64_v8, 7 }
  0x60   :  { %5960 = vmatpush1.bf16.msra.mxu1 %v8805_v46  ;;  %5898 = vmatprep.subr.bf16.mxu0 %v8807_v62  ;;  %12781 = vst [vmem:[#allocation51_spill] sm:$0xff] %v8834_v58 }
  0x61   :  { %5962 = vmatprep.subr.bf16.mxu1 %v8818_v20  ;;  %12782 = vst [vmem:[#allocation52_spill] sm:$0xff] %v8841_v3  ;;  %v8844_v42 = vsub.s32 0, %v8841_v3  ;;  %v8850_v22 = vsub.s32 1, %v8841_v3  ;;  %v12545_v8 = vsub.s32 3, %v8841_v3 }
  0x63   :  { %5900 = vmatpush1.bf16.msra.mxu0 %v8830_v34  ;;  %12783 = vst [vmem:[#allocation53_spill] sm:$0xff] %v8844_v42  ;;  %12784 = vst [vmem:[#allocation54_spill] sm:$0xff] %v8850_v22  ;;  %v8853_v31 = vrot.slane %v62_v39, %v8844_v42  ;;  %v8863_v9 = vrot.slane %v62_v39, %v12545_v8 }
  0x64   :  { %5964 = vmatpush1.bf16.msra.mxu1 %v8834_v58  ;;  %5966 = vmatprep.subr.bf16.mxu0 %v7932_v10  ;;  %v8856_v10 = vrot.slane %v62_v39, %v8850_v22  ;;  %v8866_v22 = vsub.s32 2, %v8841_v3 }
  0x65   :  { %5998 = vmatprep.subr.bf16.mxu1 %v7934_v11  ;;  %12785 = vst [vmem:[#allocation55_spill] sm:$0xff] %v8853_v31  ;;  %12787 = vst [vmem:[#allocation57_spill] sm:$0xff] %v8863_v9 }
  0x66   :  { %12786 = vst [vmem:[#allocation56_spill] sm:$0xff] %v8856_v10  ;;  %12788 = vst [vmem:[#allocation58_spill] sm:$0xff] %v8866_v22 }
  0xf9   :  { %v523_v11 = vpop.f32.mrb[0].mxu0 }
  0xfa   :  { %v7477_v58 = vadd.f32 %v523_v11, %v8853_v31  ;;  %v594_v34 = vpop.f32.mrb[0].mxu1  ;;  %v525_v20 = vpop.f32.mrb[1].mxu0  ;;  %v8870_v11 = vrot.slane %v62_v39, %v8866_v22 }
  0xfb   :  { %v7478_v62 = vadd.f32 %v525_v20, %v8856_v10  ;;  %v596_v46 = vpop.f32.mrb[1].mxu1 }
  0xfc   :  { %v5430_v6 = vmul.f32 -1.442695, %v7477_v58  ;;  %v7494_v42 = vadd.f32 %v596_v46, %v8863_v9  ;;  %v7493_v20 = vadd.f32 %v594_v34, %v8870_v11 }
  0xfd   :  { %v5431_v43 = vmul.f32 -1.442695, %v7478_v62 }
  0xfe   :  { %7544 = vpow2.f32 %v5430_v6  ;;  %v5432_v31 = vmul.f32 -1.442695, %v7494_v42 }
  0xff   :  { %7546 = vpow2.f32 %v5431_v43 }
 0x100   :  { %7548 = vpow2.f32 %v5432_v31  ;;  %v1464_v31 = vld [vmem:[%s12475_s2 + $0x28] sm:$0xff] }
 0x101   :  { %7550 = vtanh.f32 %v7493_v20 }
 0x108   :  { %v7545_v10 = vpop.eup %7544 }
 0x109   :  { %v7547_v58 = vpop.eup %7546  ;;  %v606_v62 = vadd.f32 1.0, %v7545_v10 }
 0x10a   :  { %v612_v8 = vadd.f32 1.0, %v7547_v58  ;;  %v7549_v6 = vpop.eup %7548  ;;  %v1466_v58 = vld [vmem:[%s12475_s2 + $0x38] sm:$0xff] }
 0x10b   :  { %7552 = vrcp.f32 %v606_v62  ;;  %v7551_v3 = vpop.eup %7550  ;;  %v619_v46 = vadd.f32 1.0, %v7549_v6  ;;  %v367_v6 = vld [vmem:[%s12478_s5] sm:$0xf] }
 0x10c   :  { %7554 = vrcp.f32 %v612_v8  ;;  %v1462_v8 = vld [vmem:[%s12475_s2 + $0x18] sm:$0xff] }
 0x10d   :  { %7556 = vrcp.f32 %v619_v46  ;;  %v8986_v62 = vpack.c.bf16 %v1466_v58, %v1462_v8 }
 0x115   :  { %v7553_v63 = vpop.eup %7552 }
 0x116   :  { %v7555_v43 = vpop.eup %7554  ;;  %v623_v57 = vmul.f32 %v7553_v63, %v7551_v3  ;;  %v12789_v3 = vmov 0.0   ;;  %v12837_v63 = vld [vmem:[#allocation51_spill] sm:$0xff] }
 0x117   :  { %v622_v9 = vmul.f32 0.0, %v7555_v43  ;;  %v7557_v34 = vpop.eup %7556  ;;  %v12838_v43 = vld [vmem:[#allocation53_spill] sm:$0xff] }
 0x118   :  { %v8994_v46 = vrot.slane %v367_v6, %v12838_v43  ;;  %v1721_v43 = vld [vmem:[%s12476_s4 + $0xe0] sm:$0xff] }
 0x119   :  { %v8873_v39 = vadd.f32 %v623_v57, %v622_v9  ;;  %v12836_v57 = vld [vmem:[#allocation50_spill] sm:$0xff]  ;;  %v1460_v9 = vld [vmem:[%s12475_s2 + $0x8] sm:$0xff] }
 0x11a   :  { %v8981_v20 = vpack.c.bf16 %v1464_v31, %v1460_v9 }
 0x11b   :  { %7558 = vtanh.f32 %v8873_v39 }
 0x125   :  { %v7559_v42 = vpop.eup %7558 }
 0x126   :  { %v626_v10 = vmul.f32 %v7559_v42, %v7557_v34  ;;  %v12840_v34 = vld [vmem:[#allocation54_spill] sm:$0xff] }
 0x127   :  { %v8997_v42 = vrot.slane %v367_v6, %v12840_v34 }
 0x128   :  { %820 = vmatmul.mubr.f32.vlgmr.msra.gmra.mrb[16].mxu0 %v626_v10  ;;  %891 = vmatmul.mubr.f32.vlgmr.msra.gmra.mrb[16].mxu1 %v626_v10 }
 0x129   :  { %5968 = vmatpush1.bf16.msra.mxu0 %v7945_v15  ;;  %6000 = vmatpush1.bf16.msra.mxu1 %v7960_v19  ;;  %v12790_v15 = vld [vmem:[#allocation4_spill] sm:$0xff]  ;;  %v12791_v19 = vld [vmem:[#allocation5_spill] sm:$0xff] }
 0x12a   :  { %5970 = vmatprep.subr.bf16.mxu0 %v7972_v23  ;;  %6002 = vmatprep.subr.bf16.mxu1 %v7974_v24  ;;  %v12792_v23 = vld [vmem:[#allocation6_spill] sm:$0xff]  ;;  %v12793_v24 = vld [vmem:[#allocation7_spill] sm:$0xff]  ;;  %12839 = vst [vmem:[#allocation4_spill] sm:$0xff] %v8994_v46 }
 0x12b   :  { %1054 = vmatprep.mubr.f32.mxu0 %v12789_v3  ;;  %1125 = vmatprep.mubr.f32.mxu1 %v12789_v3 }
 0x12d   :  { %5972 = vmatpush1.bf16.msra.mxu0 %v7987_v28  ;;  %6004 = vmatpush1.bf16.msra.mxu1 %v8000_v32  ;;  %v12794_v28 = vld [vmem:[#allocation8_spill] sm:$0xff]  ;;  %v12795_v32 = vld [vmem:[#allocation9_spill] sm:$0xff] }
 0x12e   :  { %5974 = vmatprep.subr.bf16.mxu0 %v8013_v36  ;;  %6006 = vmatprep.subr.bf16.mxu1 %v8015_v37  ;;  %v12796_v36 = vld [vmem:[#allocation10_spill] sm:$0xff]  ;;  %v12797_v37 = vld [vmem:[#allocation11_spill] sm:$0xff] }
 0x131   :  { %5976 = vmatpush1.bf16.msra.mxu0 %v8028_v41  ;;  %6008 = vmatpush1.bf16.msra.mxu1 %v8041_v45  ;;  %v12798_v41 = vld [vmem:[#allocation12_spill] sm:$0xff]  ;;  %v12799_v45 = vld [vmem:[#allocation13_spill] sm:$0xff] }
 0x132   :  { %5978 = vmatprep.subr.bf16.mxu0 %v8054_v49  ;;  %6010 = vmatprep.subr.bf16.mxu1 %v8067_v53  ;;  %v12800_v49 = vld [vmem:[#allocation14_spill] sm:$0xff]  ;;  %v12801_v53 = vld [vmem:[#allocation15_spill] sm:$0xff] }
 0x135   :  { %5980 = vmatpush1.bf16.msra.mxu0 %v8077_v56  ;;  %6012 = vmatpush1.bf16.msra.mxu1 %v8090_v60  ;;  %v12802_v56 = vld [vmem:[#allocation16_spill] sm:$0xff]  ;;  %v12803_v60 = vld [vmem:[#allocation17_spill] sm:$0xff] }
 0x136   :  { %5982 = vmatprep.subr.bf16.mxu0 %v8103_v0  ;;  %6014 = vmatprep.subr.bf16.mxu1 %v8113_v4  ;;  %v12804_v0 = vld [vmem:[#allocation18_spill] sm:$0xff]  ;;  %v12805_v4 = vld [vmem:[#allocation19_spill] sm:$0xff] }
 0x139   :  { %5984 = vmatpush1.bf16.msra.mxu0 %v8123_v7  ;;  %6016 = vmatpush1.bf16.msra.mxu1 %v8133_v12  ;;  %v12806_v7 = vld [vmem:[#allocation20_spill] sm:$0xff]  ;;  %v12807_v12 = vld [vmem:[#allocation21_spill] sm:$0xff] }
 0x13a   :  { %5986 = vmatprep.subr.bf16.mxu0 %v8146_v17  ;;  %6018 = vmatprep.subr.bf16.mxu1 %v8156_v21  ;;  %v12808_v17 = vld [vmem:[#allocation22_spill] sm:$0xff]  ;;  %v12809_v21 = vld [vmem:[#allocation23_spill] sm:$0xff] }
 0x13d   :  { %5988 = vmatpush1.bf16.msra.mxu0 %v8166_v26  ;;  %6020 = vmatpush1.bf16.msra.mxu1 %v8176_v30  ;;  %v12810_v26 = vld [vmem:[#allocation24_spill] sm:$0xff]  ;;  %v12811_v30 = vld [vmem:[#allocation25_spill] sm:$0xff] }
 0x13e   :  { %5990 = vmatprep.subr.bf16.mxu0 %v8189_v35  ;;  %6022 = vmatprep.subr.bf16.mxu1 %v8199_v40  ;;  %v12812_v35 = vld [vmem:[#allocation26_spill] sm:$0xff]  ;;  %v12813_v40 = vld [vmem:[#allocation27_spill] sm:$0xff] }
 0x141   :  { %5992 = vmatpush1.bf16.msra.mxu0 %v8209_v44  ;;  %6024 = vmatpush1.bf16.msra.mxu1 %v8222_v50  ;;  %v12814_v44 = vld [vmem:[#allocation28_spill] sm:$0xff]  ;;  %v12815_v50 = vld [vmem:[#allocation29_spill] sm:$0xff] }
 0x142   :  { %5994 = vmatprep.subr.bf16.mxu0 %v8235_v55  ;;  %6026 = vmatprep.subr.bf16.mxu1 %v8248_v61  ;;  %v12816_v55 = vld [vmem:[#allocation30_spill] sm:$0xff]  ;;  %v12817_v61 = vld [vmem:[#allocation31_spill] sm:$0xff] }
 0x145   :  { %5996 = vmatpush1.bf16.msra.mxu0 %v8258_v1  ;;  %6028 = vmatpush1.bf16.msra.mxu1 %v8262_v2  ;;  %v12818_v1 = vld [vmem:[#allocation32_spill] sm:$0xff]  ;;  %v12819_v2 = vld [vmem:[#allocation33_spill] sm:$0xff] }
 0x146   :  { %6030 = vmatprep.subr.bf16.mxu0 %v8264_v5  ;;  %6094 = vmatprep.subr.bf16.mxu1 %v8277_v13  ;;  %v12820_v5 = vld [vmem:[#allocation34_spill] sm:$0xff]  ;;  %v12821_v13 = vld [vmem:[#allocation35_spill] sm:$0xff] }
 0x148   :  { %1055 = vmatmul.mubr.f32.vlgmr.msra.gmra.mrb[2].mxu0 %v626_v10  ;;  %1126 = vmatmul.mubr.f32.vlgmr.msra.gmra.mrb[2].mxu1 %v626_v10 }
 0x149   :  { %6032 = vmatpush1.bf16.msra.mxu0 %v8298_v25  ;;  %6096 = vmatpush1.bf16.msra.mxu1 %v8302_v27  ;;  %v12822_v25 = vld [vmem:[#allocation36_spill] sm:$0xff]  ;;  %v12823_v27 = vld [vmem:[#allocation37_spill] sm:$0xff] }
 0x14a   :  { %6034 = vmatprep.subr.bf16.mxu0 %v8304_v29  ;;  %6098 = vmatprep.subr.bf16.mxu1 %v8316_v38  ;;  %v12824_v29 = vld [vmem:[#allocation38_spill] sm:$0xff]  ;;  %v12825_v38 = vld [vmem:[#allocation39_spill] sm:$0xff] }
 0x14d   :  { %6036 = vmatpush1.bf16.msra.mxu0 %v8336_v48  ;;  %6100 = vmatpush1.bf16.msra.mxu1 %v8340_v51  ;;  %v12826_v48 = vld [vmem:[#allocation40_spill] sm:$0xff]  ;;  %v12827_v51 = vld [vmem:[#allocation41_spill] sm:$0xff] }
 0x14e   :  { %6038 = vmatprep.subr.bf16.mxu0 %v8342_v52  ;;  %6102 = vmatprep.subr.bf16.mxu1 %v8354_v59  ;;  %v12828_v52 = vld [vmem:[#allocation42_spill] sm:$0xff]  ;;  %v12829_v59 = vld [vmem:[#allocation43_spill] sm:$0xff] }
 0x151   :  { %6040 = vmatpush1.bf16.msra.mxu0 %v8374_v14  ;;  %6104 = vmatpush1.bf16.msra.mxu1 %v8378_v16  ;;  %v12830_v14 = vld [vmem:[#allocation44_spill] sm:$0xff]  ;;  %v12831_v16 = vld [vmem:[#allocation45_spill] sm:$0xff] }
 0x152   :  { %6042 = vmatprep.subr.bf16.mxu0 %v8380_v18  ;;  %6106 = vmatprep.subr.bf16.mxu1 %v8392_v33  ;;  %v12832_v18 = vld [vmem:[#allocation46_spill] sm:$0xff]  ;;  %v12833_v33 = vld [vmem:[#allocation47_spill] sm:$0xff] }
 0x155   :  { %6044 = vmatpush1.bf16.msra.mxu0 %v8410_v47  ;;  %6108 = vmatpush1.bf16.msra.mxu1 %v8414_v54  ;;  %v12834_v47 = vld [vmem:[#allocation48_spill] sm:$0xff]  ;;  %v12835_v54 = vld [vmem:[#allocation49_spill] sm:$0xff] }
 0x156   :  { %6046 = vmatprep.subr.bf16.mxu0 %v12790_v15  ;;  %6110 = vmatprep.subr.bf16.mxu1 %v12791_v19 }
 0x159   :  { %6048 = vmatpush1.bf16.msra.mxu0 %v12792_v23  ;;  %6112 = vmatpush1.bf16.msra.mxu1 %v12793_v24 }
 0x15a   :  { %6050 = vmatprep.subr.bf16.mxu0 %v12794_v28  ;;  %6114 = vmatprep.subr.bf16.mxu1 %v12795_v32 }
 0x15d   :  { %6052 = vmatpush1.bf16.msra.mxu0 %v12796_v36  ;;  %6116 = vmatpush1.bf16.msra.mxu1 %v12797_v37  ;;  %v12841_v37 = vld [vmem:[#allocation52_spill] sm:$0xff] }
 0x15e   :  { %6054 = vmatprep.subr.bf16.mxu0 %v12798_v41  ;;  %6118 = vmatprep.subr.bf16.mxu1 %v12799_v45  ;;  %v12842_v41 = vsub.s32 3, %v12841_v37  ;;  %v1474_v37 = vld [vmem:[%s12475_s2 + $0x78] sm:$0xff] }
 0x160   :  { %v9003_v45 = vrot.slane %v367_v6, %v12842_v41 }
 0x161   :  { %6056 = vmatpush1.bf16.msra.mxu0 %v12800_v49  ;;  %6120 = vmatpush1.bf16.msra.mxu1 %v12801_v53  ;;  %v9007_v53 = vrot.slane %v367_v6, %v8866_v22 }
 0x162   :  { %6058 = vmatprep.subr.bf16.mxu0 %v12802_v56  ;;  %6122 = vmatprep.subr.bf16.mxu1 %v12803_v60 }
 0x165   :  { %6060 = vmatpush1.bf16.msra.mxu0 %v12804_v0  ;;  %6124 = vmatpush1.bf16.msra.mxu1 %v12805_v4 }
 0x166   :  { %6062 = vmatprep.subr.bf16.mxu0 %v12806_v7  ;;  %6126 = vmatprep.subr.bf16.mxu1 %v12807_v12 }
 0x169   :  { %6064 = vmatpush1.bf16.msra.mxu0 %v12808_v17  ;;  %6128 = vmatpush1.bf16.msra.mxu1 %v12809_v21 }
 0x16a   :  { %6066 = vmatprep.subr.bf16.mxu0 %v12810_v26  ;;  %6130 = vmatprep.subr.bf16.mxu1 %v12811_v30 }
 0x16d   :  { %6068 = vmatpush1.bf16.msra.mxu0 %v12812_v35  ;;  %6132 = vmatpush1.bf16.msra.mxu1 %v12813_v40 }
 0x16e   :  { %6070 = vmatprep.subr.bf16.mxu0 %v12814_v44  ;;  %6134 = vmatprep.subr.bf16.mxu1 %v12815_v50 }
 0x171   :  { %6072 = vmatpush1.bf16.msra.mxu0 %v12816_v55  ;;  %6136 = vmatpush1.bf16.msra.mxu1 %v12817_v61 }
 0x172   :  { %6074 = vmatprep.subr.bf16.mxu0 %v12818_v1  ;;  %6138 = vmatprep.subr.bf16.mxu1 %v12819_v2  ;;  %v12843_v1 = vld [vmem:[#allocation55_spill] sm:$0xff] }
 0x175   :  { %6076 = vmatpush1.bf16.msra.mxu0 %v12820_v5  ;;  %6140 = vmatpush1.bf16.msra.mxu1 %v12821_v13 }
 0x176   :  { %6078 = vmatprep.subr.bf16.mxu0 %v12822_v25  ;;  %6142 = vmatprep.subr.bf16.mxu1 %v12823_v27  ;;  %v12844_v25 = vld [vmem:[#allocation56_spill] sm:$0xff] }
 0x179   :  { %6080 = vmatpush1.bf16.msra.mxu0 %v12824_v29  ;;  %6144 = vmatpush1.bf16.msra.mxu1 %v12825_v38 }
 0x17a   :  { %6082 = vmatprep.subr.bf16.mxu0 %v12826_v48  ;;  %6146 = vmatprep.subr.bf16.mxu1 %v12827_v51  ;;  %v12845_v48 = vld [vmem:[#allocation57_spill] sm:$0xff] }
 0x17d   :  { %6084 = vmatpush1.bf16.msra.mxu0 %v12828_v52  ;;  %6148 = vmatpush1.bf16.msra.mxu1 %v12829_v59 }
 0x17e   :  { %6086 = vmatprep.subr.bf16.mxu0 %v12830_v14  ;;  %6150 = vmatprep.subr.bf16.mxu1 %v12831_v16 }
 0x181   :  { %6088 = vmatpush1.bf16.msra.mxu0 %v12832_v18  ;;  %6152 = vmatpush1.bf16.msra.mxu1 %v12833_v33 }
 0x182   :  { %6090 = vmatprep.subr.bf16.mxu0 %v12834_v47  ;;  %6154 = vmatprep.subr.bf16.mxu1 %v12835_v54 }
 0x185   :  { %6092 = vmatpush1.bf16.msra.mxu0 %v12836_v57  ;;  %6156 = vmatpush1.bf16.msra.mxu1 %v12837_v63 }
 0x186   :  { %6158 = vmatprep.subr.bf16.mxu0 %v8981_v20  ;;  %6190 = vmatprep.subr.bf16.mxu1 %v8986_v62 }
 0x1fb   :  { %v821_v10 = vpop.f32.mrb[16].mxu0  ;;  %v892_v15 = vpop.f32.mrb[16].mxu1 }
 0x1fc   :  { %v822_v19 = vadd.f32 %v821_v10, %v8994_v46  ;;  %v823_v23 = vpop.f32.mrb[17].mxu0  ;;  %v894_v24 = vpop.f32.mrb[17].mxu1  ;;  %v893_v60 = vadd.f32 %v892_v15, %v9007_v53 }
 0x1fd   :  { %v824_v28 = vadd.f32 %v823_v23, %v8997_v42  ;;  %v895_v49 = vadd.f32 %v894_v24, %v9003_v45  ;;  %v1463_v23 = vld [vmem:[%s12475_s2 + $0x20] sm:$0xff]  ;;  %v1461_v24 = vld [vmem:[%s12475_s2 + $0x10] sm:$0xff] }
 0x1fe   :  { %v5433_v32 = vmul.f32 -1.442695, %v822_v19  ;;  %v1459_v19 = vld [vmem:[%s12475_s2] sm:$0xff] }
 0x1ff   :  { %v5434_v36 = vmul.f32 -1.442695, %v824_v28  ;;  %v5435_v56 = vmul.f32 -1.442695, %v895_v49  ;;  %v1468_v28 = vld [vmem:[%s12475_s2 + $0x48] sm:$0xff] }
 0x200   :  { %7560 = vpow2.f32 %v5433_v32  ;;  %v1472_v32 = vld [vmem:[%s12475_s2 + $0x68] sm:$0xff] }
 0x201   :  { %7562 = vpow2.f32 %v5434_v36  ;;  %v1470_v36 = vld [vmem:[%s12475_s2 + $0x58] sm:$0xff] }
 0x202   :  { %7564 = vpow2.f32 %v5435_v56  ;;  %v9049_v56 = vpack.c.bf16 %v1463_v23, %v1459_v19 }
 0x203   :  { %7566 = vtanh.f32 %v893_v60 }
 0x20a   :  { %v7561_v0 = vpop.eup %7560 }
 0x20b   :  { %v7563_v4 = vpop.eup %7562  ;;  %v900_v7 = vadd.f32 1.0, %v7561_v0  ;;  %v1467_v0 = vld [vmem:[%s12475_s2 + $0x40] sm:$0xff] }
 0x20c   :  { %v906_v12 = vadd.f32 1.0, %v7563_v4  ;;  %v7565_v17 = vpop.eup %7564  ;;  %v1471_v4 = vld [vmem:[%s12475_s2 + $0x60] sm:$0xff] }
 0x20d   :  { %7568 = vrcp.f32 %v900_v7  ;;  %v7567_v21 = vpop.eup %7566  ;;  %v913_v40 = vadd.f32 1.0, %v7565_v17  ;;  %v9063_v17 = vpack.c.bf16 %v1474_v37, %v1470_v36  ;;  %v1493_v36 = vld [vmem:[%s12475_s2 + $0x110] sm:$0xff] }
 0x20e   :  { %7570 = vrcp.f32 %v906_v12  ;;  %v9061_v12 = vpack.c.bf16 %v1472_v32, %v1468_v28  ;;  %v1497_v37 = vld [vmem:[%s12475_s2 + $0x130] sm:$0xff] }
 0x20f   :  { %7572 = vrcp.f32 %v913_v40  ;;  %v1478_v40 = vld [vmem:[%s12475_s2 + $0x98] sm:$0xff] }
 0x217   :  { %v7569_v26 = vpop.eup %7568 }
 0x218   :  { %v7571_v30 = vpop.eup %7570  ;;  %v917_v35 = vmul.f32 %v7569_v26, %v7567_v21  ;;  %v1469_v21 = vld [vmem:[%s12475_s2 + $0x50] sm:$0xff] }
 0x219   :  { %v916_v44 = vmul.f32 0.0, %v7571_v30  ;;  %v7573_v52 = vpop.eup %7572  ;;  %v1473_v26 = vld [vmem:[%s12475_s2 + $0x70] sm:$0xff]  ;;  %v1476_v30 = vld [vmem:[%s12475_s2 + $0x88] sm:$0xff] }
 0x21b   :  { %v9010_v50 = vadd.f32 %v917_v35, %v916_v44  ;;  %v1056_v55 = vpop.f32.mrb[2].mxu0  ;;  %v1127_v61 = vpop.f32.mrb[2].mxu1  ;;  %v1480_v35 = vld [vmem:[%s12475_s2 + $0xa8] sm:$0xff]  ;;  %v1482_v44 = vld [vmem:[%s12475_s2 + $0xb8] sm:$0xff] }
 0x21c   :  { %v7479_v2 = vadd.f32 %v1056_v55, %v12843_v1  ;;  %v1058_v5 = vpop.f32.mrb[3].mxu0  ;;  %v1129_v13 = vpop.f32.mrb[3].mxu1  ;;  %v7495_v16 = vadd.f32 %v1127_v61, %v8870_v11  ;;  %v9087_v55 = vpack.c.bf16 %v1471_v4, %v1467_v0  ;;  %v9089_v61 = vpack.c.bf16 %v1473_v26, %v1469_v21  ;;  %v1502_v0 = vld [vmem:[%s12475_s2 + $0x158] sm:$0xff] }
 0x21d   :  { %7574 = vtanh.f32 %v9010_v50  ;;  %v7480_v27 = vadd.f32 %v1058_v5, %v12844_v25  ;;  %v7496_v51 = vadd.f32 %v1129_v13, %v12845_v48  ;;  %v1479_v5 = vld [vmem:[%s12475_s2 + $0xa0] sm:$0xff]  ;;  %v9099_v13 = vpack.c.bf16 %v1480_v35, %v1476_v30  ;;  %v1506_v4 = vld [vmem:[%s12475_s2 + $0x178] sm:$0xff] }
 0x21e   :  { %v5436_v29 = vmul.f32 -1.442695, %v7479_v2  ;;  %v1475_v2 = vld [vmem:[%s12475_s2 + $0x80] sm:$0xff]  ;;  %v9199_v26 = vpack.c.bf16 %v1497_v37, %v1493_v36 }
 0x21f   :  { %v5437_v38 = vmul.f32 -1.442695, %v7480_v27  ;;  %v5438_v14 = vmul.f32 -1.442695, %v7496_v51  ;;  %v9101_v27 = vpack.c.bf16 %v1482_v44, %v1478_v40  ;;  %v1484_v51 = vld [vmem:[%s12475_s2 + $0xc8] sm:$0xff]  ;;  %v1499_v30 = vld [vmem:[%s12475_s2 + $0x140] sm:$0xff]  ;;  %v9211_v44 = vpack.c.bf16 %v1506_v4, %v1502_v0 }
 0x220   :  { %7576 = vpow2.f32 %v5436_v29  ;;  %v1477_v29 = vld [vmem:[%s12475_s2 + $0x90] sm:$0xff]  ;;  %v1503_v35 = vld [vmem:[%s12475_s2 + $0x160] sm:$0xff] }
 0x221   :  { %7578 = vpow2.f32 %v5437_v38  ;;  %v1481_v38 = vld [vmem:[%s12475_s2 + $0xb0] sm:$0xff]  ;;  %v1519_v4 = vld [vmem:[%s12475_s2 + $0x1e0] sm:$0xff] }
 0x222   :  { %7580 = vpow2.f32 %v5438_v14  ;;  %v1490_v14 = vld [vmem:[%s12475_s2 + $0xf8] sm:$0xff] }
 0x223   :  { %7582 = vtanh.f32 %v7495_v16  ;;  %v9125_v16 = vpack.c.bf16 %v1479_v5, %v1475_v2  ;;  %v1501_v2 = vld [vmem:[%s12475_s2 + $0x150] sm:$0xff] }
 0x224   :  { %v1505_v5 = vld [vmem:[%s12475_s2 + $0x170] sm:$0xff] }
 0x227   :  { %v7575_v59 = vpop.eup %7574 }
 0x228   :  { %v9017_v18 = vmul.f32 %v7575_v59, %v7573_v52  ;;  %v1488_v52 = vld [vmem:[%s12475_s2 + $0xe8] sm:$0xff]  ;;  %v1486_v59 = vld [vmem:[%s12475_s2 + $0xd8] sm:$0xff] }
 0x22a   :  { %12846 = vst [vmem:[#allocation5_spill] sm:$0xff] %v9017_v18  ;;  %v7577_v33 = vpop.eup %7576  ;;  %1352 = vmatprep.mubr.f32.mxu0 %v9017_v18  ;;  %1423 = vmatprep.mubr.f32.mxu1 %v9017_v18 }
 0x22b   :  { %v7579_v47 = vpop.eup %7578  ;;  %v1139_v54 = vadd.f32 1.0, %v7577_v33  ;;  %v9127_v33 = vpack.c.bf16 %v1481_v38, %v1477_v29  ;;  %v1508_v29 = vld [vmem:[%s12475_s2 + $0x188] sm:$0xff] }
 0x22c   :  { %v1145_v57 = vadd.f32 1.0, %v7579_v47  ;;  %v7581_v63 = vpop.eup %7580  ;;  %v1483_v47 = vld [vmem:[%s12475_s2 + $0xc0] sm:$0xff]  ;;  %v1512_v38 = vld [vmem:[%s12475_s2 + $0x1a8] sm:$0xff] }
 0x22d   :  { %7584 = vrcp.f32 %v1139_v54  ;;  %v7583_v9 = vpop.eup %7582  ;;  %v1152_v6 = vadd.f32 1.0, %v7581_v63  ;;  %v1487_v54 = vld [vmem:[%s12475_s2 + $0xe0] sm:$0xff]  ;;  %v9139_v63 = vpack.c.bf16 %v1490_v14, %v1486_v59  ;;  %v9233_v59 = vpack.c.bf16 %v1503_v35, %v1499_v30  ;;  %v1517_v30 = vld [vmem:[%s12475_s2 + $0x1d0] sm:$0xff] }
 0x22e   :  { %7586 = vrcp.f32 %v1145_v57  ;;  %v9137_v57 = vpack.c.bf16 %v1488_v52, %v1484_v51  ;;  %v9161_v19 = vpack.c.bf16 %v1487_v54, %v1483_v47  ;;  %v1510_v51 = vld [vmem:[%s12475_s2 + $0x198] sm:$0xff]  ;;  %v9235_v14 = vpack.c.bf16 %v1505_v5, %v1501_v2  ;;  %v1507_v47 = vld [vmem:[%s12475_s2 + $0x180] sm:$0xff]  ;;  %v1521_v35 = vld [vmem:[%s12475_s2 + $0x1f0] sm:$0xff] }
 0x22f   :  { %7588 = vrcp.f32 %v1152_v6  ;;  %v1494_v6 = vld [vmem:[%s12475_s2 + $0x118] sm:$0xff]  ;;  %v1511_v54 = vld [vmem:[%s12475_s2 + $0x1a0] sm:$0xff]  ;;  %v9295_v5 = vpack.c.bf16 %v1521_v35, %v1517_v30 }
 0x230   :  { %v1514_v52 = vld [vmem:[%s12475_s2 + $0x1b8] sm:$0xff]  ;;  %v9269_v36 = vpack.c.bf16 %v1511_v54, %v1507_v47  ;;  %v1697_v54 = vld [vmem:[%s12476_s4 + $0x20] sm:$0xff] }
 0x231   :  { %v1700_v47 = vld [vmem:[%s12476_s4 + $0x38] sm:$0xff] }
 0x232   :  { %v1708_v35 = vld [vmem:[%s12476_s4 + $0x78] sm:$0xff] }
 0x237   :  { %v7585_v31 = vpop.eup %7584 }
 0x238   :  { %v7587_v8 = vpop.eup %7586  ;;  %v1156_v58 = vmul.f32 %v7585_v31, %v7583_v9  ;;  %v1485_v9 = vld [vmem:[%s12475_s2 + $0xd0] sm:$0xff] }
 0x239   :  { %v1155_v10 = vmul.f32 %v7587_v8, %v8873_v39  ;;  %v1465_v39 = vld [vmem:[%s12475_s2 + $0x30] sm:$0xff]  ;;  %v7589_v41 = vpop.eup %7588  ;;  %v1492_v8 = vld [vmem:[%s12475_s2 + $0x108] sm:$0xff] }
 0x23a   :  { %v9051_v60 = vpack.c.bf16 %v1465_v39, %v1461_v24  ;;  %v1489_v31 = vld [vmem:[%s12475_s2 + $0xf0] sm:$0xff]  ;;  %v1491_v24 = vld [vmem:[%s12475_s2 + $0x100] sm:$0xff] }
 0x23b   :  { %v9022_v15 = vadd.f32 %v1156_v58, %v1155_v10  ;;  %v1496_v58 = vld [vmem:[%s12475_s2 + $0x128] sm:$0xff]  ;;  %v1498_v10 = vld [vmem:[%s12475_s2 + $0x138] sm:$0xff]  ;;  %v9163_v23 = vpack.c.bf16 %v1489_v31, %v1485_v9  ;;  %v1495_v39 = vld [vmem:[%s12475_s2 + $0x120] sm:$0xff]  ;;  %v9245_v9 = vpack.c.bf16 %v1512_v38, %v1508_v29  ;;  %v9247_v31 = vpack.c.bf16 %v1514_v52, %v1510_v51 }
 0x23c   :  { %v9173_v28 = vpack.c.bf16 %v1496_v58, %v1492_v8  ;;  %v9175_v32 = vpack.c.bf16 %v1498_v10, %v1494_v6  ;;  %v9197_v21 = vpack.c.bf16 %v1495_v39, %v1491_v24  ;;  %v1509_v8 = vld [vmem:[%s12475_s2 + $0x190] sm:$0xff]  ;;  %v1516_v6 = vld [vmem:[%s12475_s2 + $0x1c8] sm:$0xff]  ;;  %v1518_v24 = vld [vmem:[%s12475_s2 + $0x1d8] sm:$0xff] }
 0x23d   :  { %7590 = vtanh.f32 %v9022_v15  ;;  %v1513_v58 = vld [vmem:[%s12475_s2 + $0x1b0] sm:$0xff]  ;;  %v1520_v10 = vld [vmem:[%s12475_s2 + $0x1e8] sm:$0xff]  ;;  %v1522_v39 = vld [vmem:[%s12475_s2 + $0x1f8] sm:$0xff] }
 0x23e   :  { %v9271_v37 = vpack.c.bf16 %v1513_v58, %v1509_v8  ;;  %v9280_v0 = vpack.c.bf16 %v1522_v39, %v1518_v24  ;;  %v1694_v29 = vld [vmem:[%s12476_s4 + $0x8] sm:$0xff]  ;;  %v1696_v51 = vld [vmem:[%s12476_s4 + $0x18] sm:$0xff] }
 0x23f   :  { %v1698_v38 = vld [vmem:[%s12476_s4 + $0x28] sm:$0xff]  ;;  %v9323_v8 = vpack.c.bf16 %v1700_v47, %v1696_v51 }
 0x240   :  { %v9312_v52 = vpack.c.bf16 %v1698_v38, %v1694_v29  ;;  %v1702_v39 = vld [vmem:[%s12476_s4 + $0x48] sm:$0xff]  ;;  %v1701_v29 = vld [vmem:[%s12476_s4 + $0x40] sm:$0xff] }
 0x241   :  { %v1705_v38 = vld [vmem:[%s12476_s4 + $0x60] sm:$0xff] }
 0x242   :  { %v9361_v47 = vpack.c.bf16 %v1705_v38, %v1701_v29  ;;  %v1709_v29 = vld [vmem:[%s12476_s4 + $0x80] sm:$0xff] }
 0x243   :  { %v1713_v38 = vld [vmem:[%s12476_s4 + $0xa0] sm:$0xff] }
 0x247   :  { %v7591_v49 = vpop.eup %7590 }
 0x248   :  { %v9059_v7 = vmul.f32 %v7591_v49, %v7589_v41  ;;  %v1500_v41 = vld [vmem:[%s12475_s2 + $0x148] sm:$0xff] }
 0x249   :  { %v1504_v49 = vld [vmem:[%s12475_s2 + $0x168] sm:$0xff] }
 0x24a   :  { %1353 = vmatmul.mubr.f32.vlgmr.msra.gmra.mrb[18].mxu0 %v9059_v7  ;;  %1424 = vmatmul.mubr.f32.vlgmr.msra.gmra.mrb[18].mxu1 %v9059_v7  ;;  %v9209_v40 = vpack.c.bf16 %v1504_v49, %v1500_v41  ;;  %v1515_v41 = vld [vmem:[%s12475_s2 + $0x1c0] sm:$0xff]  ;;  %v9278_v49 = vpack.c.bf16 %v1520_v10, %v1516_v6  ;;  %v1695_v6 = vld [vmem:[%s12476_s4 + $0x10] sm:$0xff] }
 0x24b   :  { %6160 = vmatpush1.bf16.msra.mxu0 %v9049_v56  ;;  %6192 = vmatpush1.bf16.msra.mxu1 %v9051_v60  ;;  %v9293_v2 = vpack.c.bf16 %v1519_v4, %v1515_v41  ;;  %v1699_v10 = vld [vmem:[%s12476_s4 + $0x30] sm:$0xff]  ;;  %v1706_v41 = vld [vmem:[%s12476_s4 + $0x68] sm:$0xff]  ;;  %v1704_v4 = vld [vmem:[%s12476_s4 + $0x58] sm:$0xff] }
 0x24c   :  { %6162 = vmatprep.subr.bf16.mxu0 %v9061_v12  ;;  %6194 = vmatprep.subr.bf16.mxu1 %v9063_v17  ;;  %v9334_v24 = vpack.c.bf16 %v1699_v10, %v1695_v6  ;;  %v9348_v30 = vpack.c.bf16 %v1706_v41, %v1702_v39  ;;  %v9359_v51 = vpack.c.bf16 %v1708_v35, %v1704_v4  ;;  %v1710_v10 = vld [vmem:[%s12476_s4 + $0x88] sm:$0xff]  ;;  %v1712_v41 = vld [vmem:[%s12476_s4 + $0x98] sm:$0xff] }
 0x24d   :  { %1587 = vmatprep.mubr.f32.mxu0 %v12789_v3  ;;  %1658 = vmatprep.mubr.f32.mxu1 %v12789_v3  ;;  %v1714_v39 = vld [vmem:[%s12476_s4 + $0xa8] sm:$0xff]  ;;  %v1716_v35 = vld [vmem:[%s12476_s4 + $0xb8] sm:$0xff] }
 0x24e   :  { %v9384_v4 = vpack.c.bf16 %v1714_v39, %v1710_v10  ;;  %v1711_v10 = vld [vmem:[%s12476_s4 + $0x90] sm:$0xff] }
 0x24f   :  { %6164 = vmatpush1.bf16.msra.mxu0 %v9087_v55  ;;  %6196 = vmatpush1.bf16.msra.mxu1 %v9089_v61  ;;  %v1715_v39 = vld [vmem:[%s12476_s4 + $0xb0] sm:$0xff] }
 0x250   :  { %6166 = vmatprep.subr.bf16.mxu0 %v9099_v13  ;;  %6198 = vmatprep.subr.bf16.mxu1 %v9101_v27  ;;  %12847 = vst [vmem:[#allocation6_spill] sm:$0xff] %v9384_v4  ;;  %v9406_v34 = vpack.c.bf16 %v1715_v39, %v1711_v10  ;;  %v1724_v10 = vld [vmem:[%s12476_s4 + $0xf8] sm:$0xff]  ;;  %v1717_v39 = vld [vmem:[%s12476_s4 + $0xc0] sm:$0xff] }
 0x251   :  { %v9433_v18 = vpack.c.bf16 %v1721_v43, %v1717_v39  ;;  %v1726_v43 = vld [vmem:[%s12476_s4 + $0x108] sm:$0xff] }
 0x252   :  { %12850 = vst [vmem:[#allocation9_spill] sm:$0xff] %v9406_v34 }
 0x253   :  { %6168 = vmatpush1.bf16.msra.mxu0 %v9125_v16  ;;  %6200 = vmatpush1.bf16.msra.mxu1 %v9127_v33  ;;  %12853 = vst [vmem:[#allocation12_spill] sm:$0xff] %v9433_v18 }
 0x254   :  { %6170 = vmatprep.subr.bf16.mxu0 %v9137_v57  ;;  %6202 = vmatprep.subr.bf16.mxu1 %v9139_v63 }
 0x257   :  { %6172 = vmatpush1.bf16.msra.mxu0 %v9161_v19  ;;  %6204 = vmatpush1.bf16.msra.mxu1 %v9163_v23 }
 0x258   :  { %6174 = vmatprep.subr.bf16.mxu0 %v9173_v28  ;;  %6206 = vmatprep.subr.bf16.mxu1 %v9175_v32 }
 0x25b   :  { %6176 = vmatpush1.bf16.msra.mxu0 %v9197_v21  ;;  %6208 = vmatpush1.bf16.msra.mxu1 %v9199_v26 }
 0x25c   :  { %6178 = vmatprep.subr.bf16.mxu0 %v9209_v40  ;;  %6210 = vmatprep.subr.bf16.mxu1 %v9211_v44 }
 0x25f   :  { %6180 = vmatpush1.bf16.msra.mxu0 %v9233_v59  ;;  %6212 = vmatpush1.bf16.msra.mxu1 %v9235_v14 }
 0x260   :  { %6182 = vmatprep.subr.bf16.mxu0 %v9245_v9  ;;  %6214 = vmatprep.subr.bf16.mxu1 %v9247_v31 }
 0x263   :  { %6184 = vmatpush1.bf16.msra.mxu0 %v9269_v36  ;;  %6216 = vmatpush1.bf16.msra.mxu1 %v9271_v37 }
 0x264   :  { %6186 = vmatprep.subr.bf16.mxu0 %v9278_v49  ;;  %6218 = vmatprep.subr.bf16.mxu1 %v9280_v0 }
 0x267   :  { %6188 = vmatpush1.bf16.msra.mxu0 %v9293_v2  ;;  %6220 = vmatpush1.bf16.msra.mxu1 %v9295_v5 }
 0x268   :  { %6222 = vmatprep.subr.bf16.mxu0 %v9312_v52  ;;  %6286 = vmatprep.subr.bf16.mxu1 %v9323_v8 }
 0x26a   :  { %1588 = vmatmul.mubr.f32.vlgmr.msra.gmra.mrb[4].mxu0 %v9059_v7  ;;  %1659 = vmatmul.mubr.f32.vlgmr.msra.gmra.mrb[4].mxu1 %v9059_v7  ;;  %v1693_v7 = vld [vmem:[%s12476_s4] sm:$0xff] }
 0x26b   :  { %v9325_v58 = vpack.c.bf16 %v1697_v54, %v1693_v7  ;;  %6288 = vmatpush1.bf16.msra.mxu1 %v9334_v24  ;;  %v1703_v7 = vld [vmem:[%s12476_s4 + $0x50] sm:$0xff] }
 0x26c   :  { %v1707_v54 = vld [vmem:[%s12476_s4 + $0x70] sm:$0xff]  ;;  %6290 = vmatprep.subr.bf16.mxu1 %v9359_v51 }
 0x26d   :  { %6224 = vmatpush1.bf16.msra.mxu0 %v9325_v58  ;;  %v9370_v6 = vpack.c.bf16 %v1707_v54, %v1703_v7  ;;  %v9395_v7 = vpack.c.bf16 %v1716_v35, %v1712_v41  ;;  %v9397_v54 = vpack.c.bf16 %v1713_v38, %v1709_v29  ;;  %v1718_v41 = vld [vmem:[%s12476_s4 + $0xc8] sm:$0xff]  ;;  %v1720_v29 = vld [vmem:[%s12476_s4 + $0xd8] sm:$0xff] }
 0x26e   :  { %6226 = vmatprep.subr.bf16.mxu0 %v9348_v30  ;;  %v1722_v35 = vld [vmem:[%s12476_s4 + $0xe8] sm:$0xff]  ;;  %v9431_v22 = vpack.c.bf16 %v1724_v10, %v1720_v29  ;;  %v1728_v10 = vld [vmem:[%s12476_s4 + $0x118] sm:$0xff] }
 0x26f   :  { %6292 = vmatpush1.bf16.msra.mxu1 %v9370_v6  ;;  %12848 = vst [vmem:[#allocation7_spill] sm:$0xff] %v9395_v7  ;;  %12849 = vst [vmem:[#allocation8_spill] sm:$0xff] %v9397_v54  ;;  %v9420_v38 = vpack.c.bf16 %v1722_v35, %v1718_v41  ;;  %v1719_v41 = vld [vmem:[%s12476_s4 + $0xd0] sm:$0xff]  ;;  %v1730_v29 = vld [vmem:[%s12476_s4 + $0x128] sm:$0xff] }
 0x270   :  { %6294 = vmatprep.subr.bf16.mxu1 %v9395_v7  ;;  %12852 = vst [vmem:[#allocation11_spill] sm:$0xff] %v9431_v22  ;;  %v1723_v35 = vld [vmem:[%s12476_s4 + $0xf0] sm:$0xff]  ;;  %v9456_v39 = vpack.c.bf16 %v1730_v29, %v1726_v43 }
 0x271   :  { %6228 = vmatpush1.bf16.msra.mxu0 %v9361_v47  ;;  %12851 = vst [vmem:[#allocation10_spill] sm:$0xff] %v9420_v38  ;;  %v1727_v43 = vld [vmem:[%s12476_s4 + $0x110] sm:$0xff] }
 0x272   :  { %6230 = vmatprep.subr.bf16.mxu0 %v9384_v4  ;;  %12855 = vst [vmem:[#allocation14_spill] sm:$0xff] %v9456_v39  ;;  %v1731_v29 = vld [vmem:[%s12476_s4 + $0x130] sm:$0xff] }
 0x273   :  { %6296 = vmatpush1.bf16.msra.mxu1 %v9406_v34  ;;  %v9442_v34 = vpack.c.bf16 %v1723_v35, %v1719_v41  ;;  %v1732_v41 = vld [vmem:[%s12476_s4 + $0x138] sm:$0xff]  ;;  %v1725_v35 = vld [vmem:[%s12476_s4 + $0x100] sm:$0xff]  ;;  %v1807_v7 = vld [vmem:[%s12476_s4 + $0x390] sm:$0xff] }
 0x274   :  { %6298 = vmatprep.subr.bf16.mxu1 %v9431_v22  ;;  %v9467_v22 = vpack.c.bf16 %v1732_v41, %v1728_v10  ;;  %v1738_v10 = vld [vmem:[%s12476_s4 + $0x168] sm:$0xff]  ;;  %v1736_v41 = vld [vmem:[%s12476_s4 + $0x158] sm:$0xff] }
 0x275   :  { %6232 = vmatpush1.bf16.msra.mxu0 %v9397_v54  ;;  %12854 = vst [vmem:[#allocation13_spill] sm:$0xff] %v9442_v34 }
 0x276   :  { %6234 = vmatprep.subr.bf16.mxu0 %v9420_v38  ;;  %12856 = vst [vmem:[#allocation15_spill] sm:$0xff] %v9467_v22 }
 0x277   :  { %6300 = vmatpush1.bf16.msra.mxu1 %v9442_v34  ;;  %v9478_v34 = vpack.c.bf16 %v1731_v29, %v1727_v43  ;;  %v1740_v43 = vld [vmem:[%s12476_s4 + $0x178] sm:$0xff]  ;;  %v1733_v29 = vld [vmem:[%s12476_s4 + $0x140] sm:$0xff] }
 0x278   :  { %6302 = vmatprep.subr.bf16.mxu1 %v9467_v22 }
 0x279   :  { %6236 = vmatpush1.bf16.msra.mxu0 %v9433_v18  ;;  %v1729_v18 = vld [vmem:[%s12476_s4 + $0x120] sm:$0xff]  ;;  %12858 = vst [vmem:[#allocation17_spill] sm:$0xff] %v9478_v34 }
 0x27a   :  { %v9469_v38 = vpack.c.bf16 %v1729_v18, %v1725_v35  ;;  %6238 = vmatprep.subr.bf16.mxu0 %v9456_v39  ;;  %v1734_v18 = vld [vmem:[%s12476_s4 + $0x148] sm:$0xff] }
 0x27b   :  { %6304 = vmatpush1.bf16.msra.mxu1 %v9478_v34  ;;  %v9492_v35 = vpack.c.bf16 %v1738_v10, %v1734_v18  ;;  %v1737_v34 = vld [vmem:[%s12476_s4 + $0x160] sm:$0xff]  ;;  %v1735_v18 = vld [vmem:[%s12476_s4 + $0x150] sm:$0xff] }
 0x27c   :  { %12857 = vst [vmem:[#allocation16_spill] sm:$0xff] %v9469_v38  ;;  %v9505_v22 = vpack.c.bf16 %v1737_v34, %v1733_v29  ;;  %v1739_v10 = vld [vmem:[%s12476_s4 + $0x170] sm:$0xff]  ;;  %v1742_v34 = vld [vmem:[%s12476_s4 + $0x188] sm:$0xff] }
 0x27d   :  { %6240 = vmatpush1.bf16.msra.mxu0 %v9469_v38  ;;  %12859 = vst [vmem:[#allocation18_spill] sm:$0xff] %v9492_v35  ;;  %v9503_v38 = vpack.c.bf16 %v1740_v43, %v1736_v41  ;;  %v9514_v39 = vpack.c.bf16 %v1739_v10, %v1735_v18  ;;  %v1746_v41 = vld [vmem:[%s12476_s4 + $0x1a8] sm:$0xff]  ;;  %v1744_v43 = vld [vmem:[%s12476_s4 + $0x198] sm:$0xff]  ;;  %v1741_v10 = vld [vmem:[%s12476_s4 + $0x180] sm:$0xff] }
 0x27e   :  { %12861 = vst [vmem:[#allocation20_spill] sm:$0xff] %v9505_v22  ;;  %6242 = vmatprep.subr.bf16.mxu0 %v9492_v35  ;;  %v9528_v29 = vpack.c.bf16 %v1746_v41, %v1742_v34  ;;  %v1748_v18 = vld [vmem:[%s12476_s4 + $0x1b8] sm:$0xff]  ;;  %v1743_v34 = vld [vmem:[%s12476_s4 + $0x190] sm:$0xff] }
 0x27f   :  { %12860 = vst [vmem:[#allocation19_spill] sm:$0xff] %v9503_v38  ;;  %12862 = vst [vmem:[#allocation21_spill] sm:$0xff] %v9514_v39  ;;  %6306 = vmatprep.subr.bf16.mxu1 %v9503_v38  ;;  %v9539_v38 = vpack.c.bf16 %v1748_v18, %v1744_v43  ;;  %v1747_v41 = vld [vmem:[%s12476_s4 + $0x1b0] sm:$0xff]  ;;  %v1754_v43 = vld [vmem:[%s12476_s4 + $0x1e8] sm:$0xff] }
 0x280   :  { %6308 = vmatpush1.bf16.msra.mxu1 %v9514_v39  ;;  %12863 = vst [vmem:[#allocation22_spill] sm:$0xff] %v9528_v29  ;;  %v9550_v39 = vpack.c.bf16 %v1747_v41, %v1743_v34  ;;  %v1752_v18 = vld [vmem:[%s12476_s4 + $0x1d8] sm:$0xff]  ;;  %v1749_v41 = vld [vmem:[%s12476_s4 + $0x1c0] sm:$0xff] }
 0x281   :  { %6244 = vmatpush1.bf16.msra.mxu0 %v9505_v22  ;;  %v1745_v22 = vld [vmem:[%s12476_s4 + $0x1a0] sm:$0xff]  ;;  %12864 = vst [vmem:[#allocation23_spill] sm:$0xff] %v9539_v38  ;;  %6310 = vmatprep.subr.bf16.mxu1 %v9539_v38  ;;  %v1756_v34 = vld [vmem:[%s12476_s4 + $0x1f8] sm:$0xff] }
 0x282   :  { %v9541_v35 = vpack.c.bf16 %v1745_v22, %v1741_v10  ;;  %6246 = vmatprep.subr.bf16.mxu0 %v9528_v29  ;;  %12866 = vst [vmem:[#allocation25_spill] sm:$0xff] %v9550_v39  ;;  %v1750_v22 = vld [vmem:[%s12476_s4 + $0x1c8] sm:$0xff]  ;;  %v9575_v38 = vpack.c.bf16 %v1756_v34, %v1752_v18  ;;  %v1760_v34 = vld [vmem:[%s12476_s4 + $0x218] sm:$0xff] }
 0x283   :  { %v9564_v10 = vpack.c.bf16 %v1754_v43, %v1750_v22  ;;  %v1751_v22 = vld [vmem:[%s12476_s4 + $0x1d0] sm:$0xff]  ;;  %v1762_v18 = vld [vmem:[%s12476_s4 + $0x228] sm:$0xff] }
 0x284   :  { %12865 = vst [vmem:[#allocation24_spill] sm:$0xff] %v9541_v35  ;;  %6312 = vmatpush1.bf16.msra.mxu1 %v9550_v39  ;;  %12868 = vst [vmem:[#allocation27_spill] sm:$0xff] %v9575_v38  ;;  %v1755_v43 = vld [vmem:[%s12476_s4 + $0x1f0] sm:$0xff] }
 0x285   :  { %6248 = vmatpush1.bf16.msra.mxu0 %v9541_v35  ;;  %12867 = vst [vmem:[#allocation26_spill] sm:$0xff] %v9564_v10  ;;  %v1753_v35 = vld [vmem:[%s12476_s4 + $0x1e0] sm:$0xff]  ;;  %v9586_v39 = vpack.c.bf16 %v1755_v43, %v1751_v22  ;;  %6314 = vmatprep.subr.bf16.mxu1 %v9575_v38  ;;  %v1764_v22 = vld [vmem:[%s12476_s4 + $0x238] sm:$0xff] }
 0x286   :  { %v9577_v29 = vpack.c.bf16 %v1753_v35, %v1749_v41  ;;  %6250 = vmatprep.subr.bf16.mxu0 %v9564_v10  ;;  %v1758_v35 = vld [vmem:[%s12476_s4 + $0x208] sm:$0xff]  ;;  %v1757_v43 = vld [vmem:[%s12476_s4 + $0x200] sm:$0xff]  ;;  %v9611_v38 = vpack.c.bf16 %v1764_v22, %v1760_v34  ;;  %v1768_v22 = vld [vmem:[%s12476_s4 + $0x258] sm:$0xff] }
 0x287   :  { %12870 = vst [vmem:[#allocation29_spill] sm:$0xff] %v9586_v39  ;;  %v9600_v41 = vpack.c.bf16 %v1762_v18, %v1758_v35  ;;  %v1759_v35 = vld [vmem:[%s12476_s4 + $0x210] sm:$0xff]  ;;  %v1770_v34 = vld [vmem:[%s12476_s4 + $0x268] sm:$0xff] }
 0x288   :  { %12869 = vst [vmem:[#allocation28_spill] sm:$0xff] %v9577_v29  ;;  %6316 = vmatpush1.bf16.msra.mxu1 %v9586_v39  ;;  %12872 = vst [vmem:[#allocation31_spill] sm:$0xff] %v9611_v38  ;;  %v1763_v18 = vld [vmem:[%s12476_s4 + $0x230] sm:$0xff] }
 0x289   :  { %6252 = vmatpush1.bf16.msra.mxu0 %v9577_v29  ;;  %12871 = vst [vmem:[#allocation30_spill] sm:$0xff] %v9600_v41  ;;  %v1761_v29 = vld [vmem:[%s12476_s4 + $0x220] sm:$0xff]  ;;  %v9622_v39 = vpack.c.bf16 %v1763_v18, %v1759_v35  ;;  %6318 = vmatprep.subr.bf16.mxu1 %v9611_v38  ;;  %v1772_v35 = vld [vmem:[%s12476_s4 + $0x278] sm:$0xff] }
 0x28a   :  { %v9613_v10 = vpack.c.bf16 %v1761_v29, %v1757_v43  ;;  %6254 = vmatprep.subr.bf16.mxu0 %v9600_v41  ;;  %v1766_v29 = vld [vmem:[%s12476_s4 + $0x248] sm:$0xff]  ;;  %v1765_v18 = vld [vmem:[%s12476_s4 + $0x240] sm:$0xff]  ;;  %v9647_v38 = vpack.c.bf16 %v1772_v35, %v1768_v22  ;;  %v1776_v35 = vld [vmem:[%s12476_s4 + $0x298] sm:$0xff] }
 0x28b   :  { %12874 = vst [vmem:[#allocation33_spill] sm:$0xff] %v9622_v39  ;;  %v9636_v43 = vpack.c.bf16 %v1770_v34, %v1766_v29  ;;  %v1767_v29 = vld [vmem:[%s12476_s4 + $0x250] sm:$0xff]  ;;  %v1778_v22 = vld [vmem:[%s12476_s4 + $0x2a8] sm:$0xff] }
 0x28c   :  { %12873 = vst [vmem:[#allocation32_spill] sm:$0xff] %v9613_v10  ;;  %6320 = vmatpush1.bf16.msra.mxu1 %v9622_v39  ;;  %12876 = vst [vmem:[#allocation35_spill] sm:$0xff] %v9647_v38  ;;  %v1771_v34 = vld [vmem:[%s12476_s4 + $0x270] sm:$0xff] }
 0x28d   :  { %6256 = vmatpush1.bf16.msra.mxu0 %v9613_v10  ;;  %12875 = vst [vmem:[#allocation34_spill] sm:$0xff] %v9636_v43  ;;  %v1769_v10 = vld [vmem:[%s12476_s4 + $0x260] sm:$0xff]  ;;  %v9658_v39 = vpack.c.bf16 %v1771_v34, %v1767_v29  ;;  %6322 = vmatprep.subr.bf16.mxu1 %v9647_v38  ;;  %v1780_v29 = vld [vmem:[%s12476_s4 + $0x2b8] sm:$0xff] }
 0x28e   :  { %v9649_v41 = vpack.c.bf16 %v1769_v10, %v1765_v18  ;;  %6258 = vmatprep.subr.bf16.mxu0 %v9636_v43  ;;  %v1774_v10 = vld [vmem:[%s12476_s4 + $0x288] sm:$0xff]  ;;  %v1773_v34 = vld [vmem:[%s12476_s4 + $0x280] sm:$0xff]  ;;  %v9683_v38 = vpack.c.bf16 %v1780_v29, %v1776_v35  ;;  %v1784_v29 = vld [vmem:[%s12476_s4 + $0x2d8] sm:$0xff] }
 0x28f   :  { %12878 = vst [vmem:[#allocation37_spill] sm:$0xff] %v9658_v39  ;;  %v9672_v18 = vpack.c.bf16 %v1778_v22, %v1774_v10  ;;  %v1775_v10 = vld [vmem:[%s12476_s4 + $0x290] sm:$0xff]  ;;  %v1786_v35 = vld [vmem:[%s12476_s4 + $0x2e8] sm:$0xff] }
 0x290   :  { %12877 = vst [vmem:[#allocation36_spill] sm:$0xff] %v9649_v41  ;;  %6324 = vmatpush1.bf16.msra.mxu1 %v9658_v39  ;;  %12880 = vst [vmem:[#allocation39_spill] sm:$0xff] %v9683_v38  ;;  %v1779_v22 = vld [vmem:[%s12476_s4 + $0x2b0] sm:$0xff] }
 0x291   :  { %6260 = vmatpush1.bf16.msra.mxu0 %v9649_v41  ;;  %12879 = vst [vmem:[#allocation38_spill] sm:$0xff] %v9672_v18  ;;  %v1777_v41 = vld [vmem:[%s12476_s4 + $0x2a0] sm:$0xff]  ;;  %v9694_v39 = vpack.c.bf16 %v1779_v22, %v1775_v10  ;;  %6326 = vmatprep.subr.bf16.mxu1 %v9683_v38  ;;  %v1788_v10 = vld [vmem:[%s12476_s4 + $0x2f8] sm:$0xff] }
 0x292   :  { %v9685_v43 = vpack.c.bf16 %v1777_v41, %v1773_v34  ;;  %6262 = vmatprep.subr.bf16.mxu0 %v9672_v18  ;;  %v1782_v41 = vld [vmem:[%s12476_s4 + $0x2c8] sm:$0xff]  ;;  %v1781_v22 = vld [vmem:[%s12476_s4 + $0x2c0] sm:$0xff]  ;;  %v9719_v38 = vpack.c.bf16 %v1788_v10, %v1784_v29  ;;  %v1792_v10 = vld [vmem:[%s12476_s4 + $0x318] sm:$0xff] }
 0x293   :  { %12882 = vst [vmem:[#allocation41_spill] sm:$0xff] %v9694_v39  ;;  %v9708_v34 = vpack.c.bf16 %v1786_v35, %v1782_v41  ;;  %v1783_v41 = vld [vmem:[%s12476_s4 + $0x2d0] sm:$0xff]  ;;  %v1794_v29 = vld [vmem:[%s12476_s4 + $0x328] sm:$0xff] }
 0x294   :  { %12881 = vst [vmem:[#allocation40_spill] sm:$0xff] %v9685_v43  ;;  %6328 = vmatpush1.bf16.msra.mxu1 %v9694_v39  ;;  %12884 = vst [vmem:[#allocation43_spill] sm:$0xff] %v9719_v38  ;;  %v1787_v35 = vld [vmem:[%s12476_s4 + $0x2f0] sm:$0xff] }
 0x295   :  { %6264 = vmatpush1.bf16.msra.mxu0 %v9685_v43  ;;  %12883 = vst [vmem:[#allocation42_spill] sm:$0xff] %v9708_v34  ;;  %v1785_v43 = vld [vmem:[%s12476_s4 + $0x2e0] sm:$0xff]  ;;  %v9730_v39 = vpack.c.bf16 %v1787_v35, %v1783_v41  ;;  %6330 = vmatprep.subr.bf16.mxu1 %v9719_v38  ;;  %v1796_v41 = vld [vmem:[%s12476_s4 + $0x338] sm:$0xff] }
 0x296   :  { %v9721_v18 = vpack.c.bf16 %v1785_v43, %v1781_v22  ;;  %6266 = vmatprep.subr.bf16.mxu0 %v9708_v34  ;;  %v1790_v43 = vld [vmem:[%s12476_s4 + $0x308] sm:$0xff]  ;;  %v1789_v35 = vld [vmem:[%s12476_s4 + $0x300] sm:$0xff]  ;;  %v9755_v38 = vpack.c.bf16 %v1796_v41, %v1792_v10  ;;  %v1800_v41 = vld [vmem:[%s12476_s4 + $0x358] sm:$0xff] }
 0x297   :  { %12886 = vst [vmem:[#allocation45_spill] sm:$0xff] %v9730_v39  ;;  %v9744_v22 = vpack.c.bf16 %v1794_v29, %v1790_v43  ;;  %v1791_v43 = vld [vmem:[%s12476_s4 + $0x310] sm:$0xff]  ;;  %v1802_v10 = vld [vmem:[%s12476_s4 + $0x368] sm:$0xff] }
 0x298   :  { %12885 = vst [vmem:[#allocation44_spill] sm:$0xff] %v9721_v18  ;;  %6332 = vmatpush1.bf16.msra.mxu1 %v9730_v39  ;;  %12888 = vst [vmem:[#allocation47_spill] sm:$0xff] %v9755_v38  ;;  %v1795_v29 = vld [vmem:[%s12476_s4 + $0x330] sm:$0xff] }
 0x299   :  { %6268 = vmatpush1.bf16.msra.mxu0 %v9721_v18  ;;  %12887 = vst [vmem:[#allocation46_spill] sm:$0xff] %v9744_v22  ;;  %v1793_v18 = vld [vmem:[%s12476_s4 + $0x320] sm:$0xff]  ;;  %v9766_v39 = vpack.c.bf16 %v1795_v29, %v1791_v43  ;;  %6334 = vmatprep.subr.bf16.mxu1 %v9755_v38  ;;  %v1804_v43 = vld [vmem:[%s12476_s4 + $0x378] sm:$0xff] }
 0x29a   :  { %v9757_v34 = vpack.c.bf16 %v1793_v18, %v1789_v35  ;;  %6270 = vmatprep.subr.bf16.mxu0 %v9744_v22  ;;  %v1798_v18 = vld [vmem:[%s12476_s4 + $0x348] sm:$0xff]  ;;  %v1797_v29 = vld [vmem:[%s12476_s4 + $0x340] sm:$0xff]  ;;  %v9791_v38 = vpack.c.bf16 %v1804_v43, %v1800_v41  ;;  %v1808_v41 = vld [vmem:[%s12476_s4 + $0x398] sm:$0xff] }
 0x29b   :  { %12890 = vst [vmem:[#allocation49_spill] sm:$0xff] %v9766_v39  ;;  %v9780_v35 = vpack.c.bf16 %v1802_v10, %v1798_v18  ;;  %v1799_v18 = vld [vmem:[%s12476_s4 + $0x350] sm:$0xff]  ;;  %v1812_v43 = vld [vmem:[%s12476_s4 + $0x3b8] sm:$0xff] }
 0x29c   :  { %12889 = vst [vmem:[#allocation48_spill] sm:$0xff] %v9757_v34  ;;  %6336 = vmatpush1.bf16.msra.mxu1 %v9766_v39  ;;  %12892 = vst [vmem:[#allocation51_spill] sm:$0xff] %v9791_v38  ;;  %v1803_v10 = vld [vmem:[%s12476_s4 + $0x370] sm:$0xff]  ;;  %v1806_v39 = vld [vmem:[%s12476_s4 + $0x388] sm:$0xff] }
 0x29d   :  { %6272 = vmatpush1.bf16.msra.mxu0 %v9757_v34  ;;  %12891 = vst [vmem:[#allocation50_spill] sm:$0xff] %v9780_v35  ;;  %v1801_v34 = vld [vmem:[%s12476_s4 + $0x360] sm:$0xff]  ;;  %v9805_v54 = vpack.c.bf16 %v1803_v10, %v1799_v18  ;;  %6338 = vmatprep.subr.bf16.mxu1 %v9791_v38  ;;  %v9820_v18 = vpack.c.bf16 %v1812_v43, %v1808_v41  ;;  %v1818_v41 = vld [vmem:[%s12476_s4 + $0x3e8] sm:$0xff] }
 0x29e   :  { %v9793_v22 = vpack.c.bf16 %v1801_v34, %v1797_v29  ;;  %6274 = vmatprep.subr.bf16.mxu0 %v9780_v35  ;;  %v1810_v34 = vld [vmem:[%s12476_s4 + $0x3a8] sm:$0xff]  ;;  %v1805_v10 = vld [vmem:[%s12476_s4 + $0x380] sm:$0xff] }
 0x29f   :  { %12894 = vst [vmem:[#allocation55_spill] sm:$0xff] %v9805_v54  ;;  %v9818_v29 = vpack.c.bf16 %v1810_v34, %v1806_v39  ;;  %12896 = vst [vmem:[#allocation57_spill] sm:$0xff] %v9820_v18  ;;  %v1809_v35 = vld [vmem:[%s12476_s4 + $0x3a0] sm:$0xff]  ;;  %v1811_v39 = vld [vmem:[%s12476_s4 + $0x3b0] sm:$0xff] }
 0x2a0   :  { %12893 = vst [vmem:[#allocation52_spill] sm:$0xff] %v9793_v22  ;;  %6340 = vmatpush1.bf16.msra.mxu1 %v9805_v54  ;;  %v9832_v38 = vpack.c.bf16 %v1809_v35, %v1805_v10  ;;  %v1814_v34 = vld [vmem:[%s12476_s4 + $0x3c8] sm:$0xff]  ;;  %v9845_v43 = vpack.c.bf16 %v1811_v39, %v1807_v7  ;;  %v1816_v10 = vld [vmem:[%s12476_s4 + $0x3d8] sm:$0xff]  ;;  %v1817_v7 = vld [vmem:[%s12476_s4 + $0x3e0] sm:$0xff] }
 0x2a1   :  { %6276 = vmatpush1.bf16.msra.mxu0 %v9793_v22  ;;  %12895 = vst [vmem:[#allocation56_spill] sm:$0xff] %v9818_v29  ;;  %6342 = vmatprep.subr.bf16.mxu1 %v9820_v18  ;;  %v9847_v35 = vpack.c.bf16 %v1818_v41, %v1814_v34  ;;  %v1820_v54 = vld [vmem:[%s12476_s4 + $0x3f8] sm:$0xff]  ;;  %v1813_v22 = vld [vmem:[%s12476_s4 + $0x3c0] sm:$0xff]  ;;  %v1815_v39 = vld [vmem:[%s12476_s4 + $0x3d0] sm:$0xff] }
 0x2a2   :  { %12897 = vst [vmem:[#allocation59_spill] sm:$0xff] %v9832_v38  ;;  %6278 = vmatprep.subr.bf16.mxu0 %v9818_v29  ;;  %12898 = vst [vmem:[#allocation60_spill] sm:$0xff] %v9845_v43  ;;  %v9858_v4 = vpack.c.bf16 %v1820_v54, %v1816_v10  ;;  %v1819_v34 = vld [vmem:[%s12476_s4 + $0x3f0] sm:$0xff]  ;;  %v9870_v41 = vpack.c.bf16 %v1817_v7, %v1813_v22 }
 0x2a3   :  { %12899 = vst [vmem:[#allocation61_spill] sm:$0xff] %v9847_v35  ;;  %v9874_v54 = vpack.c.bf16 %v1819_v34, %v1815_v39 }
 0x2a4   :  { %12900 = vst [vmem:[#allocation62_spill] sm:$0xff] %v9858_v4  ;;  %12901 = vst [vmem:[#allocation63_spill] sm:$0xff] %v9870_v41  ;;  %6344 = vmatpush1.bf16.msra.mxu1 %v9845_v43 }
 0x2a5   :  { %6280 = vmatpush1.bf16.msra.mxu0 %v9832_v38  ;;  %12902 = vst [vmem:[#allocation64_spill] sm:$0xff] %v9874_v54  ;;  %6346 = vmatprep.subr.bf16.mxu1 %v9858_v4 }
 0x2a6   :  { %6282 = vmatprep.subr.bf16.mxu0 %v9847_v35 }
 0x2a8   :  { %6348 = vmatpush1.bf16.msra.mxu1 %v9874_v54 }
 0x2a9   :  { %6284 = vmatpush1.bf16.msra.mxu0 %v9870_v41  ;;  %6382 = vmatprep.subr.bf16.mxu1 %v8986_v62 }
 0x2aa   :  { %6350 = vmatprep.subr.bf16.mxu0 %v8981_v20 }
 0x31d   :  { %v1354_v10 = vpop.f32.mrb[18].mxu0  ;;  %v1425_v38 = vpop.f32.mrb[18].mxu1 }
 0x31e   :  { %v1355_v22 = vadd.f32 %v1354_v10, %v8994_v46  ;;  %v1356_v7 = vpop.f32.mrb[19].mxu0  ;;  %v1427_v43 = vpop.f32.mrb[19].mxu1  ;;  %v1426_v54 = vadd.f32 %v1425_v38, %v9007_v53 }
 0x31f   :  { %v1357_v35 = vadd.f32 %v1356_v7, %v8997_v42  ;;  %v1428_v41 = vadd.f32 %v1427_v43, %v9003_v45 }
 0x320   :  { %v5439_v39 = vmul.f32 -1.442695, %v1355_v22 }
 0x321   :  { %v5440_v34 = vmul.f32 -1.442695, %v1357_v35  ;;  %v5441_v4 = vmul.f32 -1.442695, %v1428_v41 }
 0x322   :  { %7592 = vpow2.f32 %v5439_v39 }
 0x323   :  { %7594 = vpow2.f32 %v5440_v34 }
 0x324   :  { %7596 = vpow2.f32 %v5441_v4 }
 0x325   :  { %7598 = vtanh.f32 %v1426_v54 }
 0x32c   :  { %v7593_v20 = vpop.eup %7592 }
 0x32d   :  { %v7595_v18 = vpop.eup %7594  ;;  %v1433_v62 = vadd.f32 1.0, %v7593_v20 }
 0x32e   :  { %v1439_v29 = vadd.f32 1.0, %v7595_v18  ;;  %v7597_v10 = vpop.eup %7596 }
 0x32f   :  { %7600 = vrcp.f32 %v1433_v62  ;;  %v7599_v46 = vpop.eup %7598  ;;  %v1446_v39 = vadd.f32 1.0, %v7597_v10 }
 0x330   :  { %7602 = vrcp.f32 %v1439_v29 }
 0x331   :  { %7604 = vrcp.f32 %v1446_v39 }
 0x339   :  { %v7601_v7 = vpop.eup %7600 }
 0x33a   :  { %v7603_v22 = vpop.eup %7602  ;;  %v1450_v35 = vmul.f32 %v7601_v7, %v7599_v46 }
 0x33b   :  { %v1449_v34 = vmul.f32 %v7603_v22, %v9010_v50  ;;  %v7605_v50 = vpop.eup %7604 }
 0x33d   :  { %v9886_v43 = vadd.f32 %v1450_v35, %v1449_v34  ;;  %v1589_v41 = vpop.f32.mrb[4].mxu0  ;;  %v1660_v38 = vpop.f32.mrb[4].mxu1 }
 0x33e   :  { %v7481_v20 = vadd.f32 %v1589_v41, %v12843_v1  ;;  %v1591_v4 = vpop.f32.mrb[5].mxu0  ;;  %v1662_v54 = vpop.f32.mrb[5].mxu1  ;;  %v7497_v22 = vadd.f32 %v1660_v38, %v8870_v11 }
 0x33f   :  { %v7482_v18 = vadd.f32 %v1591_v4, %v12844_v25  ;;  %7606 = vtanh.f32 %v9886_v43  ;;  %v7498_v46 = vadd.f32 %v1662_v54, %v12845_v48 }
 0x340   :  { %v5442_v29 = vmul.f32 -1.442695, %v7481_v20 }
 0x341   :  { %v5443_v62 = vmul.f32 -1.442695, %v7482_v18  ;;  %v5444_v7 = vmul.f32 -1.442695, %v7498_v46 }
 0x342   :  { %7608 = vpow2.f32 %v5442_v29 }
 0x343   :  { %7610 = vpow2.f32 %v5443_v62 }
 0x344   :  { %7612 = vpow2.f32 %v5444_v7 }
 0x345   :  { %7614 = vtanh.f32 %v7497_v22  ;;  %v12943_v22 = vld [vmem:[#allocation45_spill] sm:$0xff] }
 0x349   :  { %v7607_v10 = vpop.eup %7606 }
 0x34a   :  { %v9893_v35 = vmul.f32 %v7607_v10, %v7605_v50 }
 0x34c   :  { %12903 = vst [vmem:[#allocation65_spill] sm:$0xff] %v9893_v35  ;;  %v7609_v39 = vpop.eup %7608  ;;  %1885 = vmatprep.mubr.f32.mxu0 %v9893_v35  ;;  %1956 = vmatprep.mubr.f32.mxu1 %v9893_v35 }
 0x34d   :  { %v7611_v34 = vpop.eup %7610  ;;  %v1672_v41 = vadd.f32 1.0, %v7609_v39 }
 0x34e   :  { %v1678_v20 = vadd.f32 1.0, %v7611_v34  ;;  %v7613_v4 = vpop.eup %7612  ;;  %v12944_v34 = vld [vmem:[#allocation46_spill] sm:$0xff] }
 0x34f   :  { %7616 = vrcp.f32 %v1672_v41  ;;  %v7615_v54 = vpop.eup %7614  ;;  %v1685_v38 = vadd.f32 1.0, %v7613_v4  ;;  %v12945_v41 = vld [vmem:[#allocation47_spill] sm:$0xff]  ;;  %v12947_v4 = vld [vmem:[#allocation49_spill] sm:$0xff] }
 0x350   :  { %7618 = vrcp.f32 %v1678_v20  ;;  %v12946_v20 = vld [vmem:[#allocation48_spill] sm:$0xff] }
 0x351   :  { %7620 = vrcp.f32 %v1685_v38  ;;  %v12952_v38 = vld [vmem:[#allocation56_spill] sm:$0xff] }
 0x359   :  { %v7617_v18 = vpop.eup %7616 }
 0x35a   :  { %v7619_v29 = vpop.eup %7618  ;;  %v1689_v62 = vmul.f32 %v7617_v18, %v7615_v54  ;;  %v12948_v54 = vld [vmem:[#allocation50_spill] sm:$0xff]  ;;  %v12949_v18 = vld [vmem:[#allocation51_spill] sm:$0xff] }
 0x35b   :  { %v1688_v46 = vmul.f32 %v7619_v29, %v9022_v15  ;;  %v7621_v10 = vpop.eup %7620  ;;  %v12904_v15 = vld [vmem:[#allocation6_spill] sm:$0xff]  ;;  %v12950_v29 = vld [vmem:[#allocation52_spill] sm:$0xff] }
 0x35d   :  { %v9898_v50 = vadd.f32 %v1689_v62, %v1688_v46  ;;  %v12951_v62 = vld [vmem:[#allocation55_spill] sm:$0xff]  ;;  %v12953_v46 = vld [vmem:[#allocation57_spill] sm:$0xff] }
 0x35f   :  { %7622 = vtanh.f32 %v9898_v50 }
 0x369   :  { %v7623_v39 = vpop.eup %7622 }
 0x36a   :  { %v1692_v7 = vmul.f32 %v7623_v39, %v7621_v10  ;;  %v12954_v10 = vld [vmem:[#allocation59_spill] sm:$0xff]  ;;  %v12955_v39 = vld [vmem:[#allocation60_spill] sm:$0xff] }
 0x36c   :  { %1886 = vmatmul.mubr.f32.vlgmr.msra.gmra.mrb[20].mxu0 %v1692_v7  ;;  %1957 = vmatmul.mubr.f32.vlgmr.msra.gmra.mrb[20].mxu1 %v1692_v7 }
 0x36d   :  { %6352 = vmatpush1.bf16.msra.mxu0 %v9049_v56  ;;  %6384 = vmatpush1.bf16.msra.mxu1 %v9051_v60  ;;  %v12905_v56 = vld [vmem:[#allocation7_spill] sm:$0xff]  ;;  %v12906_v60 = vld [vmem:[#allocation8_spill] sm:$0xff] }
 0x36e   :  { %6354 = vmatprep.subr.bf16.mxu0 %v9061_v12  ;;  %6386 = vmatprep.subr.bf16.mxu1 %v9063_v17  ;;  %v12907_v12 = vld [vmem:[#allocation9_spill] sm:$0xff]  ;;  %v12908_v17 = vld [vmem:[#allocation10_spill] sm:$0xff] }
 0x36f   :  { %2120 = vmatprep.mubr.f32.mxu0 %v12789_v3  ;;  %2191 = vmatprep.mubr.f32.mxu1 %v12789_v3 }
 0x371   :  { %6356 = vmatpush1.bf16.msra.mxu0 %v9087_v55  ;;  %6388 = vmatpush1.bf16.msra.mxu1 %v9089_v61  ;;  %v12909_v55 = vld [vmem:[#allocation11_spill] sm:$0xff]  ;;  %v12910_v61 = vld [vmem:[#allocation12_spill] sm:$0xff] }
 0x372   :  { %6358 = vmatprep.subr.bf16.mxu0 %v9099_v13  ;;  %6390 = vmatprep.subr.bf16.mxu1 %v9101_v27  ;;  %v12911_v13 = vld [vmem:[#allocation13_spill] sm:$0xff]  ;;  %v12912_v27 = vld [vmem:[#allocation14_spill] sm:$0xff] }
 0x375   :  { %6360 = vmatpush1.bf16.msra.mxu0 %v9125_v16  ;;  %6392 = vmatpush1.bf16.msra.mxu1 %v9127_v33  ;;  %v12913_v16 = vld [vmem:[#allocation15_spill] sm:$0xff]  ;;  %v12914_v33 = vld [vmem:[#allocation16_spill] sm:$0xff] }
 0x376   :  { %6362 = vmatprep.subr.bf16.mxu0 %v9137_v57  ;;  %6394 = vmatprep.subr.bf16.mxu1 %v9139_v63  ;;  %v12915_v57 = vld [vmem:[#allocation17_spill] sm:$0xff]  ;;  %v12916_v63 = vld [vmem:[#allocation18_spill] sm:$0xff] }
 0x379   :  { %6364 = vmatpush1.bf16.msra.mxu0 %v9161_v19  ;;  %6396 = vmatpush1.bf16.msra.mxu1 %v9163_v23  ;;  %v12917_v19 = vld [vmem:[#allocation19_spill] sm:$0xff]  ;;  %v12918_v23 = vld [vmem:[#allocation20_spill] sm:$0xff] }
 0x37a   :  { %6366 = vmatprep.subr.bf16.mxu0 %v9173_v28  ;;  %6398 = vmatprep.subr.bf16.mxu1 %v9175_v32  ;;  %v12919_v28 = vld [vmem:[#allocation21_spill] sm:$0xff]  ;;  %v12920_v32 = vld [vmem:[#allocation22_spill] sm:$0xff] }
 0x37d   :  { %6368 = vmatpush1.bf16.msra.mxu0 %v9197_v21  ;;  %6400 = vmatpush1.bf16.msra.mxu1 %v9199_v26  ;;  %v12921_v21 = vld [vmem:[#allocation23_spill] sm:$0xff]  ;;  %v12922_v26 = vld [vmem:[#allocation24_spill] sm:$0xff] }
 0x37e   :  { %6370 = vmatprep.subr.bf16.mxu0 %v9209_v40  ;;  %6402 = vmatprep.subr.bf16.mxu1 %v9211_v44  ;;  %v12923_v40 = vld [vmem:[#allocation25_spill] sm:$0xff]  ;;  %v12924_v44 = vld [vmem:[#allocation26_spill] sm:$0xff] }
 0x381   :  { %6372 = vmatpush1.bf16.msra.mxu0 %v9233_v59  ;;  %6404 = vmatpush1.bf16.msra.mxu1 %v9235_v14  ;;  %v12925_v59 = vld [vmem:[#allocation27_spill] sm:$0xff]  ;;  %v12926_v14 = vld [vmem:[#allocation28_spill] sm:$0xff] }
 0x382   :  { %6374 = vmatprep.subr.bf16.mxu0 %v9245_v9  ;;  %6406 = vmatprep.subr.bf16.mxu1 %v9247_v31  ;;  %v12927_v9 = vld [vmem:[#allocation29_spill] sm:$0xff]  ;;  %v12928_v31 = vld [vmem:[#allocation30_spill] sm:$0xff] }
 0x385   :  { %6376 = vmatpush1.bf16.msra.mxu0 %v9269_v36  ;;  %6408 = vmatpush1.bf16.msra.mxu1 %v9271_v37  ;;  %v12929_v36 = vld [vmem:[#allocation31_spill] sm:$0xff]  ;;  %v12930_v37 = vld [vmem:[#allocation32_spill] sm:$0xff] }
 0x386   :  { %6378 = vmatprep.subr.bf16.mxu0 %v9278_v49  ;;  %6410 = vmatprep.subr.bf16.mxu1 %v9280_v0  ;;  %v12931_v49 = vld [vmem:[#allocation33_spill] sm:$0xff]  ;;  %v12932_v0 = vld [vmem:[#allocation34_spill] sm:$0xff] }
 0x389   :  { %6380 = vmatpush1.bf16.msra.mxu0 %v9293_v2  ;;  %6412 = vmatpush1.bf16.msra.mxu1 %v9295_v5  ;;  %v12933_v2 = vld [vmem:[#allocation35_spill] sm:$0xff]  ;;  %v12934_v5 = vld [vmem:[#allocation36_spill] sm:$0xff] }
 0x38a   :  { %6414 = vmatprep.subr.bf16.mxu0 %v9312_v52  ;;  %6478 = vmatprep.subr.bf16.mxu1 %v9323_v8  ;;  %v12935_v52 = vld [vmem:[#allocation37_spill] sm:$0xff]  ;;  %v12936_v8 = vld [vmem:[#allocation38_spill] sm:$0xff] }
 0x38c   :  { %2121 = vmatmul.mubr.f32.vlgmr.msra.gmra.mrb[6].mxu0 %v1692_v7  ;;  %2192 = vmatmul.mubr.f32.vlgmr.msra.gmra.mrb[6].mxu1 %v1692_v7  ;;  %v12956_v7 = vld [vmem:[#allocation61_spill] sm:$0xff] }
 0x38d   :  { %6416 = vmatpush1.bf16.msra.mxu0 %v9325_v58  ;;  %6480 = vmatpush1.bf16.msra.mxu1 %v9334_v24  ;;  %v12937_v58 = vld [vmem:[#allocation39_spill] sm:$0xff]  ;;  %v12938_v24 = vld [vmem:[#allocation40_spill] sm:$0xff] }
 0x38e   :  { %6418 = vmatprep.subr.bf16.mxu0 %v9348_v30  ;;  %6482 = vmatprep.subr.bf16.mxu1 %v9359_v51  ;;  %v12939_v30 = vld [vmem:[#allocation41_spill] sm:$0xff]  ;;  %v12940_v51 = vld [vmem:[#allocation42_spill] sm:$0xff] }
 0x391   :  { %6420 = vmatpush1.bf16.msra.mxu0 %v9361_v47  ;;  %6484 = vmatpush1.bf16.msra.mxu1 %v9370_v6  ;;  %v12941_v47 = vld [vmem:[#allocation43_spill] sm:$0xff]  ;;  %v12942_v6 = vld [vmem:[#allocation44_spill] sm:$0xff] }
 0x392   :  { %6422 = vmatprep.subr.bf16.mxu0 %v12904_v15  ;;  %6486 = vmatprep.subr.bf16.mxu1 %v12905_v56  ;;  %v12957_v15 = vld [vmem:[#allocation62_spill] sm:$0xff]  ;;  %v12958_v56 = vld [vmem:[#allocation63_spill] sm:$0xff] }
 0x395   :  { %6424 = vmatpush1.bf16.msra.mxu0 %v12906_v60  ;;  %6488 = vmatpush1.bf16.msra.mxu1 %v12907_v12  ;;  %v12959_v60 = vld [vmem:[#allocation64_spill] sm:$0xff]  ;;  %v2526_v12 = vld [vmem:[%s12475_s2 + $0x8] sm:$0xff] }
 0x396   :  { %6426 = vmatprep.subr.bf16.mxu0 %v12908_v17  ;;  %6490 = vmatprep.subr.bf16.mxu1 %v12909_v55  ;;  %v2530_v17 = vld [vmem:[%s12475_s2 + $0x28] sm:$0xff]  ;;  %v2528_v55 = vld [vmem:[%s12475_s2 + $0x18] sm:$0xff] }
 0x399   :  { %6428 = vmatpush1.bf16.msra.mxu0 %v12910_v61  ;;  %6492 = vmatpush1.bf16.msra.mxu1 %v12911_v13  ;;  %v10006_v61 = vpack.c.bf16 %v2530_v17, %v2526_v12  ;;  %v2532_v13 = vld [vmem:[%s12475_s2 + $0x38] sm:$0xff] }
 0x39a   :  { %6430 = vmatprep.subr.bf16.mxu0 %v12912_v27  ;;  %6494 = vmatprep.subr.bf16.mxu1 %v12913_v16  ;;  %v10011_v27 = vpack.c.bf16 %v2532_v13, %v2528_v55  ;;  %v2525_v55 = vld [vmem:[%s12475_s2] sm:$0xff] }
 0x39b   :  { %v2529_v13 = vld [vmem:[%s12475_s2 + $0x20] sm:$0xff] }
 0x39d   :  { %6432 = vmatpush1.bf16.msra.mxu0 %v12914_v33  ;;  %6496 = vmatpush1.bf16.msra.mxu1 %v12915_v57  ;;  %v12960_v57 = vld [vmem:[#allocation4_spill] sm:$0xff] }
 0x39e   :  { %6434 = vmatprep.subr.bf16.mxu0 %v12916_v63  ;;  %6498 = vmatprep.subr.bf16.mxu1 %v12917_v19 }
 0x3a1   :  { %6436 = vmatpush1.bf16.msra.mxu0 %v12918_v23  ;;  %6500 = vmatpush1.bf16.msra.mxu1 %v12919_v28 }
 0x3a2   :  { %6438 = vmatprep.subr.bf16.mxu0 %v12920_v32  ;;  %6502 = vmatprep.subr.bf16.mxu1 %v12921_v21 }
 0x3a5   :  { %6440 = vmatpush1.bf16.msra.mxu0 %v12922_v26  ;;  %6504 = vmatpush1.bf16.msra.mxu1 %v12923_v40 }
 0x3a6   :  { %6442 = vmatprep.subr.bf16.mxu0 %v12924_v44  ;;  %6506 = vmatprep.subr.bf16.mxu1 %v12925_v59 }
 0x3a9   :  { %6444 = vmatpush1.bf16.msra.mxu0 %v12926_v14  ;;  %6508 = vmatpush1.bf16.msra.mxu1 %v12927_v9 }
 0x3aa   :  { %6446 = vmatprep.subr.bf16.mxu0 %v12928_v31  ;;  %6510 = vmatprep.subr.bf16.mxu1 %v12929_v36 }
 0x3ad   :  { %6448 = vmatpush1.bf16.msra.mxu0 %v12930_v37  ;;  %6512 = vmatpush1.bf16.msra.mxu1 %v12931_v49 }
 0x3ae   :  { %6450 = vmatprep.subr.bf16.mxu0 %v12932_v0  ;;  %6514 = vmatprep.subr.bf16.mxu1 %v12933_v2 }
 0x3b1   :  { %6452 = vmatpush1.bf16.msra.mxu0 %v12934_v5  ;;  %6516 = vmatpush1.bf16.msra.mxu1 %v12935_v52 }
 0x3b2   :  { %6454 = vmatprep.subr.bf16.mxu0 %v12936_v8  ;;  %6518 = vmatprep.subr.bf16.mxu1 %v12937_v58 }
 0x3b5   :  { %6456 = vmatpush1.bf16.msra.mxu0 %v12938_v24  ;;  %6520 = vmatpush1.bf16.msra.mxu1 %v12939_v30 }
 0x3b6   :  { %6458 = vmatprep.subr.bf16.mxu0 %v12940_v51  ;;  %6522 = vmatprep.subr.bf16.mxu1 %v12941_v47 }
 0x3b9   :  { %6460 = vmatpush1.bf16.msra.mxu0 %v12942_v6  ;;  %6524 = vmatpush1.bf16.msra.mxu1 %v12943_v22 }
 0x3ba   :  { %6462 = vmatprep.subr.bf16.mxu0 %v12944_v34  ;;  %6526 = vmatprep.subr.bf16.mxu1 %v12945_v41 }
 0x3bd   :  { %6464 = vmatpush1.bf16.msra.mxu0 %v12946_v20  ;;  %6528 = vmatpush1.bf16.msra.mxu1 %v12947_v4 }
 0x3be   :  { %6466 = vmatprep.subr.bf16.mxu0 %v12948_v54  ;;  %6530 = vmatprep.subr.bf16.mxu1 %v12949_v18 }
 0x3c1   :  { %6468 = vmatpush1.bf16.msra.mxu0 %v12950_v29  ;;  %6532 = vmatpush1.bf16.msra.mxu1 %v12951_v62 }
 0x3c2   :  { %6470 = vmatprep.subr.bf16.mxu0 %v12952_v38  ;;  %6534 = vmatprep.subr.bf16.mxu1 %v12953_v46 }
 0x3c5   :  { %6472 = vmatpush1.bf16.msra.mxu0 %v12954_v10  ;;  %6536 = vmatpush1.bf16.msra.mxu1 %v12955_v39 }
 0x3c6   :  { %6474 = vmatprep.subr.bf16.mxu0 %v12956_v7  ;;  %6538 = vmatprep.subr.bf16.mxu1 %v12957_v15 }
 0x3c9   :  { %6476 = vmatpush1.bf16.msra.mxu0 %v12958_v56  ;;  %6540 = vmatpush1.bf16.msra.mxu1 %v12959_v60 }
 0x3ca   :  { %6542 = vmatprep.subr.bf16.mxu0 %v10006_v61  ;;  %6574 = vmatprep.subr.bf16.mxu1 %v10011_v27 }
 0x43f   :  { %v1887_v16 = vpop.f32.mrb[20].mxu0  ;;  %v1958_v33 = vpop.f32.mrb[20].mxu1 }
 0x440   :  { %v1888_v63 = vadd.f32 %v1887_v16, %v12960_v57  ;;  %v1889_v19 = vpop.f32.mrb[21].mxu0  ;;  %v1960_v23 = vpop.f32.mrb[21].mxu1  ;;  %v1959_v44 = vadd.f32 %v1958_v33, %v9007_v53  ;;  %v2527_v16 = vld [vmem:[%s12475_s2 + $0x10] sm:$0xff]  ;;  %v2534_v33 = vld [vmem:[%s12475_s2 + $0x48] sm:$0xff] }
 0x441   :  { %v1890_v28 = vadd.f32 %v1889_v19, %v8997_v42  ;;  %v1961_v26 = vadd.f32 %v1960_v23, %v9003_v45  ;;  %v2536_v19 = vld [vmem:[%s12475_s2 + $0x58] sm:$0xff] }
 0x442   :  { %v5445_v32 = vmul.f32 -1.442695, %v1888_v63  ;;  %v2538_v63 = vld [vmem:[%s12475_s2 + $0x68] sm:$0xff]  ;;  %v2540_v23 = vld [vmem:[%s12475_s2 + $0x78] sm:$0xff] }
 0x443   :  { %v5446_v21 = vmul.f32 -1.442695, %v1890_v28  ;;  %v5447_v40 = vmul.f32 -1.442695, %v1961_v26 }
 0x444   :  { %7624 = vpow2.f32 %v5445_v32 }
 0x445   :  { %7626 = vpow2.f32 %v5446_v21  ;;  %v10059_v21 = vpack.c.bf16 %v2529_v13, %v2525_v55  ;;  %v2557_v55 = vld [vmem:[%s12475_s2 + $0x100] sm:$0xff] }
 0x446   :  { %7628 = vpow2.f32 %v5447_v40  ;;  %v2533_v40 = vld [vmem:[%s12475_s2 + $0x40] sm:$0xff] }
 0x447   :  { %7630 = vtanh.f32 %v1959_v44  ;;  %v2537_v44 = vld [vmem:[%s12475_s2 + $0x60] sm:$0xff] }
 0x448   :  { %v2561_v13 = vld [vmem:[%s12475_s2 + $0x120] sm:$0xff] }
 0x44e   :  { %v7625_v59 = vpop.eup %7624 }
 0x44f   :  { %v7627_v14 = vpop.eup %7626  ;;  %v1966_v9 = vadd.f32 1.0, %v7625_v59 }
 0x450   :  { %v1972_v31 = vadd.f32 1.0, %v7627_v14  ;;  %v7629_v36 = vpop.eup %7628  ;;  %v10071_v14 = vpack.c.bf16 %v2538_v63, %v2534_v33  ;;  %v2559_v33 = vld [vmem:[%s12475_s2 + $0x110] sm:$0xff] }
 0x451   :  { %7632 = vrcp.f32 %v1966_v9  ;;  %v7631_v37 = vpop.eup %7630  ;;  %v1979_v5 = vadd.f32 1.0, %v7629_v36  ;;  %v10073_v9 = vpack.c.bf16 %v2540_v23, %v2536_v19  ;;  %v2539_v36 = vld [vmem:[%s12475_s2 + $0x70] sm:$0xff]  ;;  %v2566_v19 = vld [vmem:[%s12475_s2 + $0x148] sm:$0xff] }
 0x452   :  { %7634 = vrcp.f32 %v1972_v31  ;;  %v2535_v31 = vld [vmem:[%s12475_s2 + $0x50] sm:$0xff]  ;;  %v2570_v23 = vld [vmem:[%s12475_s2 + $0x168] sm:$0xff] }
 0x453   :  { %7636 = vrcp.f32 %v1979_v5  ;;  %v10097_v5 = vpack.c.bf16 %v2537_v44, %v2533_v40  ;;  %v2563_v63 = vld [vmem:[%s12475_s2 + $0x130] sm:$0xff]  ;;  %v10207_v40 = vpack.c.bf16 %v2561_v13, %v2557_v55 }
 0x454   :  { %v10209_v44 = vpack.c.bf16 %v2563_v63, %v2559_v33  ;;  %v2581_v33 = vld [vmem:[%s12475_s2 + $0x1c0] sm:$0xff] }
 0x45b   :  { %v7633_v49 = vpop.eup %7632 }
 0x45c   :  { %v7635_v0 = vpop.eup %7634  ;;  %v1983_v2 = vmul.f32 %v7633_v49, %v7631_v37  ;;  %v2542_v37 = vld [vmem:[%s12475_s2 + $0x88] sm:$0xff] }
 0x45d   :  { %v1982_v52 = vmul.f32 %v7635_v0, %v9886_v43  ;;  %v7637_v43 = vpop.eup %7636  ;;  %v2546_v49 = vld [vmem:[%s12475_s2 + $0xa8] sm:$0xff]  ;;  %v2544_v0 = vld [vmem:[%s12475_s2 + $0x98] sm:$0xff] }
 0x45f   :  { %v10020_v8 = vadd.f32 %v1983_v2, %v1982_v52  ;;  %v2122_v58 = vpop.f32.mrb[6].mxu0  ;;  %v2193_v24 = vpop.f32.mrb[6].mxu1  ;;  %v2548_v2 = vld [vmem:[%s12475_s2 + $0xb8] sm:$0xff]  ;;  %v10099_v52 = vpack.c.bf16 %v2539_v36, %v2535_v31  ;;  %v2565_v31 = vld [vmem:[%s12475_s2 + $0x140] sm:$0xff] }
 0x460   :  { %v7483_v30 = vadd.f32 %v2122_v58, %v12843_v1  ;;  %v2124_v51 = vpop.f32.mrb[7].mxu0  ;;  %v2195_v47 = vpop.f32.mrb[7].mxu1  ;;  %v7499_v54 = vadd.f32 %v2193_v24, %v8870_v11  ;;  %v2541_v58 = vld [vmem:[%s12475_s2 + $0x80] sm:$0xff] }
 0x461   :  { %v7484_v6 = vadd.f32 %v2124_v51, %v12844_v25  ;;  %7638 = vtanh.f32 %v10020_v8  ;;  %v7500_v41 = vadd.f32 %v2195_v47, %v12845_v48  ;;  %v2545_v24 = vld [vmem:[%s12475_s2 + $0xa0] sm:$0xff]  ;;  %v10111_v51 = vpack.c.bf16 %v2548_v2, %v2544_v0  ;;  %v2543_v47 = vld [vmem:[%s12475_s2 + $0x90] sm:$0xff] }
 0x462   :  { %v5448_v22 = vmul.f32 -1.442695, %v7483_v30  ;;  %v10109_v30 = vpack.c.bf16 %v2546_v49, %v2542_v37  ;;  %v2569_v36 = vld [vmem:[%s12475_s2 + $0x160] sm:$0xff]  ;;  %v10219_v37 = vpack.c.bf16 %v2570_v23, %v2566_v19  ;;  %v2567_v0 = vld [vmem:[%s12475_s2 + $0x150] sm:$0xff] }
 0x463   :  { %v5449_v34 = vmul.f32 -1.442695, %v7484_v6  ;;  %v5450_v4 = vmul.f32 -1.442695, %v7500_v41  ;;  %v2547_v6 = vld [vmem:[%s12475_s2 + $0xb0] sm:$0xff]  ;;  %v2552_v41 = vld [vmem:[%s12475_s2 + $0xd8] sm:$0xff] }
 0x464   :  { %7640 = vpow2.f32 %v5448_v22  ;;  %v2550_v22 = vld [vmem:[%s12475_s2 + $0xc8] sm:$0xff]  ;;  %v2571_v2 = vld [vmem:[%s12475_s2 + $0x170] sm:$0xff]  ;;  %v2585_v23 = vld [vmem:[%s12475_s2 + $0x1e0] sm:$0xff] }
 0x465   :  { %7642 = vpow2.f32 %v5449_v34  ;;  %v2554_v34 = vld [vmem:[%s12475_s2 + $0xe8] sm:$0xff] }
 0x466   :  { %7644 = vpow2.f32 %v5450_v4  ;;  %v10137_v4 = vpack.c.bf16 %v2547_v6, %v2543_v47  ;;  %v2576_v47 = vld [vmem:[%s12475_s2 + $0x198] sm:$0xff] }
 0x467   :  { %7646 = vtanh.f32 %v7499_v54  ;;  %v2549_v54 = vld [vmem:[%s12475_s2 + $0xc0] sm:$0xff]  ;;  %v2580_v6 = vld [vmem:[%s12475_s2 + $0x1b8] sm:$0xff] }
 0x46b   :  { %v7639_v20 = vpop.eup %7638 }
 0x46c   :  { %v10027_v18 = vmul.f32 %v7639_v20, %v7637_v43  ;;  %v2556_v43 = vld [vmem:[%s12475_s2 + $0xf8] sm:$0xff]  ;;  %v10135_v20 = vpack.c.bf16 %v2545_v24, %v2541_v58  ;;  %v2574_v58 = vld [vmem:[%s12475_s2 + $0x188] sm:$0xff] }
 0x46d   :  { %v2578_v24 = vld [vmem:[%s12475_s2 + $0x1a8] sm:$0xff] }
 0x46e   :  { %12961 = vst [vmem:[#allocation6_spill] sm:$0xff] %v10027_v18  ;;  %v7641_v29 = vpop.eup %7640  ;;  %2418 = vmatprep.mubr.f32.mxu0 %v10027_v18  ;;  %2489 = vmatprep.mubr.f32.mxu1 %v10027_v18 }
 0x46f   :  { %v7643_v62 = vpop.eup %7642  ;;  %v2205_v38 = vadd.f32 1.0, %v7641_v29  ;;  %v2553_v29 = vld [vmem:[%s12475_s2 + $0xe0] sm:$0xff] }
 0x470   :  { %v2211_v46 = vadd.f32 1.0, %v7643_v62  ;;  %v7645_v10 = vpop.eup %7644  ;;  %v10147_v62 = vpack.c.bf16 %v2554_v34, %v2550_v22  ;;  %v10243_v22 = vpack.c.bf16 %v2569_v36, %v2565_v31  ;;  %v10245_v34 = vpack.c.bf16 %v2571_v2, %v2567_v0  ;;  %v2760_v0 = vld [vmem:[%s12476_s4 + $0x8] sm:$0xff] }
 0x471   :  { %7648 = vrcp.f32 %v2205_v38  ;;  %v7647_v39 = vpop.eup %7646  ;;  %v2218_v60 = vadd.f32 1.0, %v7645_v10  ;;  %v10149_v38 = vpack.c.bf16 %v2556_v43, %v2552_v41  ;;  %v2555_v10 = vld [vmem:[%s12475_s2 + $0xf0] sm:$0xff]  ;;  %v2573_v41 = vld [vmem:[%s12475_s2 + $0x180] sm:$0xff]  ;;  %v10303_v31 = vpack.c.bf16 %v2585_v23, %v2581_v33  ;;  %v2764_v2 = vld [vmem:[%s12476_s4 + $0x28] sm:$0xff] }
 0x472   :  { %7650 = vrcp.f32 %v2211_v46  ;;  %v2551_v46 = vld [vmem:[%s12475_s2 + $0xd0] sm:$0xff]  ;;  %v2577_v43 = vld [vmem:[%s12475_s2 + $0x1a0] sm:$0xff]  ;;  %v2774_v23 = vld [vmem:[%s12476_s4 + $0x78] sm:$0xff] }
 0x473   :  { %7652 = vrcp.f32 %v2218_v60  ;;  %v10171_v60 = vpack.c.bf16 %v2553_v29, %v2549_v54  ;;  %v10255_v54 = vpack.c.bf16 %v2578_v24, %v2574_v58  ;;  %v10257_v29 = vpack.c.bf16 %v2580_v6, %v2576_v47  ;;  %v2762_v58 = vld [vmem:[%s12476_s4 + $0x18] sm:$0xff]  ;;  %v2763_v6 = vld [vmem:[%s12476_s4 + $0x20] sm:$0xff] }
 0x474   :  { %v10279_v55 = vpack.c.bf16 %v2577_v43, %v2573_v41  ;;  %v10322_v24 = vpack.c.bf16 %v2764_v2, %v2760_v0  ;;  %v2766_v47 = vld [vmem:[%s12476_s4 + $0x38] sm:$0xff] }
 0x475   :  { %v10333_v41 = vpack.c.bf16 %v2766_v47, %v2762_v58  ;;  %v2769_v58 = vld [vmem:[%s12476_s4 + $0x50] sm:$0xff] }
 0x476   :  { %v2773_v47 = vld [vmem:[%s12476_s4 + $0x70] sm:$0xff] }
 0x47b   :  { %v7649_v7 = vpop.eup %7648 }
 0x47c   :  { %v7651_v15 = vpop.eup %7650  ;;  %v2222_v56 = vmul.f32 %v7649_v7, %v7647_v39  ;;  %v2558_v39 = vld [vmem:[%s12475_s2 + $0x108] sm:$0xff] }
 0x47d   :  { %v2221_v12 = vmul.f32 %v7651_v15, %v9898_v50  ;;  %v2531_v50 = vld [vmem:[%s12475_s2 + $0x30] sm:$0xff]  ;;  %v7653_v28 = vpop.eup %7652  ;;  %v2562_v7 = vld [vmem:[%s12475_s2 + $0x128] sm:$0xff]  ;;  %v2560_v15 = vld [vmem:[%s12475_s2 + $0x118] sm:$0xff] }
 0x47e   :  { %v10061_v26 = vpack.c.bf16 %v2531_v50, %v2527_v16  ;;  %v10183_v16 = vpack.c.bf16 %v2562_v7, %v2558_v39  ;;  %v2582_v39 = vld [vmem:[%s12475_s2 + $0x1c8] sm:$0xff] }
 0x47f   :  { %v10032_v17 = vadd.f32 %v2222_v56, %v2221_v12  ;;  %v2564_v56 = vld [vmem:[%s12475_s2 + $0x138] sm:$0xff]  ;;  %v10173_v12 = vpack.c.bf16 %v2555_v10, %v2551_v46  ;;  %v2575_v46 = vld [vmem:[%s12475_s2 + $0x190] sm:$0xff]  ;;  %v2586_v7 = vld [vmem:[%s12475_s2 + $0x1e8] sm:$0xff] }
 0x480   :  { %v10185_v50 = vpack.c.bf16 %v2564_v56, %v2560_v15  ;;  %v2579_v10 = vld [vmem:[%s12475_s2 + $0x1b0] sm:$0xff]  ;;  %v2584_v15 = vld [vmem:[%s12475_s2 + $0x1d8] sm:$0xff]  ;;  %v10288_v63 = vpack.c.bf16 %v2586_v7, %v2582_v39  ;;  %v2768_v7 = vld [vmem:[%s12476_s4 + $0x48] sm:$0xff] }
 0x481   :  { %7654 = vtanh.f32 %v10032_v17  ;;  %v2588_v56 = vld [vmem:[%s12475_s2 + $0x1f8] sm:$0xff]  ;;  %v10281_v13 = vpack.c.bf16 %v2579_v10, %v2575_v46  ;;  %v2761_v46 = vld [vmem:[%s12476_s4 + $0x10] sm:$0xff] }
 0x482   :  { %v10290_v19 = vpack.c.bf16 %v2588_v56, %v2584_v15  ;;  %v2765_v10 = vld [vmem:[%s12476_s4 + $0x30] sm:$0xff]  ;;  %v2772_v15 = vld [vmem:[%s12476_s4 + $0x68] sm:$0xff]  ;;  %v2770_v56 = vld [vmem:[%s12476_s4 + $0x58] sm:$0xff] }
 0x483   :  { %v10344_v39 = vpack.c.bf16 %v2765_v10, %v2761_v46  ;;  %v10358_v33 = vpack.c.bf16 %v2772_v15, %v2768_v7  ;;  %v10369_v0 = vpack.c.bf16 %v2774_v23, %v2770_v56  ;;  %v2780_v46 = vld [vmem:[%s12476_s4 + $0xa8] sm:$0xff]  ;;  %v2778_v10 = vld [vmem:[%s12476_s4 + $0x98] sm:$0xff]  ;;  %v2775_v56 = vld [vmem:[%s12476_s4 + $0x80] sm:$0xff] }
 0x484   :  { %v2782_v15 = vld [vmem:[%s12476_s4 + $0xb8] sm:$0xff]  ;;  %v2779_v23 = vld [vmem:[%s12476_s4 + $0xa0] sm:$0xff] }
 0x48b   :  { %v7655_v32 = vpop.eup %7654 }
 0x48c   :  { %v10069_v59 = vmul.f32 %v7655_v32, %v7653_v28  ;;  %v2568_v28 = vld [vmem:[%s12475_s2 + $0x158] sm:$0xff] }
 0x48d   :  { %v2572_v32 = vld [vmem:[%s12475_s2 + $0x178] sm:$0xff] }
 0x48e   :  { %2419 = vmatmul.mubr.f32.vlgmr.msra.gmra.mrb[22].mxu0 %v10069_v59  ;;  %2490 = vmatmul.mubr.f32.vlgmr.msra.gmra.mrb[22].mxu1 %v10069_v59  ;;  %v10221_v49 = vpack.c.bf16 %v2572_v32, %v2568_v28  ;;  %v2583_v28 = vld [vmem:[%s12475_s2 + $0x1d0] sm:$0xff] }
 0x48f   :  { %6544 = vmatpush1.bf16.msra.mxu0 %v10059_v21  ;;  %6576 = vmatpush1.bf16.msra.mxu1 %v10061_v26  ;;  %v2587_v32 = vld [vmem:[%s12475_s2 + $0x1f0] sm:$0xff] }
 0x490   :  { %6546 = vmatprep.subr.bf16.mxu0 %v10071_v14  ;;  %6578 = vmatprep.subr.bf16.mxu1 %v10073_v9  ;;  %v10305_v36 = vpack.c.bf16 %v2587_v32, %v2583_v28  ;;  %v2767_v28 = vld [vmem:[%s12476_s4 + $0x40] sm:$0xff] }
 0x491   :  { %2653 = vmatprep.mubr.f32.mxu0 %v12789_v3  ;;  %2724 = vmatprep.mubr.f32.mxu1 %v12789_v3  ;;  %v2771_v32 = vld [vmem:[%s12476_s4 + $0x60] sm:$0xff] }
 0x492   :  { %v10371_v2 = vpack.c.bf16 %v2771_v32, %v2767_v28  ;;  %v10405_v28 = vpack.c.bf16 %v2782_v15, %v2778_v10  ;;  %v10407_v32 = vpack.c.bf16 %v2779_v23, %v2775_v56  ;;  %v2788_v10 = vld [vmem:[%s12476_s4 + $0xe8] sm:$0xff]  ;;  %v2786_v15 = vld [vmem:[%s12476_s4 + $0xd8] sm:$0xff] }
 0x493   :  { %6548 = vmatpush1.bf16.msra.mxu0 %v10097_v5  ;;  %6580 = vmatpush1.bf16.msra.mxu1 %v10099_v52  ;;  %v2790_v23 = vld [vmem:[%s12476_s4 + $0xf8] sm:$0xff] }
 0x494   :  { %6550 = vmatprep.subr.bf16.mxu0 %v10109_v30  ;;  %6582 = vmatprep.subr.bf16.mxu1 %v10111_v51  ;;  %12963 = vst [vmem:[#allocation8_spill] sm:$0xff] %v10405_v28  ;;  %12964 = vst [vmem:[#allocation9_spill] sm:$0xff] %v10407_v32  ;;  %v10441_v18 = vpack.c.bf16 %v2790_v23, %v2786_v15  ;;  %v2792_v15 = vld [vmem:[%s12476_s4 + $0x108] sm:$0xff] }
 0x495   :  { %v2796_v23 = vld [vmem:[%s12476_s4 + $0x128] sm:$0xff] }
 0x496   :  { %12967 = vst [vmem:[#allocation12_spill] sm:$0xff] %v10441_v18 }
 0x497   :  { %6552 = vmatpush1.bf16.msra.mxu0 %v10135_v20  ;;  %6584 = vmatpush1.bf16.msra.mxu1 %v10137_v4 }
 0x498   :  { %6554 = vmatprep.subr.bf16.mxu0 %v10147_v62  ;;  %6586 = vmatprep.subr.bf16.mxu1 %v10149_v38 }
 0x49b   :  { %6556 = vmatpush1.bf16.msra.mxu0 %v10171_v60  ;;  %6588 = vmatpush1.bf16.msra.mxu1 %v10173_v12 }
 0x49c   :  { %6558 = vmatprep.subr.bf16.mxu0 %v10183_v16  ;;  %6590 = vmatprep.subr.bf16.mxu1 %v10185_v50 }
 0x49f   :  { %6560 = vmatpush1.bf16.msra.mxu0 %v10207_v40  ;;  %6592 = vmatpush1.bf16.msra.mxu1 %v10209_v44 }
 0x4a0   :  { %6562 = vmatprep.subr.bf16.mxu0 %v10219_v37  ;;  %6594 = vmatprep.subr.bf16.mxu1 %v10221_v49 }
 0x4a3   :  { %6564 = vmatpush1.bf16.msra.mxu0 %v10243_v22  ;;  %6596 = vmatpush1.bf16.msra.mxu1 %v10245_v34 }
 0x4a4   :  { %6566 = vmatprep.subr.bf16.mxu0 %v10255_v54  ;;  %6598 = vmatprep.subr.bf16.mxu1 %v10257_v29 }
 0x4a7   :  { %6568 = vmatpush1.bf16.msra.mxu0 %v10279_v55  ;;  %6600 = vmatpush1.bf16.msra.mxu1 %v10281_v13 }
 0x4a8   :  { %6570 = vmatprep.subr.bf16.mxu0 %v10288_v63  ;;  %6602 = vmatprep.subr.bf16.mxu1 %v10290_v19 }
 0x4ab   :  { %6572 = vmatpush1.bf16.msra.mxu0 %v10303_v31  ;;  %6604 = vmatpush1.bf16.msra.mxu1 %v10305_v36 }
 0x4ac   :  { %6606 = vmatprep.subr.bf16.mxu0 %v10322_v24  ;;  %6670 = vmatprep.subr.bf16.mxu1 %v10333_v41 }
 0x4ae   :  { %2654 = vmatmul.mubr.f32.vlgmr.msra.gmra.mrb[8].mxu0 %v10069_v59  ;;  %2725 = vmatmul.mubr.f32.vlgmr.msra.gmra.mrb[8].mxu1 %v10069_v59  ;;  %v2759_v59 = vld [vmem:[%s12476_s4] sm:$0xff] }
 0x4af   :  { %v10335_v43 = vpack.c.bf16 %v2763_v6, %v2759_v59  ;;  %6672 = vmatpush1.bf16.msra.mxu1 %v10344_v39  ;;  %v10380_v59 = vpack.c.bf16 %v2773_v47, %v2769_v58  ;;  %v2776_v6 = vld [vmem:[%s12476_s4 + $0x88] sm:$0xff]  ;;  %v2777_v58 = vld [vmem:[%s12476_s4 + $0x90] sm:$0xff] }
 0x4b0   :  { %6674 = vmatprep.subr.bf16.mxu1 %v10369_v0  ;;  %v10394_v7 = vpack.c.bf16 %v2780_v46, %v2776_v6  ;;  %v2781_v47 = vld [vmem:[%s12476_s4 + $0xb0] sm:$0xff]  ;;  %v2784_v46 = vld [vmem:[%s12476_s4 + $0xc8] sm:$0xff] }
 0x4b1   :  { %6608 = vmatpush1.bf16.msra.mxu0 %v10335_v43  ;;  %v10416_v6 = vpack.c.bf16 %v2781_v47, %v2777_v58  ;;  %v10430_v56 = vpack.c.bf16 %v2788_v10, %v2784_v46  ;;  %v2783_v58 = vld [vmem:[%s12476_s4 + $0xc0] sm:$0xff]  ;;  %v2785_v46 = vld [vmem:[%s12476_s4 + $0xd0] sm:$0xff] }
 0x4b2   :  { %6610 = vmatprep.subr.bf16.mxu0 %v10358_v33  ;;  %12962 = vst [vmem:[#allocation7_spill] sm:$0xff] %v10394_v7  ;;  %v2787_v47 = vld [vmem:[%s12476_s4 + $0xe0] sm:$0xff]  ;;  %v2789_v10 = vld [vmem:[%s12476_s4 + $0xf0] sm:$0xff] }
 0x4b3   :  { %6676 = vmatpush1.bf16.msra.mxu1 %v10380_v59  ;;  %12965 = vst [vmem:[#allocation10_spill] sm:$0xff] %v10416_v6  ;;  %12966 = vst [vmem:[#allocation11_spill] sm:$0xff] %v10430_v56  ;;  %v10443_v35 = vpack.c.bf16 %v2787_v47, %v2783_v58  ;;  %v2794_v58 = vld [vmem:[%s12476_s4 + $0x118] sm:$0xff]  ;;  %v10466_v47 = vpack.c.bf16 %v2796_v23, %v2792_v15  ;;  %v2793_v15 = vld [vmem:[%s12476_s4 + $0x110] sm:$0xff] }
 0x4b4   :  { %6678 = vmatprep.subr.bf16.mxu1 %v10405_v28  ;;  %v2797_v23 = vld [vmem:[%s12476_s4 + $0x130] sm:$0xff] }
 0x4b5   :  { %6612 = vmatpush1.bf16.msra.mxu0 %v10371_v2  ;;  %12968 = vst [vmem:[#allocation13_spill] sm:$0xff] %v10443_v35  ;;  %12970 = vst [vmem:[#allocation15_spill] sm:$0xff] %v10466_v47  ;;  %v2873_v28 = vld [vmem:[%s12476_s4 + $0x390] sm:$0xff] }
 0x4b6   :  { %6614 = vmatprep.subr.bf16.mxu0 %v10394_v7 }
 0x4b7   :  { %6680 = vmatpush1.bf16.msra.mxu1 %v10416_v6  ;;  %v10452_v6 = vpack.c.bf16 %v2789_v10, %v2785_v46  ;;  %v2798_v46 = vld [vmem:[%s12476_s4 + $0x138] sm:$0xff]  ;;  %v2791_v10 = vld [vmem:[%s12476_s4 + $0x100] sm:$0xff] }
 0x4b8   :  { %6682 = vmatprep.subr.bf16.mxu1 %v10441_v18  ;;  %v10477_v18 = vpack.c.bf16 %v2798_v46, %v2794_v58  ;;  %v2804_v58 = vld [vmem:[%s12476_s4 + $0x168] sm:$0xff]  ;;  %v2802_v46 = vld [vmem:[%s12476_s4 + $0x158] sm:$0xff] }
 0x4b9   :  { %6616 = vmatpush1.bf16.msra.mxu0 %v10407_v32  ;;  %12969 = vst [vmem:[#allocation14_spill] sm:$0xff] %v10452_v6 }
 0x4ba   :  { %6618 = vmatprep.subr.bf16.mxu0 %v10430_v56  ;;  %12971 = vst [vmem:[#allocation16_spill] sm:$0xff] %v10477_v18 }
 0x4bb   :  { %6684 = vmatpush1.bf16.msra.mxu1 %v10452_v6  ;;  %v10488_v6 = vpack.c.bf16 %v2797_v23, %v2793_v15  ;;  %v2806_v15 = vld [vmem:[%s12476_s4 + $0x178] sm:$0xff]  ;;  %v2799_v23 = vld [vmem:[%s12476_s4 + $0x140] sm:$0xff] }
 0x4bc   :  { %6686 = vmatprep.subr.bf16.mxu1 %v10477_v18 }
 0x4bd   :  { %6620 = vmatpush1.bf16.msra.mxu0 %v10443_v35  ;;  %v2795_v35 = vld [vmem:[%s12476_s4 + $0x120] sm:$0xff]  ;;  %12973 = vst [vmem:[#allocation18_spill] sm:$0xff] %v10488_v6 }
 0x4be   :  { %v10479_v56 = vpack.c.bf16 %v2795_v35, %v2791_v10  ;;  %6622 = vmatprep.subr.bf16.mxu0 %v10466_v47  ;;  %v2800_v35 = vld [vmem:[%s12476_s4 + $0x148] sm:$0xff] }
 0x4bf   :  { %6688 = vmatpush1.bf16.msra.mxu1 %v10488_v6  ;;  %v10502_v10 = vpack.c.bf16 %v2804_v58, %v2800_v35  ;;  %v2803_v6 = vld [vmem:[%s12476_s4 + $0x160] sm:$0xff]  ;;  %v2801_v35 = vld [vmem:[%s12476_s4 + $0x150] sm:$0xff] }
 0x4c0   :  { %12972 = vst [vmem:[#allocation17_spill] sm:$0xff] %v10479_v56  ;;  %v10515_v18 = vpack.c.bf16 %v2803_v6, %v2799_v23  ;;  %v2805_v58 = vld [vmem:[%s12476_s4 + $0x170] sm:$0xff]  ;;  %v2808_v6 = vld [vmem:[%s12476_s4 + $0x188] sm:$0xff] }
 0x4c1   :  { %6624 = vmatpush1.bf16.msra.mxu0 %v10479_v56  ;;  %12974 = vst [vmem:[#allocation19_spill] sm:$0xff] %v10502_v10  ;;  %v10513_v56 = vpack.c.bf16 %v2806_v15, %v2802_v46  ;;  %v10524_v47 = vpack.c.bf16 %v2805_v58, %v2801_v35  ;;  %v2812_v46 = vld [vmem:[%s12476_s4 + $0x1a8] sm:$0xff]  ;;  %v2810_v15 = vld [vmem:[%s12476_s4 + $0x198] sm:$0xff]  ;;  %v2807_v58 = vld [vmem:[%s12476_s4 + $0x180] sm:$0xff] }
 0x4c2   :  { %12976 = vst [vmem:[#allocation21_spill] sm:$0xff] %v10515_v18  ;;  %6626 = vmatprep.subr.bf16.mxu0 %v10502_v10  ;;  %v10538_v23 = vpack.c.bf16 %v2812_v46, %v2808_v6  ;;  %v2814_v35 = vld [vmem:[%s12476_s4 + $0x1b8] sm:$0xff]  ;;  %v2809_v6 = vld [vmem:[%s12476_s4 + $0x190] sm:$0xff] }
 0x4c3   :  { %12975 = vst [vmem:[#allocation20_spill] sm:$0xff] %v10513_v56  ;;  %12977 = vst [vmem:[#allocation22_spill] sm:$0xff] %v10524_v47  ;;  %6690 = vmatprep.subr.bf16.mxu1 %v10513_v56  ;;  %v10549_v56 = vpack.c.bf16 %v2814_v35, %v2810_v15  ;;  %v2813_v46 = vld [vmem:[%s12476_s4 + $0x1b0] sm:$0xff]  ;;  %v2820_v15 = vld [vmem:[%s12476_s4 + $0x1e8] sm:$0xff] }
 0x4c4   :  { %6692 = vmatpush1.bf16.msra.mxu1 %v10524_v47  ;;  %12978 = vst [vmem:[#allocation23_spill] sm:$0xff] %v10538_v23  ;;  %v10560_v47 = vpack.c.bf16 %v2813_v46, %v2809_v6  ;;  %v2818_v35 = vld [vmem:[%s12476_s4 + $0x1d8] sm:$0xff]  ;;  %v2815_v46 = vld [vmem:[%s12476_s4 + $0x1c0] sm:$0xff] }
 0x4c5   :  { %6628 = vmatpush1.bf16.msra.mxu0 %v10515_v18  ;;  %v2811_v18 = vld [vmem:[%s12476_s4 + $0x1a0] sm:$0xff]  ;;  %12979 = vst [vmem:[#allocation24_spill] sm:$0xff] %v10549_v56  ;;  %6694 = vmatprep.subr.bf16.mxu1 %v10549_v56  ;;  %v2822_v6 = vld [vmem:[%s12476_s4 + $0x1f8] sm:$0xff] }
 0x4c6   :  { %v10551_v10 = vpack.c.bf16 %v2811_v18, %v2807_v58  ;;  %6630 = vmatprep.subr.bf16.mxu0 %v10538_v23  ;;  %12981 = vst [vmem:[#allocation26_spill] sm:$0xff] %v10560_v47  ;;  %v2816_v18 = vld [vmem:[%s12476_s4 + $0x1c8] sm:$0xff]  ;;  %v10585_v56 = vpack.c.bf16 %v2822_v6, %v2818_v35  ;;  %v2826_v6 = vld [vmem:[%s12476_s4 + $0x218] sm:$0xff] }
 0x4c7   :  { %v10574_v58 = vpack.c.bf16 %v2820_v15, %v2816_v18  ;;  %v2817_v18 = vld [vmem:[%s12476_s4 + $0x1d0] sm:$0xff]  ;;  %v2828_v35 = vld [vmem:[%s12476_s4 + $0x228] sm:$0xff] }
 0x4c8   :  { %12980 = vst [vmem:[#allocation25_spill] sm:$0xff] %v10551_v10  ;;  %6696 = vmatpush1.bf16.msra.mxu1 %v10560_v47  ;;  %12983 = vst [vmem:[#allocation28_spill] sm:$0xff] %v10585_v56  ;;  %v2821_v15 = vld [vmem:[%s12476_s4 + $0x1f0] sm:$0xff] }
 0x4c9   :  { %6632 = vmatpush1.bf16.msra.mxu0 %v10551_v10  ;;  %12982 = vst [vmem:[#allocation27_spill] sm:$0xff] %v10574_v58  ;;  %v2819_v10 = vld [vmem:[%s12476_s4 + $0x1e0] sm:$0xff]  ;;  %v10596_v47 = vpack.c.bf16 %v2821_v15, %v2817_v18  ;;  %6698 = vmatprep.subr.bf16.mxu1 %v10585_v56  ;;  %v2830_v18 = vld [vmem:[%s12476_s4 + $0x238] sm:$0xff] }
 0x4ca   :  { %v10587_v23 = vpack.c.bf16 %v2819_v10, %v2815_v46  ;;  %6634 = vmatprep.subr.bf16.mxu0 %v10574_v58  ;;  %v2824_v10 = vld [vmem:[%s12476_s4 + $0x208] sm:$0xff]  ;;  %v2823_v15 = vld [vmem:[%s12476_s4 + $0x200] sm:$0xff]  ;;  %v10621_v56 = vpack.c.bf16 %v2830_v18, %v2826_v6  ;;  %v2834_v18 = vld [vmem:[%s12476_s4 + $0x258] sm:$0xff] }
 0x4cb   :  { %12985 = vst [vmem:[#allocation30_spill] sm:$0xff] %v10596_v47  ;;  %v10610_v46 = vpack.c.bf16 %v2828_v35, %v2824_v10  ;;  %v2825_v10 = vld [vmem:[%s12476_s4 + $0x210] sm:$0xff]  ;;  %v2836_v6 = vld [vmem:[%s12476_s4 + $0x268] sm:$0xff] }
 0x4cc   :  { %12984 = vst [vmem:[#allocation29_spill] sm:$0xff] %v10587_v23  ;;  %6700 = vmatpush1.bf16.msra.mxu1 %v10596_v47  ;;  %12987 = vst [vmem:[#allocation32_spill] sm:$0xff] %v10621_v56  ;;  %v2829_v35 = vld [vmem:[%s12476_s4 + $0x230] sm:$0xff] }
 0x4cd   :  { %6636 = vmatpush1.bf16.msra.mxu0 %v10587_v23  ;;  %12986 = vst [vmem:[#allocation31_spill] sm:$0xff] %v10610_v46  ;;  %v2827_v23 = vld [vmem:[%s12476_s4 + $0x220] sm:$0xff]  ;;  %v10632_v47 = vpack.c.bf16 %v2829_v35, %v2825_v10  ;;  %6702 = vmatprep.subr.bf16.mxu1 %v10621_v56  ;;  %v2838_v10 = vld [vmem:[%s12476_s4 + $0x278] sm:$0xff] }
 0x4ce   :  { %v10623_v58 = vpack.c.bf16 %v2827_v23, %v2823_v15  ;;  %6638 = vmatprep.subr.bf16.mxu0 %v10610_v46  ;;  %v2832_v23 = vld [vmem:[%s12476_s4 + $0x248] sm:$0xff]  ;;  %v2831_v35 = vld [vmem:[%s12476_s4 + $0x240] sm:$0xff]  ;;  %v10657_v56 = vpack.c.bf16 %v2838_v10, %v2834_v18  ;;  %v2842_v10 = vld [vmem:[%s12476_s4 + $0x298] sm:$0xff] }
 0x4cf   :  { %12989 = vst [vmem:[#allocation34_spill] sm:$0xff] %v10632_v47  ;;  %v10646_v15 = vpack.c.bf16 %v2836_v6, %v2832_v23  ;;  %v2833_v23 = vld [vmem:[%s12476_s4 + $0x250] sm:$0xff]  ;;  %v2844_v18 = vld [vmem:[%s12476_s4 + $0x2a8] sm:$0xff] }
 0x4d0   :  { %12988 = vst [vmem:[#allocation33_spill] sm:$0xff] %v10623_v58  ;;  %6704 = vmatpush1.bf16.msra.mxu1 %v10632_v47  ;;  %12991 = vst [vmem:[#allocation36_spill] sm:$0xff] %v10657_v56  ;;  %v2837_v6 = vld [vmem:[%s12476_s4 + $0x270] sm:$0xff] }
 0x4d1   :  { %6640 = vmatpush1.bf16.msra.mxu0 %v10623_v58  ;;  %12990 = vst [vmem:[#allocation35_spill] sm:$0xff] %v10646_v15  ;;  %v2835_v58 = vld [vmem:[%s12476_s4 + $0x260] sm:$0xff]  ;;  %v10668_v47 = vpack.c.bf16 %v2837_v6, %v2833_v23  ;;  %6706 = vmatprep.subr.bf16.mxu1 %v10657_v56  ;;  %v2846_v23 = vld [vmem:[%s12476_s4 + $0x2b8] sm:$0xff] }
 0x4d2   :  { %v10659_v46 = vpack.c.bf16 %v2835_v58, %v2831_v35  ;;  %6642 = vmatprep.subr.bf16.mxu0 %v10646_v15  ;;  %v2840_v58 = vld [vmem:[%s12476_s4 + $0x288] sm:$0xff]  ;;  %v2839_v6 = vld [vmem:[%s12476_s4 + $0x280] sm:$0xff]  ;;  %v10693_v56 = vpack.c.bf16 %v2846_v23, %v2842_v10  ;;  %v2850_v23 = vld [vmem:[%s12476_s4 + $0x2d8] sm:$0xff] }
 0x4d3   :  { %12993 = vst [vmem:[#allocation38_spill] sm:$0xff] %v10668_v47  ;;  %v10682_v35 = vpack.c.bf16 %v2844_v18, %v2840_v58  ;;  %v2841_v58 = vld [vmem:[%s12476_s4 + $0x290] sm:$0xff]  ;;  %v2852_v10 = vld [vmem:[%s12476_s4 + $0x2e8] sm:$0xff] }
 0x4d4   :  { %12992 = vst [vmem:[#allocation37_spill] sm:$0xff] %v10659_v46  ;;  %6708 = vmatpush1.bf16.msra.mxu1 %v10668_v47  ;;  %12995 = vst [vmem:[#allocation40_spill] sm:$0xff] %v10693_v56  ;;  %v2845_v18 = vld [vmem:[%s12476_s4 + $0x2b0] sm:$0xff] }
 0x4d5   :  { %6644 = vmatpush1.bf16.msra.mxu0 %v10659_v46  ;;  %12994 = vst [vmem:[#allocation39_spill] sm:$0xff] %v10682_v35  ;;  %v2843_v46 = vld [vmem:[%s12476_s4 + $0x2a0] sm:$0xff]  ;;  %v10704_v47 = vpack.c.bf16 %v2845_v18, %v2841_v58  ;;  %6710 = vmatprep.subr.bf16.mxu1 %v10693_v56  ;;  %v2854_v58 = vld [vmem:[%s12476_s4 + $0x2f8] sm:$0xff] }
 0x4d6   :  { %v10695_v15 = vpack.c.bf16 %v2843_v46, %v2839_v6  ;;  %6646 = vmatprep.subr.bf16.mxu0 %v10682_v35  ;;  %v2848_v46 = vld [vmem:[%s12476_s4 + $0x2c8] sm:$0xff]  ;;  %v2847_v18 = vld [vmem:[%s12476_s4 + $0x2c0] sm:$0xff]  ;;  %v10729_v56 = vpack.c.bf16 %v2854_v58, %v2850_v23  ;;  %v2858_v58 = vld [vmem:[%s12476_s4 + $0x318] sm:$0xff] }
 0x4d7   :  { %12997 = vst [vmem:[#allocation42_spill] sm:$0xff] %v10704_v47  ;;  %v10718_v6 = vpack.c.bf16 %v2852_v10, %v2848_v46  ;;  %v2849_v46 = vld [vmem:[%s12476_s4 + $0x2d0] sm:$0xff]  ;;  %v2860_v23 = vld [vmem:[%s12476_s4 + $0x328] sm:$0xff] }
 0x4d8   :  { %12996 = vst [vmem:[#allocation41_spill] sm:$0xff] %v10695_v15  ;;  %6712 = vmatpush1.bf16.msra.mxu1 %v10704_v47  ;;  %12999 = vst [vmem:[#allocation44_spill] sm:$0xff] %v10729_v56  ;;  %v2853_v10 = vld [vmem:[%s12476_s4 + $0x2f0] sm:$0xff] }
 0x4d9   :  { %6648 = vmatpush1.bf16.msra.mxu0 %v10695_v15  ;;  %12998 = vst [vmem:[#allocation43_spill] sm:$0xff] %v10718_v6  ;;  %v2851_v15 = vld [vmem:[%s12476_s4 + $0x2e0] sm:$0xff]  ;;  %v10740_v47 = vpack.c.bf16 %v2853_v10, %v2849_v46  ;;  %6714 = vmatprep.subr.bf16.mxu1 %v10729_v56  ;;  %v2862_v46 = vld [vmem:[%s12476_s4 + $0x338] sm:$0xff] }
 0x4da   :  { %v10731_v35 = vpack.c.bf16 %v2851_v15, %v2847_v18  ;;  %6650 = vmatprep.subr.bf16.mxu0 %v10718_v6  ;;  %v2856_v15 = vld [vmem:[%s12476_s4 + $0x308] sm:$0xff]  ;;  %v2855_v10 = vld [vmem:[%s12476_s4 + $0x300] sm:$0xff]  ;;  %v10765_v56 = vpack.c.bf16 %v2862_v46, %v2858_v58  ;;  %v2866_v46 = vld [vmem:[%s12476_s4 + $0x358] sm:$0xff] }
 0x4db   :  { %13001 = vst [vmem:[#allocation46_spill] sm:$0xff] %v10740_v47  ;;  %v10754_v18 = vpack.c.bf16 %v2860_v23, %v2856_v15  ;;  %v2857_v15 = vld [vmem:[%s12476_s4 + $0x310] sm:$0xff]  ;;  %v2868_v58 = vld [vmem:[%s12476_s4 + $0x368] sm:$0xff] }
 0x4dc   :  { %13000 = vst [vmem:[#allocation45_spill] sm:$0xff] %v10731_v35  ;;  %6716 = vmatpush1.bf16.msra.mxu1 %v10740_v47  ;;  %13003 = vst [vmem:[#allocation48_spill] sm:$0xff] %v10765_v56  ;;  %v2861_v23 = vld [vmem:[%s12476_s4 + $0x330] sm:$0xff] }
 0x4dd   :  { %6652 = vmatpush1.bf16.msra.mxu0 %v10731_v35  ;;  %13002 = vst [vmem:[#allocation47_spill] sm:$0xff] %v10754_v18  ;;  %v2859_v35 = vld [vmem:[%s12476_s4 + $0x320] sm:$0xff]  ;;  %v10776_v47 = vpack.c.bf16 %v2861_v23, %v2857_v15  ;;  %6718 = vmatprep.subr.bf16.mxu1 %v10765_v56  ;;  %v2870_v15 = vld [vmem:[%s12476_s4 + $0x378] sm:$0xff] }
 0x4de   :  { %v10767_v6 = vpack.c.bf16 %v2859_v35, %v2855_v10  ;;  %6654 = vmatprep.subr.bf16.mxu0 %v10754_v18  ;;  %v2864_v35 = vld [vmem:[%s12476_s4 + $0x348] sm:$0xff]  ;;  %v2863_v23 = vld [vmem:[%s12476_s4 + $0x340] sm:$0xff]  ;;  %v10801_v56 = vpack.c.bf16 %v2870_v15, %v2866_v46  ;;  %v2874_v46 = vld [vmem:[%s12476_s4 + $0x398] sm:$0xff] }
 0x4df   :  { %13005 = vst [vmem:[#allocation50_spill] sm:$0xff] %v10776_v47  ;;  %v10790_v10 = vpack.c.bf16 %v2868_v58, %v2864_v35  ;;  %v2865_v35 = vld [vmem:[%s12476_s4 + $0x350] sm:$0xff]  ;;  %v2878_v15 = vld [vmem:[%s12476_s4 + $0x3b8] sm:$0xff] }
 0x4e0   :  { %13004 = vst [vmem:[#allocation49_spill] sm:$0xff] %v10767_v6  ;;  %6720 = vmatpush1.bf16.msra.mxu1 %v10776_v47  ;;  %13007 = vst [vmem:[#allocation52_spill] sm:$0xff] %v10801_v56  ;;  %v2869_v58 = vld [vmem:[%s12476_s4 + $0x370] sm:$0xff]  ;;  %v2872_v47 = vld [vmem:[%s12476_s4 + $0x388] sm:$0xff] }
 0x4e1   :  { %6656 = vmatpush1.bf16.msra.mxu0 %v10767_v6  ;;  %13006 = vst [vmem:[#allocation51_spill] sm:$0xff] %v10790_v10  ;;  %v2867_v6 = vld [vmem:[%s12476_s4 + $0x360] sm:$0xff]  ;;  %v10815_v32 = vpack.c.bf16 %v2869_v58, %v2865_v35  ;;  %6722 = vmatprep.subr.bf16.mxu1 %v10801_v56  ;;  %v10830_v35 = vpack.c.bf16 %v2878_v15, %v2874_v46  ;;  %v2884_v46 = vld [vmem:[%s12476_s4 + $0x3e8] sm:$0xff] }
 0x4e2   :  { %v10803_v18 = vpack.c.bf16 %v2867_v6, %v2863_v23  ;;  %6658 = vmatprep.subr.bf16.mxu0 %v10790_v10  ;;  %v2876_v6 = vld [vmem:[%s12476_s4 + $0x3a8] sm:$0xff]  ;;  %v2871_v58 = vld [vmem:[%s12476_s4 + $0x380] sm:$0xff] }
 0x4e3   :  { %13009 = vst [vmem:[#allocation56_spill] sm:$0xff] %v10815_v32  ;;  %v10828_v23 = vpack.c.bf16 %v2876_v6, %v2872_v47  ;;  %13011 = vst [vmem:[#allocation59_spill] sm:$0xff] %v10830_v35  ;;  %v2875_v10 = vld [vmem:[%s12476_s4 + $0x3a0] sm:$0xff]  ;;  %v2877_v47 = vld [vmem:[%s12476_s4 + $0x3b0] sm:$0xff] }
 0x4e4   :  { %13008 = vst [vmem:[#allocation55_spill] sm:$0xff] %v10803_v18  ;;  %6724 = vmatpush1.bf16.msra.mxu1 %v10815_v32  ;;  %v10842_v56 = vpack.c.bf16 %v2875_v10, %v2871_v58  ;;  %v2880_v6 = vld [vmem:[%s12476_s4 + $0x3c8] sm:$0xff]  ;;  %v10855_v15 = vpack.c.bf16 %v2877_v47, %v2873_v28  ;;  %v2882_v58 = vld [vmem:[%s12476_s4 + $0x3d8] sm:$0xff]  ;;  %v2883_v28 = vld [vmem:[%s12476_s4 + $0x3e0] sm:$0xff] }
 0x4e5   :  { %6660 = vmatpush1.bf16.msra.mxu0 %v10803_v18  ;;  %13010 = vst [vmem:[#allocation57_spill] sm:$0xff] %v10828_v23  ;;  %6726 = vmatprep.subr.bf16.mxu1 %v10830_v35  ;;  %v10857_v10 = vpack.c.bf16 %v2884_v46, %v2880_v6  ;;  %v2886_v32 = vld [vmem:[%s12476_s4 + $0x3f8] sm:$0xff]  ;;  %v2879_v18 = vld [vmem:[%s12476_s4 + $0x3c0] sm:$0xff]  ;;  %v2881_v47 = vld [vmem:[%s12476_s4 + $0x3d0] sm:$0xff] }
 0x4e6   :  { %13012 = vst [vmem:[#allocation60_spill] sm:$0xff] %v10842_v56  ;;  %6662 = vmatprep.subr.bf16.mxu0 %v10828_v23  ;;  %13013 = vst [vmem:[#allocation61_spill] sm:$0xff] %v10855_v15  ;;  %v10868_v7 = vpack.c.bf16 %v2886_v32, %v2882_v58  ;;  %v2885_v6 = vld [vmem:[%s12476_s4 + $0x3f0] sm:$0xff]  ;;  %v10880_v46 = vpack.c.bf16 %v2883_v28, %v2879_v18 }
 0x4e7   :  { %13014 = vst [vmem:[#allocation62_spill] sm:$0xff] %v10857_v10  ;;  %v10884_v32 = vpack.c.bf16 %v2885_v6, %v2881_v47 }
 0x4e8   :  { %13015 = vst [vmem:[#allocation63_spill] sm:$0xff] %v10868_v7  ;;  %13016 = vst [vmem:[#allocation64_spill] sm:$0xff] %v10880_v46  ;;  %6728 = vmatpush1.bf16.msra.mxu1 %v10855_v15 }
 0x4e9   :  { %6664 = vmatpush1.bf16.msra.mxu0 %v10842_v56  ;;  %13017 = vst [vmem:[#allocation66_spill] sm:$0xff] %v10884_v32  ;;  %6730 = vmatprep.subr.bf16.mxu1 %v10868_v7 }
 0x4ea   :  { %6666 = vmatprep.subr.bf16.mxu0 %v10857_v10 }
 0x4ec   :  { %6732 = vmatpush1.bf16.msra.mxu1 %v10884_v32 }
 0x4ed   :  { %6668 = vmatpush1.bf16.msra.mxu0 %v10880_v46  ;;  %6766 = vmatprep.subr.bf16.mxu1 %v10011_v27 }
 0x4ee   :  { %6734 = vmatprep.subr.bf16.mxu0 %v10006_v61 }
 0x561   :  { %v2420_v58 = vpop.f32.mrb[22].mxu0  ;;  %v2491_v56 = vpop.f32.mrb[22].mxu1 }
 0x562   :  { %v2421_v18 = vadd.f32 %v2420_v58, %v12960_v57  ;;  %v2422_v28 = vpop.f32.mrb[23].mxu0  ;;  %v2493_v15 = vpop.f32.mrb[23].mxu1  ;;  %v2492_v32 = vadd.f32 %v2491_v56, %v9007_v53 }
 0x563   :  { %v2423_v10 = vadd.f32 %v2422_v28, %v8997_v42  ;;  %v2494_v46 = vadd.f32 %v2493_v15, %v9003_v45 }
 0x564   :  { %v5451_v47 = vmul.f32 -1.442695, %v2421_v18 }
 0x565   :  { %v5452_v6 = vmul.f32 -1.442695, %v2423_v10  ;;  %v5453_v7 = vmul.f32 -1.442695, %v2494_v46 }
 0x566   :  { %7656 = vpow2.f32 %v5451_v47 }
 0x567   :  { %7658 = vpow2.f32 %v5452_v6 }
 0x568   :  { %7660 = vpow2.f32 %v5453_v7 }
 0x569   :  { %7662 = vtanh.f32 %v2492_v32 }
 0x570   :  { %v7657_v61 = vpop.eup %7656 }
 0x571   :  { %v7659_v35 = vpop.eup %7658  ;;  %v2499_v27 = vadd.f32 1.0, %v7657_v61 }
 0x572   :  { %v2505_v23 = vadd.f32 1.0, %v7659_v35  ;;  %v7661_v58 = vpop.eup %7660 }
 0x573   :  { %7664 = vrcp.f32 %v2499_v27  ;;  %v7663_v57 = vpop.eup %7662  ;;  %v2512_v47 = vadd.f32 1.0, %v7661_v58 }
 0x574   :  { %7666 = vrcp.f32 %v2505_v23 }
 0x575   :  { %7668 = vrcp.f32 %v2512_v47 }
 0x57d   :  { %v7665_v28 = vpop.eup %7664 }
 0x57e   :  { %v7667_v18 = vpop.eup %7666  ;;  %v2516_v10 = vmul.f32 %v7665_v28, %v7663_v57 }
 0x57f   :  { %v2515_v6 = vmul.f32 %v7667_v18, %v10020_v8  ;;  %v7669_v8 = vpop.eup %7668 }
 0x581   :  { %v10896_v15 = vadd.f32 %v2516_v10, %v2515_v6  ;;  %v2655_v46 = vpop.f32.mrb[8].mxu0  ;;  %v2726_v56 = vpop.f32.mrb[8].mxu1 }
 0x582   :  { %v7485_v61 = vadd.f32 %v2655_v46, %v12843_v1  ;;  %v2657_v7 = vpop.f32.mrb[9].mxu0  ;;  %v2728_v32 = vpop.f32.mrb[9].mxu1  ;;  %v7501_v18 = vadd.f32 %v2726_v56, %v8870_v11 }
 0x583   :  { %v7486_v35 = vadd.f32 %v2657_v7, %v12844_v25  ;;  %7670 = vtanh.f32 %v10896_v15  ;;  %v7502_v57 = vadd.f32 %v2728_v32, %v12845_v48 }
 0x584   :  { %v5454_v23 = vmul.f32 -1.442695, %v7485_v61 }
 0x585   :  { %v5455_v27 = vmul.f32 -1.442695, %v7486_v35  ;;  %v5456_v28 = vmul.f32 -1.442695, %v7502_v57 }
 0x586   :  { %7672 = vpow2.f32 %v5454_v23 }
 0x587   :  { %7674 = vpow2.f32 %v5455_v27 }
 0x588   :  { %7676 = vpow2.f32 %v5456_v28 }
 0x589   :  { %7678 = vtanh.f32 %v7501_v18  ;;  %v13058_v18 = vld [vmem:[#allocation46_spill] sm:$0xff] }
 0x58d   :  { %v7671_v58 = vpop.eup %7670 }
 0x58e   :  { %v10903_v10 = vmul.f32 %v7671_v58, %v7669_v8 }
 0x590   :  { %13018 = vst [vmem:[#allocation67_spill] sm:$0xff] %v10903_v10  ;;  %v7673_v47 = vpop.eup %7672  ;;  %2951 = vmatprep.mubr.f32.mxu0 %v10903_v10  ;;  %3022 = vmatprep.mubr.f32.mxu1 %v10903_v10 }
 0x591   :  { %v7675_v6 = vpop.eup %7674  ;;  %v2738_v46 = vadd.f32 1.0, %v7673_v47 }
 0x592   :  { %v2744_v61 = vadd.f32 1.0, %v7675_v6  ;;  %v7677_v7 = vpop.eup %7676  ;;  %v13059_v6 = vld [vmem:[#allocation47_spill] sm:$0xff] }
 0x593   :  { %7680 = vrcp.f32 %v2738_v46  ;;  %v7679_v32 = vpop.eup %7678  ;;  %v2751_v56 = vadd.f32 1.0, %v7677_v7  ;;  %v13060_v46 = vld [vmem:[#allocation48_spill] sm:$0xff]  ;;  %v13062_v7 = vld [vmem:[#allocation50_spill] sm:$0xff] }
 0x594   :  { %7682 = vrcp.f32 %v2744_v61  ;;  %v13061_v61 = vld [vmem:[#allocation49_spill] sm:$0xff] }
 0x595   :  { %7684 = vrcp.f32 %v2751_v56  ;;  %v13067_v56 = vld [vmem:[#allocation57_spill] sm:$0xff] }
 0x59d   :  { %v7681_v35 = vpop.eup %7680 }
 0x59e   :  { %v7683_v23 = vpop.eup %7682  ;;  %v2755_v27 = vmul.f32 %v7681_v35, %v7679_v32  ;;  %v13063_v32 = vld [vmem:[#allocation51_spill] sm:$0xff]  ;;  %v13064_v35 = vld [vmem:[#allocation52_spill] sm:$0xff] }
 0x59f   :  { %v2754_v57 = vmul.f32 %v7683_v23, %v10032_v17  ;;  %v7685_v58 = vpop.eup %7684  ;;  %v13019_v17 = vld [vmem:[#allocation7_spill] sm:$0xff] }
 0x5a0   :  { %v13065_v23 = vld [vmem:[#allocation55_spill] sm:$0xff] }
 0x5a1   :  { %v10908_v8 = vadd.f32 %v2755_v27, %v2754_v57  ;;  %v13066_v27 = vld [vmem:[#allocation56_spill] sm:$0xff]  ;;  %v13068_v57 = vld [vmem:[#allocation59_spill] sm:$0xff] }
 0x5a3   :  { %7686 = vtanh.f32 %v10908_v8 }
 0x5ad   :  { %v7687_v47 = vpop.eup %7686 }
 0x5ae   :  { %v2758_v28 = vmul.f32 %v7687_v47, %v7685_v58  ;;  %v13069_v58 = vld [vmem:[#allocation60_spill] sm:$0xff]  ;;  %v13070_v47 = vld [vmem:[#allocation61_spill] sm:$0xff] }
 0x5b0   :  { %2952 = vmatmul.mubr.f32.vlgmr.msra.gmra.mrb[24].mxu0 %v2758_v28  ;;  %3023 = vmatmul.mubr.f32.vlgmr.msra.gmra.mrb[24].mxu1 %v2758_v28 }
 0x5b1   :  { %6736 = vmatpush1.bf16.msra.mxu0 %v10059_v21  ;;  %6768 = vmatpush1.bf16.msra.mxu1 %v10061_v26  ;;  %v13020_v21 = vld [vmem:[#allocation8_spill] sm:$0xff]  ;;  %v13021_v26 = vld [vmem:[#allocation9_spill] sm:$0xff] }
 0x5b2   :  { %6738 = vmatprep.subr.bf16.mxu0 %v10071_v14  ;;  %6770 = vmatprep.subr.bf16.mxu1 %v10073_v9  ;;  %v13022_v14 = vld [vmem:[#allocation10_spill] sm:$0xff]  ;;  %v13023_v9 = vld [vmem:[#allocation11_spill] sm:$0xff] }
 0x5b3   :  { %3186 = vmatprep.mubr.f32.mxu0 %v12789_v3  ;;  %3257 = vmatprep.mubr.f32.mxu1 %v12789_v3 }
 0x5b5   :  { %6740 = vmatpush1.bf16.msra.mxu0 %v10097_v5  ;;  %6772 = vmatpush1.bf16.msra.mxu1 %v10099_v52  ;;  %v13024_v5 = vld [vmem:[#allocation12_spill] sm:$0xff]  ;;  %v13025_v52 = vld [vmem:[#allocation13_spill] sm:$0xff] }
 0x5b6   :  { %6742 = vmatprep.subr.bf16.mxu0 %v10109_v30  ;;  %6774 = vmatprep.subr.bf16.mxu1 %v10111_v51  ;;  %v13026_v30 = vld [vmem:[#allocation14_spill] sm:$0xff]  ;;  %v13027_v51 = vld [vmem:[#allocation15_spill] sm:$0xff] }
 0x5b9   :  { %6744 = vmatpush1.bf16.msra.mxu0 %v10135_v20  ;;  %6776 = vmatpush1.bf16.msra.mxu1 %v10137_v4  ;;  %v13028_v20 = vld [vmem:[#allocation16_spill] sm:$0xff]  ;;  %v13029_v4 = vld [vmem:[#allocation17_spill] sm:$0xff] }
 0x5ba   :  { %6746 = vmatprep.subr.bf16.mxu0 %v10147_v62  ;;  %6778 = vmatprep.subr.bf16.mxu1 %v10149_v38  ;;  %v13030_v62 = vld [vmem:[#allocation18_spill] sm:$0xff]  ;;  %v13031_v38 = vld [vmem:[#allocation19_spill] sm:$0xff] }
 0x5bd   :  { %6748 = vmatpush1.bf16.msra.mxu0 %v10171_v60  ;;  %6780 = vmatpush1.bf16.msra.mxu1 %v10173_v12  ;;  %v13032_v60 = vld [vmem:[#allocation20_spill] sm:$0xff]  ;;  %v13033_v12 = vld [vmem:[#allocation21_spill] sm:$0xff] }
 0x5be   :  { %6750 = vmatprep.subr.bf16.mxu0 %v10183_v16  ;;  %6782 = vmatprep.subr.bf16.mxu1 %v10185_v50  ;;  %v13034_v16 = vld [vmem:[#allocation22_spill] sm:$0xff]  ;;  %v13035_v50 = vld [vmem:[#allocation23_spill] sm:$0xff] }
 0x5c1   :  { %6752 = vmatpush1.bf16.msra.mxu0 %v10207_v40  ;;  %6784 = vmatpush1.bf16.msra.mxu1 %v10209_v44  ;;  %v13036_v40 = vld [vmem:[#allocation24_spill] sm:$0xff]  ;;  %v13037_v44 = vld [vmem:[#allocation25_spill] sm:$0xff] }
 0x5c2   :  { %6754 = vmatprep.subr.bf16.mxu0 %v10219_v37  ;;  %6786 = vmatprep.subr.bf16.mxu1 %v10221_v49  ;;  %v13038_v37 = vld [vmem:[#allocation26_spill] sm:$0xff]  ;;  %v13039_v49 = vld [vmem:[#allocation27_spill] sm:$0xff] }
 0x5c5   :  { %6756 = vmatpush1.bf16.msra.mxu0 %v10243_v22  ;;  %6788 = vmatpush1.bf16.msra.mxu1 %v10245_v34  ;;  %v13040_v22 = vld [vmem:[#allocation28_spill] sm:$0xff]  ;;  %v13041_v34 = vld [vmem:[#allocation29_spill] sm:$0xff] }
 0x5c6   :  { %6758 = vmatprep.subr.bf16.mxu0 %v10255_v54  ;;  %6790 = vmatprep.subr.bf16.mxu1 %v10257_v29  ;;  %v13042_v54 = vld [vmem:[#allocation30_spill] sm:$0xff]  ;;  %v13043_v29 = vld [vmem:[#allocation31_spill] sm:$0xff] }
 0x5c9   :  { %6760 = vmatpush1.bf16.msra.mxu0 %v10279_v55  ;;  %6792 = vmatpush1.bf16.msra.mxu1 %v10281_v13  ;;  %v13044_v55 = vld [vmem:[#allocation32_spill] sm:$0xff]  ;;  %v13045_v13 = vld [vmem:[#allocation33_spill] sm:$0xff] }
 0x5ca   :  { %6762 = vmatprep.subr.bf16.mxu0 %v10288_v63  ;;  %6794 = vmatprep.subr.bf16.mxu1 %v10290_v19  ;;  %v13046_v63 = vld [vmem:[#allocation34_spill] sm:$0xff]  ;;  %v13047_v19 = vld [vmem:[#allocation35_spill] sm:$0xff] }
 0x5cd   :  { %6764 = vmatpush1.bf16.msra.mxu0 %v10303_v31  ;;  %6796 = vmatpush1.bf16.msra.mxu1 %v10305_v36  ;;  %v13048_v31 = vld [vmem:[#allocation36_spill] sm:$0xff]  ;;  %v13049_v36 = vld [vmem:[#allocation37_spill] sm:$0xff] }
 0x5ce   :  { %6798 = vmatprep.subr.bf16.mxu0 %v10322_v24  ;;  %6862 = vmatprep.subr.bf16.mxu1 %v10333_v41  ;;  %v13050_v24 = vld [vmem:[#allocation38_spill] sm:$0xff]  ;;  %v13051_v41 = vld [vmem:[#allocation39_spill] sm:$0xff] }
 0x5d0   :  { %3187 = vmatmul.mubr.f32.vlgmr.msra.gmra.mrb[10].mxu0 %v2758_v28  ;;  %3258 = vmatmul.mubr.f32.vlgmr.msra.gmra.mrb[10].mxu1 %v2758_v28  ;;  %v13071_v28 = vld [vmem:[#allocation62_spill] sm:$0xff] }
 0x5d1   :  { %6800 = vmatpush1.bf16.msra.mxu0 %v10335_v43  ;;  %6864 = vmatpush1.bf16.msra.mxu1 %v10344_v39  ;;  %v13052_v43 = vld [vmem:[#allocation40_spill] sm:$0xff]  ;;  %v13053_v39 = vld [vmem:[#allocation41_spill] sm:$0xff] }
 0x5d2   :  { %6802 = vmatprep.subr.bf16.mxu0 %v10358_v33  ;;  %6866 = vmatprep.subr.bf16.mxu1 %v10369_v0  ;;  %v13054_v33 = vld [vmem:[#allocation42_spill] sm:$0xff]  ;;  %v13055_v0 = vld [vmem:[#allocation43_spill] sm:$0xff] }
 0x5d5   :  { %6804 = vmatpush1.bf16.msra.mxu0 %v10371_v2  ;;  %6868 = vmatpush1.bf16.msra.mxu1 %v10380_v59  ;;  %v13056_v2 = vld [vmem:[#allocation44_spill] sm:$0xff]  ;;  %v13057_v59 = vld [vmem:[#allocation45_spill] sm:$0xff] }
 0x5d6   :  { %6806 = vmatprep.subr.bf16.mxu0 %v13019_v17  ;;  %6870 = vmatprep.subr.bf16.mxu1 %v13020_v21  ;;  %v13072_v17 = vld [vmem:[#allocation63_spill] sm:$0xff]  ;;  %v13073_v21 = vld [vmem:[#allocation64_spill] sm:$0xff] }
 0x5d9   :  { %6808 = vmatpush1.bf16.msra.mxu0 %v13021_v26  ;;  %6872 = vmatpush1.bf16.msra.mxu1 %v13022_v14  ;;  %v13074_v26 = vld [vmem:[#allocation66_spill] sm:$0xff]  ;;  %v3592_v14 = vld [vmem:[%s12475_s2 + $0x8] sm:$0xff] }
 0x5da   :  { %6810 = vmatprep.subr.bf16.mxu0 %v13023_v9  ;;  %6874 = vmatprep.subr.bf16.mxu1 %v13024_v5  ;;  %v3596_v9 = vld [vmem:[%s12475_s2 + $0x28] sm:$0xff]  ;;  %v3594_v5 = vld [vmem:[%s12475_s2 + $0x18] sm:$0xff] }
 0x5dd   :  { %6812 = vmatpush1.bf16.msra.mxu0 %v13025_v52  ;;  %6876 = vmatpush1.bf16.msra.mxu1 %v13026_v30  ;;  %v11016_v52 = vpack.c.bf16 %v3596_v9, %v3592_v14  ;;  %v3598_v30 = vld [vmem:[%s12475_s2 + $0x38] sm:$0xff] }
 0x5de   :  { %6814 = vmatprep.subr.bf16.mxu0 %v13027_v51  ;;  %6878 = vmatprep.subr.bf16.mxu1 %v13028_v20  ;;  %v11021_v51 = vpack.c.bf16 %v3598_v30, %v3594_v5  ;;  %v3591_v5 = vld [vmem:[%s12475_s2] sm:$0xff] }
 0x5df   :  { %v3595_v30 = vld [vmem:[%s12475_s2 + $0x20] sm:$0xff] }
 0x5e1   :  { %6816 = vmatpush1.bf16.msra.mxu0 %v13029_v4  ;;  %6880 = vmatpush1.bf16.msra.mxu1 %v13030_v62  ;;  %v13075_v62 = vld [vmem:[#allocation4_spill] sm:$0xff] }
 0x5e2   :  { %6818 = vmatprep.subr.bf16.mxu0 %v13031_v38  ;;  %6882 = vmatprep.subr.bf16.mxu1 %v13032_v60 }
 0x5e5   :  { %6820 = vmatpush1.bf16.msra.mxu0 %v13033_v12  ;;  %6884 = vmatpush1.bf16.msra.mxu1 %v13034_v16 }
 0x5e6   :  { %6822 = vmatprep.subr.bf16.mxu0 %v13035_v50  ;;  %6886 = vmatprep.subr.bf16.mxu1 %v13036_v40 }
 0x5e9   :  { %6824 = vmatpush1.bf16.msra.mxu0 %v13037_v44  ;;  %6888 = vmatpush1.bf16.msra.mxu1 %v13038_v37 }
 0x5ea   :  { %6826 = vmatprep.subr.bf16.mxu0 %v13039_v49  ;;  %6890 = vmatprep.subr.bf16.mxu1 %v13040_v22 }
 0x5ed   :  { %6828 = vmatpush1.bf16.msra.mxu0 %v13041_v34  ;;  %6892 = vmatpush1.bf16.msra.mxu1 %v13042_v54 }
 0x5ee   :  { %6830 = vmatprep.subr.bf16.mxu0 %v13043_v29  ;;  %6894 = vmatprep.subr.bf16.mxu1 %v13044_v55 }
 0x5f1   :  { %6832 = vmatpush1.bf16.msra.mxu0 %v13045_v13  ;;  %6896 = vmatpush1.bf16.msra.mxu1 %v13046_v63 }
 0x5f2   :  { %6834 = vmatprep.subr.bf16.mxu0 %v13047_v19  ;;  %6898 = vmatprep.subr.bf16.mxu1 %v13048_v31 }
 0x5f5   :  { %6836 = vmatpush1.bf16.msra.mxu0 %v13049_v36  ;;  %6900 = vmatpush1.bf16.msra.mxu1 %v13050_v24 }
 0x5f6   :  { %6838 = vmatprep.subr.bf16.mxu0 %v13051_v41  ;;  %6902 = vmatprep.subr.bf16.mxu1 %v13052_v43 }
 0x5f9   :  { %6840 = vmatpush1.bf16.msra.mxu0 %v13053_v39  ;;  %6904 = vmatpush1.bf16.msra.mxu1 %v13054_v33 }
 0x5fa   :  { %6842 = vmatprep.subr.bf16.mxu0 %v13055_v0  ;;  %6906 = vmatprep.subr.bf16.mxu1 %v13056_v2 }
 0x5fd   :  { %6844 = vmatpush1.bf16.msra.mxu0 %v13057_v59  ;;  %6908 = vmatpush1.bf16.msra.mxu1 %v13058_v18 }
 0x5fe   :  { %6846 = vmatprep.subr.bf16.mxu0 %v13059_v6  ;;  %6910 = vmatprep.subr.bf16.mxu1 %v13060_v46 }
 0x601   :  { %6848 = vmatpush1.bf16.msra.mxu0 %v13061_v61  ;;  %6912 = vmatpush1.bf16.msra.mxu1 %v13062_v7 }
 0x602   :  { %6850 = vmatprep.subr.bf16.mxu0 %v13063_v32  ;;  %6914 = vmatprep.subr.bf16.mxu1 %v13064_v35 }
 0x605   :  { %6852 = vmatpush1.bf16.msra.mxu0 %v13065_v23  ;;  %6916 = vmatpush1.bf16.msra.mxu1 %v13066_v27 }
 0x606   :  { %6854 = vmatprep.subr.bf16.mxu0 %v13067_v56  ;;  %6918 = vmatprep.subr.bf16.mxu1 %v13068_v57 }
 0x609   :  { %6856 = vmatpush1.bf16.msra.mxu0 %v13069_v58  ;;  %6920 = vmatpush1.bf16.msra.mxu1 %v13070_v47 }
 0x60a   :  { %6858 = vmatprep.subr.bf16.mxu0 %v13071_v28  ;;  %6922 = vmatprep.subr.bf16.mxu1 %v13072_v17 }
 0x60d   :  { %6860 = vmatpush1.bf16.msra.mxu0 %v13073_v21  ;;  %6924 = vmatpush1.bf16.msra.mxu1 %v13074_v26 }
 0x60e   :  { %6926 = vmatprep.subr.bf16.mxu0 %v11016_v52  ;;  %6958 = vmatprep.subr.bf16.mxu1 %v11021_v51 }
 0x683   :  { %v2953_v20 = vpop.f32.mrb[24].mxu0  ;;  %v3024_v4 = vpop.f32.mrb[24].mxu1 }
 0x684   :  { %v2954_v38 = vadd.f32 %v2953_v20, %v13075_v62  ;;  %v2955_v60 = vpop.f32.mrb[25].mxu0  ;;  %v3026_v12 = vpop.f32.mrb[25].mxu1  ;;  %v3025_v49 = vadd.f32 %v3024_v4, %v9007_v53  ;;  %v3593_v20 = vld [vmem:[%s12475_s2 + $0x10] sm:$0xff]  ;;  %v3600_v4 = vld [vmem:[%s12475_s2 + $0x48] sm:$0xff] }
 0x685   :  { %v2956_v16 = vadd.f32 %v2955_v60, %v8997_v42  ;;  %v3027_v44 = vadd.f32 %v3026_v12, %v9003_v45  ;;  %v3602_v60 = vld [vmem:[%s12475_s2 + $0x58] sm:$0xff] }
 0x686   :  { %v5457_v50 = vmul.f32 -1.442695, %v2954_v38  ;;  %v3604_v38 = vld [vmem:[%s12475_s2 + $0x68] sm:$0xff]  ;;  %v3606_v12 = vld [vmem:[%s12475_s2 + $0x78] sm:$0xff] }
 0x687   :  { %v5458_v40 = vmul.f32 -1.442695, %v2956_v16  ;;  %v5459_v37 = vmul.f32 -1.442695, %v3027_v44 }
 0x688   :  { %7688 = vpow2.f32 %v5457_v50 }
 0x689   :  { %7690 = vpow2.f32 %v5458_v40  ;;  %v11069_v40 = vpack.c.bf16 %v3595_v30, %v3591_v5  ;;  %v3623_v5 = vld [vmem:[%s12475_s2 + $0x100] sm:$0xff] }
 0x68a   :  { %7692 = vpow2.f32 %v5459_v37  ;;  %v3599_v37 = vld [vmem:[%s12475_s2 + $0x40] sm:$0xff] }
 0x68b   :  { %7694 = vtanh.f32 %v3025_v49  ;;  %v3603_v49 = vld [vmem:[%s12475_s2 + $0x60] sm:$0xff] }
 0x68c   :  { %v3627_v30 = vld [vmem:[%s12475_s2 + $0x120] sm:$0xff] }
 0x692   :  { %v7689_v22 = vpop.eup %7688 }
 0x693   :  { %v7691_v34 = vpop.eup %7690  ;;  %v3032_v54 = vadd.f32 1.0, %v7689_v22 }
 0x694   :  { %v3038_v29 = vadd.f32 1.0, %v7691_v34  ;;  %v7693_v55 = vpop.eup %7692  ;;  %v11081_v34 = vpack.c.bf16 %v3604_v38, %v3600_v4  ;;  %v3625_v4 = vld [vmem:[%s12475_s2 + $0x110] sm:$0xff] }
 0x695   :  { %7696 = vrcp.f32 %v3032_v54  ;;  %v7695_v13 = vpop.eup %7694  ;;  %v3045_v36 = vadd.f32 1.0, %v7693_v55  ;;  %v11083_v54 = vpack.c.bf16 %v3606_v12, %v3602_v60  ;;  %v3605_v55 = vld [vmem:[%s12475_s2 + $0x70] sm:$0xff]  ;;  %v3632_v60 = vld [vmem:[%s12475_s2 + $0x148] sm:$0xff] }
 0x696   :  { %7698 = vrcp.f32 %v3038_v29  ;;  %v3601_v29 = vld [vmem:[%s12475_s2 + $0x50] sm:$0xff]  ;;  %v3636_v12 = vld [vmem:[%s12475_s2 + $0x168] sm:$0xff] }
 0x697   :  { %7700 = vrcp.f32 %v3045_v36  ;;  %v11107_v36 = vpack.c.bf16 %v3603_v49, %v3599_v37  ;;  %v3629_v38 = vld [vmem:[%s12475_s2 + $0x130] sm:$0xff]  ;;  %v11217_v37 = vpack.c.bf16 %v3627_v30, %v3623_v5 }
 0x698   :  { %v11219_v49 = vpack.c.bf16 %v3629_v38, %v3625_v4  ;;  %v3647_v4 = vld [vmem:[%s12475_s2 + $0x1c0] sm:$0xff] }
 0x69f   :  { %v7697_v63 = vpop.eup %7696 }
 0x6a0   :  { %v7699_v19 = vpop.eup %7698  ;;  %v3049_v31 = vmul.f32 %v7697_v63, %v7695_v13  ;;  %v3608_v13 = vld [vmem:[%s12475_s2 + $0x88] sm:$0xff] }
 0x6a1   :  { %v3048_v24 = vmul.f32 %v7699_v19, %v10896_v15  ;;  %v7701_v15 = vpop.eup %7700  ;;  %v3612_v63 = vld [vmem:[%s12475_s2 + $0xa8] sm:$0xff]  ;;  %v3610_v19 = vld [vmem:[%s12475_s2 + $0x98] sm:$0xff] }
 0x6a3   :  { %v11030_v41 = vadd.f32 %v3049_v31, %v3048_v24  ;;  %v3188_v43 = vpop.f32.mrb[10].mxu0  ;;  %v3259_v39 = vpop.f32.mrb[10].mxu1  ;;  %v3614_v31 = vld [vmem:[%s12475_s2 + $0xb8] sm:$0xff]  ;;  %v11109_v24 = vpack.c.bf16 %v3605_v55, %v3601_v29  ;;  %v3631_v29 = vld [vmem:[%s12475_s2 + $0x140] sm:$0xff] }
 0x6a4   :  { %v7487_v33 = vadd.f32 %v3188_v43, %v12843_v1  ;;  %v3190_v0 = vpop.f32.mrb[11].mxu0  ;;  %v3261_v2 = vpop.f32.mrb[11].mxu1  ;;  %v7503_v32 = vadd.f32 %v3259_v39, %v8870_v11  ;;  %v3607_v43 = vld [vmem:[%s12475_s2 + $0x80] sm:$0xff] }
 0x6a5   :  { %v7488_v59 = vadd.f32 %v3190_v0, %v12844_v25  ;;  %7702 = vtanh.f32 %v11030_v41  ;;  %v7504_v46 = vadd.f32 %v3261_v2, %v12845_v48  ;;  %v3611_v39 = vld [vmem:[%s12475_s2 + $0xa0] sm:$0xff]  ;;  %v11121_v0 = vpack.c.bf16 %v3614_v31, %v3610_v19  ;;  %v3609_v2 = vld [vmem:[%s12475_s2 + $0x90] sm:$0xff] }
 0x6a6   :  { %v5460_v18 = vmul.f32 -1.442695, %v7487_v33  ;;  %v11119_v33 = vpack.c.bf16 %v3612_v63, %v3608_v13  ;;  %v3635_v55 = vld [vmem:[%s12475_s2 + $0x160] sm:$0xff]  ;;  %v11229_v13 = vpack.c.bf16 %v3636_v12, %v3632_v60  ;;  %v3633_v19 = vld [vmem:[%s12475_s2 + $0x150] sm:$0xff] }
 0x6a7   :  { %v5461_v6 = vmul.f32 -1.442695, %v7488_v59  ;;  %v5462_v7 = vmul.f32 -1.442695, %v7504_v46  ;;  %v3613_v59 = vld [vmem:[%s12475_s2 + $0xb0] sm:$0xff]  ;;  %v3618_v46 = vld [vmem:[%s12475_s2 + $0xd8] sm:$0xff] }
 0x6a8   :  { %7704 = vpow2.f32 %v5460_v18  ;;  %v3616_v18 = vld [vmem:[%s12475_s2 + $0xc8] sm:$0xff]  ;;  %v3637_v31 = vld [vmem:[%s12475_s2 + $0x170] sm:$0xff]  ;;  %v3651_v12 = vld [vmem:[%s12475_s2 + $0x1e0] sm:$0xff] }
 0x6a9   :  { %7706 = vpow2.f32 %v5461_v6  ;;  %v3620_v6 = vld [vmem:[%s12475_s2 + $0xe8] sm:$0xff] }
 0x6aa   :  { %7708 = vpow2.f32 %v5462_v7  ;;  %v11147_v7 = vpack.c.bf16 %v3613_v59, %v3609_v2  ;;  %v3642_v2 = vld [vmem:[%s12475_s2 + $0x198] sm:$0xff] }
 0x6ab   :  { %7710 = vtanh.f32 %v7503_v32  ;;  %v3615_v32 = vld [vmem:[%s12475_s2 + $0xc0] sm:$0xff]  ;;  %v3646_v59 = vld [vmem:[%s12475_s2 + $0x1b8] sm:$0xff] }
 0x6af   :  { %v7703_v61 = vpop.eup %7702 }
 0x6b0   :  { %v11037_v35 = vmul.f32 %v7703_v61, %v7701_v15  ;;  %v3622_v15 = vld [vmem:[%s12475_s2 + $0xf8] sm:$0xff]  ;;  %v11145_v61 = vpack.c.bf16 %v3611_v39, %v3607_v43  ;;  %v3640_v43 = vld [vmem:[%s12475_s2 + $0x188] sm:$0xff] }
 0x6b1   :  { %v3644_v39 = vld [vmem:[%s12475_s2 + $0x1a8] sm:$0xff] }
 0x6b2   :  { %13076 = vst [vmem:[#allocation7_spill] sm:$0xff] %v11037_v35  ;;  %v7705_v23 = vpop.eup %7704  ;;  %3484 = vmatprep.mubr.f32.mxu0 %v11037_v35  ;;  %3555 = vmatprep.mubr.f32.mxu1 %v11037_v35 }
 0x6b3   :  { %v7707_v27 = vpop.eup %7706  ;;  %v3271_v56 = vadd.f32 1.0, %v7705_v23  ;;  %v3619_v23 = vld [vmem:[%s12475_s2 + $0xe0] sm:$0xff] }
 0x6b4   :  { %v3277_v57 = vadd.f32 1.0, %v7707_v27  ;;  %v7709_v58 = vpop.eup %7708  ;;  %v11157_v27 = vpack.c.bf16 %v3620_v6, %v3616_v18  ;;  %v11253_v18 = vpack.c.bf16 %v3635_v55, %v3631_v29  ;;  %v11255_v6 = vpack.c.bf16 %v3637_v31, %v3633_v19  ;;  %v3826_v19 = vld [vmem:[%s12476_s4 + $0x8] sm:$0xff] }
 0x6b5   :  { %7712 = vrcp.f32 %v3271_v56  ;;  %v7711_v47 = vpop.eup %7710  ;;  %v3284_v26 = vadd.f32 1.0, %v7709_v58  ;;  %v11159_v56 = vpack.c.bf16 %v3622_v15, %v3618_v46  ;;  %v3621_v58 = vld [vmem:[%s12475_s2 + $0xf0] sm:$0xff]  ;;  %v3639_v46 = vld [vmem:[%s12475_s2 + $0x180] sm:$0xff]  ;;  %v11313_v29 = vpack.c.bf16 %v3651_v12, %v3647_v4  ;;  %v3830_v31 = vld [vmem:[%s12476_s4 + $0x28] sm:$0xff] }
 0x6b6   :  { %7714 = vrcp.f32 %v3277_v57  ;;  %v3617_v57 = vld [vmem:[%s12475_s2 + $0xd0] sm:$0xff]  ;;  %v3643_v15 = vld [vmem:[%s12475_s2 + $0x1a0] sm:$0xff]  ;;  %v3840_v12 = vld [vmem:[%s12476_s4 + $0x78] sm:$0xff] }
 0x6b7   :  { %7716 = vrcp.f32 %v3284_v26  ;;  %v11181_v26 = vpack.c.bf16 %v3619_v23, %v3615_v32  ;;  %v11265_v32 = vpack.c.bf16 %v3644_v39, %v3640_v43  ;;  %v11267_v23 = vpack.c.bf16 %v3646_v59, %v3642_v2  ;;  %v3828_v43 = vld [vmem:[%s12476_s4 + $0x18] sm:$0xff]  ;;  %v3829_v59 = vld [vmem:[%s12476_s4 + $0x20] sm:$0xff] }
 0x6b8   :  { %v11289_v5 = vpack.c.bf16 %v3643_v15, %v3639_v46  ;;  %v11332_v39 = vpack.c.bf16 %v3830_v31, %v3826_v19  ;;  %v3832_v2 = vld [vmem:[%s12476_s4 + $0x38] sm:$0xff] }
 0x6b9   :  { %v11343_v46 = vpack.c.bf16 %v3832_v2, %v3828_v43  ;;  %v3835_v43 = vld [vmem:[%s12476_s4 + $0x50] sm:$0xff] }
 0x6ba   :  { %v3839_v2 = vld [vmem:[%s12476_s4 + $0x70] sm:$0xff] }
 0x6bf   :  { %v7713_v28 = vpop.eup %7712 }
 0x6c0   :  { %v7715_v17 = vpop.eup %7714  ;;  %v3288_v21 = vmul.f32 %v7713_v28, %v7711_v47  ;;  %v3624_v47 = vld [vmem:[%s12475_s2 + $0x108] sm:$0xff] }
 0x6c1   :  { %v3287_v14 = vmul.f32 %v7715_v17, %v10908_v8  ;;  %v3597_v8 = vld [vmem:[%s12475_s2 + $0x30] sm:$0xff]  ;;  %v7717_v16 = vpop.eup %7716  ;;  %v3628_v28 = vld [vmem:[%s12475_s2 + $0x128] sm:$0xff]  ;;  %v3626_v17 = vld [vmem:[%s12475_s2 + $0x118] sm:$0xff] }
 0x6c2   :  { %v11071_v44 = vpack.c.bf16 %v3597_v8, %v3593_v20  ;;  %v11193_v20 = vpack.c.bf16 %v3628_v28, %v3624_v47  ;;  %v3648_v47 = vld [vmem:[%s12475_s2 + $0x1c8] sm:$0xff] }
 0x6c3   :  { %v11042_v9 = vadd.f32 %v3288_v21, %v3287_v14  ;;  %v3630_v21 = vld [vmem:[%s12475_s2 + $0x138] sm:$0xff]  ;;  %v11183_v14 = vpack.c.bf16 %v3621_v58, %v3617_v57  ;;  %v3641_v57 = vld [vmem:[%s12475_s2 + $0x190] sm:$0xff]  ;;  %v3652_v28 = vld [vmem:[%s12475_s2 + $0x1e8] sm:$0xff] }
 0x6c4   :  { %v11195_v8 = vpack.c.bf16 %v3630_v21, %v3626_v17  ;;  %v3645_v58 = vld [vmem:[%s12475_s2 + $0x1b0] sm:$0xff]  ;;  %v3650_v17 = vld [vmem:[%s12475_s2 + $0x1d8] sm:$0xff]  ;;  %v11298_v38 = vpack.c.bf16 %v3652_v28, %v3648_v47  ;;  %v3834_v28 = vld [vmem:[%s12476_s4 + $0x48] sm:$0xff] }
 0x6c5   :  { %7718 = vtanh.f32 %v11042_v9  ;;  %v3654_v21 = vld [vmem:[%s12475_s2 + $0x1f8] sm:$0xff]  ;;  %v11291_v30 = vpack.c.bf16 %v3645_v58, %v3641_v57  ;;  %v3827_v57 = vld [vmem:[%s12476_s4 + $0x10] sm:$0xff] }
 0x6c6   :  { %v11300_v60 = vpack.c.bf16 %v3654_v21, %v3650_v17  ;;  %v3831_v58 = vld [vmem:[%s12476_s4 + $0x30] sm:$0xff]  ;;  %v3838_v17 = vld [vmem:[%s12476_s4 + $0x68] sm:$0xff]  ;;  %v3836_v21 = vld [vmem:[%s12476_s4 + $0x58] sm:$0xff] }
 0x6c7   :  { %v11354_v47 = vpack.c.bf16 %v3831_v58, %v3827_v57  ;;  %v11368_v4 = vpack.c.bf16 %v3838_v17, %v3834_v28  ;;  %v11379_v19 = vpack.c.bf16 %v3840_v12, %v3836_v21  ;;  %v3846_v57 = vld [vmem:[%s12476_s4 + $0xa8] sm:$0xff]  ;;  %v3844_v58 = vld [vmem:[%s12476_s4 + $0x98] sm:$0xff]  ;;  %v3841_v21 = vld [vmem:[%s12476_s4 + $0x80] sm:$0xff] }
 0x6c8   :  { %v3848_v17 = vld [vmem:[%s12476_s4 + $0xb8] sm:$0xff]  ;;  %v3845_v12 = vld [vmem:[%s12476_s4 + $0xa0] sm:$0xff] }
 0x6cf   :  { %v7719_v50 = vpop.eup %7718 }
 0x6d0   :  { %v11079_v22 = vmul.f32 %v7719_v50, %v7717_v16  ;;  %v3634_v16 = vld [vmem:[%s12475_s2 + $0x158] sm:$0xff] }
 0x6d1   :  { %v3638_v50 = vld [vmem:[%s12475_s2 + $0x178] sm:$0xff] }
 0x6d2   :  { %3485 = vmatmul.mubr.f32.vlgmr.msra.gmra.mrb[26].mxu0 %v11079_v22  ;;  %3556 = vmatmul.mubr.f32.vlgmr.msra.gmra.mrb[26].mxu1 %v11079_v22  ;;  %v11231_v63 = vpack.c.bf16 %v3638_v50, %v3634_v16  ;;  %v3649_v16 = vld [vmem:[%s12475_s2 + $0x1d0] sm:$0xff] }
 0x6d3   :  { %6928 = vmatpush1.bf16.msra.mxu0 %v11069_v40  ;;  %6960 = vmatpush1.bf16.msra.mxu1 %v11071_v44  ;;  %v3653_v50 = vld [vmem:[%s12475_s2 + $0x1f0] sm:$0xff] }
 0x6d4   :  { %6930 = vmatprep.subr.bf16.mxu0 %v11081_v34  ;;  %6962 = vmatprep.subr.bf16.mxu1 %v11083_v54  ;;  %v11315_v55 = vpack.c.bf16 %v3653_v50, %v3649_v16  ;;  %v3833_v16 = vld [vmem:[%s12476_s4 + $0x40] sm:$0xff] }
 0x6d5   :  { %3719 = vmatprep.mubr.f32.mxu0 %v12789_v3  ;;  %3790 = vmatprep.mubr.f32.mxu1 %v12789_v3  ;;  %v3837_v50 = vld [vmem:[%s12476_s4 + $0x60] sm:$0xff] }
 0x6d6   :  { %v11381_v31 = vpack.c.bf16 %v3837_v50, %v3833_v16  ;;  %v11415_v16 = vpack.c.bf16 %v3848_v17, %v3844_v58  ;;  %v11417_v50 = vpack.c.bf16 %v3845_v12, %v3841_v21  ;;  %v3854_v58 = vld [vmem:[%s12476_s4 + $0xe8] sm:$0xff]  ;;  %v3852_v17 = vld [vmem:[%s12476_s4 + $0xd8] sm:$0xff] }
 0x6d7   :  { %6932 = vmatpush1.bf16.msra.mxu0 %v11107_v36  ;;  %6964 = vmatpush1.bf16.msra.mxu1 %v11109_v24  ;;  %v3856_v12 = vld [vmem:[%s12476_s4 + $0xf8] sm:$0xff] }
 0x6d8   :  { %6934 = vmatprep.subr.bf16.mxu0 %v11119_v33  ;;  %6966 = vmatprep.subr.bf16.mxu1 %v11121_v0  ;;  %13078 = vst [vmem:[#allocation9_spill] sm:$0xff] %v11415_v16  ;;  %13079 = vst [vmem:[#allocation10_spill] sm:$0xff] %v11417_v50  ;;  %v11451_v35 = vpack.c.bf16 %v3856_v12, %v3852_v17  ;;  %v3858_v17 = vld [vmem:[%s12476_s4 + $0x108] sm:$0xff] }
 0x6d9   :  { %v3862_v12 = vld [vmem:[%s12476_s4 + $0x128] sm:$0xff] }
 0x6da   :  { %13082 = vst [vmem:[#allocation13_spill] sm:$0xff] %v11451_v35 }
 0x6db   :  { %6936 = vmatpush1.bf16.msra.mxu0 %v11145_v61  ;;  %6968 = vmatpush1.bf16.msra.mxu1 %v11147_v7 }
 0x6dc   :  { %6938 = vmatprep.subr.bf16.mxu0 %v11157_v27  ;;  %6970 = vmatprep.subr.bf16.mxu1 %v11159_v56 }
 0x6df   :  { %6940 = vmatpush1.bf16.msra.mxu0 %v11181_v26  ;;  %6972 = vmatpush1.bf16.msra.mxu1 %v11183_v14 }
 0x6e0   :  { %6942 = vmatprep.subr.bf16.mxu0 %v11193_v20  ;;  %6974 = vmatprep.subr.bf16.mxu1 %v11195_v8 }
 0x6e3   :  { %6944 = vmatpush1.bf16.msra.mxu0 %v11217_v37  ;;  %6976 = vmatpush1.bf16.msra.mxu1 %v11219_v49 }
 0x6e4   :  { %6946 = vmatprep.subr.bf16.mxu0 %v11229_v13  ;;  %6978 = vmatprep.subr.bf16.mxu1 %v11231_v63 }
 0x6e7   :  { %6948 = vmatpush1.bf16.msra.mxu0 %v11253_v18  ;;  %6980 = vmatpush1.bf16.msra.mxu1 %v11255_v6 }
 0x6e8   :  { %6950 = vmatprep.subr.bf16.mxu0 %v11265_v32  ;;  %6982 = vmatprep.subr.bf16.mxu1 %v11267_v23 }
 0x6eb   :  { %6952 = vmatpush1.bf16.msra.mxu0 %v11289_v5  ;;  %6984 = vmatpush1.bf16.msra.mxu1 %v11291_v30 }
 0x6ec   :  { %6954 = vmatprep.subr.bf16.mxu0 %v11298_v38  ;;  %6986 = vmatprep.subr.bf16.mxu1 %v11300_v60 }
 0x6ef   :  { %6956 = vmatpush1.bf16.msra.mxu0 %v11313_v29  ;;  %6988 = vmatpush1.bf16.msra.mxu1 %v11315_v55 }
 0x6f0   :  { %6990 = vmatprep.subr.bf16.mxu0 %v11332_v39  ;;  %7054 = vmatprep.subr.bf16.mxu1 %v11343_v46 }
 0x6f2   :  { %3720 = vmatmul.mubr.f32.vlgmr.msra.gmra.mrb[12].mxu0 %v11079_v22  ;;  %3791 = vmatmul.mubr.f32.vlgmr.msra.gmra.mrb[12].mxu1 %v11079_v22  ;;  %v3825_v22 = vld [vmem:[%s12476_s4] sm:$0xff] }
 0x6f3   :  { %v11345_v15 = vpack.c.bf16 %v3829_v59, %v3825_v22  ;;  %7056 = vmatpush1.bf16.msra.mxu1 %v11354_v47  ;;  %v11390_v22 = vpack.c.bf16 %v3839_v2, %v3835_v43  ;;  %v3842_v59 = vld [vmem:[%s12476_s4 + $0x88] sm:$0xff]  ;;  %v3843_v43 = vld [vmem:[%s12476_s4 + $0x90] sm:$0xff] }
 0x6f4   :  { %7058 = vmatprep.subr.bf16.mxu1 %v11379_v19  ;;  %v11404_v28 = vpack.c.bf16 %v3846_v57, %v3842_v59  ;;  %v3847_v2 = vld [vmem:[%s12476_s4 + $0xb0] sm:$0xff]  ;;  %v3850_v57 = vld [vmem:[%s12476_s4 + $0xc8] sm:$0xff] }
 0x6f5   :  { %6992 = vmatpush1.bf16.msra.mxu0 %v11345_v15  ;;  %v11426_v59 = vpack.c.bf16 %v3847_v2, %v3843_v43  ;;  %v11440_v21 = vpack.c.bf16 %v3854_v58, %v3850_v57  ;;  %v3849_v43 = vld [vmem:[%s12476_s4 + $0xc0] sm:$0xff]  ;;  %v3851_v57 = vld [vmem:[%s12476_s4 + $0xd0] sm:$0xff] }
 0x6f6   :  { %6994 = vmatprep.subr.bf16.mxu0 %v11368_v4  ;;  %13077 = vst [vmem:[#allocation8_spill] sm:$0xff] %v11404_v28  ;;  %v3853_v2 = vld [vmem:[%s12476_s4 + $0xe0] sm:$0xff]  ;;  %v3855_v58 = vld [vmem:[%s12476_s4 + $0xf0] sm:$0xff] }
 0x6f7   :  { %7060 = vmatpush1.bf16.msra.mxu1 %v11390_v22  ;;  %13080 = vst [vmem:[#allocation11_spill] sm:$0xff] %v11426_v59  ;;  %13081 = vst [vmem:[#allocation12_spill] sm:$0xff] %v11440_v21  ;;  %v11453_v10 = vpack.c.bf16 %v3853_v2, %v3849_v43  ;;  %v3860_v43 = vld [vmem:[%s12476_s4 + $0x118] sm:$0xff]  ;;  %v11476_v2 = vpack.c.bf16 %v3862_v12, %v3858_v17  ;;  %v3859_v17 = vld [vmem:[%s12476_s4 + $0x110] sm:$0xff] }
 0x6f8   :  { %7062 = vmatprep.subr.bf16.mxu1 %v11415_v16  ;;  %v3863_v12 = vld [vmem:[%s12476_s4 + $0x130] sm:$0xff] }
 0x6f9   :  { %6996 = vmatpush1.bf16.msra.mxu0 %v11381_v31  ;;  %13083 = vst [vmem:[#allocation14_spill] sm:$0xff] %v11453_v10  ;;  %13085 = vst [vmem:[#allocation16_spill] sm:$0xff] %v11476_v2  ;;  %v3939_v16 = vld [vmem:[%s12476_s4 + $0x390] sm:$0xff] }
 0x6fa   :  { %6998 = vmatprep.subr.bf16.mxu0 %v11404_v28 }
 0x6fb   :  { %7064 = vmatpush1.bf16.msra.mxu1 %v11426_v59  ;;  %v11462_v59 = vpack.c.bf16 %v3855_v58, %v3851_v57  ;;  %v3864_v57 = vld [vmem:[%s12476_s4 + $0x138] sm:$0xff]  ;;  %v3857_v58 = vld [vmem:[%s12476_s4 + $0x100] sm:$0xff] }
 0x6fc   :  { %7066 = vmatprep.subr.bf16.mxu1 %v11451_v35  ;;  %v11487_v35 = vpack.c.bf16 %v3864_v57, %v3860_v43  ;;  %v3870_v43 = vld [vmem:[%s12476_s4 + $0x168] sm:$0xff]  ;;  %v3868_v57 = vld [vmem:[%s12476_s4 + $0x158] sm:$0xff] }
 0x6fd   :  { %7000 = vmatpush1.bf16.msra.mxu0 %v11417_v50  ;;  %13084 = vst [vmem:[#allocation15_spill] sm:$0xff] %v11462_v59 }
 0x6fe   :  { %7002 = vmatprep.subr.bf16.mxu0 %v11440_v21  ;;  %13086 = vst [vmem:[#allocation17_spill] sm:$0xff] %v11487_v35 }
 0x6ff   :  { %7068 = vmatpush1.bf16.msra.mxu1 %v11462_v59  ;;  %v11498_v59 = vpack.c.bf16 %v3863_v12, %v3859_v17  ;;  %v3872_v17 = vld [vmem:[%s12476_s4 + $0x178] sm:$0xff]  ;;  %v3865_v12 = vld [vmem:[%s12476_s4 + $0x140] sm:$0xff] }
 0x700   :  { %7070 = vmatprep.subr.bf16.mxu1 %v11487_v35 }
 0x701   :  { %7004 = vmatpush1.bf16.msra.mxu0 %v11453_v10  ;;  %v3861_v10 = vld [vmem:[%s12476_s4 + $0x120] sm:$0xff]  ;;  %13088 = vst [vmem:[#allocation19_spill] sm:$0xff] %v11498_v59 }
 0x702   :  { %v11489_v21 = vpack.c.bf16 %v3861_v10, %v3857_v58  ;;  %7006 = vmatprep.subr.bf16.mxu0 %v11476_v2  ;;  %v3866_v10 = vld [vmem:[%s12476_s4 + $0x148] sm:$0xff] }
 0x703   :  { %7072 = vmatpush1.bf16.msra.mxu1 %v11498_v59  ;;  %v11512_v58 = vpack.c.bf16 %v3870_v43, %v3866_v10  ;;  %v3869_v59 = vld [vmem:[%s12476_s4 + $0x160] sm:$0xff]  ;;  %v3867_v10 = vld [vmem:[%s12476_s4 + $0x150] sm:$0xff] }
 0x704   :  { %13087 = vst [vmem:[#allocation18_spill] sm:$0xff] %v11489_v21  ;;  %v11525_v35 = vpack.c.bf16 %v3869_v59, %v3865_v12  ;;  %v3871_v43 = vld [vmem:[%s12476_s4 + $0x170] sm:$0xff]  ;;  %v3874_v59 = vld [vmem:[%s12476_s4 + $0x188] sm:$0xff] }
 0x705   :  { %7008 = vmatpush1.bf16.msra.mxu0 %v11489_v21  ;;  %13089 = vst [vmem:[#allocation20_spill] sm:$0xff] %v11512_v58  ;;  %v11523_v21 = vpack.c.bf16 %v3872_v17, %v3868_v57  ;;  %v11534_v2 = vpack.c.bf16 %v3871_v43, %v3867_v10  ;;  %v3878_v57 = vld [vmem:[%s12476_s4 + $0x1a8] sm:$0xff]  ;;  %v3876_v17 = vld [vmem:[%s12476_s4 + $0x198] sm:$0xff]  ;;  %v3873_v43 = vld [vmem:[%s12476_s4 + $0x180] sm:$0xff] }
 0x706   :  { %13091 = vst [vmem:[#allocation22_spill] sm:$0xff] %v11525_v35  ;;  %7010 = vmatprep.subr.bf16.mxu0 %v11512_v58  ;;  %v11548_v12 = vpack.c.bf16 %v3878_v57, %v3874_v59  ;;  %v3880_v10 = vld [vmem:[%s12476_s4 + $0x1b8] sm:$0xff]  ;;  %v3875_v59 = vld [vmem:[%s12476_s4 + $0x190] sm:$0xff] }
 0x707   :  { %13090 = vst [vmem:[#allocation21_spill] sm:$0xff] %v11523_v21  ;;  %13092 = vst [vmem:[#allocation23_spill] sm:$0xff] %v11534_v2  ;;  %7074 = vmatprep.subr.bf16.mxu1 %v11523_v21  ;;  %v11559_v21 = vpack.c.bf16 %v3880_v10, %v3876_v17  ;;  %v3879_v57 = vld [vmem:[%s12476_s4 + $0x1b0] sm:$0xff]  ;;  %v3886_v17 = vld [vmem:[%s12476_s4 + $0x1e8] sm:$0xff] }
 0x708   :  { %7076 = vmatpush1.bf16.msra.mxu1 %v11534_v2  ;;  %13093 = vst [vmem:[#allocation24_spill] sm:$0xff] %v11548_v12  ;;  %v11570_v2 = vpack.c.bf16 %v3879_v57, %v3875_v59  ;;  %v3884_v10 = vld [vmem:[%s12476_s4 + $0x1d8] sm:$0xff]  ;;  %v3881_v57 = vld [vmem:[%s12476_s4 + $0x1c0] sm:$0xff] }
 0x709   :  { %7012 = vmatpush1.bf16.msra.mxu0 %v11525_v35  ;;  %v3877_v35 = vld [vmem:[%s12476_s4 + $0x1a0] sm:$0xff]  ;;  %13094 = vst [vmem:[#allocation25_spill] sm:$0xff] %v11559_v21  ;;  %7078 = vmatprep.subr.bf16.mxu1 %v11559_v21  ;;  %v3888_v59 = vld [vmem:[%s12476_s4 + $0x1f8] sm:$0xff] }
 0x70a   :  { %v11561_v58 = vpack.c.bf16 %v3877_v35, %v3873_v43  ;;  %7014 = vmatprep.subr.bf16.mxu0 %v11548_v12  ;;  %13096 = vst [vmem:[#allocation27_spill] sm:$0xff] %v11570_v2  ;;  %v3882_v35 = vld [vmem:[%s12476_s4 + $0x1c8] sm:$0xff]  ;;  %v11595_v21 = vpack.c.bf16 %v3888_v59, %v3884_v10  ;;  %v3892_v59 = vld [vmem:[%s12476_s4 + $0x218] sm:$0xff] }
 0x70b   :  { %v11584_v43 = vpack.c.bf16 %v3886_v17, %v3882_v35  ;;  %v3883_v35 = vld [vmem:[%s12476_s4 + $0x1d0] sm:$0xff]  ;;  %v3894_v10 = vld [vmem:[%s12476_s4 + $0x228] sm:$0xff] }
 0x70c   :  { %13095 = vst [vmem:[#allocation26_spill] sm:$0xff] %v11561_v58  ;;  %7080 = vmatpush1.bf16.msra.mxu1 %v11570_v2  ;;  %13098 = vst [vmem:[#allocation29_spill] sm:$0xff] %v11595_v21  ;;  %v3887_v17 = vld [vmem:[%s12476_s4 + $0x1f0] sm:$0xff] }
 0x70d   :  { %7016 = vmatpush1.bf16.msra.mxu0 %v11561_v58  ;;  %13097 = vst [vmem:[#allocation28_spill] sm:$0xff] %v11584_v43  ;;  %v3885_v58 = vld [vmem:[%s12476_s4 + $0x1e0] sm:$0xff]  ;;  %v11606_v2 = vpack.c.bf16 %v3887_v17, %v3883_v35  ;;  %7082 = vmatprep.subr.bf16.mxu1 %v11595_v21  ;;  %v3896_v35 = vld [vmem:[%s12476_s4 + $0x238] sm:$0xff] }
 0x70e   :  { %v11597_v12 = vpack.c.bf16 %v3885_v58, %v3881_v57  ;;  %7018 = vmatprep.subr.bf16.mxu0 %v11584_v43  ;;  %v3890_v58 = vld [vmem:[%s12476_s4 + $0x208] sm:$0xff]  ;;  %v3889_v17 = vld [vmem:[%s12476_s4 + $0x200] sm:$0xff]  ;;  %v11631_v21 = vpack.c.bf16 %v3896_v35, %v3892_v59  ;;  %v3900_v35 = vld [vmem:[%s12476_s4 + $0x258] sm:$0xff] }
 0x70f   :  { %13100 = vst [vmem:[#allocation31_spill] sm:$0xff] %v11606_v2  ;;  %v11620_v57 = vpack.c.bf16 %v3894_v10, %v3890_v58  ;;  %v3891_v58 = vld [vmem:[%s12476_s4 + $0x210] sm:$0xff]  ;;  %v3902_v59 = vld [vmem:[%s12476_s4 + $0x268] sm:$0xff] }
 0x710   :  { %13099 = vst [vmem:[#allocation30_spill] sm:$0xff] %v11597_v12  ;;  %7084 = vmatpush1.bf16.msra.mxu1 %v11606_v2  ;;  %13102 = vst [vmem:[#allocation33_spill] sm:$0xff] %v11631_v21  ;;  %v3895_v10 = vld [vmem:[%s12476_s4 + $0x230] sm:$0xff] }
 0x711   :  { %7020 = vmatpush1.bf16.msra.mxu0 %v11597_v12  ;;  %13101 = vst [vmem:[#allocation32_spill] sm:$0xff] %v11620_v57  ;;  %v3893_v12 = vld [vmem:[%s12476_s4 + $0x220] sm:$0xff]  ;;  %v11642_v2 = vpack.c.bf16 %v3895_v10, %v3891_v58  ;;  %7086 = vmatprep.subr.bf16.mxu1 %v11631_v21  ;;  %v3904_v58 = vld [vmem:[%s12476_s4 + $0x278] sm:$0xff] }
 0x712   :  { %v11633_v43 = vpack.c.bf16 %v3893_v12, %v3889_v17  ;;  %7022 = vmatprep.subr.bf16.mxu0 %v11620_v57  ;;  %v3898_v12 = vld [vmem:[%s12476_s4 + $0x248] sm:$0xff]  ;;  %v3897_v10 = vld [vmem:[%s12476_s4 + $0x240] sm:$0xff]  ;;  %v11667_v21 = vpack.c.bf16 %v3904_v58, %v3900_v35  ;;  %v3908_v58 = vld [vmem:[%s12476_s4 + $0x298] sm:$0xff] }
 0x713   :  { %13104 = vst [vmem:[#allocation35_spill] sm:$0xff] %v11642_v2  ;;  %v11656_v17 = vpack.c.bf16 %v3902_v59, %v3898_v12  ;;  %v3899_v12 = vld [vmem:[%s12476_s4 + $0x250] sm:$0xff]  ;;  %v3910_v35 = vld [vmem:[%s12476_s4 + $0x2a8] sm:$0xff] }
 0x714   :  { %13103 = vst [vmem:[#allocation34_spill] sm:$0xff] %v11633_v43  ;;  %7088 = vmatpush1.bf16.msra.mxu1 %v11642_v2  ;;  %13106 = vst [vmem:[#allocation37_spill] sm:$0xff] %v11667_v21  ;;  %v3903_v59 = vld [vmem:[%s12476_s4 + $0x270] sm:$0xff] }
 0x715   :  { %7024 = vmatpush1.bf16.msra.mxu0 %v11633_v43  ;;  %13105 = vst [vmem:[#allocation36_spill] sm:$0xff] %v11656_v17  ;;  %v3901_v43 = vld [vmem:[%s12476_s4 + $0x260] sm:$0xff]  ;;  %v11678_v2 = vpack.c.bf16 %v3903_v59, %v3899_v12  ;;  %7090 = vmatprep.subr.bf16.mxu1 %v11667_v21  ;;  %v3912_v12 = vld [vmem:[%s12476_s4 + $0x2b8] sm:$0xff] }
 0x716   :  { %v11669_v57 = vpack.c.bf16 %v3901_v43, %v3897_v10  ;;  %7026 = vmatprep.subr.bf16.mxu0 %v11656_v17  ;;  %v3906_v43 = vld [vmem:[%s12476_s4 + $0x288] sm:$0xff]  ;;  %v3905_v59 = vld [vmem:[%s12476_s4 + $0x280] sm:$0xff]  ;;  %v11703_v21 = vpack.c.bf16 %v3912_v12, %v3908_v58  ;;  %v3916_v12 = vld [vmem:[%s12476_s4 + $0x2d8] sm:$0xff] }
 0x717   :  { %13108 = vst [vmem:[#allocation39_spill] sm:$0xff] %v11678_v2  ;;  %v11692_v10 = vpack.c.bf16 %v3910_v35, %v3906_v43  ;;  %v3907_v43 = vld [vmem:[%s12476_s4 + $0x290] sm:$0xff]  ;;  %v3918_v58 = vld [vmem:[%s12476_s4 + $0x2e8] sm:$0xff] }
 0x718   :  { %13107 = vst [vmem:[#allocation38_spill] sm:$0xff] %v11669_v57  ;;  %7092 = vmatpush1.bf16.msra.mxu1 %v11678_v2  ;;  %13110 = vst [vmem:[#allocation41_spill] sm:$0xff] %v11703_v21  ;;  %v3911_v35 = vld [vmem:[%s12476_s4 + $0x2b0] sm:$0xff] }
 0x719   :  { %7028 = vmatpush1.bf16.msra.mxu0 %v11669_v57  ;;  %13109 = vst [vmem:[#allocation40_spill] sm:$0xff] %v11692_v10  ;;  %v3909_v57 = vld [vmem:[%s12476_s4 + $0x2a0] sm:$0xff]  ;;  %v11714_v2 = vpack.c.bf16 %v3911_v35, %v3907_v43  ;;  %7094 = vmatprep.subr.bf16.mxu1 %v11703_v21  ;;  %v3920_v43 = vld [vmem:[%s12476_s4 + $0x2f8] sm:$0xff] }
 0x71a   :  { %v11705_v17 = vpack.c.bf16 %v3909_v57, %v3905_v59  ;;  %7030 = vmatprep.subr.bf16.mxu0 %v11692_v10  ;;  %v3914_v57 = vld [vmem:[%s12476_s4 + $0x2c8] sm:$0xff]  ;;  %v3913_v35 = vld [vmem:[%s12476_s4 + $0x2c0] sm:$0xff]  ;;  %v11739_v21 = vpack.c.bf16 %v3920_v43, %v3916_v12  ;;  %v3924_v43 = vld [vmem:[%s12476_s4 + $0x318] sm:$0xff] }
 0x71b   :  { %13112 = vst [vmem:[#allocation43_spill] sm:$0xff] %v11714_v2  ;;  %v11728_v59 = vpack.c.bf16 %v3918_v58, %v3914_v57  ;;  %v3915_v57 = vld [vmem:[%s12476_s4 + $0x2d0] sm:$0xff]  ;;  %v3926_v12 = vld [vmem:[%s12476_s4 + $0x328] sm:$0xff] }
 0x71c   :  { %13111 = vst [vmem:[#allocation42_spill] sm:$0xff] %v11705_v17  ;;  %7096 = vmatpush1.bf16.msra.mxu1 %v11714_v2  ;;  %13114 = vst [vmem:[#allocation45_spill] sm:$0xff] %v11739_v21  ;;  %v3919_v58 = vld [vmem:[%s12476_s4 + $0x2f0] sm:$0xff] }
 0x71d   :  { %7032 = vmatpush1.bf16.msra.mxu0 %v11705_v17  ;;  %13113 = vst [vmem:[#allocation44_spill] sm:$0xff] %v11728_v59  ;;  %v3917_v17 = vld [vmem:[%s12476_s4 + $0x2e0] sm:$0xff]  ;;  %v11750_v2 = vpack.c.bf16 %v3919_v58, %v3915_v57  ;;  %7098 = vmatprep.subr.bf16.mxu1 %v11739_v21  ;;  %v3928_v57 = vld [vmem:[%s12476_s4 + $0x338] sm:$0xff] }
 0x71e   :  { %v11741_v10 = vpack.c.bf16 %v3917_v17, %v3913_v35  ;;  %7034 = vmatprep.subr.bf16.mxu0 %v11728_v59  ;;  %v3922_v17 = vld [vmem:[%s12476_s4 + $0x308] sm:$0xff]  ;;  %v3921_v58 = vld [vmem:[%s12476_s4 + $0x300] sm:$0xff]  ;;  %v11775_v21 = vpack.c.bf16 %v3928_v57, %v3924_v43  ;;  %v3932_v57 = vld [vmem:[%s12476_s4 + $0x358] sm:$0xff] }
 0x71f   :  { %13116 = vst [vmem:[#allocation47_spill] sm:$0xff] %v11750_v2  ;;  %v11764_v35 = vpack.c.bf16 %v3926_v12, %v3922_v17  ;;  %v3923_v17 = vld [vmem:[%s12476_s4 + $0x310] sm:$0xff]  ;;  %v3934_v43 = vld [vmem:[%s12476_s4 + $0x368] sm:$0xff] }
 0x720   :  { %13115 = vst [vmem:[#allocation46_spill] sm:$0xff] %v11741_v10  ;;  %7100 = vmatpush1.bf16.msra.mxu1 %v11750_v2  ;;  %13118 = vst [vmem:[#allocation49_spill] sm:$0xff] %v11775_v21  ;;  %v3927_v12 = vld [vmem:[%s12476_s4 + $0x330] sm:$0xff] }
 0x721   :  { %7036 = vmatpush1.bf16.msra.mxu0 %v11741_v10  ;;  %13117 = vst [vmem:[#allocation48_spill] sm:$0xff] %v11764_v35  ;;  %v3925_v10 = vld [vmem:[%s12476_s4 + $0x320] sm:$0xff]  ;;  %v11786_v2 = vpack.c.bf16 %v3927_v12, %v3923_v17  ;;  %7102 = vmatprep.subr.bf16.mxu1 %v11775_v21  ;;  %v3936_v17 = vld [vmem:[%s12476_s4 + $0x378] sm:$0xff] }
 0x722   :  { %v11777_v59 = vpack.c.bf16 %v3925_v10, %v3921_v58  ;;  %7038 = vmatprep.subr.bf16.mxu0 %v11764_v35  ;;  %v3930_v10 = vld [vmem:[%s12476_s4 + $0x348] sm:$0xff]  ;;  %v3929_v12 = vld [vmem:[%s12476_s4 + $0x340] sm:$0xff]  ;;  %v11811_v21 = vpack.c.bf16 %v3936_v17, %v3932_v57  ;;  %v3940_v57 = vld [vmem:[%s12476_s4 + $0x398] sm:$0xff] }
 0x723   :  { %13120 = vst [vmem:[#allocation51_spill] sm:$0xff] %v11786_v2  ;;  %v11800_v58 = vpack.c.bf16 %v3934_v43, %v3930_v10  ;;  %v3931_v10 = vld [vmem:[%s12476_s4 + $0x350] sm:$0xff]  ;;  %v3944_v17 = vld [vmem:[%s12476_s4 + $0x3b8] sm:$0xff] }
 0x724   :  { %13119 = vst [vmem:[#allocation50_spill] sm:$0xff] %v11777_v59  ;;  %7104 = vmatpush1.bf16.msra.mxu1 %v11786_v2  ;;  %13122 = vst [vmem:[#allocation55_spill] sm:$0xff] %v11811_v21  ;;  %v3935_v43 = vld [vmem:[%s12476_s4 + $0x370] sm:$0xff]  ;;  %v3938_v2 = vld [vmem:[%s12476_s4 + $0x388] sm:$0xff] }
 0x725   :  { %7040 = vmatpush1.bf16.msra.mxu0 %v11777_v59  ;;  %13121 = vst [vmem:[#allocation52_spill] sm:$0xff] %v11800_v58  ;;  %v3933_v59 = vld [vmem:[%s12476_s4 + $0x360] sm:$0xff]  ;;  %v11825_v50 = vpack.c.bf16 %v3935_v43, %v3931_v10  ;;  %7106 = vmatprep.subr.bf16.mxu1 %v11811_v21  ;;  %v11840_v10 = vpack.c.bf16 %v3944_v17, %v3940_v57  ;;  %v3950_v57 = vld [vmem:[%s12476_s4 + $0x3e8] sm:$0xff] }
 0x726   :  { %v11813_v35 = vpack.c.bf16 %v3933_v59, %v3929_v12  ;;  %7042 = vmatprep.subr.bf16.mxu0 %v11800_v58  ;;  %v3942_v59 = vld [vmem:[%s12476_s4 + $0x3a8] sm:$0xff]  ;;  %v3937_v43 = vld [vmem:[%s12476_s4 + $0x380] sm:$0xff] }
 0x727   :  { %13124 = vst [vmem:[#allocation57_spill] sm:$0xff] %v11825_v50  ;;  %v11838_v12 = vpack.c.bf16 %v3942_v59, %v3938_v2  ;;  %13126 = vst [vmem:[#allocation60_spill] sm:$0xff] %v11840_v10  ;;  %v3941_v58 = vld [vmem:[%s12476_s4 + $0x3a0] sm:$0xff]  ;;  %v3943_v2 = vld [vmem:[%s12476_s4 + $0x3b0] sm:$0xff] }
 0x728   :  { %13123 = vst [vmem:[#allocation56_spill] sm:$0xff] %v11813_v35  ;;  %7108 = vmatpush1.bf16.msra.mxu1 %v11825_v50  ;;  %v11852_v21 = vpack.c.bf16 %v3941_v58, %v3937_v43  ;;  %v3946_v59 = vld [vmem:[%s12476_s4 + $0x3c8] sm:$0xff]  ;;  %v11865_v17 = vpack.c.bf16 %v3943_v2, %v3939_v16  ;;  %v3948_v43 = vld [vmem:[%s12476_s4 + $0x3d8] sm:$0xff]  ;;  %v3949_v16 = vld [vmem:[%s12476_s4 + $0x3e0] sm:$0xff] }
 0x729   :  { %7044 = vmatpush1.bf16.msra.mxu0 %v11813_v35  ;;  %13125 = vst [vmem:[#allocation59_spill] sm:$0xff] %v11838_v12  ;;  %7110 = vmatprep.subr.bf16.mxu1 %v11840_v10  ;;  %v11867_v58 = vpack.c.bf16 %v3950_v57, %v3946_v59  ;;  %v3952_v50 = vld [vmem:[%s12476_s4 + $0x3f8] sm:$0xff]  ;;  %v3945_v35 = vld [vmem:[%s12476_s4 + $0x3c0] sm:$0xff]  ;;  %v3947_v2 = vld [vmem:[%s12476_s4 + $0x3d0] sm:$0xff] }
 0x72a   :  { %13127 = vst [vmem:[#allocation61_spill] sm:$0xff] %v11852_v21  ;;  %7046 = vmatprep.subr.bf16.mxu0 %v11838_v12  ;;  %13128 = vst [vmem:[#allocation62_spill] sm:$0xff] %v11865_v17  ;;  %v11878_v28 = vpack.c.bf16 %v3952_v50, %v3948_v43  ;;  %v3951_v59 = vld [vmem:[%s12476_s4 + $0x3f0] sm:$0xff]  ;;  %v11890_v57 = vpack.c.bf16 %v3949_v16, %v3945_v35 }
 0x72b   :  { %13129 = vst [vmem:[#allocation63_spill] sm:$0xff] %v11867_v58  ;;  %v11894_v50 = vpack.c.bf16 %v3951_v59, %v3947_v2 }
 0x72c   :  { %13130 = vst [vmem:[#allocation64_spill] sm:$0xff] %v11878_v28  ;;  %13131 = vst [vmem:[#allocation66_spill] sm:$0xff] %v11890_v57  ;;  %7112 = vmatpush1.bf16.msra.mxu1 %v11865_v17 }
 0x72d   :  { %7048 = vmatpush1.bf16.msra.mxu0 %v11852_v21  ;;  %13132 = vst [vmem:[#allocation68_spill] sm:$0xff] %v11894_v50  ;;  %7114 = vmatprep.subr.bf16.mxu1 %v11878_v28 }
 0x72e   :  { %7050 = vmatprep.subr.bf16.mxu0 %v11867_v58 }
 0x730   :  { %7116 = vmatpush1.bf16.msra.mxu1 %v11894_v50 }
 0x731   :  { %7052 = vmatpush1.bf16.msra.mxu0 %v11890_v57  ;;  %7150 = vmatprep.subr.bf16.mxu1 %v11021_v51 }
 0x732   :  { %7118 = vmatprep.subr.bf16.mxu0 %v11016_v52 }
 0x7a5   :  { %v3486_v43 = vpop.f32.mrb[26].mxu0  ;;  %v3557_v21 = vpop.f32.mrb[26].mxu1 }
 0x7a6   :  { %v3487_v35 = vadd.f32 %v3486_v43, %v13075_v62  ;;  %v3488_v16 = vpop.f32.mrb[27].mxu0  ;;  %v3559_v17 = vpop.f32.mrb[27].mxu1  ;;  %v3558_v50 = vadd.f32 %v3557_v21, %v9007_v53 }
 0x7a7   :  { %v3489_v58 = vadd.f32 %v3488_v16, %v8997_v42  ;;  %v3560_v57 = vadd.f32 %v3559_v17, %v9003_v45 }
 0x7a8   :  { %v5463_v2 = vmul.f32 -1.442695, %v3487_v35 }
 0x7a9   :  { %v5464_v59 = vmul.f32 -1.442695, %v3489_v58  ;;  %v5465_v28 = vmul.f32 -1.442695, %v3560_v57 }
 0x7aa   :  { %7720 = vpow2.f32 %v5463_v2 }
 0x7ab   :  { %7722 = vpow2.f32 %v5464_v59 }
 0x7ac   :  { %7724 = vpow2.f32 %v5465_v28 }
 0x7ad   :  { %7726 = vtanh.f32 %v3558_v50 }
 0x7b4   :  { %v7721_v52 = vpop.eup %7720 }
 0x7b5   :  { %v7723_v10 = vpop.eup %7722  ;;  %v3565_v51 = vadd.f32 1.0, %v7721_v52 }
 0x7b6   :  { %v3571_v12 = vadd.f32 1.0, %v7723_v10  ;;  %v7725_v43 = vpop.eup %7724 }
 0x7b7   :  { %7728 = vrcp.f32 %v3565_v51  ;;  %v7727_v62 = vpop.eup %7726  ;;  %v3578_v2 = vadd.f32 1.0, %v7725_v43 }
 0x7b8   :  { %7730 = vrcp.f32 %v3571_v12 }
 0x7b9   :  { %7732 = vrcp.f32 %v3578_v2 }
 0x7c1   :  { %v7729_v16 = vpop.eup %7728 }
 0x7c2   :  { %v7731_v35 = vpop.eup %7730  ;;  %v3582_v58 = vmul.f32 %v7729_v16, %v7727_v62 }
 0x7c3   :  { %v3581_v59 = vmul.f32 %v7731_v35, %v11030_v41  ;;  %v7733_v41 = vpop.eup %7732 }
 0x7c5   :  { %v11906_v17 = vadd.f32 %v3582_v58, %v3581_v59  ;;  %v3721_v57 = vpop.f32.mrb[12].mxu0  ;;  %v3792_v21 = vpop.f32.mrb[12].mxu1 }
 0x7c6   :  { %v7489_v52 = vadd.f32 %v3721_v57, %v12843_v1  ;;  %v3723_v28 = vpop.f32.mrb[13].mxu0  ;;  %v3794_v50 = vpop.f32.mrb[13].mxu1  ;;  %v7505_v35 = vadd.f32 %v3792_v21, %v8870_v11 }
 0x7c7   :  { %v7490_v10 = vadd.f32 %v3723_v28, %v12844_v25  ;;  %7734 = vtanh.f32 %v11906_v17  ;;  %v7506_v62 = vadd.f32 %v3794_v50, %v12845_v48 }
 0x7c8   :  { %v5466_v12 = vmul.f32 -1.442695, %v7489_v52 }
 0x7c9   :  { %v5467_v51 = vmul.f32 -1.442695, %v7490_v10  ;;  %v5468_v16 = vmul.f32 -1.442695, %v7506_v62 }
 0x7ca   :  { %7736 = vpow2.f32 %v5466_v12 }
 0x7cb   :  { %7738 = vpow2.f32 %v5467_v51 }
 0x7cc   :  { %7740 = vpow2.f32 %v5468_v16 }
 0x7cd   :  { %7742 = vtanh.f32 %v7505_v35  ;;  %v13172_v35 = vld [vmem:[#allocation47_spill] sm:$0xff] }
 0x7d1   :  { %v7735_v43 = vpop.eup %7734 }
 0x7d2   :  { %v11913_v58 = vmul.f32 %v7735_v43, %v7733_v41 }
 0x7d4   :  { %v7737_v2 = vpop.eup %7736  ;;  %4017 = vmatprep.mubr.f32.mxu0 %v11913_v58  ;;  %4088 = vmatprep.mubr.f32.mxu1 %v11913_v58 }
 0x7d5   :  { %v7739_v59 = vpop.eup %7738  ;;  %v3804_v57 = vadd.f32 1.0, %v7737_v2 }
 0x7d6   :  { %v3810_v52 = vadd.f32 1.0, %v7739_v59  ;;  %v7741_v28 = vpop.eup %7740  ;;  %v13173_v59 = vld [vmem:[#allocation48_spill] sm:$0xff] }
 0x7d7   :  { %7744 = vrcp.f32 %v3804_v57  ;;  %v7743_v50 = vpop.eup %7742  ;;  %v3817_v21 = vadd.f32 1.0, %v7741_v28  ;;  %v13174_v57 = vld [vmem:[#allocation49_spill] sm:$0xff]  ;;  %v13176_v28 = vld [vmem:[#allocation51_spill] sm:$0xff] }
 0x7d8   :  { %7746 = vrcp.f32 %v3810_v52  ;;  %v13175_v52 = vld [vmem:[#allocation50_spill] sm:$0xff] }
 0x7d9   :  { %7748 = vrcp.f32 %v3817_v21  ;;  %v13181_v21 = vld [vmem:[#allocation59_spill] sm:$0xff] }
 0x7e1   :  { %v7745_v10 = vpop.eup %7744 }
 0x7e2   :  { %v7747_v12 = vpop.eup %7746  ;;  %v3821_v51 = vmul.f32 %v7745_v10, %v7743_v50  ;;  %v13177_v50 = vld [vmem:[#allocation52_spill] sm:$0xff]  ;;  %v13178_v10 = vld [vmem:[#allocation55_spill] sm:$0xff] }
 0x7e3   :  { %v3820_v62 = vmul.f32 %v7747_v12, %v11042_v9  ;;  %v7749_v43 = vpop.eup %7748  ;;  %v13133_v9 = vld [vmem:[#allocation8_spill] sm:$0xff] }
 0x7e4   :  { %v13179_v12 = vld [vmem:[#allocation56_spill] sm:$0xff] }
 0x7e5   :  { %v11918_v41 = vadd.f32 %v3821_v51, %v3820_v62  ;;  %v13180_v51 = vld [vmem:[#allocation57_spill] sm:$0xff]  ;;  %v13182_v62 = vld [vmem:[#allocation60_spill] sm:$0xff] }
 0x7e7   :  { %7750 = vtanh.f32 %v11918_v41 }
 0x7f1   :  { %v7751_v2 = vpop.eup %7750 }
 0x7f2   :  { %v3824_v16 = vmul.f32 %v7751_v2, %v7749_v43  ;;  %v13183_v43 = vld [vmem:[#allocation61_spill] sm:$0xff]  ;;  %v13184_v2 = vld [vmem:[#allocation62_spill] sm:$0xff] }
 0x7f4   :  { %4018 = vmatmul.mubr.f32.vlgmr.msra.gmra.mrb[28].mxu0 %v3824_v16  ;;  %4089 = vmatmul.mubr.f32.vlgmr.msra.gmra.mrb[28].mxu1 %v3824_v16 }
 0x7f5   :  { %7120 = vmatpush1.bf16.msra.mxu0 %v11069_v40  ;;  %7152 = vmatpush1.bf16.msra.mxu1 %v11071_v44  ;;  %v13134_v40 = vld [vmem:[#allocation9_spill] sm:$0xff]  ;;  %v13135_v44 = vld [vmem:[#allocation10_spill] sm:$0xff] }
 0x7f6   :  { %7122 = vmatprep.subr.bf16.mxu0 %v11081_v34  ;;  %7154 = vmatprep.subr.bf16.mxu1 %v11083_v54  ;;  %v13136_v34 = vld [vmem:[#allocation11_spill] sm:$0xff]  ;;  %v13137_v54 = vld [vmem:[#allocation12_spill] sm:$0xff] }
 0x7f7   :  { %4252 = vmatprep.mubr.f32.mxu0 %v12789_v3  ;;  %4323 = vmatprep.mubr.f32.mxu1 %v12789_v3 }
 0x7f9   :  { %7124 = vmatpush1.bf16.msra.mxu0 %v11107_v36  ;;  %7156 = vmatpush1.bf16.msra.mxu1 %v11109_v24  ;;  %v13138_v36 = vld [vmem:[#allocation13_spill] sm:$0xff]  ;;  %v13139_v24 = vld [vmem:[#allocation14_spill] sm:$0xff] }
 0x7fa   :  { %7126 = vmatprep.subr.bf16.mxu0 %v11119_v33  ;;  %7158 = vmatprep.subr.bf16.mxu1 %v11121_v0  ;;  %v13140_v33 = vld [vmem:[#allocation15_spill] sm:$0xff]  ;;  %v13141_v0 = vld [vmem:[#allocation16_spill] sm:$0xff] }
 0x7fd   :  { %7128 = vmatpush1.bf16.msra.mxu0 %v11145_v61  ;;  %7160 = vmatpush1.bf16.msra.mxu1 %v11147_v7  ;;  %v13142_v61 = vld [vmem:[#allocation17_spill] sm:$0xff]  ;;  %v13143_v7 = vld [vmem:[#allocation18_spill] sm:$0xff] }
 0x7fe   :  { %7130 = vmatprep.subr.bf16.mxu0 %v11157_v27  ;;  %7162 = vmatprep.subr.bf16.mxu1 %v11159_v56  ;;  %v13144_v27 = vld [vmem:[#allocation19_spill] sm:$0xff]  ;;  %v13145_v56 = vld [vmem:[#allocation20_spill] sm:$0xff] }
 0x801   :  { %7132 = vmatpush1.bf16.msra.mxu0 %v11181_v26  ;;  %7164 = vmatpush1.bf16.msra.mxu1 %v11183_v14  ;;  %v13146_v26 = vld [vmem:[#allocation21_spill] sm:$0xff]  ;;  %v13147_v14 = vld [vmem:[#allocation22_spill] sm:$0xff] }
 0x802   :  { %7134 = vmatprep.subr.bf16.mxu0 %v11193_v20  ;;  %7166 = vmatprep.subr.bf16.mxu1 %v11195_v8  ;;  %v13148_v20 = vld [vmem:[#allocation23_spill] sm:$0xff]  ;;  %v13149_v8 = vld [vmem:[#allocation24_spill] sm:$0xff] }
 0x805   :  { %7136 = vmatpush1.bf16.msra.mxu0 %v11217_v37  ;;  %7168 = vmatpush1.bf16.msra.mxu1 %v11219_v49  ;;  %v13150_v37 = vld [vmem:[#allocation25_spill] sm:$0xff]  ;;  %v13151_v49 = vld [vmem:[#allocation26_spill] sm:$0xff] }
 0x806   :  { %7138 = vmatprep.subr.bf16.mxu0 %v11229_v13  ;;  %7170 = vmatprep.subr.bf16.mxu1 %v11231_v63  ;;  %v13152_v13 = vld [vmem:[#allocation27_spill] sm:$0xff]  ;;  %v13153_v63 = vld [vmem:[#allocation28_spill] sm:$0xff] }
 0x809   :  { %7140 = vmatpush1.bf16.msra.mxu0 %v11253_v18  ;;  %7172 = vmatpush1.bf16.msra.mxu1 %v11255_v6  ;;  %v13154_v18 = vld [vmem:[#allocation29_spill] sm:$0xff]  ;;  %v13155_v6 = vld [vmem:[#allocation30_spill] sm:$0xff] }
 0x80a   :  { %7142 = vmatprep.subr.bf16.mxu0 %v11265_v32  ;;  %7174 = vmatprep.subr.bf16.mxu1 %v11267_v23  ;;  %v13156_v32 = vld [vmem:[#allocation31_spill] sm:$0xff]  ;;  %v13157_v23 = vld [vmem:[#allocation32_spill] sm:$0xff] }
 0x80d   :  { %7144 = vmatpush1.bf16.msra.mxu0 %v11289_v5  ;;  %7176 = vmatpush1.bf16.msra.mxu1 %v11291_v30  ;;  %v13158_v5 = vld [vmem:[#allocation33_spill] sm:$0xff]  ;;  %v13159_v30 = vld [vmem:[#allocation34_spill] sm:$0xff] }
 0x80e   :  { %7146 = vmatprep.subr.bf16.mxu0 %v11298_v38  ;;  %7178 = vmatprep.subr.bf16.mxu1 %v11300_v60  ;;  %v13160_v38 = vld [vmem:[#allocation35_spill] sm:$0xff]  ;;  %v13161_v60 = vld [vmem:[#allocation36_spill] sm:$0xff] }
 0x811   :  { %7148 = vmatpush1.bf16.msra.mxu0 %v11313_v29  ;;  %7180 = vmatpush1.bf16.msra.mxu1 %v11315_v55  ;;  %v13162_v29 = vld [vmem:[#allocation37_spill] sm:$0xff]  ;;  %v13163_v55 = vld [vmem:[#allocation38_spill] sm:$0xff] }
 0x812   :  { %7182 = vmatprep.subr.bf16.mxu0 %v11332_v39  ;;  %7246 = vmatprep.subr.bf16.mxu1 %v11343_v46  ;;  %v13164_v39 = vld [vmem:[#allocation39_spill] sm:$0xff]  ;;  %v13165_v46 = vld [vmem:[#allocation40_spill] sm:$0xff] }
 0x814   :  { %4253 = vmatmul.mubr.f32.vlgmr.msra.gmra.mrb[14].mxu0 %v3824_v16  ;;  %4324 = vmatmul.mubr.f32.vlgmr.msra.gmra.mrb[14].mxu1 %v3824_v16  ;;  %v13185_v16 = vld [vmem:[#allocation63_spill] sm:$0xff] }
 0x815   :  { %7184 = vmatpush1.bf16.msra.mxu0 %v11345_v15  ;;  %7248 = vmatpush1.bf16.msra.mxu1 %v11354_v47  ;;  %v13166_v15 = vld [vmem:[#allocation41_spill] sm:$0xff]  ;;  %v13167_v47 = vld [vmem:[#allocation42_spill] sm:$0xff] }
 0x816   :  { %7186 = vmatprep.subr.bf16.mxu0 %v11368_v4  ;;  %7250 = vmatprep.subr.bf16.mxu1 %v11379_v19  ;;  %v13168_v4 = vld [vmem:[#allocation43_spill] sm:$0xff]  ;;  %v13169_v19 = vld [vmem:[#allocation44_spill] sm:$0xff] }
 0x819   :  { %7188 = vmatpush1.bf16.msra.mxu0 %v11381_v31  ;;  %7252 = vmatpush1.bf16.msra.mxu1 %v11390_v22  ;;  %v13170_v31 = vld [vmem:[#allocation45_spill] sm:$0xff]  ;;  %v13171_v22 = vld [vmem:[#allocation46_spill] sm:$0xff] }
 0x81a   :  { %7190 = vmatprep.subr.bf16.mxu0 %v13133_v9  ;;  %7254 = vmatprep.subr.bf16.mxu1 %v13134_v40  ;;  %v13186_v9 = vld [vmem:[#allocation64_spill] sm:$0xff]  ;;  %v13187_v40 = vld [vmem:[#allocation66_spill] sm:$0xff] }
 0x81d   :  { %7192 = vmatpush1.bf16.msra.mxu0 %v13135_v44  ;;  %7256 = vmatpush1.bf16.msra.mxu1 %v13136_v34  ;;  %v13188_v44 = vld [vmem:[#allocation68_spill] sm:$0xff]  ;;  %v4662_v34 = vld [vmem:[%s12479_s6 + $0x8] sm:$0xff] }
 0x81e   :  { %7194 = vmatprep.subr.bf16.mxu0 %v13137_v54  ;;  %7258 = vmatprep.subr.bf16.mxu1 %v13138_v36  ;;  %v4665_v54 = vld [vmem:[%s12479_s6 + $0x20] sm:$0xff]  ;;  %v4663_v36 = vld [vmem:[%s12479_s6 + $0x10] sm:$0xff] }
 0x821   :  { %7196 = vmatpush1.bf16.msra.mxu0 %v13139_v24  ;;  %7260 = vmatpush1.bf16.msra.mxu1 %v13140_v33  ;;  %v7309_v24 = vpack.c.bf16 %v4665_v54, %v4662_v34  ;;  %v4666_v33 = vld [vmem:[%s12479_s6 + $0x28] sm:$0xff]  ;;  %v4668_v34 = vld [vmem:[%s12479_s6 + $0x38] sm:$0xff]  ;;  %v4671_v54 = vld [vmem:[%s12479_s6 + $0x50] sm:$0xff] }
 0x822   :  { %7198 = vmatprep.subr.bf16.mxu0 %v13141_v0  ;;  %7262 = vmatprep.subr.bf16.mxu1 %v13142_v61  ;;  %v12029_v0 = vpack.c.bf16 %v4666_v33, %v4663_v36  ;;  %v4669_v36 = vld [vmem:[%s12479_s6 + $0x40] sm:$0xff] }
 0x825   :  { %7200 = vmatpush1.bf16.msra.mxu0 %v13143_v7  ;;  %7264 = vmatpush1.bf16.msra.mxu1 %v13144_v27  ;;  %v13189_v27 = vld [vmem:[#allocation4_spill] sm:$0xff] }
 0x826   :  { %7202 = vmatprep.subr.bf16.mxu0 %v13145_v56  ;;  %7266 = vmatprep.subr.bf16.mxu1 %v13146_v26 }
 0x829   :  { %7204 = vmatpush1.bf16.msra.mxu0 %v13147_v14  ;;  %7268 = vmatpush1.bf16.msra.mxu1 %v13148_v20 }
 0x82a   :  { %7206 = vmatprep.subr.bf16.mxu0 %v13149_v8  ;;  %7270 = vmatprep.subr.bf16.mxu1 %v13150_v37 }
 0x82d   :  { %7208 = vmatpush1.bf16.msra.mxu0 %v13151_v49  ;;  %7272 = vmatpush1.bf16.msra.mxu1 %v13152_v13 }
 0x82e   :  { %7210 = vmatprep.subr.bf16.mxu0 %v13153_v63  ;;  %7274 = vmatprep.subr.bf16.mxu1 %v13154_v18 }
 0x831   :  { %7212 = vmatpush1.bf16.msra.mxu0 %v13155_v6  ;;  %7276 = vmatpush1.bf16.msra.mxu1 %v13156_v32 }
 0x832   :  { %7214 = vmatprep.subr.bf16.mxu0 %v13157_v23  ;;  %7278 = vmatprep.subr.bf16.mxu1 %v13158_v5 }
 0x835   :  { %7216 = vmatpush1.bf16.msra.mxu0 %v13159_v30  ;;  %7280 = vmatpush1.bf16.msra.mxu1 %v13160_v38 }
 0x836   :  { %7218 = vmatprep.subr.bf16.mxu0 %v13161_v60  ;;  %7282 = vmatprep.subr.bf16.mxu1 %v13162_v29 }
 0x839   :  { %7220 = vmatpush1.bf16.msra.mxu0 %v13163_v55  ;;  %7284 = vmatpush1.bf16.msra.mxu1 %v13164_v39 }
 0x83a   :  { %7222 = vmatprep.subr.bf16.mxu0 %v13165_v46  ;;  %7286 = vmatprep.subr.bf16.mxu1 %v13166_v15 }
 0x83d   :  { %7224 = vmatpush1.bf16.msra.mxu0 %v13167_v47  ;;  %7288 = vmatpush1.bf16.msra.mxu1 %v13168_v4 }
 0x83e   :  { %7226 = vmatprep.subr.bf16.mxu0 %v13169_v19  ;;  %7290 = vmatprep.subr.bf16.mxu1 %v13170_v31 }
 0x841   :  { %7228 = vmatpush1.bf16.msra.mxu0 %v13171_v22  ;;  %7292 = vmatpush1.bf16.msra.mxu1 %v13172_v35 }
 0x842   :  { %7230 = vmatprep.subr.bf16.mxu0 %v13173_v59  ;;  %7294 = vmatprep.subr.bf16.mxu1 %v13174_v57 }
 0x845   :  { %7232 = vmatpush1.bf16.msra.mxu0 %v13175_v52  ;;  %7296 = vmatpush1.bf16.msra.mxu1 %v13176_v28 }
 0x846   :  { %7234 = vmatprep.subr.bf16.mxu0 %v13177_v50  ;;  %7298 = vmatprep.subr.bf16.mxu1 %v13178_v10 }
 0x849   :  { %7236 = vmatpush1.bf16.msra.mxu0 %v13179_v12  ;;  %7300 = vmatpush1.bf16.msra.mxu1 %v13180_v51 }
 0x84a   :  { %7238 = vmatprep.subr.bf16.mxu0 %v13181_v21  ;;  %7302 = vmatprep.subr.bf16.mxu1 %v13182_v62 }
 0x84d   :  { %7240 = vmatpush1.bf16.msra.mxu0 %v13183_v43  ;;  %7304 = vmatpush1.bf16.msra.mxu1 %v13184_v2 }
 0x84e   :  { %7242 = vmatprep.subr.bf16.mxu0 %v13185_v16  ;;  %7306 = vmatprep.subr.bf16.mxu1 %v13186_v9 }
 0x851   :  { %7244 = vmatpush1.bf16.msra.mxu0 %v13187_v40  ;;  %7308 = vmatpush1.bf16.msra.mxu1 %v13188_v44  ;;  %v4661_v40 = vld [vmem:[%s12479_s6] sm:$0xff]  ;;  %v4664_v44 = vld [vmem:[%s12479_s6 + $0x18] sm:$0xff] }
 0x852   :  { %7310 = vmatprep.subr.bf16.mxu0 %v7309_v24  ;;  %7342 = vmatprep.subr.bf16.mxu1 %v12029_v0  ;;  %v4672_v24 = vld [vmem:[%s12479_s6 + $0x58] sm:$0xff] }
 0x8c7   :  { %v4019_v61 = vpop.f32.mrb[28].mxu0  ;;  %v4090_v7 = vpop.f32.mrb[28].mxu1 }
 0x8c8   :  { %v4020_v56 = vadd.f32 %v4019_v61, %v13189_v27  ;;  %v4021_v26 = vpop.f32.mrb[29].mxu0  ;;  %v4092_v14 = vpop.f32.mrb[29].mxu1  ;;  %v4091_v63 = vadd.f32 %v4090_v7, %v9007_v53  ;;  %v7311_v61 = vpack.c.bf16 %v4664_v44, %v4661_v40 }
 0x8c9   :  { %v4022_v20 = vadd.f32 %v4021_v26, %v8997_v42  ;;  %v4093_v49 = vadd.f32 %v4092_v14, %v9003_v45  ;;  %v4667_v26 = vld [vmem:[%s12479_s6 + $0x30] sm:$0xff]  ;;  %v4670_v14 = vld [vmem:[%s12479_s6 + $0x48] sm:$0xff] }
 0x8ca   :  { %v5469_v8 = vmul.f32 -1.442695, %v4020_v56  ;;  %v7313_v56 = vpack.c.bf16 %v4671_v54, %v4668_v34  ;;  %v4697_v34 = vld [vmem:[%s12479_s6 + $0x120] sm:$0xff]  ;;  %v4700_v54 = vld [vmem:[%s12479_s6 + $0x138] sm:$0xff] }
 0x8cb   :  { %v5470_v37 = vmul.f32 -1.442695, %v4022_v20  ;;  %v5471_v13 = vmul.f32 -1.442695, %v4093_v49  ;;  %v4674_v20 = vld [vmem:[%s12479_s6 + $0x68] sm:$0xff]  ;;  %v4675_v49 = vld [vmem:[%s12479_s6 + $0x70] sm:$0xff] }
 0x8cc   :  { %7752 = vpow2.f32 %v5469_v8  ;;  %v7345_v8 = vpack.c.bf16 %v4672_v24, %v4669_v36  ;;  %v4707_v36 = vld [vmem:[%s12479_s6 + $0x170] sm:$0xff]  ;;  %v4705_v24 = vld [vmem:[%s12479_s6 + $0x160] sm:$0xff] }
 0x8cd   :  { %7754 = vpow2.f32 %v5470_v37  ;;  %v4677_v37 = vld [vmem:[%s12479_s6 + $0x80] sm:$0xff] }
 0x8ce   :  { %7756 = vpow2.f32 %v5471_v13  ;;  %v4678_v13 = vld [vmem:[%s12479_s6 + $0x88] sm:$0xff] }
 0x8cf   :  { %7758 = vtanh.f32 %v4091_v63  ;;  %v7315_v63 = vpack.c.bf16 %v4670_v14, %v4667_v26  ;;  %v4703_v26 = vld [vmem:[%s12479_s6 + $0x150] sm:$0xff]  ;;  %v4706_v14 = vld [vmem:[%s12479_s6 + $0x168] sm:$0xff] }
 0x8d6   :  { %v7753_v18 = vpop.eup %7752 }
 0x8d7   :  { %v7755_v6 = vpop.eup %7754  ;;  %v4098_v32 = vadd.f32 1.0, %v7753_v18  ;;  %v13190_v18 = vld [vmem:[#allocation5_spill] sm:$0xff] }
 0x8d8   :  { %v4104_v23 = vadd.f32 1.0, %v7755_v6  ;;  %v7757_v5 = vpop.eup %7756  ;;  %v7317_v6 = vpack.c.bf16 %v4677_v37, %v4674_v20  ;;  %v7339_v20 = vpack.c.bf16 %v4706_v14, %v4703_v26  ;;  %v13192_v37 = vld [vmem:[#allocation6_spill] sm:$0xff] }
 0x8d9   :  { %7760 = vrcp.f32 %v4098_v32  ;;  %v7759_v30 = vpop.eup %7758  ;;  %v4111_v55 = vadd.f32 1.0, %v7757_v5  ;;  %v7349_v32 = vpack.c.bf16 %v4678_v13, %v4675_v49  ;;  %v4676_v5 = vld [vmem:[%s12479_s6 + $0x78] sm:$0xff] }
 0x8da   :  { %7762 = vrcp.f32 %v4104_v23  ;;  %v4673_v23 = vld [vmem:[%s12479_s6 + $0x60] sm:$0xff]  ;;  %v13193_v49 = vld [vmem:[#allocation67_spill] sm:$0xff] }
 0x8db   :  { %7764 = vrcp.f32 %v4111_v55  ;;  %v13194_v13 = vld [vmem:[#allocation7_spill] sm:$0xff] }
 0x8e3   :  { %v7761_v38 = vpop.eup %7760 }
 0x8e4   :  { %v7763_v60 = vpop.eup %7762  ;;  %v4115_v29 = vmul.f32 %v7761_v38, %v7759_v30  ;;  %v4680_v30 = vld [vmem:[%s12479_s6 + $0x98] sm:$0xff]  ;;  %v4681_v38 = vld [vmem:[%s12479_s6 + $0xa0] sm:$0xff] }
 0x8e5   :  { %v4114_v39 = vmul.f32 %v7763_v60, %v11906_v17  ;;  %v7765_v17 = vpop.eup %7764  ;;  %v4684_v60 = vld [vmem:[%s12479_s6 + $0xb8] sm:$0xff] }
 0x8e7   :  { %v12037_v46 = vadd.f32 %v4115_v29, %v4114_v39  ;;  %v4254_v15 = vpop.f32.mrb[14].mxu0  ;;  %v4325_v47 = vpop.f32.mrb[14].mxu1  ;;  %v7319_v29 = vpack.c.bf16 %v4676_v5, %v4673_v23  ;;  %v7353_v39 = vpack.c.bf16 %v4684_v60, %v4681_v38  ;;  %v4950_v23 = vld [vmem:[%s12480_s14 + $0x20] sm:$0xff]  ;;  %v4951_v5 = vld [vmem:[%s12480_s14 + $0x28] sm:$0xff]  ;;  %v4953_v38 = vld [vmem:[%s12480_s14 + $0x38] sm:$0xff] }
 0x8e8   :  { %v7491_v4 = vadd.f32 %v4254_v15, %v12843_v1  ;;  %v4256_v19 = vpop.f32.mrb[15].mxu0  ;;  %v4327_v31 = vpop.f32.mrb[15].mxu1  ;;  %v7507_v50 = vadd.f32 %v4325_v47, %v8870_v11  ;;  %v4679_v15 = vld [vmem:[%s12479_s6 + $0x90] sm:$0xff]  ;;  %v4682_v47 = vld [vmem:[%s12479_s6 + $0xa8] sm:$0xff] }
 0x8e9   :  { %v7492_v22 = vadd.f32 %v4256_v19, %v12844_v25  ;;  %7766 = vtanh.f32 %v12037_v46  ;;  %v7508_v57 = vadd.f32 %v4327_v31, %v12845_v48  ;;  %v4689_v19 = vld [vmem:[%s12479_s6 + $0xe0] sm:$0xff]  ;;  %v4687_v31 = vld [vmem:[%s12479_s6 + $0xd0] sm:$0xff] }
 0x8ea   :  { %v5472_v35 = vmul.f32 -1.442695, %v7491_v4  ;;  %v4686_v4 = vld [vmem:[%s12479_s6 + $0xc8] sm:$0xff] }
 0x8eb   :  { %v5473_v59 = vmul.f32 -1.442695, %v7492_v22  ;;  %v5474_v28 = vmul.f32 -1.442695, %v7508_v57  ;;  %v4690_v22 = vld [vmem:[%s12479_s6 + $0xe8] sm:$0xff] }
 0x8ec   :  { %7768 = vpow2.f32 %v5472_v35  ;;  %v7323_v35 = vpack.c.bf16 %v4682_v47, %v4679_v15  ;;  %v7357_v57 = vpack.c.bf16 %v4690_v22, %v4687_v31  ;;  %v4956_v15 = vld [vmem:[%s12480_s14 + $0x50] sm:$0xff]  ;;  %v4957_v47 = vld [vmem:[%s12480_s14 + $0x58] sm:$0xff] }
 0x8ed   :  { %7770 = vpow2.f32 %v5473_v59  ;;  %v7325_v59 = vpack.c.bf16 %v4689_v19, %v4686_v4  ;;  %v7393_v4 = vpack.c.bf16 %v4957_v47, %v4956_v15  ;;  %v13196_v47 = vld [vmem:[#allocation53_spill] sm:$0xff] }
 0x8ee   :  { %7772 = vpow2.f32 %v5474_v28  ;;  %v4692_v28 = vld [vmem:[%s12479_s6 + $0xf8] sm:$0xff] }
 0x8ef   :  { %7774 = vtanh.f32 %v7507_v50  ;;  %v4695_v50 = vld [vmem:[%s12479_s6 + $0x110] sm:$0xff] }
 0x8f3   :  { %v7767_v52 = vpop.eup %7766 }
 0x8f4   :  { %v12044_v10 = vmul.f32 %v7767_v52, %v7765_v17  ;;  %v4685_v17 = vld [vmem:[%s12479_s6 + $0xc0] sm:$0xff]  ;;  %v4688_v52 = vld [vmem:[%s12479_s6 + $0xd8] sm:$0xff] }
 0x8f6   :  { %v7769_v1 = vpop.eup %7768  ;;  %4550 = vmatprep.mubr.f32.mxu0 %v12044_v10  ;;  %4621 = vmatprep.mubr.f32.mxu1 %v12044_v10 }
 0x8f7   :  { %v7771_v25 = vpop.eup %7770  ;;  %v4337_v12 = vadd.f32 1.0, %v7769_v1  ;;  %v4693_v1 = vld [vmem:[%s12479_s6 + $0x100] sm:$0xff] }
 0x8f8   :  { %v4343_v51 = vadd.f32 1.0, %v7771_v25  ;;  %v7773_v48 = vpop.eup %7772  ;;  %v4696_v25 = vld [vmem:[%s12479_s6 + $0x118] sm:$0xff] }
 0x8f9   :  { %7776 = vrcp.f32 %v4337_v12  ;;  %v7775_v21 = vpop.eup %7774  ;;  %v4350_v11 = vadd.f32 1.0, %v7773_v48  ;;  %v7327_v12 = vpack.c.bf16 %v4688_v52, %v4685_v17  ;;  %v7361_v48 = vpack.c.bf16 %v4696_v25, %v4693_v1 }
 0x8fa   :  { %7778 = vrcp.f32 %v4343_v51  ;;  %v7329_v51 = vpack.c.bf16 %v4695_v50, %v4692_v28 }
 0x8fb   :  { %7780 = vrcp.f32 %v4350_v11  ;;  %v4699_v11 = vld [vmem:[%s12479_s6 + $0x130] sm:$0xff] }
 0x903   :  { %v7777_v62 = vpop.eup %7776 }
 0x904   :  { %v7779_v43 = vpop.eup %7778  ;;  %v4354_v2 = vmul.f32 %v7777_v62, %v7775_v21  ;;  %v4691_v21 = vld [vmem:[%s12479_s6 + $0xf0] sm:$0xff]  ;;  %v4694_v62 = vld [vmem:[%s12479_s6 + $0x108] sm:$0xff] }
 0x905   :  { %v4353_v16 = vmul.f32 %v7779_v43, %v11918_v41  ;;  %v7781_v41 = vpop.eup %7780  ;;  %v4698_v43 = vld [vmem:[%s12479_s6 + $0x128] sm:$0xff] }
 0x907   :  { %v4355_v9 = vadd.f32 %v4354_v2, %v4353_v16  ;;  %v4701_v2 = vld [vmem:[%s12479_s6 + $0x140] sm:$0xff]  ;;  %v4702_v16 = vld [vmem:[%s12479_s6 + $0x148] sm:$0xff] }
 0x908   :  { %v7333_v40 = vpack.c.bf16 %v4701_v2, %v4698_v43  ;;  %v7365_v44 = vpack.c.bf16 %v4702_v16, %v4699_v11  ;;  %v13195_v11 = vld [vmem:[#allocation58_spill] sm:$0xff] }
 0x909   :  { %7782 = vtanh.f32 %v4355_v9  ;;  %v7331_v9 = vpack.c.bf16 %v4694_v62, %v4691_v21 }
 0x913   :  { %v7783_v33 = vpop.eup %7782 }
 0x914   :  { %v4357_v7 = vmul.f32 %v7783_v33, %v7781_v41  ;;  %v4704_v41 = vld [vmem:[%s12479_s6 + $0x158] sm:$0xff] }
 0x915   :  { %v4708_v33 = vld [vmem:[%s12479_s6 + $0x178] sm:$0xff] }
 0x916   :  { %4551 = vmatmul.mubr.f32.vlgmr.msra.gmra.mrb[30].mxu0 %v4357_v7  ;;  %4622 = vmatmul.mubr.f32.vlgmr.msra.gmra.mrb[30].mxu1 %v4357_v7  ;;  %v7337_v7 = vpack.c.bf16 %v4707_v36, %v4704_v41 }
 0x917   :  { %7312 = vmatpush1.bf16.msra.mxu0 %v7311_v61  ;;  %7344 = vmatpush3.bf16.msra.mxu1 %v12029_v0  ;;  %v4683_v0 = vld [vmem:[%s12479_s6 + $0xb0] sm:$0xff]  ;;  %v7335_v61 = vpack.c.bf16 %v4700_v54, %v4697_v34 }
 0x918   :  { %5612 = vmatprep.mubr.f32.mxu1 %v13190_v18  ;;  %7314 = vmatprep.subr.bf16.mxu0 %v7313_v56  ;;  %v7321_v55 = vpack.c.bf16 %v4683_v0, %v4680_v30  ;;  %v7369_v56 = vpack.c.bf16 %v4708_v33, %v4705_v24  ;;  %v7381_v30 = vpack.c.bf16 %v4951_v5, %v4950_v23  ;;  %v4952_v0 = vld [vmem:[%s12480_s14 + $0x30] sm:$0xff] }
 0x919   :  { %7346 = vmatprep.subr.bf16.mxu1 %v7345_v8  ;;  %4790 = vmatprep.mubr.f32.mxu0 %v12789_v3  ;;  %v7385_v60 = vpack.c.bf16 %v4953_v38, %v4952_v0  ;;  %v4958_v38 = vld [vmem:[%s12480_s14 + $0x60] sm:$0xff] }
 0x91b   :  { %7316 = vmatpush1.bf16.msra.mxu0 %v7315_v63  ;;  %7348 = vmatpush3.bf16.msra.mxu1 %v7345_v8  ;;  %v13191_v8 = vld [vmem:[#allocation65_spill] sm:$0xff]  ;;  %v4946_v63 = vld [vmem:[%s12480_s14] sm:$0xff] }
 0x91c   :  { %7318 = vmatprep.subr.bf16.mxu0 %v7317_v6  ;;  %7350 = vmatprep.subr.bf16.mxu1 %v7349_v32  ;;  %v4948_v6 = vld [vmem:[%s12480_s14 + $0x10] sm:$0xff] }
 0x91f   :  { %7320 = vmatpush1.bf16.msra.mxu0 %v7319_v29  ;;  %7352 = vmatpush3.bf16.msra.mxu1 %v7349_v32  ;;  %v4954_v29 = vld [vmem:[%s12480_s14 + $0x40] sm:$0xff] }
 0x920   :  { %7322 = vmatprep.subr.bf16.mxu0 %v7321_v55  ;;  %7354 = vmatprep.subr.bf16.mxu1 %v7353_v39  ;;  %v4955_v55 = vld [vmem:[%s12480_s14 + $0x48] sm:$0xff] }
 0x923   :  { %7324 = vmatpush1.bf16.msra.mxu0 %v7323_v35  ;;  %7356 = vmatpush3.bf16.msra.mxu1 %v7353_v39  ;;  %v7389_v39 = vpack.c.bf16 %v4955_v55, %v4954_v29  ;;  %v4960_v55 = vld [vmem:[%s12480_s14 + $0x70] sm:$0xff] }
 0x924   :  { %7326 = vmatprep.subr.bf16.mxu0 %v7325_v59  ;;  %7358 = vmatprep.subr.bf16.mxu1 %v7357_v57 }
 0x927   :  { %7328 = vmatpush1.bf16.msra.mxu0 %v7327_v12  ;;  %7360 = vmatpush3.bf16.msra.mxu1 %v7357_v57 }
 0x928   :  { %7330 = vmatprep.subr.bf16.mxu0 %v7329_v51  ;;  %7362 = vmatprep.subr.bf16.mxu1 %v7361_v48 }
 0x92b   :  { %7332 = vmatpush1.bf16.msra.mxu0 %v7331_v9  ;;  %7364 = vmatpush3.bf16.msra.mxu1 %v7361_v48 }
 0x92c   :  { %7334 = vmatprep.subr.bf16.mxu0 %v7333_v40  ;;  %7366 = vmatprep.subr.bf16.mxu1 %v7365_v44 }
 0x92f   :  { %7336 = vmatpush1.bf16.msra.mxu0 %v7335_v61  ;;  %7368 = vmatpush3.bf16.msra.mxu1 %v7365_v44 }
 0x930   :  { %7338 = vmatprep.subr.bf16.mxu0 %v7337_v7  ;;  %7370 = vmatprep.subr.bf16.mxu1 %v7369_v56 }
 0x933   :  { %7340 = vmatpush1.bf16.msra.mxu0 %v7339_v20  ;;  %7372 = vmatpush3.bf16.msra.mxu1 %v7369_v56 }
 0x936   :  { %4791 = vmatmul.mubr.f32.vlgmr.msra.gmra.mrb[32].mxu0 %v13190_v18  ;;  %5613 = vmatmul.mubr.f32.vlgmr.msra.gmra.mrb[32].mxu1 %v13191_v8  ;;  %v4947_v18 = vld [vmem:[%s12480_s14 + $0x8] sm:$0xff] }
 0x937   :  { %5615 = vmatprep.mubr.f32.mxu1 %v13192_v37  ;;  %4795 = vmatprep.mubr.f32.mxu0 %v12789_v3  ;;  %v7373_v32 = vpack.c.bf16 %v4947_v18, %v4946_v63 }
 0x939   :  { %7374 = vmatprep.subr.bf16.mxu0 %v7373_v32 }
 0x93a   :  { %4796 = vmatmul.mubr.f32.gmra.mrb[34].mxu0 %v13191_v8  ;;  %5616 = vmatmul.mubr.f32.gmra.mrb[34].mxu1 %v13193_v49 }
 0x93b   :  { %5618 = vmatprep.mubr.f32.mxu1 %v13194_v13  ;;  %4800 = vmatprep.mubr.f32.mxu0 %v12789_v3 }
 0x93c   :  { %7376 = vmatpush3.bf16.msra.mxu0 %v7373_v32 }
 0x93e   :  { %4801 = vmatmul.mubr.f32.gmra.mrb[36].mxu0 %v13192_v37  ;;  %5619 = vmatmul.mubr.f32.gmra.mrb[36].mxu1 %v11913_v58 }
 0x93f   :  { %5621 = vmatprep.mubr.f32.mxu1 %v12044_v10  ;;  %4805 = vmatprep.mubr.f32.mxu0 %v12789_v3 }
 0x942   :  { %4806 = vmatmul.mubr.f32.gmra.mrb[38].mxu0 %v13193_v49 }
 0x943   :  { %4810 = vmatprep.mubr.f32.mxu0 %v12789_v3 }
 0x946   :  { %4811 = vmatmul.mubr.f32.gmra.mrb[40].mxu0 %v13194_v13 }
 0x947   :  { %4815 = vmatprep.mubr.f32.mxu0 %v12789_v3 }
 0x94a   :  { %4816 = vmatmul.mubr.f32.gmra.mrb[42].mxu0 %v11913_v58  ;;  %v4949_v58 = vld [vmem:[%s12480_s14 + $0x18] sm:$0xff] }
 0x94b   :  { %4820 = vmatprep.mubr.f32.mxu0 %v12789_v3 }
 0x94e   :  { %4821 = vmatmul.mubr.f32.gmra.mrb[44].mxu0 %v12044_v10  ;;  %v7377_v10 = vpack.c.bf16 %v4949_v58, %v4948_v6 }
 0x94f   :  { %4825 = vmatprep.mubr.f32.mxu0 %v12789_v3 }
 0x950   :  { %7378 = vmatprep.subr.bf16.mxu0 %v7377_v10 }
 0x951   :  { %7380 = vmatpush3.bf16.msra.mxu0 %v7377_v10 }
 0x952   :  { %7382 = vmatprep.subr.bf16.mxu0 %v7381_v30 }
 0x955   :  { %7384 = vmatpush3.bf16.msra.mxu0 %v7381_v30 }
 0x956   :  { %7386 = vmatprep.subr.bf16.mxu0 %v7385_v60 }
 0x959   :  { %7388 = vmatpush3.bf16.msra.mxu0 %v7385_v60  ;;  %v4959_v60 = vld [vmem:[%s12480_s14 + $0x68] sm:$0xff] }
 0x95a   :  { %7390 = vmatprep.subr.bf16.mxu0 %v7389_v39  ;;  %v7397_v29 = vpack.c.bf16 %v4959_v60, %v4958_v38  ;;  %v5144_v38 = vld [vmem:[%s12482_s8 + $0x78] sm:$0xff] }
 0x95d   :  { %7392 = vmatpush3.bf16.msra.mxu0 %v7389_v39  ;;  %v4961_v39 = vld [vmem:[%s12480_s14 + $0x78] sm:$0xff] }
 0x95e   :  { %7394 = vmatprep.subr.bf16.mxu0 %v7393_v4  ;;  %v7401_v15 = vpack.c.bf16 %v4961_v39, %v4960_v55  ;;  %v5223_v55 = vld [vmem:[%s12483_s10 + $0x8] sm:$0xff]  ;;  %v5224_v39 = vld [vmem:[%s12483_s10 + $0x10] sm:$0xff] }
 0x961   :  { %7396 = vmatpush3.bf16.msra.mxu0 %v7393_v4 }
 0x962   :  { %7398 = vmatprep.subr.bf16.mxu0 %v7397_v29 }
 0x965   :  { %7400 = vmatpush3.bf16.msra.mxu0 %v7397_v29  ;;  %v5222_v29 = vld [vmem:[%s12483_s10] sm:$0xff] }
 0x966   :  { %7402 = vmatprep.subr.bf16.mxu0 %v7401_v15 }
 0x969   :  { %7404 = vmatpush3.bf16.msra.mxu0 %v7401_v15  ;;  %v7430_v15 = vpack.c.bf16 %v5223_v55, %v5222_v29 }
 0x9e9   :  { %v4552_v19 = vpop.f32.mrb[30].mxu0  ;;  %v4623_v31 = vpop.f32.mrb[30].mxu1 }
 0x9ea   :  { %v4553_v22 = vadd.f32 %v4552_v19, %v13189_v27  ;;  %v4554_v35 = vpop.f32.mrb[31].mxu0  ;;  %v4625_v59 = vpop.f32.mrb[31].mxu1  ;;  %v4624_v1 = vadd.f32 %v4623_v31, %v9007_v53  ;;  %v13197_v19 = vld [vmem:[#allocation54_spill] sm:$0xff] }
 0x9eb   :  { %v4555_v57 = vadd.f32 %v4554_v35, %v8997_v42  ;;  %v4626_v28 = vadd.f32 %v4625_v59, %v9003_v45  ;;  %v4709_v42 = vld [vmem:[%s12481_s7] sm:$0x7] }
 0x9ec   :  { %v5475_v17 = vmul.f32 -1.442695, %v4553_v22  ;;  %v4722_v53 = vrot.slane %v4709_v42, %v13195_v11  ;;  %v4714_v4 = vrot.slane %v4709_v42, %v13196_v47  ;;  %v4718_v31 = vrot.slane %v4709_v42, %v13197_v19  ;;  %v5225_v47 = vld [vmem:[%s12483_s10 + $0x18] sm:$0xff]  ;;  %v5226_v19 = vld [vmem:[%s12483_s10 + $0x20] sm:$0xff] }
 0x9ed   :  { %v5476_v52 = vmul.f32 -1.442695, %v4555_v57  ;;  %v5477_v50 = vmul.f32 -1.442695, %v4626_v28 }
 0x9ee   :  { %7784 = vpow2.f32 %v5475_v17 }
 0x9ef   :  { %7786 = vpow2.f32 %v5476_v52 }
 0x9f0   :  { %7788 = vpow2.f32 %v5477_v50 }
 0x9f1   :  { %7790 = vtanh.f32 %v4624_v1 }
 0x9f8   :  { %v7785_v25 = vpop.eup %7784 }
 0x9f9   :  { %v7787_v12 = vpop.eup %7786  ;;  %v4631_v51 = vadd.f32 1.0, %v7785_v25 }
 0x9fa   :  { %v4637_v48 = vadd.f32 1.0, %v7787_v12  ;;  %v7789_v27 = vpop.eup %7788 }
 0x9fb   :  { %7792 = vrcp.f32 %v4631_v51  ;;  %v7791_v21 = vpop.eup %7790  ;;  %v4644_v2 = vadd.f32 1.0, %v7789_v27 }
 0x9fc   :  { %7794 = vrcp.f32 %v4637_v48 }
 0x9fd   :  { %7796 = vrcp.f32 %v4644_v2 }
 0xa05   :  { %v7793_v62 = vpop.eup %7792 }
 0xa06   :  { %v7795_v43 = vpop.eup %7794  ;;  %v4648_v45 = vmul.f32 %v7793_v62, %v7791_v21 }
 0xa07   :  { %v4647_v16 = vmul.f32 %v7795_v43, %v12037_v46  ;;  %v7797_v13 = vpop.eup %7796 }
 0xa09   :  { %v4792_v9 = vpop.f32.mrb[32].mxu0  ;;  %v5614_v40 = vpop.f32.mrb[32].mxu1  ;;  %v4649_v44 = vadd.f32 %v4648_v45, %v4647_v16 }
 0xa0a   :  { %v12249_v34 = vadd.f32 %v5614_v40, %v4722_v53  ;;  %v4793_v54 = vpop.f32.mrb[33].mxu0  ;;  %v4898_v41 = vpop.f32.mrb[33].mxu1 }
 0xa0b   :  { %v12251_v36 = vadd.f32 %v4898_v41, %v4722_v53  ;;  %7798 = vtanh.f32 %v4649_v44  ;;  %v4794_v1 = vadd.f32 %v4793_v54, %v4718_v31  ;;  %v5130_v44 = vld [vmem:[%s12482_s8 + $0x8] sm:$0xff]  ;;  %v7819_v41 = vmov 0.0|0.0  }
 0xa0c   :  { %7405 = vmatprep.subr.bf16.mxu1 %v7819_v41  ;;  %7429 = vmatprep.subr.bf16.mxu0 %v7819_v41 }
 0xa0d   :  { %v4797_v24 = vpop.f32.mrb[34].mxu0  ;;  %v5617_v33 = vpop.f32.mrb[34].mxu1 }
 0xa0e   :  { %v12253_v61 = vadd.f32 %v5617_v33, %v4722_v53  ;;  %v4798_v7 = vpop.f32.mrb[35].mxu0  ;;  %v4908_v56 = vpop.f32.mrb[35].mxu1  ;;  %v5131_v24 = vld [vmem:[%s12482_s8 + $0x10] sm:$0xff]  ;;  %v5132_v33 = vld [vmem:[%s12482_s8 + $0x18] sm:$0xff] }
 0xa0f   :  { %v12255_v26 = vadd.f32 %v4908_v56, %v4722_v53  ;;  %v4799_v25 = vadd.f32 %v4798_v7, %v4718_v31  ;;  %v7409_v7 = vpack.c.bf16 %v5132_v33, %v5131_v24  ;;  %v5133_v56 = vld [vmem:[%s12482_s8 + $0x20] sm:$0xff] }
 0xa11   :  { %v4802_v46 = vpop.f32.mrb[36].mxu0  ;;  %v5620_v14 = vpop.f32.mrb[36].mxu1 }
 0xa12   :  { %v12257_v20 = vadd.f32 %v5620_v14, %v4722_v53  ;;  %v4803_v8 = vpop.f32.mrb[37].mxu0  ;;  %v4918_v37 = vpop.f32.mrb[37].mxu1  ;;  %v5134_v46 = vld [vmem:[%s12482_s8 + $0x28] sm:$0xff] }
 0xa13   :  { %v12259_v49 = vadd.f32 %v4918_v37, %v4722_v53  ;;  %v4804_v12 = vadd.f32 %v4803_v8, %v4718_v31  ;;  %v7412_v14 = vpack.c.bf16 %v5134_v46, %v5133_v56  ;;  %v5135_v8 = vld [vmem:[%s12482_s8 + $0x30] sm:$0xff]  ;;  %v5136_v37 = vld [vmem:[%s12482_s8 + $0x38] sm:$0xff] }
 0xa15   :  { %v7799_v63 = vpop.eup %7798  ;;  %v4807_v18 = vpop.f32.mrb[38].mxu0 }
 0xa16   :  { %v4808_v6 = vpop.f32.mrb[39].mxu0  ;;  %v4651_v32 = vmul.f32 %v7799_v63, %v7797_v13  ;;  %v5137_v13 = vld [vmem:[%s12482_s8 + $0x40] sm:$0xff]  ;;  %v7415_v63 = vpack.c.bf16 %v5136_v37, %v5135_v8  ;;  %v5138_v18 = vld [vmem:[%s12482_s8 + $0x48] sm:$0xff] }
 0xa17   :  { %v4809_v48 = vadd.f32 %v4808_v6, %v4718_v31  ;;  %v7418_v6 = vpack.c.bf16 %v5138_v18, %v5137_v13 }
 0xa18   :  { %4826 = vmatmul.mubr.f32.gmra.mrb[46].mxu0 %v4651_v32  ;;  %5622 = vmatmul.mubr.f32.gmra.mrb[38].mxu1 %v4651_v32  ;;  %v5139_v32 = vld [vmem:[%s12482_s8 + $0x50] sm:$0xff] }
 0xa19   :  { %v4812_v58 = vpop.f32.mrb[40].mxu0  ;;  %5700 = vmatprep.mubr.msk.f32.mxu1 %vm7820_vm1, %v12789_v3 }
 0xa1a   :  { %v4813_v10 = vpop.f32.mrb[41].mxu0  ;;  %v5140_v58 = vld [vmem:[%s12482_s8 + $0x58] sm:$0xff] }
 0xa1b   :  { %v4814_v27 = vadd.f32 %v4813_v10, %v4718_v31  ;;  %v7421_v10 = vpack.c.bf16 %v5140_v58, %v5139_v32 }
 0xa1d   :  { %v4817_v23 = vpop.f32.mrb[42].mxu0 }
 0xa1e   :  { %v4818_v5 = vpop.f32.mrb[43].mxu0  ;;  %v5141_v23 = vld [vmem:[%s12482_s8 + $0x60] sm:$0xff] }
 0xa1f   :  { %v4819_v21 = vadd.f32 %v4818_v5, %v4718_v31  ;;  %v5142_v5 = vld [vmem:[%s12482_s8 + $0x68] sm:$0xff] }
 0xa21   :  { %v4822_v30 = vpop.f32.mrb[44].mxu0 }
 0xa22   :  { %v4823_v0 = vpop.f32.mrb[45].mxu0  ;;  %v7424_v30 = vpack.c.bf16 %v5142_v5, %v5141_v23 }
 0xa23   :  { %v4824_v62 = vadd.f32 %v4823_v0, %v4718_v31  ;;  %v5143_v0 = vld [vmem:[%s12482_s8 + $0x70] sm:$0xff] }
 0xa24   :  { %v7427_v60 = vpack.c.bf16 %v5144_v38, %v5143_v0 }
 0xaeb   :  { %v4827_v22 = vpop.f32.mrb[46].mxu0  ;;  %v5623_v35 = vpop.f32.mrb[38].mxu1 }
 0xaec   :  { %v4828_v59 = vadd.f32 %v4827_v22, %v4714_v4  ;;  %v12275_v57 = vadd.f32 %v5623_v35, %v4722_v53  ;;  %v4829_v17 = vpop.f32.mrb[47].mxu0  ;;  %v4928_v52 = vpop.f32.mrb[39].mxu1  ;;  %v7433_v4 = vpack.c.bf16 %v5225_v47, %v5224_v39  ;;  %v5228_v35 = vld [vmem:[%s12483_s10 + $0x30] sm:$0xff] }
 0xaed   :  { %v4830_v28 = vadd.f32 %v4829_v17, %v4718_v31  ;;  %v12277_v50 = vadd.f32 %v4928_v52, %v4722_v53  ;;  %v5129_v53 = vld [vmem:[%s12482_s8] sm:$0xff]  ;;  %v5227_v31 = vld [vmem:[%s12483_s10 + $0x28] sm:$0xff] }
 0xaee   :  { %v4937_v51 = vmul.f32 0.25, %v4828_v59  ;;  %v7406_v54 = vpack.c.bf16 %v5130_v44, %v5129_v53  ;;  %v7436_v22 = vpack.c.bf16 %v5227_v31, %v5226_v19  ;;  %v5229_v59 = vld [vmem:[%s12483_s10 + $0x38] sm:$0xff]  ;;  %v5230_v52 = vld [vmem:[%s12483_s10 + $0x40] sm:$0xff] }
 0xaef   :  { %v7439_v17 = vpack.c.bf16 %v5229_v59, %v5228_v35 }
 0xaf0   :  { %v4945_v43 = vmul.f32 %v4937_v51, %v4830_v28  ;;  %v4938_v42 = vmul.f32 %v4937_v51, %v4794_v1  ;;  %v4939_v45 = vmul.f32 %v4937_v51, %v4799_v25  ;;  %v4940_v2 = vmul.f32 %v4937_v51, %v4804_v12  ;;  %7407 = vmatpush3.bf16.msra.mxu1 %v7406_v54  ;;  %v5231_v28 = vld [vmem:[%s12483_s10 + $0x48] sm:$0xff]  ;;  %v5232_v25 = vld [vmem:[%s12483_s10 + $0x50] sm:$0xff]  ;;  %v5233_v12 = vld [vmem:[%s12483_s10 + $0x58] sm:$0xff] }
 0xaf1   :  { %v4941_v11 = vmul.f32 %v4937_v51, %v4809_v48  ;;  %v4942_v16 = vmul.f32 %v4937_v51, %v4814_v27  ;;  %v4943_v9 = vmul.f32 %v4937_v51, %v4819_v21  ;;  %v4944_v40 = vmul.f32 %v4937_v51, %v4824_v62  ;;  %7408 = vmatprep.subr.bf16.mxu1 %v7819_v41  ;;  %v5234_v48 = vld [vmem:[%s12483_s10 + $0x60] sm:$0xff]  ;;  %v5235_v27 = vld [vmem:[%s12483_s10 + $0x68] sm:$0xff] }
 0xaf2   :  { %5656 = vmatprep.mubr.f32.mxu0 %v4938_v42  ;;  %v7442_v1 = vpack.c.bf16 %v5231_v28, %v5230_v52  ;;  %v7445_v51 = vpack.c.bf16 %v5233_v12, %v5232_v25  ;;  %v7448_v21 = vpack.c.bf16 %v5235_v27, %v5234_v48 }
 0xaf3   :  { %5657 = vmatmul.mubr.f32.vlgmr.msra.gmra.mrb[48].mxu0 %v4939_v45 }
 0xaf4   :  { %5659 = vmatprep.mubr.f32.mxu0 %v4940_v2  ;;  %7410 = vmatpush3.bf16.msra.mxu1 %v7409_v7 }
 0xaf5   :  { %7411 = vmatprep.subr.bf16.mxu1 %v7819_v41  ;;  %7431 = vmatpush3.bf16.msra.mxu0 %v7430_v15 }
 0xaf6   :  { %7432 = vmatprep.subr.bf16.mxu0 %v7819_v41 }
 0xaf7   :  { %5660 = vmatmul.mubr.f32.gmra.mrb[50].mxu0 %v4941_v11 }
 0xaf8   :  { %5662 = vmatprep.mubr.f32.mxu0 %v4942_v16  ;;  %7413 = vmatpush3.bf16.msra.mxu1 %v7412_v14 }
 0xaf9   :  { %7414 = vmatprep.subr.bf16.mxu1 %v7819_v41  ;;  %7434 = vmatpush3.bf16.msra.mxu0 %v7433_v4 }
 0xafa   :  { %7435 = vmatprep.subr.bf16.mxu0 %v7819_v41 }
 0xafb   :  { %5663 = vmatmul.mubr.f32.gmra.mrb[52].mxu0 %v4943_v9 }
 0xafc   :  { %5665 = vmatprep.mubr.f32.mxu0 %v4944_v40  ;;  %7416 = vmatpush3.bf16.msra.mxu1 %v7415_v63 }
 0xafd   :  { %7417 = vmatprep.subr.bf16.mxu1 %v7819_v41  ;;  %7437 = vmatpush3.bf16.msra.mxu0 %v7436_v22 }
 0xafe   :  { %7438 = vmatprep.subr.bf16.mxu0 %v7819_v41 }
 0xaff   :  { %5666 = vmatmul.mubr.f32.gmra.mrb[54].mxu0 %v4945_v43 }
 0xb00   :  { %5735 = vmatprep.mubr.msk.f32.mxu0 %vm7820_vm1, %v12789_v3  ;;  %7419 = vmatpush3.bf16.msra.mxu1 %v7418_v6 }
 0xb01   :  { %7420 = vmatprep.subr.bf16.mxu1 %v7819_v41  ;;  %7440 = vmatpush3.bf16.msra.mxu0 %v7439_v17 }
 0xb02   :  { %7441 = vmatprep.subr.bf16.mxu0 %v7819_v41 }
 0xb04   :  { %7422 = vmatpush3.bf16.msra.mxu1 %v7421_v10 }
 0xb05   :  { %7423 = vmatprep.subr.bf16.mxu1 %v7819_v41  ;;  %7443 = vmatpush3.bf16.msra.mxu0 %v7442_v1 }
 0xb06   :  { %7444 = vmatprep.subr.bf16.mxu0 %v7819_v41 }
 0xb08   :  { %7425 = vmatpush3.bf16.msra.mxu1 %v7424_v30 }
 0xb09   :  { %7426 = vmatprep.subr.bf16.mxu1 %v7819_v41  ;;  %7446 = vmatpush3.bf16.msra.mxu0 %v7445_v51 }
 0xb0a   :  { %7447 = vmatprep.subr.bf16.mxu0 %v7819_v41 }
 0xb0c   :  { %7428 = vmatpush3.bf16.msra.mxu1 %v7427_v60 }
 0xb0d   :  { %7453 = vmatprep.subr.bf16.mxu1 %v7819_v41  ;;  %7449 = vmatpush3.bf16.msra.mxu0 %v7448_v21 }
 0xb0e   :  { %7450 = vmatprep.subr.bf16.mxu0 %v7819_v41 }
 0xbc6   :  { %v5658_v62 = vpop.f32.mrb[48].mxu0 }
 0xbc7   :  { %v5028_v43 = vpop.f32.mrb[49].mxu0 }
 0xbca   :  { %v5661_v42 = vpop.f32.mrb[50].mxu0 }
 0xbcb   :  { %v5038_v45 = vpop.f32.mrb[51].mxu0 }
 0xbce   :  { %v5664_v2 = vpop.f32.mrb[52].mxu0 }
 0xbcf   :  { %v5068_v11 = vmax.f32 %v5658_v62, %v5664_v2  ;;  %v5048_v16 = vpop.f32.mrb[53].mxu0 }
 0xbd0   :  { %v5067_v9 = vmax.f32 %v5028_v43, %v5048_v16 }
 0xbd2   :  { %v5071_v40 = vmax.f32 %v5067_v9, %v5068_v11  ;;  %v5667_v53 = vpop.f32.mrb[54].mxu0 }
 0xbd3   :  { %v5070_v44 = vmax.f32 %v5661_v42, %v5667_v53  ;;  %v5058_v54 = vpop.f32.mrb[55].mxu0 }
 0xbd4   :  { %v5069_v24 = vmax.f32 %v5038_v45, %v5058_v54 }
 0xbd6   :  { %v5072_v33 = vmax.f32 %v5069_v24, %v5070_v44 }
 0xbd8   :  { %v5073_v7 = vmax.f32 %v5071_v40, %v5072_v33 }
 0xbda   :  { %v5074_v56 = vsub.f32 %v5028_v43, %v5073_v7  ;;  %v5075_v46 = vsub.f32 %v5658_v62, %v5073_v7  ;;  %v5076_v14 = vsub.f32 %v5038_v45, %v5073_v7  ;;  %v5077_v8 = vsub.f32 %v5661_v42, %v5073_v7 }
 0xbdb   :  { %v5078_v37 = vsub.f32 %v5048_v16, %v5073_v7  ;;  %v5079_v13 = vsub.f32 %v5664_v2, %v5073_v7  ;;  %v5080_v63 = vsub.f32 %v5058_v54, %v5073_v7  ;;  %v5081_v18 = vsub.f32 %v5667_v53, %v5073_v7 }
 0xbdc   :  { %v5082_v6 = vmul.f32 1.442695, %v5074_v56  ;;  %v5084_v32 = vmul.f32 1.442695, %v5075_v46  ;;  %v5086_v58 = vmul.f32 1.442695, %v5076_v14 }
 0xbdd   :  { %v5088_v10 = vmul.f32 1.442695, %v5077_v8  ;;  %v5090_v23 = vmul.f32 1.442695, %v5078_v37  ;;  %v5092_v5 = vmul.f32 1.442695, %v5079_v13 }
 0xbde   :  { %7800 = vpow2.f32 %v5082_v6  ;;  %v5094_v30 = vmul.f32 1.442695, %v5080_v63  ;;  %v5096_v0 = vmul.f32 1.442695, %v5081_v18  ;;  %v5320_v46 = vld [vmem:[%s12484_s12 + $0x20] sm:$0xff]  ;;  %v5321_v14 = vld [vmem:[%s12484_s12 + $0x28] sm:$0xff] }
 0xbdf   :  { %7802 = vpow2.f32 %v5084_v32  ;;  %v7460_v8 = vpack.c.bf16 %v5321_v14, %v5320_v46  ;;  %v5322_v37 = vld [vmem:[%s12484_s12 + $0x30] sm:$0xff]  ;;  %v5323_v13 = vld [vmem:[%s12484_s12 + $0x38] sm:$0xff]  ;;  %v5324_v18 = vld [vmem:[%s12484_s12 + $0x40] sm:$0xff] }
 0xbe0   :  { %7804 = vpow2.f32 %v5086_v58  ;;  %v7463_v63 = vpack.c.bf16 %v5323_v13, %v5322_v37  ;;  %v5325_v6 = vld [vmem:[%s12484_s12 + $0x48] sm:$0xff]  ;;  %v5326_v58 = vld [vmem:[%s12484_s12 + $0x50] sm:$0xff] }
 0xbe1   :  { %7806 = vpow2.f32 %v5088_v10  ;;  %v7466_v32 = vpack.c.bf16 %v5325_v6, %v5324_v18  ;;  %v5327_v10 = vld [vmem:[%s12484_s12 + $0x58] sm:$0xff] }
 0xbe2   :  { %7808 = vpow2.f32 %v5090_v23  ;;  %v7469_v23 = vpack.c.bf16 %v5327_v10, %v5326_v58 }
 0xbe3   :  { %7810 = vpow2.f32 %v5092_v5  ;;  %v5328_v5 = vld [vmem:[%s12484_s12 + $0x60] sm:$0xff] }
 0xbe4   :  { %7812 = vpow2.f32 %v5094_v30  ;;  %v5329_v30 = vld [vmem:[%s12484_s12 + $0x68] sm:$0xff] }
 0xbe5   :  { %7814 = vpow2.f32 %v5096_v0  ;;  %v7472_v0 = vpack.c.bf16 %v5329_v30, %v5328_v5 }
 0xbe8   :  { %v7801_v38 = vpop.eup %7800 }
 0xbe9   :  { %v7803_v60 = vpop.eup %7802 }
 0xbea   :  { %v5098_v29 = vadd.f32 %v7803_v60, %v7801_v38  ;;  %v7805_v55 = vpop.eup %7804 }
 0xbeb   :  { %v7807_v15 = vpop.eup %7806 }
 0xbec   :  { %v5099_v39 = vadd.f32 %v7805_v55, %v5098_v29  ;;  %v7809_v4 = vpop.eup %7808 }
 0xbed   :  { %v7811_v31 = vpop.eup %7810 }
 0xbee   :  { %v5100_v47 = vadd.f32 %v7807_v15, %v5099_v39  ;;  %v7813_v35 = vpop.eup %7812  ;;  %v5330_v39 = vld [vmem:[%s12484_s12 + $0x70] sm:$0xff] }
 0xbef   :  { %v7815_v17 = vpop.eup %7814 }
 0xbf0   :  { %v5101_v19 = vadd.f32 %v7809_v4, %v5100_v47 }
 0xbf2   :  { %v5102_v22 = vadd.f32 %v7811_v31, %v5101_v19 }
 0xbf4   :  { %v5103_v59 = vadd.f32 %v7813_v35, %v5102_v22 }
 0xbf6   :  { %v5104_v52 = vadd.f32 %v7815_v17, %v5103_v59 }
 0xbf8   :  { %7816 = vrcp.f32 %v5104_v52 }
 0xc02   :  { %v7817_v28 = vpop.eup %7816 }
 0xc03   :  { %v5112_v1 = vmul.f32 %v7817_v28, %v7813_v35  ;;  %v5106_v25 = vmul.f32 %v7817_v28, %v7801_v38  ;;  %v5107_v12 = vmul.f32 %v7817_v28, %v7803_v60  ;;  %v5108_v51 = vmul.f32 %v7817_v28, %v7805_v55  ;;  %v5478_v38 = vld [vmem:[%s12485_s9] ss:$0 sm:$0xff] }
 0xc04   :  { %v5109_v48 = vmul.f32 %v7817_v28, %v7807_v15  ;;  %v5110_v27 = vmul.f32 %v7817_v28, %v7809_v4  ;;  %v5111_v21 = vmul.f32 %v7817_v28, %v7811_v31  ;;  %v5113_v62 = vmul.f32 %v7817_v28, %v7815_v17  ;;  %v5331_v15 = vld [vmem:[%s12484_s12 + $0x78] sm:$0xff]  ;;  %v5480_v35 = vld [vmem:[%s12487_s13] ss:$0 sm:$0xff] }
 0xc05   :  { %v5120_v43 = vmul.f32 %v5112_v1, %v12277_v50  ;;  %v5114_v42 = vmul.f32 %v5106_v25, %v12251_v36  ;;  %v5115_v45 = vmul.f32 %v5107_v12, %v12249_v34  ;;  %v5116_v2 = vmul.f32 %v5108_v51, %v12255_v26  ;;  %v5236_v34 = vld [vmem:[%s12483_s10 + $0x70] sm:$0xff]  ;;  %v5237_v36 = vld [vmem:[%s12483_s10 + $0x78] sm:$0xff]  ;;  %v5316_v26 = vld [vmem:[%s12484_s12] sm:$0xff] }
 0xc06   :  { %v5117_v11 = vmul.f32 %v5109_v48, %v12253_v61  ;;  %v5118_v16 = vmul.f32 %v5110_v27, %v12259_v49  ;;  %v5119_v9 = vmul.f32 %v5111_v21, %v12257_v20  ;;  %v5121_v40 = vmul.f32 %v5113_v62, %v12275_v57  ;;  %v5317_v20 = vld [vmem:[%s12484_s12 + $0x8] sm:$0xff]  ;;  %v5319_v57 = vld [vmem:[%s12484_s12 + $0x18] sm:$0xff] }
 0xc07   :  { %v5122_v53 = vadd.f32 %v5115_v45, %v5114_v42  ;;  %v7451_v61 = vpack.c.bf16 %v5237_v36, %v5236_v34  ;;  %v7454_v49 = vpack.c.bf16 %v5317_v20, %v5316_v26  ;;  %v7475_v47 = vpack.c.bf16 %v5331_v15, %v5330_v39 }
 0xc09   :  { %v5123_v44 = vadd.f32 %v5122_v53, %v5116_v2  ;;  %7452 = vmatpush3.bf16.msra.mxu0 %v7451_v61 }
 0xc0b   :  { %v5124_v54 = vadd.f32 %v5123_v44, %v5117_v11 }
 0xc0d   :  { %v5125_v24 = vadd.f32 %v5124_v54, %v5118_v16 }
 0xc0f   :  { %v5126_v33 = vadd.f32 %v5125_v24, %v5119_v9 }
 0xc11   :  { %v5127_v50 = vadd.f32 %v5126_v33, %v5120_v43 }
 0xc13   :  { %v5128_v7 = vadd.f32 %v5127_v50, %v5121_v40 }
 0xc15   :  { %5701 = vmatmul.mubr.f32.vlgmr.msra.gmra.mrb[40].mxu1 %v5128_v7 }
 0xc16   :  { %5770 = vmatprep.mubr.msk.f32.mxu1 %vm7820_vm1, %v12789_v3  ;;  %v5318_v3 = vld [vmem:[%s12484_s12 + $0x10] sm:$0xff]  ;;  %7455 = vmatpush3.bf16.msra.mxu1 %v7454_v49 }
 0xc17   :  { %v7457_v56 = vpack.c.bf16 %v5319_v57, %v5318_v3  ;;  %7456 = vmatprep.subr.bf16.mxu1 %v7819_v41 }
 0xc1a   :  { %7458 = vmatpush3.bf16.msra.mxu1 %v7457_v56 }
 0xc1b   :  { %7459 = vmatprep.subr.bf16.mxu1 %v7819_v41 }
 0xc1e   :  { %7461 = vmatpush3.bf16.msra.mxu1 %v7460_v8 }
 0xc1f   :  { %7462 = vmatprep.subr.bf16.mxu1 %v7819_v41 }
 0xc22   :  { %7464 = vmatpush3.bf16.msra.mxu1 %v7463_v63 }
 0xc23   :  { %7465 = vmatprep.subr.bf16.mxu1 %v7819_v41 }
 0xc26   :  { %7467 = vmatpush3.bf16.msra.mxu1 %v7466_v32 }
 0xc27   :  { %7468 = vmatprep.subr.bf16.mxu1 %v7819_v41 }
 0xc2a   :  { %7470 = vmatpush3.bf16.msra.mxu1 %v7469_v23 }
 0xc2b   :  { %7471 = vmatprep.subr.bf16.mxu1 %v7819_v41 }
 0xc2e   :  { %7473 = vmatpush3.bf16.msra.mxu1 %v7472_v0 }
 0xc2f   :  { %7474 = vmatprep.subr.bf16.mxu1 %v7819_v41  ;;  %v5479_v41 = vld [vmem:[%s12486_s11] ss:$0 sm:$0xff] }
 0xc32   :  { %7476 = vmatpush3.bf16.msra.mxu1 %v7475_v47 }
 0xce8   :  { %v5218_v60 = vpop.f32.mrb[40].mxu1 }
 0xce9   :  { %v5219_v29 = vadd.f32 %v5478_v38, %v5218_v60  ;;  %v5702_v55 = vpop.f32.mrb[41].mxu1 }
 0xceb   :  { %5736 = vmatmul.mubr.f32.vlgmr.msra.gmra.mrb[56].mxu0 %v5219_v29 }
 0xdbe   :  { %v5311_v4 = vpop.f32.mrb[56].mxu0 }
 0xdbf   :  { %v5312_v19 = vadd.f32 %v5479_v41, %v5311_v4  ;;  %v5737_v31 = vpop.f32.mrb[57].mxu0 }
 0xdc1   :  { %v5315_v22 = vmax.f32 %v5312_v19, 0.0 }
 0xdc3   :  { %5771 = vmatmul.mubr.f32.vlgmr.msra.gmra.mrb[42].mxu1 %v5315_v22 }
 0xe96   :  { %v5405_v59 = vpop.f32.mrb[42].mxu1 }
 0xe97   :  { %v5406_v17 = vadd.f32 %v5480_v35, %v5405_v59  ;;  %v5772_v52 = vpop.f32.mrb[43].mxu1 }
 0xe99   :  { %5409 = vst [vmem:[%s12488_s15] sm:$0xff] %v5406_v17 }

</bundles_post_ra>
